<compile_context>
chip_gen: v6e
topology: v6e:2x2x1
jax: 0.10.0
libtpu: 0.0.40
codegen_flags: <defaults>
</compile_context>

<pallas_src>
import math

import jax
import jax.numpy as jnp
from jax.experimental import pallas as pl
from jax.experimental.pallas import tpu as pltpu


# ---------------------------------------------------------------------------
# Kernel 1: fused conv layer  (im2col matmul + conv-bias + ReLU + BatchNorm)
# ---------------------------------------------------------------------------
def _conv_relu_bn_kernel(a_ref, w_ref, cb_ref, sc_ref, sh_ref, o_ref):
    # bf16 x bf16 -> f32 accumulation on the MXU
    acc = jnp.dot(a_ref[...], w_ref[...], preferred_element_type=jnp.float32)
    y = jnp.maximum(acc + cb_ref[...], 0.0)          # Conv bias + ReLU
    o_ref[...] = y * sc_ref[...] + sh_ref[...]       # folded BatchNorm (inference)


def conv3x3_relu_bn(x, p, tm=512):
    """Conv2d(k=3, pad=1, stride=1, bias) + ReLU + BatchNorm2d, NHWC f32 in/out."""
    B, H, W, C = x.shape
    kh, kw, cin, cout = p['w'].shape

    # im2col patch extraction (tiny: <1 MB here), in bf16 for the MXU.
    xb = x.astype(jnp.bfloat16)
    xp = jnp.pad(xb, ((0, 0), (1, 1), (1, 1), (0, 0)))
    cols = [xp[:, i:i + H, j:j + W, :] for i in range(kh) for j in range(kw)]
    patches = jnp.concatenate(cols, axis=-1).reshape(B * H * W, kh * kw * cin)

    M, K = patches.shape
    tm = min(tm, M)
    assert M % tm == 0 and tm % 16 == 0, (M, tm)

    w2 = p['w'].reshape(K, cout).astype(jnp.bfloat16)
    cb = p['conv_b'].reshape(1, cout)
    sc = p['bn_scale'].reshape(1, cout)
    sh = p['bn_shift'].reshape(1, cout)

    out = pl.pallas_call(
        _conv_relu_bn_kernel,
        out_shape=jax.ShapeDtypeStruct((M, cout), jnp.float32),
        grid_spec=pltpu.PrefetchScalarGridSpec(
            num_scalar_prefetch=0,
            grid=(M // tm,),
            in_specs=[
                pl.BlockSpec((tm, K), lambda i: (i, 0)),      # patches tile
                pl.BlockSpec((K, cout), lambda i: (0, 0)),    # weights (resident)
                pl.BlockSpec((1, cout), lambda i: (0, 0)),    # conv bias
                pl.BlockSpec((1, cout), lambda i: (0, 0)),    # bn scale
                pl.BlockSpec((1, cout), lambda i: (0, 0)),    # bn shift
            ],
            out_specs=pl.BlockSpec((tm, cout), lambda i: (i, 0)),
        ),
        compiler_params=pltpu.CompilerParams(
            dimension_semantics=("parallel",)),
    )(patches, w2, cb, sc, sh)
    return out.reshape(B, H, W, cout)


def maxpool_2x2(x):
    """MaxPool2d(kernel_size=2, stride=2) on NHWC, pairwise maxima (no 4x stack)."""
    a = jnp.maximum(x[:, 0::2, :, :], x[:, 1::2, :, :])
    return jnp.maximum(a[:, :, 0::2, :], a[:, :, 1::2, :])


# ---------------------------------------------------------------------------
# Kernel 2: fused dense head  (fc1 streamed over K, fc2+ReLU and fc3 in finalize)
# ---------------------------------------------------------------------------
def _head_kernel(x_ref, w1_ref, b1_ref, w2_ref, b2_ref, w3t_ref, b3_ref,
                 o_ref, acc_ref):
    k = pl.program_id(0)

    @pl.when(k == 0)
    def _init():
        acc_ref[...] = jnp.zeros_like(acc_ref)

    acc_ref[...] += jnp.dot(x_ref[...], w1_ref[...],
                            preferred_element_type=jnp.float32)

    @pl.when(k == pl.num_programs(0) - 1)
    def _finalize():
        h1 = jnp.maximum(acc_ref[...] + b1_ref[...], 0.0)        # fc1 + ReLU
        # TODO(synk): nn.Dropout is identity in eval/inference mode; the
        # training-time random mask is intentionally not implemented here.
        h2 = jnp.dot(h1.astype(jnp.bfloat16), w2_ref[...],
                     preferred_element_type=jnp.float32) + b2_ref[...]
        h2 = jnp.maximum(h2, 0.0)                                # fc2 + ReLU
        # fc3 (out_features=1) as a lane reduction (avoids an N=1 MXU dot).
        o_ref[...] = (jnp.sum(h2 * w3t_ref[...], axis=-1, keepdims=True)
                      + b3_ref[...])


def dense_head(feat, p, tk=1024):
    B, K1 = feat.shape
    H1 = p['fc1_w'].shape[1]
    H2 = p['fc2_w'].shape[1]
    assert K1 % tk == 0, (K1, tk)

    xb = feat.astype(jnp.bfloat16)
    w1 = p['fc1_w'].astype(jnp.bfloat16)
    w2 = p['fc2_w'].astype(jnp.bfloat16)
    w3t = p['fc3_w'].reshape(1, H2)            # keep f32 for the VPU epilogue
    b1 = p['fc1_b'].reshape(1, H1)
    b2 = p['fc2_b'].reshape(1, H2)
    b3 = p['fc3_b'].reshape(1, 1)

    return pl.pallas_call(
        _head_kernel,
        out_shape=jax.ShapeDtypeStruct((B, 1), jnp.float32),
        grid_spec=pltpu.PrefetchScalarGridSpec(
            num_scalar_prefetch=0,
            grid=(K1 // tk,),
            in_specs=[
                pl.BlockSpec((B, tk), lambda k: (0, k)),    # feature slice
                pl.BlockSpec((tk, H1), lambda k: (k, 0)),   # fc1 weight slice
                pl.BlockSpec((1, H1), lambda k: (0, 0)),    # fc1 bias
                pl.BlockSpec((H1, H2), lambda k: (0, 0)),   # fc2 weight (resident)
                pl.BlockSpec((1, H2), lambda k: (0, 0)),    # fc2 bias
                pl.BlockSpec((1, H2), lambda k: (0, 0)),    # fc3 weight (row)
                pl.BlockSpec((1, 1), lambda k: (0, 0)),     # fc3 bias
            ],
            out_specs=pl.BlockSpec((B, 1), lambda k: (0, 0)),
            scratch_shapes=[pltpu.VMEM((B, H1), jnp.float32)],
        ),
        compiler_params=pltpu.CompilerParams(
            dimension_semantics=("arbitrary",),
            vmem_limit_bytes=32 * 1024 * 1024),
    )(xb, w1, b1, w2, b2, w3t, b3)


# ---------------------------------------------------------------------------
# Forward pass
# ---------------------------------------------------------------------------
def forward(params, x_nchw):
    # PyTorch NCHW input -> NHWC so channels map to the 128-wide lane axis.
    x = jnp.transpose(x_nchw, (0, 2, 3, 1)).astype(jnp.float32)
    x = conv3x3_relu_bn(x, params['conv1'])     # Conv+ReLU+BN (fused Pallas)
    x = maxpool_2x2(x)                          # MaxPool 2x2
    x = conv3x3_relu_bn(x, params['conv2'])
    x = maxpool_2x2(x)                          # (B, 16, 16, 48)
    B = x.shape[0]
    # PyTorch Flatten order is (C, H, W).
    feat = jnp.transpose(x, (0, 3, 1, 2)).reshape(B, -1)   # (B, 48*16*16)
    return dense_head(feat, params)             # (B, 1)


# ---------------------------------------------------------------------------
# Deterministic parameter initialization (shapes match SunsetModel)
# ---------------------------------------------------------------------------
def init_params(key):
    ks = jax.random.split(key, 5)
    eps = 1e-5

    def conv_bn(k, cin, cout):
        k1, k2, k3, k4, k5, k6 = jax.random.split(k, 6)
        fan_in = 9 * cin
        w = jax.random.normal(k1, (3, 3, cin, cout), jnp.float32) / math.sqrt(fan_in)
        b = 0.1 * jax.random.normal(k2, (cout,), jnp.float32)
        gamma = 1.0 + 0.1 * jax.random.normal(k3, (cout,), jnp.float32)
        beta = 0.1 * jax.random.normal(k4, (cout,), jnp.float32)
        mean = 0.1 * jax.random.normal(k5, (cout,), jnp.float32)
        var = 1.0 + 0.1 * jax.random.uniform(k6, (cout,), jnp.float32)
        scale = gamma / jnp.sqrt(var + eps)      # fold BN (inference) into scale/shift
        shift = beta - mean * scale
        return {'w': w, 'conv_b': b, 'bn_scale': scale, 'bn_shift': shift}

    def linear(k, fin, fout):
        k1, k2 = jax.random.split(k)
        w = jax.random.normal(k1, (fin, fout), jnp.float32) / math.sqrt(fin)
        b = 0.1 * jax.random.normal(k2, (fout,), jnp.float32)
        return w, b

    p = {'conv1': conv_bn(ks[0], 3, 24),
         'conv2': conv_bn(ks[1], 24, 48)}
    p['fc1_w'], p['fc1_b'] = linear(ks[2], 48 * 16 * 16, 1024)
    p['fc2_w'], p['fc2_b'] = linear(ks[3], 1024, 1024)
    p['fc3_w'], p['fc3_b'] = linear(ks[4], 1024, 1)
    return p


# ---------------------------------------------------------------------------

if __name__ == "__main__":
    key = jax.random.PRNGKey(0)
    pkey, xkey = jax.random.split(key)

    params = init_params(pkey)

    # The dense layer expects 48*16*16 features, which implies 64x64 input
    # (two 2x2 max-pools: 64 -> 32 -> 16).  Batch=2, 3 channels.
    x = jax.random.normal(xkey, (2, 3, 64, 64), jnp.float32)

    fwd = jax.jit(forward)
    out = jax.block_until_ready(fwd(params, x))

    assert out.shape == (2, 1), out.shape
    assert out.dtype == jnp.float32
    assert bool(jnp.all(jnp.isfinite(out)))
    print("KERNEL_OK")
</pallas_src>

<mosaic_0001>
module attributes {stable_mosaic.version = 11 : i64} {
  func.func @_conv_relu_bn_kernel(%arg0: i32, %arg1: memref<512x27xbf16, #tpu.memory_space<vmem>>, %arg2: memref<27x24xbf16, #tpu.memory_space<vmem>>, %arg3: memref<1x24xf32, #tpu.memory_space<vmem>>, %arg4: memref<1x24xf32, #tpu.memory_space<vmem>>, %arg5: memref<1x24xf32, #tpu.memory_space<vmem>>, %arg6: memref<512x24xf32, #tpu.memory_space<vmem>>) attributes {dimension_semantics = [#tpu.dimension_semantics<parallel>], iteration_bounds = array<i64: 16>, scalar_prefetch = 0 : i64, scratch_operands = 0 : i64, tpu.core_type = #tpu.core_type<tc>, window_params = [{transform_indices = @transform_0, window_bounds = array<i64: 512, 27>}, {pipeline_mode = #tpu.pipeline_mode<synchronous>, transform_indices = @transform_1, window_bounds = array<i64: 27, 24>}, {pipeline_mode = #tpu.pipeline_mode<synchronous>, transform_indices = @transform_2, window_bounds = array<i64: 1, 24>}, {pipeline_mode = #tpu.pipeline_mode<synchronous>, transform_indices = @transform_3, window_bounds = array<i64: 1, 24>}, {pipeline_mode = #tpu.pipeline_mode<synchronous>, transform_indices = @transform_4, window_bounds = array<i64: 1, 24>}, {transform_indices = @transform_5, window_bounds = array<i64: 512, 24>}]} {
    %c0 = arith.constant 0 : index
    %c0_0 = arith.constant 0 : index
    %0 = vector.load %arg1[%c0, %c0_0] : memref<512x27xbf16, #tpu.memory_space<vmem>>, vector<512x27xbf16>
    %c0_1 = arith.constant 0 : index
    %c0_2 = arith.constant 0 : index
    %1 = vector.load %arg2[%c0_1, %c0_2] : memref<27x24xbf16, #tpu.memory_space<vmem>>, vector<27x24xbf16>
    %cst = arith.constant dense<0.000000e+00> : vector<512x24xf32>
    %2 = tpu.matmul %0, %1, %cst {dimension_numbers = #tpu.dot_dimension_numbers<[1], [0], [0], [1], [0, 0, 1, 1], [], []>} : vector<512x27xbf16>, vector<27x24xbf16>, vector<512x24xf32> -> vector<512x24xf32>
    %c0_3 = arith.constant 0 : index
    %c0_4 = arith.constant 0 : index
    %3 = vector.load %arg3[%c0_3, %c0_4] : memref<1x24xf32, #tpu.memory_space<vmem>>, vector<1x24xf32>
    %4 = vector.broadcast %3 : vector<1x24xf32> to vector<512x24xf32>
    %5 = arith.addf %2, %4 : vector<512x24xf32>
    %cst_5 = arith.constant 0.000000e+00 : f32
    %6 = vector.broadcast %cst_5 : f32 to vector<512x24xf32>
    %7 = arith.maximumf %5, %6 : vector<512x24xf32>
    %c0_6 = arith.constant 0 : index
    %c0_7 = arith.constant 0 : index
    %8 = vector.load %arg4[%c0_6, %c0_7] : memref<1x24xf32, #tpu.memory_space<vmem>>, vector<1x24xf32>
    %9 = vector.broadcast %8 : vector<1x24xf32> to vector<512x24xf32>
    %10 = arith.mulf %7, %9 : vector<512x24xf32>
    %c0_8 = arith.constant 0 : index
    %c0_9 = arith.constant 0 : index
    %11 = vector.load %arg5[%c0_8, %c0_9] : memref<1x24xf32, #tpu.memory_space<vmem>>, vector<1x24xf32>
    %12 = vector.broadcast %11 : vector<1x24xf32> to vector<512x24xf32>
    %13 = arith.addf %10, %12 : vector<512x24xf32>
    %c0_10 = arith.constant 0 : index
    %c0_11 = arith.constant 0 : index
    %14 = vector.load %arg6[%c0_10, %c0_11] : memref<512x24xf32, #tpu.memory_space<vmem>>, vector<512x24xf32>
    tpu.vector_store %arg6[%c0_10, %c0_11], %13 {strides = array<i32>} : memref<512x24xf32, #tpu.memory_space<vmem>>, vector<512x24xf32>,
    return
  }
  func.func @transform_0(%arg0: i32) -> (i32, i32) {
    %c0_i32 = arith.constant 0 : i32
    %c0_i32_0 = arith.constant 0 : i32
    return %arg0, %c0_i32 : i32, i32
  }
  func.func @transform_1(%arg0: i32) -> (i32, i32) {
    %c0_i32 = arith.constant 0 : i32
    %c0_i32_0 = arith.constant 0 : i32
    %c0_i32_1 = arith.constant 0 : i32
    return %c0_i32, %c0_i32_0 : i32, i32
  }
  func.func @transform_2(%arg0: i32) -> (i32, i32) {
    %c0_i32 = arith.constant 0 : i32
    %c0_i32_0 = arith.constant 0 : i32
    %c0_i32_1 = arith.constant 0 : i32
    return %c0_i32, %c0_i32_0 : i32, i32
  }
  func.func @transform_3(%arg0: i32) -> (i32, i32) {
    %c0_i32 = arith.constant 0 : i32
    %c0_i32_0 = arith.constant 0 : i32
    %c0_i32_1 = arith.constant 0 : i32
    return %c0_i32, %c0_i32_0 : i32, i32
  }
  func.func @transform_4(%arg0: i32) -> (i32, i32) {
    %c0_i32 = arith.constant 0 : i32
    %c0_i32_0 = arith.constant 0 : i32
    %c0_i32_1 = arith.constant 0 : i32
    return %c0_i32, %c0_i32_0 : i32, i32
  }
  func.func @transform_5(%arg0: i32) -> (i32, i32) {
    %c0_i32 = arith.constant 0 : i32
    %c0_i32_0 = arith.constant 0 : i32
    return %arg0, %c0_i32 : i32, i32
  }
}

module attributes {stable_mosaic.version = 11 : i64} {
  func.func @_conv_relu_bn_kernel(%arg0: i32, %arg1: memref<512x216xbf16, #tpu.memory_space<vmem>>, %arg2: memref<216x48xbf16, #tpu.memory_space<vmem>>, %arg3: memref<1x48xf32, #tpu.memory_space<vmem>>, %arg4: memref<1x48xf32, #tpu.memory_space<vmem>>, %arg5: memref<1x48xf32, #tpu.memory_space<vmem>>, %arg6: memref<512x48xf32, #tpu.memory_space<vmem>>) attributes {dimension_semantics = [#tpu.dimension_semantics<parallel>], iteration_bounds = array<i64: 4>, scalar_prefetch = 0 : i64, scratch_operands = 0 : i64, tpu.core_type = #tpu.core_type<tc>, window_params = [{transform_indices = @transform_0, window_bounds = array<i64: 512, 216>}, {pipeline_mode = #tpu.pipeline_mode<synchronous>, transform_indices = @transform_1, window_bounds = array<i64: 216, 48>}, {pipeline_mode = #tpu.pipeline_mode<synchronous>, transform_indices = @transform_2, window_bounds = array<i64: 1, 48>}, {pipeline_mode = #tpu.pipeline_mode<synchronous>, transform_indices = @transform_3, window_bounds = array<i64: 1, 48>}, {pipeline_mode = #tpu.pipeline_mode<synchronous>, transform_indices = @transform_4, window_bounds = array<i64: 1, 48>}, {transform_indices = @transform_5, window_bounds = array<i64: 512, 48>}]} {
    %c0 = arith.constant 0 : index
    %c0_0 = arith.constant 0 : index
    %0 = vector.load %arg1[%c0, %c0_0] : memref<512x216xbf16, #tpu.memory_space<vmem>>, vector<512x216xbf16>
    %c0_1 = arith.constant 0 : index
    %c0_2 = arith.constant 0 : index
    %1 = vector.load %arg2[%c0_1, %c0_2] : memref<216x48xbf16, #tpu.memory_space<vmem>>, vector<216x48xbf16>
    %cst = arith.constant dense<0.000000e+00> : vector<512x48xf32>
    %2 = tpu.matmul %0, %1, %cst {dimension_numbers = #tpu.dot_dimension_numbers<[1], [0], [0], [1], [0, 0, 1, 1], [], []>} : vector<512x216xbf16>, vector<216x48xbf16>, vector<512x48xf32> -> vector<512x48xf32>
    %c0_3 = arith.constant 0 : index
    %c0_4 = arith.constant 0 : index
    %3 = vector.load %arg3[%c0_3, %c0_4] : memref<1x48xf32, #tpu.memory_space<vmem>>, vector<1x48xf32>
    %4 = vector.broadcast %3 : vector<1x48xf32> to vector<512x48xf32>
    %5 = arith.addf %2, %4 : vector<512x48xf32>
    %cst_5 = arith.constant 0.000000e+00 : f32
    %6 = vector.broadcast %cst_5 : f32 to vector<512x48xf32>
    %7 = arith.maximumf %5, %6 : vector<512x48xf32>
    %c0_6 = arith.constant 0 : index
    %c0_7 = arith.constant 0 : index
    %8 = vector.load %arg4[%c0_6, %c0_7] : memref<1x48xf32, #tpu.memory_space<vmem>>, vector<1x48xf32>
    %9 = vector.broadcast %8 : vector<1x48xf32> to vector<512x48xf32>
    %10 = arith.mulf %7, %9 : vector<512x48xf32>
    %c0_8 = arith.constant 0 : index
    %c0_9 = arith.constant 0 : index
    %11 = vector.load %arg5[%c0_8, %c0_9] : memref<1x48xf32, #tpu.memory_space<vmem>>, vector<1x48xf32>
    %12 = vector.broadcast %11 : vector<1x48xf32> to vector<512x48xf32>
    %13 = arith.addf %10, %12 : vector<512x48xf32>
    %c0_10 = arith.constant 0 : index
    %c0_11 = arith.constant 0 : index
    %14 = vector.load %arg6[%c0_10, %c0_11] : memref<512x48xf32, #tpu.memory_space<vmem>>, vector<512x48xf32>
    tpu.vector_store %arg6[%c0_10, %c0_11], %13 {strides = array<i32>} : memref<512x48xf32, #tpu.memory_space<vmem>>, vector<512x48xf32>,
    return
  }
  func.func @transform_0(%arg0: i32) -> (i32, i32) {
    %c0_i32 = arith.constant 0 : i32
    %c0_i32_0 = arith.constant 0 : i32
    return %arg0, %c0_i32 : i32, i32
  }
  func.func @transform_1(%arg0: i32) -> (i32, i32) {
    %c0_i32 = arith.constant 0 : i32
    %c0_i32_0 = arith.constant 0 : i32
    %c0_i32_1 = arith.constant 0 : i32
    return %c0_i32, %c0_i32_0 : i32, i32
  }
  func.func @transform_2(%arg0: i32) -> (i32, i32) {
    %c0_i32 = arith.constant 0 : i32
    %c0_i32_0 = arith.constant 0 : i32
    %c0_i32_1 = arith.constant 0 : i32
    return %c0_i32, %c0_i32_0 : i32, i32
  }
  func.func @transform_3(%arg0: i32) -> (i32, i32) {
    %c0_i32 = arith.constant 0 : i32
    %c0_i32_0 = arith.constant 0 : i32
    %c0_i32_1 = arith.constant 0 : i32
    return %c0_i32, %c0_i32_0 : i32, i32
  }
  func.func @transform_4(%arg0: i32) -> (i32, i32) {
    %c0_i32 = arith.constant 0 : i32
    %c0_i32_0 = arith.constant 0 : i32
    %c0_i32_1 = arith.constant 0 : i32
    return %c0_i32, %c0_i32_0 : i32, i32
  }
  func.func @transform_5(%arg0: i32) -> (i32, i32) {
    %c0_i32 = arith.constant 0 : i32
    %c0_i32_0 = arith.constant 0 : i32
    return %arg0, %c0_i32 : i32, i32
  }
}

module attributes {stable_mosaic.version = 11 : i64} {
  func.func @_head_kernel(%arg0: i32, %arg1: memref<2x1024xbf16, #tpu.memory_space<vmem>>, %arg2: memref<1024x1024xbf16, #tpu.memory_space<vmem>>, %arg3: memref<1x1024xf32, #tpu.memory_space<vmem>>, %arg4: memref<1024x1024xbf16, #tpu.memory_space<vmem>>, %arg5: memref<1x1024xf32, #tpu.memory_space<vmem>>, %arg6: memref<1x1024xf32, #tpu.memory_space<vmem>>, %arg7: memref<1x1xf32, #tpu.memory_space<vmem>>, %arg8: memref<2x1xf32, #tpu.memory_space<vmem>>, %arg9: memref<2x1024xf32, #tpu.memory_space<vmem>>) attributes {dimension_semantics = [#tpu.dimension_semantics<arbitrary>], iteration_bounds = array<i64: 12>, scalar_prefetch = 0 : i64, scratch_operands = 1 : i64, tpu.core_type = #tpu.core_type<tc>, window_params = [{transform_indices = @transform_0, window_bounds = array<i64: 2, 1024>}, {transform_indices = @transform_1, window_bounds = array<i64: 1024, 1024>}, {pipeline_mode = #tpu.pipeline_mode<synchronous>, transform_indices = @transform_2, window_bounds = array<i64: 1, 1024>}, {pipeline_mode = #tpu.pipeline_mode<synchronous>, transform_indices = @transform_3, window_bounds = array<i64: 1024, 1024>}, {pipeline_mode = #tpu.pipeline_mode<synchronous>, transform_indices = @transform_4, window_bounds = array<i64: 1, 1024>}, {pipeline_mode = #tpu.pipeline_mode<synchronous>, transform_indices = @transform_5, window_bounds = array<i64: 1, 1024>}, {pipeline_mode = #tpu.pipeline_mode<synchronous>, transform_indices = @transform_6, window_bounds = array<i64: 1, 1>}, {pipeline_mode = #tpu.pipeline_mode<synchronous>, transform_indices = @transform_7, window_bounds = array<i64: 2, 1>}]} {
    %c0_i32 = arith.constant 0 : i32
    %0 = arith.cmpi eq, %arg0, %c0_i32 : i32
    %1 = arith.extui %0 : i1 to i32
    %c0_i32_0 = arith.constant 0 : i32
    %2 = arith.cmpi ne, %1, %c0_i32_0 : i32
    scf.if %2 {
      %cst_9 = arith.constant 0.000000e+00 : f32
      %12 = vector.broadcast %cst_9 : f32 to vector<2x1024xf32>
      %c0_10 = arith.constant 0 : index
      %c0_11 = arith.constant 0 : index
      %13 = vector.load %arg9[%c0_10, %c0_11] : memref<2x1024xf32, #tpu.memory_space<vmem>>, vector<2x1024xf32>
      tpu.vector_store %arg9[%c0_10, %c0_11], %12 {strides = array<i32>} : memref<2x1024xf32, #tpu.memory_space<vmem>>, vector<2x1024xf32>,
    } else {
    }
    %c0 = arith.constant 0 : index
    %c0_1 = arith.constant 0 : index
    %3 = vector.load %arg9[%c0, %c0_1] : memref<2x1024xf32, #tpu.memory_space<vmem>>, vector<2x1024xf32>
    %c0_2 = arith.constant 0 : index
    %c0_3 = arith.constant 0 : index
    %4 = vector.load %arg1[%c0_2, %c0_3] : memref<2x1024xbf16, #tpu.memory_space<vmem>>, vector<2x1024xbf16>
    %c0_4 = arith.constant 0 : index
    %c0_5 = arith.constant 0 : index
    %5 = vector.load %arg2[%c0_4, %c0_5] : memref<1024x1024xbf16, #tpu.memory_space<vmem>>, vector<1024x1024xbf16>
    %cst = arith.constant dense<0.000000e+00> : vector<2x1024xf32>
    %6 = tpu.matmul %4, %5, %cst {dimension_numbers = #tpu.dot_dimension_numbers<[1], [0], [0], [1], [0, 0, 1, 1], [], []>} : vector<2x1024xbf16>, vector<1024x1024xbf16>, vector<2x1024xf32> -> vector<2x1024xf32>
    %7 = arith.addf %3, %6 : vector<2x1024xf32>
    %c0_6 = arith.constant 0 : index
    %c0_7 = arith.constant 0 : index
    %8 = vector.load %arg9[%c0_6, %c0_7] : memref<2x1024xf32, #tpu.memory_space<vmem>>, vector<2x1024xf32>
    tpu.vector_store %arg9[%c0_6, %c0_7], %7 {strides = array<i32>} : memref<2x1024xf32, #tpu.memory_space<vmem>>, vector<2x1024xf32>,
    %c11_i32 = arith.constant 11 : i32
    %9 = arith.cmpi eq, %arg0, %c11_i32 : i32
    %10 = arith.extui %9 : i1 to i32
    %c0_i32_8 = arith.constant 0 : i32
    %11 = arith.cmpi ne, %10, %c0_i32_8 : i32
    scf.if %11 {
      %c0_9 = arith.constant 0 : index
      %c0_10 = arith.constant 0 : index
      %12 = vector.load %arg9[%c0_9, %c0_10] : memref<2x1024xf32, #tpu.memory_space<vmem>>, vector<2x1024xf32>
      %c0_11 = arith.constant 0 : index
      %c0_12 = arith.constant 0 : index
      %13 = vector.load %arg3[%c0_11, %c0_12] : memref<1x1024xf32, #tpu.memory_space<vmem>>, vector<1x1024xf32>
      %14 = vector.broadcast %13 : vector<1x1024xf32> to vector<2x1024xf32>
      %15 = arith.addf %12, %14 : vector<2x1024xf32>
      %cst_13 = arith.constant 0.000000e+00 : f32
      %16 = vector.broadcast %cst_13 : f32 to vector<2x1024xf32>
      %17 = arith.maximumf %15, %16 : vector<2x1024xf32>
      %18 = arith.truncf %17 : vector<2x1024xf32> to vector<2x1024xbf16>
      %c0_14 = arith.constant 0 : index
      %c0_15 = arith.constant 0 : index
      %19 = vector.load %arg4[%c0_14, %c0_15] : memref<1024x1024xbf16, #tpu.memory_space<vmem>>, vector<1024x1024xbf16>
      %cst_16 = arith.constant dense<0.000000e+00> : vector<2x1024xf32>
      %20 = tpu.matmul %18, %19, %cst_16 {dimension_numbers = #tpu.dot_dimension_numbers<[1], [0], [0], [1], [0, 0, 1, 1], [], []>} : vector<2x1024xbf16>, vector<1024x1024xbf16>, vector<2x1024xf32> -> vector<2x1024xf32>
      %c0_17 = arith.constant 0 : index
      %c0_18 = arith.constant 0 : index
      %21 = vector.load %arg5[%c0_17, %c0_18] : memref<1x1024xf32, #tpu.memory_space<vmem>>, vector<1x1024xf32>
      %22 = vector.broadcast %21 : vector<1x1024xf32> to vector<2x1024xf32>
      %23 = arith.addf %20, %22 : vector<2x1024xf32>
      %cst_19 = arith.constant 0.000000e+00 : f32
      %24 = vector.broadcast %cst_19 : f32 to vector<2x1024xf32>
      %25 = arith.maximumf %23, %24 : vector<2x1024xf32>
      %c0_20 = arith.constant 0 : index
      %c0_21 = arith.constant 0 : index
      %26 = vector.load %arg6[%c0_20, %c0_21] : memref<1x1024xf32, #tpu.memory_space<vmem>>, vector<1x1024xf32>
      %27 = vector.broadcast %26 : vector<1x1024xf32> to vector<2x1024xf32>
      %28 = arith.mulf %25, %27 : vector<2x1024xf32>
      %cst_22 = arith.constant dense<0.000000e+00> : vector<2xf32>
      %29 = vector.multi_reduction <add>, %28, %cst_22 [1] : vector<2x1024xf32> to vector<2xf32>
      %30 = vector.shape_cast %29 : vector<2xf32> to vector<2x1xf32>
      %c0_23 = arith.constant 0 : index
      %c0_24 = arith.constant 0 : index
      %31 = vector.load %arg7[%c0_23, %c0_24] : memref<1x1xf32, #tpu.memory_space<vmem>>, vector<1x1xf32>
      %32 = vector.broadcast %31 : vector<1x1xf32> to vector<2x1xf32>
      %33 = arith.addf %30, %32 : vector<2x1xf32>
      %c0_25 = arith.constant 0 : index
      %c0_26 = arith.constant 0 : index
      %34 = vector.load %arg8[%c0_25, %c0_26] : memref<2x1xf32, #tpu.memory_space<vmem>>, vector<2x1xf32>
      tpu.vector_store %arg8[%c0_25, %c0_26], %33 {strides = array<i32>} : memref<2x1xf32, #tpu.memory_space<vmem>>, vector<2x1xf32>,
    } else {
    }
    return
  }
  func.func @transform_0(%arg0: i32) -> (i32, i32) {
    %c0_i32 = arith.constant 0 : i32
    %c0_i32_0 = arith.constant 0 : i32
    return %c0_i32, %arg0 : i32, i32
  }
  func.func @transform_1(%arg0: i32) -> (i32, i32) {
    %c0_i32 = arith.constant 0 : i32
    %c0_i32_0 = arith.constant 0 : i32
    return %arg0, %c0_i32 : i32, i32
  }
  func.func @transform_2(%arg0: i32) -> (i32, i32) {
    %c0_i32 = arith.constant 0 : i32
    %c0_i32_0 = arith.constant 0 : i32
    %c0_i32_1 = arith.constant 0 : i32
    return %c0_i32, %c0_i32_0 : i32, i32
  }
  func.func @transform_3(%arg0: i32) -> (i32, i32) {
    %c0_i32 = arith.constant 0 : i32
    %c0_i32_0 = arith.constant 0 : i32
    %c0_i32_1 = arith.constant 0 : i32
    return %c0_i32, %c0_i32_0 : i32, i32
  }
  func.func @transform_4(%arg0: i32) -> (i32, i32) {
    %c0_i32 = arith.constant 0 : i32
    %c0_i32_0 = arith.constant 0 : i32
    %c0_i32_1 = arith.constant 0 : i32
    return %c0_i32, %c0_i32_0 : i32, i32
  }
  func.func @transform_5(%arg0: i32) -> (i32, i32) {
    %c0_i32 = arith.constant 0 : i32
    %c0_i32_0 = arith.constant 0 : i32
    %c0_i32_1 = arith.constant 0 : i32
    return %c0_i32, %c0_i32_0 : i32, i32
  }
  func.func @transform_6(%arg0: i32) -> (i32, i32) {
    %c0_i32 = arith.constant 0 : i32
    %c0_i32_0 = arith.constant 0 : i32
    %c0_i32_1 = arith.constant 0 : i32
    return %c0_i32, %c0_i32_0 : i32, i32
  }
  func.func @transform_7(%arg0: i32) -> (i32, i32) {
    %c0_i32 = arith.constant 0 : i32
    %c0_i32_0 = arith.constant 0 : i32
    %c0_i32_1 = arith.constant 0 : i32
    return %c0_i32, %c0_i32_0 : i32, i32
  }
}

</mosaic_0001>

<bundles_post_ra>
// kernel: forward.3
= control target key start
LH: loop header
LB: loop body
LE: loop exit
PB: predicated region body
PF: predicated region fallthrough
CT: control target
= control target key end

     0   :  { %s1463_s18 = smov 0   ;;  %s1893_s0 = inlined_call_operand.vmem [shape: bf16[8192,27], index: 0, kind: input, shape index: {}]   ;;  %s1894_s1 = inlined_call_operand.vmem [shape: bf16[27,24], index: 1, kind: input, shape index: {}]   ;;  %s1895_s2 = inlined_call_operand.vmem [shape: f32[1,24], index: 2, kind: input, shape index: {}]   ;;  %s1896_s3 = inlined_call_operand.vmem [shape: f32[1,24], index: 3, kind: input, shape index: {}]   ;;  %s1897_s4 = inlined_call_operand.vmem [shape: f32[1,24], index: 4, kind: input, shape index: {}]   ;;  %s1898_s5 = inlined_call_operand.vmem [shape: f32[8192,24], index: 5, kind: output, shape index: {}]  }
   0x1 LB: > { %s1195_s19 = sadd.s32 4294967295, %s1430_s18   ;;  %p1199_p0 = scmp.ge.s32.totalorder %s1430_s18, 1  ;;  %s1430_s18 = sphi %s1463_s18, %s15_s18  }
   0x2   : > { %p188_p1 = scmp.lt.s32.totalorder %s1430_s18, 17 }
   0x4   : > { %p189_p2 = pnand %p1199_p0, %p188_p1 }
   0x5   : > { %s1200_s22 = sshll.u32 (!%p189_p2), %s1195_s19, 6 }
   0x6   : > { %192 = sbr.rel (%p189_p2) target bundleno = 290 (0x122), region = 40  ;;  %p217_p3 = scmp.lt.s32.totalorder (!%p189_p2), %s1200_s22, 1023 }
   0xb   : > { %v1390_v0 = vld [vmem:[%s1894_s1 + $0x8] sm:$0x3f]   ;;  %vm572_vm0 = vcmask 1044480   ;;  %vm573_vm1 = vcmask 1045504   ;;  %v1432_v1 = vmov 65535   ;;  %v1391_v5 = vld [vmem:[%s1894_s1] sm:$0xff]  }
   0xc   : > { %v574_v2 = vsel %vm572_vm0, 4294967295, %v1432_v1  ;;  %s1900_s22 = smov (!%p217_p3, %s1200_s22), 1023  ;;  %vm475_vm2 = vcmask 220160   ;;  %v1552_v38 = vld [vmem:[%s1895_s2] ss:$0 sm:$0xff]  ;;  %vm1074_vm3 = vcmask 195584  }
   0xd   : > { %v575_v3 = vsel %vm573_vm1, %v574_v2, 0  ;;  %s1201_s25 = sshll.u32 %s1900_s22, 2  ;;  %v1559_v43 = vld [vmem:[%s1896_s3] ss:$0 sm:$0xff]  ;;  %s1203_s8 = sshll.u32 %s1900_s22, 3 }
   0xe   : > { %v577_v4 = vand.u32 %v1390_v0, %v575_v3  ;;  %s1483_s28 = scalar_lea.vmem %s1893_s0, %s1201_s25  ;;  %v1567_v50 = vld [vmem:[%s1897_s4] ss:$0 sm:$0xff]  ;;  %s1574_s13 = scalar_lea.vmem %s1898_s5, %s1203_s8 }
   0xf   : > { %v1392_v6 = vld [vmem:[%s1483_s28] sm:$0xff]   ;;  %v1394_v8 = vld [vmem:[%s1483_s28 + $0x8] sm:$0xff]   ;;  %v1396_v10 = vld [vmem:[%s1483_s28 + $0x10] sm:$0xff]  }
  0x10   : > { %1309 = vmatprep.subr.bf16.mxu0 %v577_v4  ;;  %1377 = vmatprep.subr.bf16.mxu1 %v577_v4  ;;  %v1393_v7 = vld [vmem:[%s1483_s28 + $0x80] sm:$0xff]   ;;  %v1395_v9 = vld [vmem:[%s1483_s28 + $0x88] sm:$0xff]   ;;  %v1397_v11 = vld [vmem:[%s1483_s28 + $0x90] sm:$0xff]  }
  0x11   : > { %1310 = vmatpush3.bf16.msra.mxu0 %v577_v4  ;;  %1379 = vmatpush3.bf16.msra.mxu1 %v577_v4  ;;  %v1398_v12 = vld [vmem:[%s1483_s28 + $0x18] sm:$0xff]   ;;  %v1400_v14 = vld [vmem:[%s1483_s28 + $0x20] sm:$0xff]   ;;  %v1402_v16 = vld [vmem:[%s1483_s28 + $0x28] sm:$0xff]  }
  0x12   : > { %1311 = vmatprep.subr.bf16.mxu0 %v1391_v5  ;;  %1378 = vmatprep.subr.bf16.mxu1 %v1391_v5  ;;  %v1399_v13 = vld [vmem:[%s1483_s28 + $0x98] sm:$0xff]   ;;  %v1401_v15 = vld [vmem:[%s1483_s28 + $0xa0] sm:$0xff]   ;;  %v1403_v17 = vld [vmem:[%s1483_s28 + $0xa8] sm:$0xff]  }
  0x13   : > { %1313 = vmatprep.mubr.msk.bf16.mxu0 %vm475_vm2, %v1392_v6  ;;  %1345 = vmatprep.mubr.msk.bf16.mxu1 %vm475_vm2, %v1393_v7  ;;  %v1404_v18 = vld [vmem:[%s1483_s28 + $0x30] sm:$0xff]   ;;  %v1406_v20 = vld [vmem:[%s1483_s28 + $0x38] sm:$0xff]   ;;  %v1408_v22 = vld [vmem:[%s1483_s28 + $0x40] sm:$0xff]  }
  0x14   : > { %v1405_v19 = vld [vmem:[%s1483_s28 + $0xb0] sm:$0xff]   ;;  %v1407_v21 = vld [vmem:[%s1483_s28 + $0xb8] sm:$0xff]   ;;  %v1409_v23 = vld [vmem:[%s1483_s28 + $0xc0] sm:$0xff]  }
  0x15   : > { %1312 = vmatpush3.bf16.msra.mxu0 %v1391_v5  ;;  %1380 = vmatpush3.bf16.msra.mxu1 %v1391_v5  ;;  %v1410_v24 = vld [vmem:[%s1483_s28 + $0x48] sm:$0xff]   ;;  %v1412_v26 = vld [vmem:[%s1483_s28 + $0x50] sm:$0xff]   ;;  %v1414_v28 = vld [vmem:[%s1483_s28 + $0x58] sm:$0xff]  }
  0x16   : > { %v1411_v25 = vld [vmem:[%s1483_s28 + $0xc8] sm:$0xff]   ;;  %v1413_v27 = vld [vmem:[%s1483_s28 + $0xd0] sm:$0xff]   ;;  %v1415_v29 = vld [vmem:[%s1483_s28 + $0xd8] sm:$0xff]  }
  0x17   : > { %v1416_v30 = vld [vmem:[%s1483_s28 + $0x60] sm:$0xff]   ;;  %v1418_v32 = vld [vmem:[%s1483_s28 + $0x68] sm:$0xff]   ;;  %v1420_v34 = vld [vmem:[%s1483_s28 + $0x70] sm:$0xff]  }
  0x18   : > { %1314 = vmatmul.mubr.msk.bf16.vlgmr.msra.gmra.mxu0 %vm475_vm2, %v1394_v8  ;;  %1346 = vmatmul.mubr.msk.bf16.vlgmr.msra.gmra.mxu1 %vm475_vm2, %v1395_v9  ;;  %v1417_v31 = vld [vmem:[%s1483_s28 + $0xe0] sm:$0xff]   ;;  %v1419_v33 = vld [vmem:[%s1483_s28 + $0xe8] sm:$0xff]   ;;  %v1421_v35 = vld [vmem:[%s1483_s28 + $0xf0] sm:$0xff]  }
  0x19   : > { %1317 = vmatprep.mubr.msk.bf16.mxu0 %vm475_vm2, %v1396_v10  ;;  %1349 = vmatprep.mubr.msk.bf16.mxu1 %vm475_vm2, %v1397_v11  ;;  %v1422_v36 = vld [vmem:[%s1483_s28 + $0x78] sm:$0xff]  }
  0x1a   : > { %v1423_v37 = vld [vmem:[%s1483_s28 + $0xf8] sm:$0xff]  }
  0x20   : > { %1318 = vmatmul.mubr.msk.bf16.gmra.mxu0 %vm475_vm2, %v1398_v12  ;;  %1350 = vmatmul.mubr.msk.bf16.gmra.mxu1 %vm475_vm2, %v1399_v13 }
  0x21   : > { %1321 = vmatprep.mubr.msk.bf16.mxu0 %vm475_vm2, %v1400_v14  ;;  %1353 = vmatprep.mubr.msk.bf16.mxu1 %vm475_vm2, %v1401_v15 }
  0x28   : > { %1322 = vmatmul.mubr.msk.bf16.gmra.mxu0 %vm475_vm2, %v1402_v16  ;;  %1354 = vmatmul.mubr.msk.bf16.gmra.mxu1 %vm475_vm2, %v1403_v17 }
  0x29   : > { %1325 = vmatprep.mubr.msk.bf16.mxu0 %vm475_vm2, %v1404_v18  ;;  %1357 = vmatprep.mubr.msk.bf16.mxu1 %vm475_vm2, %v1405_v19 }
  0x30   : > { %1326 = vmatmul.mubr.msk.bf16.gmra.mxu0 %vm475_vm2, %v1406_v20  ;;  %1358 = vmatmul.mubr.msk.bf16.gmra.mxu1 %vm475_vm2, %v1407_v21 }
  0x31   : > { %1329 = vmatprep.mubr.msk.bf16.mxu0 %vm475_vm2, %v1408_v22  ;;  %1361 = vmatprep.mubr.msk.bf16.mxu1 %vm475_vm2, %v1409_v23 }
  0x38   : > { %1330 = vmatmul.mubr.msk.bf16.gmra.mxu0 %vm475_vm2, %v1410_v24  ;;  %1362 = vmatmul.mubr.msk.bf16.gmra.mxu1 %vm475_vm2, %v1411_v25 }
  0x39   : > { %1333 = vmatprep.mubr.msk.bf16.mxu0 %vm475_vm2, %v1412_v26  ;;  %1365 = vmatprep.mubr.msk.bf16.mxu1 %vm475_vm2, %v1413_v27 }
  0x40   : > { %1334 = vmatmul.mubr.msk.bf16.gmra.mxu0 %vm475_vm2, %v1414_v28  ;;  %1366 = vmatmul.mubr.msk.bf16.gmra.mxu1 %vm475_vm2, %v1415_v29 }
  0x41   : > { %1337 = vmatprep.mubr.msk.bf16.mxu0 %vm475_vm2, %v1416_v30  ;;  %1369 = vmatprep.mubr.msk.bf16.mxu1 %vm475_vm2, %v1417_v31 }
  0x48   : > { %1338 = vmatmul.mubr.msk.bf16.gmra.mxu0 %vm475_vm2, %v1418_v32  ;;  %1370 = vmatmul.mubr.msk.bf16.gmra.mxu1 %vm475_vm2, %v1419_v33 }
  0x49   : > { %1341 = vmatprep.mubr.msk.bf16.mxu0 %vm475_vm2, %v1420_v34  ;;  %1373 = vmatprep.mubr.msk.bf16.mxu1 %vm475_vm2, %v1421_v35 }
  0x50   : > { %1342 = vmatmul.mubr.msk.bf16.gmra.mxu0 %vm475_vm2, %v1422_v36  ;;  %1374 = vmatmul.mubr.msk.bf16.gmra.mxu1 %vm475_vm2, %v1423_v37 }
  0xd8   : > { %v1315_v39 = vpop.f32.mrf.mxu0  ;;  %v1347_v40 = vpop.f32.mrf.mxu1 }
  0xd9   : > { %v622_v41 = vadd.f32 %v1315_v39, %v1552_v38  ;;  %v750_v42 = vadd.f32 %v1347_v40, %v1552_v38 }
  0xda   : > { %v613_v44 = vpop.f32.mrf.mxu0  ;;  %v741_v45 = vpop.f32.mrf.mxu1 }
  0xdb   : > { %v870_v46 = vmax.f32 %v622_v41, 0.0  ;;  %v902_v47 = vmax.f32 %v750_v42, 0.0  ;;  %v614_v48 = vadd.f32 %v1552_v38, %v613_v44  ;;  %v742_v49 = vadd.f32 %v1552_v38, %v741_v45 }
  0xdc   : > { %v1316_v51 = vpop.f32.mrf.mxu0  ;;  %v1348_v52 = vpop.f32.mrf.mxu1 }
  0xdd   : > { %v941_v53 = vmul.f32 %v1559_v43, %v870_v46  ;;  %v973_v54 = vmul.f32 %v1559_v43, %v902_v47  ;;  %v868_v55 = vmax.f32 %v614_v48, 0.0  ;;  %v900_v56 = vmax.f32 %v742_v49, 0.0 }
  0xde   : > { %v625_v57 = vadd.f32 %v1316_v51, %v1552_v38  ;;  %v753_v58 = vadd.f32 %v1348_v52, %v1552_v38  ;;  %v616_v59 = vpop.f32.mrf.mxu0  ;;  %v744_v60 = vpop.f32.mrf.mxu1 }
  0xdf   : > { %v1012_v61 = vadd.f32 %v1567_v50, %v941_v53  ;;  %v1044_v62 = vadd.f32 %v1567_v50, %v973_v54  ;;  %v939_v63 = vmul.f32 %v1559_v43, %v868_v55  ;;  %v971_v0 = vmul.f32 %v1559_v43, %v900_v56 }
  0xe0   : > { %v871_v1 = vmax.f32 %v625_v57, 0.0  ;;  %v903_v2 = vmax.f32 %v753_v58, 0.0  ;;  %v617_v3 = vadd.f32 %v1552_v38, %v616_v59  ;;  %v745_v4 = vadd.f32 %v1552_v38, %v744_v60  ;;  %v1319_v5 = vpop.f32.mrf.mxu0  ;;  %v1351_v6 = vpop.f32.mrf.mxu1 }
  0xe1   : > { %1077 = vst.msk [vmem:[%s1574_s13 + $0x10] sm:$0xff] %vm1074_vm3, %v1012_v61  ;;  %1109 = vst.msk [vmem:[%s1574_s13 + $0x110] sm:$0xff] %vm1074_vm3, %v1044_v62  ;;  %v1010_v7 = vadd.f32 %v1567_v50, %v939_v63  ;;  %v1042_v8 = vadd.f32 %v1567_v50, %v971_v0  ;;  %v638_v9 = vadd.f32 %v1319_v5, %v1552_v38 }
  0xe2   : > { %v766_v10 = vadd.f32 %v1351_v6, %v1552_v38  ;;  %v942_v11 = vmul.f32 %v1559_v43, %v871_v1  ;;  %v974_v12 = vmul.f32 %v1559_v43, %v903_v2  ;;  %v869_v13 = vmax.f32 %v617_v3, 0.0  ;;  %v629_v15 = vpop.f32.mrf.mxu0  ;;  %v757_v16 = vpop.f32.mrf.mxu1 }
  0xe3   : > { %v901_v14 = vmax.f32 %v745_v4, 0.0  ;;  %1075 = vst.msk [vmem:[%s1574_s13] sm:$0xff] %vm1074_vm3, %v1010_v7  ;;  %1107 = vst.msk [vmem:[%s1574_s13 + $0x100] sm:$0xff] %vm1074_vm3, %v1042_v8  ;;  %v874_v17 = vmax.f32 %v638_v9, 0.0  ;;  %v630_v19 = vadd.f32 %v1552_v38, %v629_v15  ;;  %v758_v20 = vadd.f32 %v1552_v38, %v757_v16 }
  0xe4   : > { %v906_v18 = vmax.f32 %v766_v10, 0.0  ;;  %v1013_v21 = vadd.f32 %v1567_v50, %v942_v11  ;;  %v1045_v22 = vadd.f32 %v1567_v50, %v974_v12  ;;  %v940_v23 = vmul.f32 %v1559_v43, %v869_v13  ;;  %v1320_v25 = vpop.f32.mrf.mxu0  ;;  %v1352_v26 = vpop.f32.mrf.mxu1 }
  0xe5   : > { %v972_v24 = vmul.f32 %v1559_v43, %v901_v14  ;;  %v945_v27 = vmul.f32 %v1559_v43, %v874_v17  ;;  %v872_v29 = vmax.f32 %v630_v19, 0.0  ;;  %v904_v30 = vmax.f32 %v758_v20, 0.0 }
  0xe6   : > { %v977_v28 = vmul.f32 %v1559_v43, %v906_v18  ;;  %1078 = vst.msk [vmem:[%s1574_s13 + $0x18] sm:$0xff] %vm1074_vm3, %v1013_v21  ;;  %1110 = vst.msk [vmem:[%s1574_s13 + $0x118] sm:$0xff] %vm1074_vm3, %v1045_v22  ;;  %v1011_v31 = vadd.f32 %v1567_v50, %v940_v23  ;;  %v641_v33 = vadd.f32 %v1320_v25, %v1552_v38  ;;  %v632_v35 = vpop.f32.mrf.mxu0  ;;  %v760_v36 = vpop.f32.mrf.mxu1 }
  0xe7   : > { %v1043_v32 = vadd.f32 %v1567_v50, %v972_v24  ;;  %v769_v34 = vadd.f32 %v1352_v26, %v1552_v38  ;;  %v1016_v37 = vadd.f32 %v1567_v50, %v945_v27  ;;  %v943_v40 = vmul.f32 %v1559_v43, %v872_v29 }
  0xe8   : > { %v1048_v39 = vadd.f32 %v1567_v50, %v977_v28  ;;  %v975_v41 = vmul.f32 %v1559_v43, %v904_v30  ;;  %1076 = vst.msk [vmem:[%s1574_s13 + $0x8] sm:$0xff] %vm1074_vm3, %v1011_v31  ;;  %v875_v42 = vmax.f32 %v641_v33, 0.0  ;;  %v633_v45 = vadd.f32 %v1552_v38, %v632_v35  ;;  %v1323_v47 = vpop.f32.mrf.mxu0  ;;  %v1355_v48 = vpop.f32.mrf.mxu1 }
  0xe9   : > { %1108 = vst.msk [vmem:[%s1574_s13 + $0x108] sm:$0xff] %vm1074_vm3, %v1043_v32  ;;  %v907_v44 = vmax.f32 %v769_v34, 0.0  ;;  %v761_v46 = vadd.f32 %v1552_v38, %v760_v36  ;;  %1081 = vst.msk [vmem:[%s1574_s13 + $0x30] sm:$0xff] %vm1074_vm3, %v1016_v37  ;;  %v1014_v49 = vadd.f32 %v1567_v50, %v943_v40  ;;  %v654_v52 = vadd.f32 %v1323_v47, %v1552_v38 }
  0xea   : > { %1113 = vst.msk [vmem:[%s1574_s13 + $0x130] sm:$0xff] %vm1074_vm3, %v1048_v39  ;;  %v1046_v51 = vadd.f32 %v1567_v50, %v975_v41  ;;  %v782_v53 = vadd.f32 %v1355_v48, %v1552_v38  ;;  %v946_v54 = vmul.f32 %v1559_v43, %v875_v42  ;;  %v873_v56 = vmax.f32 %v633_v45, 0.0  ;;  %v645_v58 = vpop.f32.mrf.mxu0  ;;  %v773_v59 = vpop.f32.mrf.mxu1 }
  0xeb   : > { %v978_v55 = vmul.f32 %v1559_v43, %v907_v44  ;;  %v905_v57 = vmax.f32 %v761_v46, 0.0  ;;  %1079 = vst.msk [vmem:[%s1574_s13 + $0x20] sm:$0xff] %vm1074_vm3, %v1014_v49  ;;  %v878_v60 = vmax.f32 %v654_v52, 0.0  ;;  %v646_v62 = vadd.f32 %v1552_v38, %v645_v58 }
  0xec   : > { %1111 = vst.msk [vmem:[%s1574_s13 + $0x120] sm:$0xff] %vm1074_vm3, %v1046_v51  ;;  %v910_v61 = vmax.f32 %v782_v53, 0.0  ;;  %v774_v63 = vadd.f32 %v1552_v38, %v773_v59  ;;  %v1017_v0 = vadd.f32 %v1567_v50, %v946_v54  ;;  %v944_v2 = vmul.f32 %v1559_v43, %v873_v56  ;;  %v1324_v4 = vpop.f32.mrf.mxu0  ;;  %v1356_v5 = vpop.f32.mrf.mxu1 }
  0xed   : > { %v1049_v1 = vadd.f32 %v1567_v50, %v978_v55  ;;  %v976_v3 = vmul.f32 %v1559_v43, %v905_v57  ;;  %v949_v6 = vmul.f32 %v1559_v43, %v878_v60  ;;  %v876_v8 = vmax.f32 %v646_v62, 0.0 }
  0xee   : > { %v981_v7 = vmul.f32 %v1559_v43, %v910_v61  ;;  %v908_v9 = vmax.f32 %v774_v63, 0.0  ;;  %1082 = vst.msk [vmem:[%s1574_s13 + $0x38] sm:$0xff] %vm1074_vm3, %v1017_v0  ;;  %v1015_v10 = vadd.f32 %v1567_v50, %v944_v2  ;;  %v657_v12 = vadd.f32 %v1324_v4, %v1552_v38  ;;  %v648_v14 = vpop.f32.mrf.mxu0  ;;  %v776_v15 = vpop.f32.mrf.mxu1 }
  0xef   : > { %1114 = vst.msk [vmem:[%s1574_s13 + $0x138] sm:$0xff] %vm1074_vm3, %v1049_v1  ;;  %v1047_v11 = vadd.f32 %v1567_v50, %v976_v3  ;;  %v785_v13 = vadd.f32 %v1356_v5, %v1552_v38  ;;  %v1020_v16 = vadd.f32 %v1567_v50, %v949_v6  ;;  %v947_v18 = vmul.f32 %v1559_v43, %v876_v8 }
  0xf0   : > { %v1052_v17 = vadd.f32 %v1567_v50, %v981_v7  ;;  %v979_v19 = vmul.f32 %v1559_v43, %v908_v9  ;;  %1080 = vst.msk [vmem:[%s1574_s13 + $0x28] sm:$0xff] %vm1074_vm3, %v1015_v10  ;;  %v879_v20 = vmax.f32 %v657_v12, 0.0  ;;  %v649_v22 = vadd.f32 %v1552_v38, %v648_v14  ;;  %v1327_v24 = vpop.f32.mrf.mxu0  ;;  %v1359_v25 = vpop.f32.mrf.mxu1 }
  0xf1   : > { %1112 = vst.msk [vmem:[%s1574_s13 + $0x128] sm:$0xff] %vm1074_vm3, %v1047_v11  ;;  %v911_v21 = vmax.f32 %v785_v13, 0.0  ;;  %v777_v23 = vadd.f32 %v1552_v38, %v776_v15  ;;  %1085 = vst.msk [vmem:[%s1574_s13 + $0x50] sm:$0xff] %vm1074_vm3, %v1020_v16  ;;  %v1018_v26 = vadd.f32 %v1567_v50, %v947_v18  ;;  %v670_v28 = vadd.f32 %v1327_v24, %v1552_v38 }
  0xf2   : > { %1117 = vst.msk [vmem:[%s1574_s13 + $0x150] sm:$0xff] %vm1074_vm3, %v1052_v17  ;;  %v1050_v27 = vadd.f32 %v1567_v50, %v979_v19  ;;  %v798_v29 = vadd.f32 %v1359_v25, %v1552_v38  ;;  %v950_v30 = vmul.f32 %v1559_v43, %v879_v20  ;;  %v877_v32 = vmax.f32 %v649_v22, 0.0  ;;  %v661_v34 = vpop.f32.mrf.mxu0  ;;  %v789_v35 = vpop.f32.mrf.mxu1 }
  0xf3   : > { %v982_v31 = vmul.f32 %v1559_v43, %v911_v21  ;;  %v909_v33 = vmax.f32 %v777_v23, 0.0  ;;  %1083 = vst.msk [vmem:[%s1574_s13 + $0x40] sm:$0xff] %vm1074_vm3, %v1018_v26  ;;  %v882_v36 = vmax.f32 %v670_v28, 0.0  ;;  %v662_v39 = vadd.f32 %v1552_v38, %v661_v34 }
  0xf4   : > { %1115 = vst.msk [vmem:[%s1574_s13 + $0x140] sm:$0xff] %vm1074_vm3, %v1050_v27  ;;  %v914_v37 = vmax.f32 %v798_v29, 0.0  ;;  %v790_v40 = vadd.f32 %v1552_v38, %v789_v35  ;;  %v1021_v41 = vadd.f32 %v1567_v50, %v950_v30  ;;  %v948_v44 = vmul.f32 %v1559_v43, %v877_v32  ;;  %v1328_v46 = vpop.f32.mrf.mxu0  ;;  %v1360_v47 = vpop.f32.mrf.mxu1 }
  0xf5   : > { %v1053_v42 = vadd.f32 %v1567_v50, %v982_v31  ;;  %v980_v45 = vmul.f32 %v1559_v43, %v909_v33  ;;  %v953_v48 = vmul.f32 %v1559_v43, %v882_v36  ;;  %v880_v51 = vmax.f32 %v662_v39, 0.0 }
  0xf6   : > { %v985_v49 = vmul.f32 %v1559_v43, %v914_v37  ;;  %v912_v52 = vmax.f32 %v790_v40, 0.0  ;;  %1086 = vst.msk [vmem:[%s1574_s13 + $0x58] sm:$0xff] %vm1074_vm3, %v1021_v41  ;;  %v1019_v53 = vadd.f32 %v1567_v50, %v948_v44  ;;  %v673_v55 = vadd.f32 %v1328_v46, %v1552_v38  ;;  %v664_v57 = vpop.f32.mrf.mxu0  ;;  %v792_v58 = vpop.f32.mrf.mxu1 }
  0xf7   : > { %1118 = vst.msk [vmem:[%s1574_s13 + $0x158] sm:$0xff] %vm1074_vm3, %v1053_v42  ;;  %v1051_v54 = vadd.f32 %v1567_v50, %v980_v45  ;;  %v801_v56 = vadd.f32 %v1360_v47, %v1552_v38  ;;  %v1024_v59 = vadd.f32 %v1567_v50, %v953_v48  ;;  %v951_v61 = vmul.f32 %v1559_v43, %v880_v51 }
  0xf8   : > { %v1056_v60 = vadd.f32 %v1567_v50, %v985_v49  ;;  %v983_v62 = vmul.f32 %v1559_v43, %v912_v52  ;;  %1084 = vst.msk [vmem:[%s1574_s13 + $0x48] sm:$0xff] %vm1074_vm3, %v1019_v53  ;;  %v883_v63 = vmax.f32 %v673_v55, 0.0  ;;  %v665_v1 = vadd.f32 %v1552_v38, %v664_v57  ;;  %v1331_v3 = vpop.f32.mrf.mxu0  ;;  %v1363_v4 = vpop.f32.mrf.mxu1 }
  0xf9   : > { %1116 = vst.msk [vmem:[%s1574_s13 + $0x148] sm:$0xff] %vm1074_vm3, %v1051_v54  ;;  %v915_v0 = vmax.f32 %v801_v56, 0.0  ;;  %v793_v2 = vadd.f32 %v1552_v38, %v792_v58  ;;  %1089 = vst.msk [vmem:[%s1574_s13 + $0x70] sm:$0xff] %vm1074_vm3, %v1024_v59  ;;  %v1022_v5 = vadd.f32 %v1567_v50, %v951_v61  ;;  %v686_v7 = vadd.f32 %v1331_v3, %v1552_v38 }
  0xfa   : > { %1121 = vst.msk [vmem:[%s1574_s13 + $0x170] sm:$0xff] %vm1074_vm3, %v1056_v60  ;;  %v1054_v6 = vadd.f32 %v1567_v50, %v983_v62  ;;  %v814_v8 = vadd.f32 %v1363_v4, %v1552_v38  ;;  %v954_v9 = vmul.f32 %v1559_v43, %v883_v63  ;;  %v881_v11 = vmax.f32 %v665_v1, 0.0  ;;  %v677_v13 = vpop.f32.mrf.mxu0  ;;  %v805_v14 = vpop.f32.mrf.mxu1 }
  0xfb   : > { %v986_v10 = vmul.f32 %v1559_v43, %v915_v0  ;;  %v913_v12 = vmax.f32 %v793_v2, 0.0  ;;  %1087 = vst.msk [vmem:[%s1574_s13 + $0x60] sm:$0xff] %vm1074_vm3, %v1022_v5  ;;  %v886_v15 = vmax.f32 %v686_v7, 0.0  ;;  %v678_v17 = vadd.f32 %v1552_v38, %v677_v13 }
  0xfc   : > { %1119 = vst.msk [vmem:[%s1574_s13 + $0x160] sm:$0xff] %vm1074_vm3, %v1054_v6  ;;  %v918_v16 = vmax.f32 %v814_v8, 0.0  ;;  %v806_v18 = vadd.f32 %v1552_v38, %v805_v14  ;;  %v1025_v19 = vadd.f32 %v1567_v50, %v954_v9  ;;  %v952_v21 = vmul.f32 %v1559_v43, %v881_v11  ;;  %v1332_v23 = vpop.f32.mrf.mxu0  ;;  %v1364_v24 = vpop.f32.mrf.mxu1 }
  0xfd   : > { %v1057_v20 = vadd.f32 %v1567_v50, %v986_v10  ;;  %v984_v22 = vmul.f32 %v1559_v43, %v913_v12  ;;  %v957_v25 = vmul.f32 %v1559_v43, %v886_v15  ;;  %v884_v27 = vmax.f32 %v678_v17, 0.0 }
  0xfe   : > { %v989_v26 = vmul.f32 %v1559_v43, %v918_v16  ;;  %v916_v28 = vmax.f32 %v806_v18, 0.0  ;;  %1090 = vst.msk [vmem:[%s1574_s13 + $0x78] sm:$0xff] %vm1074_vm3, %v1025_v19  ;;  %v1023_v29 = vadd.f32 %v1567_v50, %v952_v21  ;;  %v689_v31 = vadd.f32 %v1332_v23, %v1552_v38  ;;  %v680_v33 = vpop.f32.mrf.mxu0  ;;  %v808_v34 = vpop.f32.mrf.mxu1 }
  0xff   : > { %1122 = vst.msk [vmem:[%s1574_s13 + $0x178] sm:$0xff] %vm1074_vm3, %v1057_v20  ;;  %v1055_v30 = vadd.f32 %v1567_v50, %v984_v22  ;;  %v817_v32 = vadd.f32 %v1364_v24, %v1552_v38  ;;  %v1028_v35 = vadd.f32 %v1567_v50, %v957_v25  ;;  %v955_v37 = vmul.f32 %v1559_v43, %v884_v27 }
 0x100   : > { %v1060_v36 = vadd.f32 %v1567_v50, %v989_v26  ;;  %v987_v39 = vmul.f32 %v1559_v43, %v916_v28  ;;  %1088 = vst.msk [vmem:[%s1574_s13 + $0x68] sm:$0xff] %vm1074_vm3, %v1023_v29  ;;  %v887_v40 = vmax.f32 %v689_v31, 0.0  ;;  %v681_v42 = vadd.f32 %v1552_v38, %v680_v33  ;;  %v1335_v45 = vpop.f32.mrf.mxu0  ;;  %v1367_v46 = vpop.f32.mrf.mxu1 }
 0x101   : > { %1120 = vst.msk [vmem:[%s1574_s13 + $0x168] sm:$0xff] %vm1074_vm3, %v1055_v30  ;;  %v919_v41 = vmax.f32 %v817_v32, 0.0  ;;  %v809_v44 = vadd.f32 %v1552_v38, %v808_v34  ;;  %1093 = vst.msk [vmem:[%s1574_s13 + $0x90] sm:$0xff] %vm1074_vm3, %v1028_v35  ;;  %v1026_v47 = vadd.f32 %v1567_v50, %v955_v37  ;;  %v702_v49 = vadd.f32 %v1335_v45, %v1552_v38 }
 0x102   : > { %1125 = vst.msk [vmem:[%s1574_s13 + $0x190] sm:$0xff] %vm1074_vm3, %v1060_v36  ;;  %v1058_v48 = vadd.f32 %v1567_v50, %v987_v39  ;;  %v830_v51 = vadd.f32 %v1367_v46, %v1552_v38  ;;  %v958_v52 = vmul.f32 %v1559_v43, %v887_v40  ;;  %v885_v54 = vmax.f32 %v681_v42, 0.0  ;;  %v693_v56 = vpop.f32.mrf.mxu0  ;;  %v821_v57 = vpop.f32.mrf.mxu1 }
 0x103   : > { %v990_v53 = vmul.f32 %v1559_v43, %v919_v41  ;;  %v917_v55 = vmax.f32 %v809_v44, 0.0  ;;  %1091 = vst.msk [vmem:[%s1574_s13 + $0x80] sm:$0xff] %vm1074_vm3, %v1026_v47  ;;  %v890_v58 = vmax.f32 %v702_v49, 0.0  ;;  %v694_v60 = vadd.f32 %v1552_v38, %v693_v56 }
 0x104   : > { %1123 = vst.msk [vmem:[%s1574_s13 + $0x180] sm:$0xff] %vm1074_vm3, %v1058_v48  ;;  %v922_v59 = vmax.f32 %v830_v51, 0.0  ;;  %v822_v61 = vadd.f32 %v1552_v38, %v821_v57  ;;  %v1029_v62 = vadd.f32 %v1567_v50, %v958_v52  ;;  %v956_v0 = vmul.f32 %v1559_v43, %v885_v54  ;;  %v1336_v2 = vpop.f32.mrf.mxu0  ;;  %v1368_v3 = vpop.f32.mrf.mxu1 }
 0x105   : > { %v1061_v63 = vadd.f32 %v1567_v50, %v990_v53  ;;  %v988_v1 = vmul.f32 %v1559_v43, %v917_v55  ;;  %v961_v4 = vmul.f32 %v1559_v43, %v890_v58  ;;  %v888_v6 = vmax.f32 %v694_v60, 0.0 }
 0x106   : > { %v993_v5 = vmul.f32 %v1559_v43, %v922_v59  ;;  %v920_v7 = vmax.f32 %v822_v61, 0.0  ;;  %1094 = vst.msk [vmem:[%s1574_s13 + $0x98] sm:$0xff] %vm1074_vm3, %v1029_v62  ;;  %v1027_v8 = vadd.f32 %v1567_v50, %v956_v0  ;;  %v705_v10 = vadd.f32 %v1336_v2, %v1552_v38  ;;  %v696_v12 = vpop.f32.mrf.mxu0  ;;  %v824_v13 = vpop.f32.mrf.mxu1 }
 0x107   : > { %1126 = vst.msk [vmem:[%s1574_s13 + $0x198] sm:$0xff] %vm1074_vm3, %v1061_v63  ;;  %v1059_v9 = vadd.f32 %v1567_v50, %v988_v1  ;;  %v833_v11 = vadd.f32 %v1368_v3, %v1552_v38  ;;  %v1032_v14 = vadd.f32 %v1567_v50, %v961_v4  ;;  %v959_v16 = vmul.f32 %v1559_v43, %v888_v6 }
 0x108   : > { %v1064_v15 = vadd.f32 %v1567_v50, %v993_v5  ;;  %v991_v17 = vmul.f32 %v1559_v43, %v920_v7  ;;  %1092 = vst.msk [vmem:[%s1574_s13 + $0x88] sm:$0xff] %vm1074_vm3, %v1027_v8  ;;  %v891_v18 = vmax.f32 %v705_v10, 0.0  ;;  %v697_v20 = vadd.f32 %v1552_v38, %v696_v12  ;;  %v1339_v22 = vpop.f32.mrf.mxu0  ;;  %v1371_v23 = vpop.f32.mrf.mxu1 }
 0x109   : > { %1124 = vst.msk [vmem:[%s1574_s13 + $0x188] sm:$0xff] %vm1074_vm3, %v1059_v9  ;;  %v923_v19 = vmax.f32 %v833_v11, 0.0  ;;  %v825_v21 = vadd.f32 %v1552_v38, %v824_v13  ;;  %1097 = vst.msk [vmem:[%s1574_s13 + $0xb0] sm:$0xff] %vm1074_vm3, %v1032_v14  ;;  %v1030_v24 = vadd.f32 %v1567_v50, %v959_v16  ;;  %v718_v26 = vadd.f32 %v1339_v22, %v1552_v38 }
 0x10a   : > { %1129 = vst.msk [vmem:[%s1574_s13 + $0x1b0] sm:$0xff] %vm1074_vm3, %v1064_v15  ;;  %v1062_v25 = vadd.f32 %v1567_v50, %v991_v17  ;;  %v846_v27 = vadd.f32 %v1371_v23, %v1552_v38  ;;  %v962_v28 = vmul.f32 %v1559_v43, %v891_v18  ;;  %v889_v30 = vmax.f32 %v697_v20, 0.0  ;;  %v709_v32 = vpop.f32.mrf.mxu0  ;;  %v837_v33 = vpop.f32.mrf.mxu1 }
 0x10b   : > { %v994_v29 = vmul.f32 %v1559_v43, %v923_v19  ;;  %v921_v31 = vmax.f32 %v825_v21, 0.0  ;;  %1095 = vst.msk [vmem:[%s1574_s13 + $0xa0] sm:$0xff] %vm1074_vm3, %v1030_v24  ;;  %v894_v34 = vmax.f32 %v718_v26, 0.0  ;;  %v710_v36 = vadd.f32 %v1552_v38, %v709_v32 }
 0x10c   : > { %1127 = vst.msk [vmem:[%s1574_s13 + $0x1a0] sm:$0xff] %vm1074_vm3, %v1062_v25  ;;  %v926_v35 = vmax.f32 %v846_v27, 0.0  ;;  %v838_v37 = vadd.f32 %v1552_v38, %v837_v33  ;;  %v1033_v39 = vadd.f32 %v1567_v50, %v962_v28  ;;  %v960_v41 = vmul.f32 %v1559_v43, %v889_v30  ;;  %v1340_v44 = vpop.f32.mrf.mxu0  ;;  %v1372_v45 = vpop.f32.mrf.mxu1 }
 0x10d   : > { %v1065_v40 = vadd.f32 %v1567_v50, %v994_v29  ;;  %v992_v42 = vmul.f32 %v1559_v43, %v921_v31  ;;  %v965_v46 = vmul.f32 %v1559_v43, %v894_v34  ;;  %v892_v48 = vmax.f32 %v710_v36, 0.0 }
 0x10e   : > { %v997_v47 = vmul.f32 %v1559_v43, %v926_v35  ;;  %v924_v49 = vmax.f32 %v838_v37, 0.0  ;;  %1098 = vst.msk [vmem:[%s1574_s13 + $0xb8] sm:$0xff] %vm1074_vm3, %v1033_v39  ;;  %v1031_v51 = vadd.f32 %v1567_v50, %v960_v41  ;;  %v721_v53 = vadd.f32 %v1340_v44, %v1552_v38  ;;  %v712_v55 = vpop.f32.mrf.mxu0  ;;  %v840_v56 = vpop.f32.mrf.mxu1 }
 0x10f   : > { %1130 = vst.msk [vmem:[%s1574_s13 + $0x1b8] sm:$0xff] %vm1074_vm3, %v1065_v40  ;;  %v1063_v52 = vadd.f32 %v1567_v50, %v992_v42  ;;  %v849_v54 = vadd.f32 %v1372_v45, %v1552_v38  ;;  %v1036_v57 = vadd.f32 %v1567_v50, %v965_v46  ;;  %v963_v59 = vmul.f32 %v1559_v43, %v892_v48 }
 0x110   : > { %v1068_v58 = vadd.f32 %v1567_v50, %v997_v47  ;;  %v995_v60 = vmul.f32 %v1559_v43, %v924_v49  ;;  %1096 = vst.msk [vmem:[%s1574_s13 + $0xa8] sm:$0xff] %vm1074_vm3, %v1031_v51  ;;  %v895_v61 = vmax.f32 %v721_v53, 0.0  ;;  %v713_v63 = vadd.f32 %v1552_v38, %v712_v55  ;;  %v1343_v1 = vpop.f32.mrf.mxu0  ;;  %v1375_v2 = vpop.f32.mrf.mxu1 }
 0x111   : > { %1128 = vst.msk [vmem:[%s1574_s13 + $0x1a8] sm:$0xff] %vm1074_vm3, %v1063_v52  ;;  %v927_v62 = vmax.f32 %v849_v54, 0.0  ;;  %v841_v0 = vadd.f32 %v1552_v38, %v840_v56  ;;  %1101 = vst.msk [vmem:[%s1574_s13 + $0xd0] sm:$0xff] %vm1074_vm3, %v1036_v57  ;;  %v1034_v3 = vadd.f32 %v1567_v50, %v963_v59  ;;  %v734_v5 = vadd.f32 %v1343_v1, %v1552_v38 }
 0x112   : > { %1133 = vst.msk [vmem:[%s1574_s13 + $0x1d0] sm:$0xff] %vm1074_vm3, %v1068_v58  ;;  %v1066_v4 = vadd.f32 %v1567_v50, %v995_v60  ;;  %v862_v6 = vadd.f32 %v1375_v2, %v1552_v38  ;;  %v966_v7 = vmul.f32 %v1559_v43, %v895_v61  ;;  %v893_v9 = vmax.f32 %v713_v63, 0.0  ;;  %v725_v11 = vpop.f32.mrf.mxu0  ;;  %v853_v12 = vpop.f32.mrf.mxu1 }
 0x113   : > { %v998_v8 = vmul.f32 %v1559_v43, %v927_v62  ;;  %v925_v10 = vmax.f32 %v841_v0, 0.0  ;;  %1099 = vst.msk [vmem:[%s1574_s13 + $0xc0] sm:$0xff] %vm1074_vm3, %v1034_v3  ;;  %v898_v13 = vmax.f32 %v734_v5, 0.0  ;;  %v726_v15 = vadd.f32 %v1552_v38, %v725_v11 }
 0x114   : > { %1131 = vst.msk [vmem:[%s1574_s13 + $0x1c0] sm:$0xff] %vm1074_vm3, %v1066_v4  ;;  %v930_v14 = vmax.f32 %v862_v6, 0.0  ;;  %v854_v16 = vadd.f32 %v1552_v38, %v853_v12  ;;  %v1037_v17 = vadd.f32 %v1567_v50, %v966_v7  ;;  %v964_v19 = vmul.f32 %v1559_v43, %v893_v9  ;;  %v1344_v21 = vpop.f32.mrf.mxu0  ;;  %v1376_v22 = vpop.f32.mrf.mxu1 }
 0x115   : > { %v1069_v18 = vadd.f32 %v1567_v50, %v998_v8  ;;  %v996_v20 = vmul.f32 %v1559_v43, %v925_v10  ;;  %v969_v23 = vmul.f32 %v1559_v43, %v898_v13  ;;  %v896_v25 = vmax.f32 %v726_v15, 0.0 }
 0x116   : > { %v1001_v24 = vmul.f32 %v1559_v43, %v930_v14  ;;  %v928_v26 = vmax.f32 %v854_v16, 0.0  ;;  %1102 = vst.msk [vmem:[%s1574_s13 + $0xd8] sm:$0xff] %vm1074_vm3, %v1037_v17  ;;  %v1035_v27 = vadd.f32 %v1567_v50, %v964_v19  ;;  %v737_v29 = vadd.f32 %v1344_v21, %v1552_v38  ;;  %v728_v31 = vpop.f32.mrf.mxu0  ;;  %v856_v32 = vpop.f32.mrf.mxu1 }
 0x117   : > { %1134 = vst.msk [vmem:[%s1574_s13 + $0x1d8] sm:$0xff] %vm1074_vm3, %v1069_v18  ;;  %v1067_v28 = vadd.f32 %v1567_v50, %v996_v20  ;;  %v865_v30 = vadd.f32 %v1376_v22, %v1552_v38  ;;  %v1040_v33 = vadd.f32 %v1567_v50, %v969_v23  ;;  %v967_v35 = vmul.f32 %v1559_v43, %v896_v25 }
 0x118   : > { %v1072_v34 = vadd.f32 %v1567_v50, %v1001_v24  ;;  %v999_v36 = vmul.f32 %v1559_v43, %v928_v26  ;;  %1100 = vst.msk [vmem:[%s1574_s13 + $0xc8] sm:$0xff] %vm1074_vm3, %v1035_v27  ;;  %v899_v37 = vmax.f32 %v737_v29, 0.0  ;;  %v729_v40 = vadd.f32 %v1552_v38, %v728_v31 }
 0x119   : > { %1132 = vst.msk [vmem:[%s1574_s13 + $0x1c8] sm:$0xff] %vm1074_vm3, %v1067_v28  ;;  %v931_v39 = vmax.f32 %v865_v30, 0.0  ;;  %v857_v41 = vadd.f32 %v1552_v38, %v856_v32  ;;  %1105 = vst.msk [vmem:[%s1574_s13 + $0xf0] sm:$0xff] %vm1074_vm3, %v1040_v33  ;;  %v1038_v42 = vadd.f32 %v1567_v50, %v967_v35 }
 0x11a   : > { %1137 = vst.msk [vmem:[%s1574_s13 + $0x1f0] sm:$0xff] %vm1074_vm3, %v1072_v34  ;;  %v1070_v44 = vadd.f32 %v1567_v50, %v999_v36  ;;  %v970_v45 = vmul.f32 %v1559_v43, %v899_v37  ;;  %v897_v47 = vmax.f32 %v729_v40, 0.0 }
 0x11b   : > { %v1002_v46 = vmul.f32 %v1559_v43, %v931_v39  ;;  %v929_v48 = vmax.f32 %v857_v41, 0.0  ;;  %1103 = vst.msk [vmem:[%s1574_s13 + $0xe0] sm:$0xff] %vm1074_vm3, %v1038_v42 }
 0x11c   : > { %1135 = vst.msk [vmem:[%s1574_s13 + $0x1e0] sm:$0xff] %vm1074_vm3, %v1070_v44  ;;  %v1041_v38 = vadd.f32 %v1567_v50, %v970_v45  ;;  %v968_v51 = vmul.f32 %v1559_v43, %v897_v47 }
 0x11d   : > { %v1073_v49 = vadd.f32 %v1567_v50, %v1002_v46  ;;  %v1000_v52 = vmul.f32 %v1559_v43, %v929_v48 }
 0x11e   : > { %1106 = vst.msk [vmem:[%s1574_s13 + $0xf8] sm:$0xff] %vm1074_vm3, %v1041_v38  ;;  %v1039_v53 = vadd.f32 %v1567_v50, %v968_v51 }
 0x11f   : > { %1138 = vst.msk [vmem:[%s1574_s13 + $0x1f8] sm:$0xff] %vm1074_vm3, %v1073_v49  ;;  %v1071_v54 = vadd.f32 %v1567_v50, %v1000_v52 }
 0x120   : > { %1104 = vst.msk [vmem:[%s1574_s13 + $0xe8] sm:$0xff] %vm1074_vm3, %v1039_v53 }
 0x121   : > { %1136 = vst.msk [vmem:[%s1574_s13 + $0x1e8] sm:$0xff] %vm1074_vm3, %v1071_v54 }
 0x122 PF: > { %s15_s18 = sadd.s32 1, %s1430_s18  }
 0x123   : > { %p12_p4 = scmp.ge.s32.totalorder %s15_s18, 18  }
 0x125   :  { %14 = sbr.rel (!%p12_p4) target bundleno = 1 (0x1), region = 70 }

// kernel: forward.4
= control target key start
LH: loop header
LB: loop body
LE: loop exit
PB: predicated region body
PF: predicated region fallthrough
CT: control target
= control target key end

     0   :  { %s1728_s18 = smov 0   ;;  %s2257_s0 = inlined_call_operand.vmem [shape: bf16[2048,216], index: 0, kind: input, shape index: {}]   ;;  %s2258_s1 = inlined_call_operand.vmem [shape: bf16[216,48], index: 1, kind: input, shape index: {}]   ;;  %s2259_s2 = inlined_call_operand.vmem [shape: f32[1,48], index: 2, kind: input, shape index: {}]   ;;  %s2260_s3 = inlined_call_operand.vmem [shape: f32[1,48], index: 3, kind: input, shape index: {}]   ;;  %s2261_s4 = inlined_call_operand.vmem [shape: f32[1,48], index: 4, kind: input, shape index: {}]   ;;  %s2262_s5 = inlined_call_operand.vmem [shape: f32[2048,48], index: 5, kind: output, shape index: {}]  }
   0x1 LB: > { %s1416_s19 = sadd.s32 4294967295, %s1695_s18   ;;  %p1420_p0 = scmp.ge.s32.totalorder %s1695_s18, 1  ;;  %s1695_s18 = sphi %s1728_s18, %s15_s18  }
   0x2   : > { %p189_p1 = scmp.lt.s32.totalorder %s1695_s18, 5 }
   0x4   : > { %p190_p2 = pnand %p1420_p0, %p189_p1 }
   0x5   : > { %s1421_s24 = sshll.u32 (!%p190_p2), %s1416_s19, 6 }
   0x6   : > { %193 = sbr.rel (%p190_p2) target bundleno = 394 (0x18a), region = 40  ;;  %p219_p3 = scmp.lt.s32.totalorder (!%p190_p2), %s1421_s24, 255 }
   0xb   : > { %v1579_v0 = vld [vmem:[%s2258_s1 + $0x38] sm:$0xff]   ;;  %v1697_v1 = vmov 0   ;;  %v1580_v2 = vld [vmem:[%s2258_s1 + $0x30] sm:$0xff]   ;;  %s2264_s24 = smov (!%p219_p3, %s1421_s24), 255  ;;  %v1581_v3 = vld [vmem:[%s2258_s1 + $0x28] sm:$0xff]   ;;  %vm699_vm0 = vcmask 719872  }
   0xc   : > { %800 = vmatprep.subr.bf16.mxu0 %v1697_v1  ;;  %1542 = vmatprep.subr.bf16.mxu1 %v1697_v1  ;;  %s1541_s27 = sshll.u32 %s2264_s24, 3  ;;  %v1582_v4 = vld [vmem:[%s2258_s1 + $0x20] sm:$0xff]   ;;  %v1583_v5 = vld [vmem:[%s2258_s1 + $0x18] sm:$0xff]   ;;  %v1584_v8 = vld [vmem:[%s2258_s1 + $0x10] sm:$0xff]   ;;  %vm796_vm1 = vcmask 1043456   ;;  %vm1295_vm2 = vcmask 392192  }
   0xd   : > { %801 = vmatpush1.bf16.msra.mxu0 %v1579_v0  ;;  %1556 = vmatpush1.bf16.msra.mxu1 %v1579_v0  ;;  %s1764_s7 = scalar_lea.vmem %s2257_s0, %s1541_s27  ;;  %v1585_v9 = vld [vmem:[%s2258_s1 + $0x8] sm:$0xff]   ;;  %v1586_v10 = vld [vmem:[%s2258_s1] sm:$0xff]   ;;  %v1589_v14 = vld [vmem:[%s2258_s1 + $0x58] sm:$0xff]   ;;  %s1938_s14 = scalar_lea.vmem %s2262_s5, %s1541_s27 }
   0xe   : > { %802 = vmatprep.subr.bf16.mxu0 %v1697_v1  ;;  %1543 = vmatprep.subr.bf16.mxu1 %v1697_v1  ;;  %v1595_v6 = vld [vmem:[%s1764_s7 + $0x4] ss:$8 sps:$4 sm:$0xff]   ;;  %v1587_v11 = vld [vmem:[%s2258_s1 + $0x68] ss:$0 sps:$4 sm:$0xff]   ;;  %v1590_v15 = vld [vmem:[%s2258_s1 + $0x50] sm:$0xff]  }
   0xf   : > { %1505 = vmatprep.mubr.msk.bf16.mxu0 %vm699_vm0, %v1595_v6  ;;  %v1598_v7 = vld [vmem:[%s1764_s7 + $0x104] ss:$8 sps:$4 sm:$0xff]   ;;  %v798_v12 = vsel %vm796_vm1, %v1587_v11, 0  ;;  %v1593_v18 = vld [vmem:[%s1764_s7] ss:$8 sps:$4 sm:$0xff]  }
  0x10   : > { %1521 = vmatprep.mubr.msk.bf16.mxu1 %vm699_vm0, %v1598_v7  ;;  %v1588_v13 = vld [vmem:[%s2258_s1 + $0x60] sm:$0xff]   ;;  %v1591_v16 = vld [vmem:[%s2258_s1 + $0x48] sm:$0xff]   ;;  %v1599_v20 = vld [vmem:[%s1764_s7 + $0x14] ss:$8 sps:$4 sm:$0xff]  }
  0x11   : > { %803 = vmatpush1.bf16.msra.mxu0 %v1580_v2  ;;  %1557 = vmatpush1.bf16.msra.mxu1 %v1580_v2  ;;  %v1592_v17 = vld [vmem:[%s2258_s1 + $0x40] sm:$0xff]   ;;  %v1601_v21 = vld [vmem:[%s1764_s7 + $0x114] ss:$8 sps:$4 sm:$0xff]   ;;  %v1603_v22 = vld [vmem:[%s1764_s7 + $0x10] ss:$8 sps:$4 sm:$0xff]  }
  0x12   : > { %804 = vmatprep.subr.bf16.mxu0 %v1697_v1  ;;  %1544 = vmatprep.subr.bf16.mxu1 %v1697_v1  ;;  %v1596_v19 = vld [vmem:[%s1764_s7 + $0x100] ss:$8 sps:$4 sm:$0xff]   ;;  %v1604_v23 = vld [vmem:[%s1764_s7 + $0x110] ss:$8 sps:$4 sm:$0xff]   ;;  %v1605_v24 = vld [vmem:[%s1764_s7 + $0x24] ss:$8 sps:$4 sm:$0xff]  }
  0x13   : > { %v1607_v25 = vld [vmem:[%s1764_s7 + $0x124] ss:$8 sps:$4 sm:$0xff]   ;;  %v1609_v26 = vld [vmem:[%s1764_s7 + $0x20] ss:$8 sps:$4 sm:$0xff]   ;;  %v1611_v28 = vld [vmem:[%s1764_s7 + $0x34] ss:$8 sps:$4 sm:$0xff]  }
  0x14   : > { %v1610_v27 = vld [vmem:[%s1764_s7 + $0x120] ss:$8 sps:$4 sm:$0xff]   ;;  %v1613_v29 = vld [vmem:[%s1764_s7 + $0x134] ss:$8 sps:$4 sm:$0xff]   ;;  %v1615_v30 = vld [vmem:[%s1764_s7 + $0x30] ss:$8 sps:$4 sm:$0xff]  }
  0x15   : > { %805 = vmatpush1.bf16.msra.mxu0 %v1581_v3  ;;  %1558 = vmatpush1.bf16.msra.mxu1 %v1581_v3  ;;  %v1616_v31 = vld [vmem:[%s1764_s7 + $0x130] ss:$8 sps:$4 sm:$0xff]   ;;  %v1617_v32 = vld [vmem:[%s1764_s7 + $0x44] ss:$8 sps:$4 sm:$0xff]   ;;  %v1621_v34 = vld [vmem:[%s1764_s7 + $0x40] ss:$8 sps:$4 sm:$0xff]  }
  0x16   : > { %806 = vmatprep.subr.bf16.mxu0 %v1697_v1  ;;  %1545 = vmatprep.subr.bf16.mxu1 %v1697_v1  ;;  %v1619_v33 = vld [vmem:[%s1764_s7 + $0x144] ss:$8 sps:$4 sm:$0xff]   ;;  %v1622_v35 = vld [vmem:[%s1764_s7 + $0x140] ss:$8 sps:$4 sm:$0xff]   ;;  %v1623_v36 = vld [vmem:[%s1764_s7 + $0x54] ss:$8 sps:$4 sm:$0xff]  }
  0x17   : > { %v1625_v37 = vld [vmem:[%s1764_s7 + $0x154] ss:$8 sps:$4 sm:$0xff]   ;;  %v1627_v38 = vld [vmem:[%s1764_s7 + $0x50] ss:$8 sps:$4 sm:$0xff]   ;;  %v1629_v40 = vld [vmem:[%s1764_s7 + $0x64] ss:$8 sps:$4 sm:$0xff]  }
  0x18   : > { %v1628_v39 = vld [vmem:[%s1764_s7 + $0x150] ss:$8 sps:$4 sm:$0xff]   ;;  %v1631_v41 = vld [vmem:[%s1764_s7 + $0x164] ss:$8 sps:$4 sm:$0xff]   ;;  %v1633_v42 = vld [vmem:[%s1764_s7 + $0x60] ss:$8 sps:$4 sm:$0xff]  }
  0x19   : > { %807 = vmatpush1.bf16.msra.mxu0 %v1582_v4  ;;  %1559 = vmatpush1.bf16.msra.mxu1 %v1582_v4  ;;  %v1634_v43 = vld [vmem:[%s1764_s7 + $0x160] ss:$8 sps:$4 sm:$0xff]   ;;  %v1635_v44 = vld [vmem:[%s1764_s7 + $0x74] ss:$8 sps:$4 sm:$0xff]   ;;  %v1639_v46 = vld [vmem:[%s1764_s7 + $0x70] ss:$8 sps:$4 sm:$0xff]  }
  0x1a   : > { %808 = vmatprep.subr.bf16.mxu0 %v1697_v1  ;;  %1546 = vmatprep.subr.bf16.mxu1 %v1697_v1  ;;  %v1637_v45 = vld [vmem:[%s1764_s7 + $0x174] ss:$8 sps:$4 sm:$0xff]   ;;  %v1640_v47 = vld [vmem:[%s1764_s7 + $0x170] ss:$8 sps:$4 sm:$0xff]   ;;  %v1641_v48 = vld [vmem:[%s1764_s7 + $0x84] ss:$8 sps:$4 sm:$0xff]  }
  0x1b   : > { %v1643_v49 = vld [vmem:[%s1764_s7 + $0x184] ss:$8 sps:$4 sm:$0xff]   ;;  %v1645_v50 = vld [vmem:[%s1764_s7 + $0x80] ss:$8 sps:$4 sm:$0xff]   ;;  %v1647_v52 = vld [vmem:[%s1764_s7 + $0x94] ss:$8 sps:$4 sm:$0xff]  }
  0x1c   : > { %v1646_v51 = vld [vmem:[%s1764_s7 + $0x180] ss:$8 sps:$4 sm:$0xff]   ;;  %v1649_v53 = vld [vmem:[%s1764_s7 + $0x194] ss:$8 sps:$4 sm:$0xff]   ;;  %v1651_v54 = vld [vmem:[%s1764_s7 + $0x90] ss:$8 sps:$4 sm:$0xff]  }
  0x1d   : > { %809 = vmatpush1.bf16.msra.mxu0 %v1583_v5  ;;  %1560 = vmatpush1.bf16.msra.mxu1 %v1583_v5  ;;  %v1652_v55 = vld [vmem:[%s1764_s7 + $0x190] ss:$8 sps:$4 sm:$0xff]   ;;  %v1653_v56 = vld [vmem:[%s1764_s7 + $0xa4] ss:$8 sps:$4 sm:$0xff]   ;;  %v1657_v58 = vld [vmem:[%s1764_s7 + $0xa0] ss:$8 sps:$4 sm:$0xff]  }
  0x1e   : > { %810 = vmatprep.subr.bf16.mxu0 %v1697_v1  ;;  %1547 = vmatprep.subr.bf16.mxu1 %v1697_v1  ;;  %v1655_v57 = vld [vmem:[%s1764_s7 + $0x1a4] ss:$8 sps:$4 sm:$0xff]   ;;  %v1658_v59 = vld [vmem:[%s1764_s7 + $0x1a0] ss:$8 sps:$4 sm:$0xff]   ;;  %v1659_v60 = vld [vmem:[%s1764_s7 + $0xb4] ss:$8 sps:$4 sm:$0xff]  }
  0x1f   : > { %v1661_v61 = vld [vmem:[%s1764_s7 + $0x1b4] ss:$8 sps:$4 sm:$0xff]   ;;  %v1663_v62 = vld [vmem:[%s1764_s7 + $0xb0] ss:$8 sps:$4 sm:$0xff]   ;;  %v1665_v0 = vld [vmem:[%s1764_s7 + $0xc4] ss:$8 sps:$4 sm:$0xff]  }
  0x20   : > { %v1664_v63 = vld [vmem:[%s1764_s7 + $0x1b0] ss:$8 sps:$4 sm:$0xff]   ;;  %v1669_v2 = vld [vmem:[%s1764_s7 + $0xc0] ss:$8 sps:$4 sm:$0xff]   ;;  %v1671_v4 = vld [vmem:[%s1764_s7 + $0xd4] ss:$8 sps:$4 sm:$0xff]  }
  0x21   : > { %811 = vmatpush1.bf16.msra.mxu0 %v1584_v8  ;;  %1561 = vmatpush1.bf16.msra.mxu1 %v1584_v8  ;;  %v1670_v3 = vld [vmem:[%s1764_s7 + $0x1c0] ss:$8 sps:$4 sm:$0xff]   ;;  %v1673_v5 = vld [vmem:[%s1764_s7 + $0x1d4] ss:$8 sps:$4 sm:$0xff]   ;;  %v1675_v6 = vld [vmem:[%s1764_s7 + $0xd0] ss:$8 sps:$4 sm:$0xff]  }
  0x22   : > { %812 = vmatprep.subr.bf16.mxu0 %v1697_v1  ;;  %1548 = vmatprep.subr.bf16.mxu1 %v1697_v1  ;;  %v1676_v7 = vld [vmem:[%s1764_s7 + $0x1d0] ss:$8 sps:$4 sm:$0xff]   ;;  %v1677_v8 = vld [vmem:[%s1764_s7 + $0xe4] ss:$8 sps:$4 sm:$0xff]   ;;  %v1682_v11 = vld [vmem:[%s1764_s7 + $0x1e0] ss:$8 sps:$4 sm:$0xff]  }
  0x25   : > { %813 = vmatpush1.bf16.msra.mxu0 %v1585_v9  ;;  %1562 = vmatpush1.bf16.msra.mxu1 %v1585_v9  ;;  %v1679_v9 = vld [vmem:[%s1764_s7 + $0x1e4] ss:$8 sps:$4 sm:$0xff]  }
  0x26   : > { %814 = vmatprep.subr.bf16.mxu0 %v1697_v1  ;;  %1549 = vmatprep.subr.bf16.mxu1 %v1697_v1 }
  0x29   : > { %815 = vmatpush1.bf16.msra.mxu0 %v1586_v10  ;;  %1563 = vmatpush1.bf16.msra.mxu1 %v1586_v10  ;;  %v1681_v10 = vld [vmem:[%s1764_s7 + $0xe0] ss:$8 sps:$4 sm:$0xff]  }
  0x2a   : > { %820 = vmatprep.subr.bf16.mxu0 %v1697_v1  ;;  %1550 = vmatprep.subr.bf16.mxu1 %v1697_v1 }
  0x2d   : > { %821 = vmatpush2.bf16.msra.mxu0 %v798_v12  ;;  %1564 = vmatpush2.bf16.msra.mxu1 %v798_v12  ;;  %v1683_v12 = vld [vmem:[%s1764_s7 + $0xf4] ss:$8 sps:$4 sm:$0xff]  }
  0x2e   : > { %822 = vmatprep.subr.bf16.mxu0 %v1697_v1  ;;  %1551 = vmatprep.subr.bf16.mxu1 %v1697_v1 }
  0x31   : > { %823 = vmatpush2.bf16.msra.mxu0 %v1588_v13  ;;  %1565 = vmatpush2.bf16.msra.mxu1 %v1588_v13  ;;  %v1685_v13 = vld [vmem:[%s1764_s7 + $0x1f4] ss:$8 sps:$4 sm:$0xff]  }
  0x32   : > { %824 = vmatprep.subr.bf16.mxu0 %v1697_v1  ;;  %1552 = vmatprep.subr.bf16.mxu1 %v1697_v1 }
  0x35   : > { %825 = vmatpush2.bf16.msra.mxu0 %v1589_v14  ;;  %1566 = vmatpush2.bf16.msra.mxu1 %v1589_v14  ;;  %v1687_v14 = vld [vmem:[%s1764_s7 + $0xf0] ss:$8 sps:$4 sm:$0xff]  }
  0x36   : > { %826 = vmatprep.subr.bf16.mxu0 %v1697_v1  ;;  %1553 = vmatprep.subr.bf16.mxu1 %v1697_v1 }
  0x39   : > { %827 = vmatpush2.bf16.msra.mxu0 %v1590_v15  ;;  %1567 = vmatpush2.bf16.msra.mxu1 %v1590_v15  ;;  %v1688_v15 = vld [vmem:[%s1764_s7 + $0x1f0] ss:$8 sps:$4 sm:$0xff]  }
  0x3a   : > { %828 = vmatprep.subr.bf16.mxu0 %v1697_v1  ;;  %1554 = vmatprep.subr.bf16.mxu1 %v1697_v1 }
  0x3d   : > { %829 = vmatpush2.bf16.msra.mxu0 %v1591_v16  ;;  %1568 = vmatpush2.bf16.msra.mxu1 %v1591_v16  ;;  %v1915_v16 = vld [vmem:[%s2259_s2] ss:$0 sm:$0xff] }
  0x3e   : > { %830 = vmatprep.subr.bf16.mxu0 %v1697_v1  ;;  %1555 = vmatprep.subr.bf16.mxu1 %v1697_v1  ;;  %v1667_v1 = vld [vmem:[%s1764_s7 + $0x1c4] ss:$8 sps:$4 sm:$0xff]  }
  0x41   : > { %831 = vmatpush2.bf16.msra.mxu0 %v1592_v17  ;;  %1569 = vmatpush2.bf16.msra.mxu1 %v1592_v17 }
  0x44   : > { %833 = vmatmul.mubr.bf16.vlgmr.msra.gmra.mxu0 %v1593_v18  ;;  %961 = vmatmul.mubr.bf16.vlgmr.msra.gmra.mxu1 %v1596_v19 }
  0x45   : > { %1506 = vmatprep.mubr.msk.bf16.mxu0 %vm699_vm0, %v1599_v20  ;;  %1522 = vmatprep.mubr.msk.bf16.mxu1 %vm699_vm0, %v1601_v21  ;;  %v1922_v21 = vld [vmem:[%s2260_s3] ss:$0 sm:$0xff] }
  0x4c   : > { %841 = vmatmul.mubr.bf16.gmra.mxu0 %v1603_v22  ;;  %969 = vmatmul.mubr.bf16.gmra.mxu1 %v1604_v23 }
  0x4d   : > { %1507 = vmatprep.mubr.msk.bf16.mxu0 %vm699_vm0, %v1605_v24  ;;  %1523 = vmatprep.mubr.msk.bf16.mxu1 %vm699_vm0, %v1607_v25 }
  0x54   : > { %849 = vmatmul.mubr.bf16.gmra.mxu0 %v1609_v26  ;;  %977 = vmatmul.mubr.bf16.gmra.mxu1 %v1610_v27  ;;  %v1927_v26 = vld [vmem:[%s2261_s4] ss:$0 sm:$0xff] }
  0x55   : > { %1508 = vmatprep.mubr.msk.bf16.mxu0 %vm699_vm0, %v1611_v28  ;;  %1524 = vmatprep.mubr.msk.bf16.mxu1 %vm699_vm0, %v1613_v29 }
  0x5c   : > { %857 = vmatmul.mubr.bf16.gmra.mxu0 %v1615_v30  ;;  %985 = vmatmul.mubr.bf16.gmra.mxu1 %v1616_v31 }
  0x5d   : > { %1509 = vmatprep.mubr.msk.bf16.mxu0 %vm699_vm0, %v1617_v32  ;;  %1525 = vmatprep.mubr.msk.bf16.mxu1 %vm699_vm0, %v1619_v33 }
  0x64   : > { %865 = vmatmul.mubr.bf16.gmra.mxu0 %v1621_v34  ;;  %993 = vmatmul.mubr.bf16.gmra.mxu1 %v1622_v35 }
  0x65   : > { %1510 = vmatprep.mubr.msk.bf16.mxu0 %vm699_vm0, %v1623_v36  ;;  %1526 = vmatprep.mubr.msk.bf16.mxu1 %vm699_vm0, %v1625_v37 }
  0x6c   : > { %873 = vmatmul.mubr.bf16.gmra.mxu0 %v1627_v38  ;;  %1001 = vmatmul.mubr.bf16.gmra.mxu1 %v1628_v39 }
  0x6d   : > { %1511 = vmatprep.mubr.msk.bf16.mxu0 %vm699_vm0, %v1629_v40  ;;  %1527 = vmatprep.mubr.msk.bf16.mxu1 %vm699_vm0, %v1631_v41 }
  0x74   : > { %881 = vmatmul.mubr.bf16.gmra.mxu0 %v1633_v42  ;;  %1009 = vmatmul.mubr.bf16.gmra.mxu1 %v1634_v43 }
  0x75   : > { %1512 = vmatprep.mubr.msk.bf16.mxu0 %vm699_vm0, %v1635_v44  ;;  %1528 = vmatprep.mubr.msk.bf16.mxu1 %vm699_vm0, %v1637_v45 }
  0x7c   : > { %889 = vmatmul.mubr.bf16.gmra.mxu0 %v1639_v46  ;;  %1017 = vmatmul.mubr.bf16.gmra.mxu1 %v1640_v47 }
  0x7d   : > { %1513 = vmatprep.mubr.msk.bf16.mxu0 %vm699_vm0, %v1641_v48  ;;  %1529 = vmatprep.mubr.msk.bf16.mxu1 %vm699_vm0, %v1643_v49 }
  0x84   : > { %897 = vmatmul.mubr.bf16.gmra.mxu0 %v1645_v50  ;;  %1025 = vmatmul.mubr.bf16.gmra.mxu1 %v1646_v51 }
  0x85   : > { %1514 = vmatprep.mubr.msk.bf16.mxu0 %vm699_vm0, %v1647_v52  ;;  %1530 = vmatprep.mubr.msk.bf16.mxu1 %vm699_vm0, %v1649_v53 }
  0x8c   : > { %905 = vmatmul.mubr.bf16.gmra.mxu0 %v1651_v54  ;;  %1033 = vmatmul.mubr.bf16.gmra.mxu1 %v1652_v55 }
  0x8d   : > { %1515 = vmatprep.mubr.msk.bf16.mxu0 %vm699_vm0, %v1653_v56  ;;  %1531 = vmatprep.mubr.msk.bf16.mxu1 %vm699_vm0, %v1655_v57 }
  0x94   : > { %913 = vmatmul.mubr.bf16.gmra.mxu0 %v1657_v58  ;;  %1041 = vmatmul.mubr.bf16.gmra.mxu1 %v1658_v59 }
  0x95   : > { %1516 = vmatprep.mubr.msk.bf16.mxu0 %vm699_vm0, %v1659_v60  ;;  %1532 = vmatprep.mubr.msk.bf16.mxu1 %vm699_vm0, %v1661_v61 }
  0x9c   : > { %921 = vmatmul.mubr.bf16.gmra.mxu0 %v1663_v62  ;;  %1049 = vmatmul.mubr.bf16.gmra.mxu1 %v1664_v63 }
  0x9d   : > { %1517 = vmatprep.mubr.msk.bf16.mxu0 %vm699_vm0, %v1665_v0  ;;  %1533 = vmatprep.mubr.msk.bf16.mxu1 %vm699_vm0, %v1667_v1 }
  0xa4   : > { %929 = vmatmul.mubr.bf16.gmra.mxu0 %v1669_v2  ;;  %1057 = vmatmul.mubr.bf16.gmra.mxu1 %v1670_v3 }
  0xa5   : > { %1518 = vmatprep.mubr.msk.bf16.mxu0 %vm699_vm0, %v1671_v4  ;;  %1534 = vmatprep.mubr.msk.bf16.mxu1 %vm699_vm0, %v1673_v5 }
  0xac   : > { %937 = vmatmul.mubr.bf16.gmra.mxu0 %v1675_v6  ;;  %1065 = vmatmul.mubr.bf16.gmra.mxu1 %v1676_v7 }
  0xad   : > { %1519 = vmatprep.mubr.msk.bf16.mxu0 %vm699_vm0, %v1677_v8  ;;  %1535 = vmatprep.mubr.msk.bf16.mxu1 %vm699_vm0, %v1679_v9 }
  0xb4   : > { %945 = vmatmul.mubr.bf16.gmra.mxu0 %v1681_v10  ;;  %1073 = vmatmul.mubr.bf16.gmra.mxu1 %v1682_v11 }
  0xb5   : > { %1520 = vmatprep.mubr.msk.bf16.mxu0 %vm699_vm0, %v1683_v12  ;;  %1536 = vmatprep.mubr.msk.bf16.mxu1 %vm699_vm0, %v1685_v13 }
  0xbc   : > { %953 = vmatmul.mubr.bf16.gmra.mxu0 %v1687_v14  ;;  %1081 = vmatmul.mubr.bf16.gmra.mxu1 %v1688_v15 }
 0x104   : > { %v834_v17 = vpop.f32.mrf.mxu0  ;;  %v962_v18 = vpop.f32.mrf.mxu1 }
 0x105   : > { %v835_v19 = vadd.f32 %v1915_v16, %v834_v17  ;;  %v963_v20 = vadd.f32 %v1915_v16, %v962_v18 }
 0x106   : > { %v836_v22 = vpop.f32.mrf.mxu0  ;;  %v964_v23 = vpop.f32.mrf.mxu1 }
 0x107   : > { %v1089_v24 = vmax.f32 %v835_v19, 0.0  ;;  %v1121_v25 = vmax.f32 %v963_v20, 0.0 }
 0x108   : > { %v837_v27 = vpop.f32.mrf.mxu0  ;;  %v965_v28 = vpop.f32.mrf.mxu1 }
 0x109   : > { %v1160_v29 = vmul.f32 %v1922_v21, %v1089_v24  ;;  %v1192_v30 = vmul.f32 %v1922_v21, %v1121_v25  ;;  %v838_v31 = vadd.f32 %v1915_v16, %v837_v27  ;;  %v966_v32 = vadd.f32 %v1915_v16, %v965_v28 }
 0x10a   : > { %v839_v33 = vpop.f32.mrf.mxu0  ;;  %v967_v34 = vpop.f32.mrf.mxu1 }
 0x10b   : > { %v1231_v35 = vadd.f32 %v1927_v26, %v1160_v29  ;;  %v1263_v36 = vadd.f32 %v1927_v26, %v1192_v30  ;;  %v1090_v37 = vmax.f32 %v838_v31, 0.0  ;;  %v1122_v38 = vmax.f32 %v966_v32, 0.0 }
 0x10c   : > { %v842_v39 = vpop.f32.mrf.mxu0  ;;  %v970_v40 = vpop.f32.mrf.mxu1 }
 0x10d   : > { %1296 = vst.msk [vmem:[%s1938_s14] sm:$0xff] %vm1295_vm2, %v1231_v35  ;;  %1328 = vst.msk [vmem:[%s1938_s14 + $0x100] sm:$0xff] %vm1295_vm2, %v1263_v36  ;;  %v1161_v41 = vmul.f32 %v1922_v21, %v1090_v37  ;;  %v1193_v42 = vmul.f32 %v1922_v21, %v1122_v38  ;;  %v843_v43 = vadd.f32 %v1915_v16, %v842_v39 }
 0x10e   : > { %v971_v44 = vadd.f32 %v1915_v16, %v970_v40  ;;  %v844_v45 = vpop.f32.mrf.mxu0  ;;  %v972_v46 = vpop.f32.mrf.mxu1 }
 0x10f   : > { %v1232_v47 = vadd.f32 %v1927_v26, %v1161_v41  ;;  %v1264_v48 = vadd.f32 %v1927_v26, %v1193_v42  ;;  %v1091_v49 = vmax.f32 %v843_v43, 0.0 }
 0x110   : > { %v1123_v50 = vmax.f32 %v971_v44, 0.0  ;;  %v845_v51 = vpop.f32.mrf.mxu0  ;;  %v973_v52 = vpop.f32.mrf.mxu1 }
 0x111   : > { %1297 = vst.msk [vmem:[%s1938_s14 + $0x8] sm:$0xff] %vm1295_vm2, %v1232_v47  ;;  %1329 = vst.msk [vmem:[%s1938_s14 + $0x108] sm:$0xff] %vm1295_vm2, %v1264_v48  ;;  %v1162_v53 = vmul.f32 %v1922_v21, %v1091_v49  ;;  %v846_v55 = vadd.f32 %v1915_v16, %v845_v51  ;;  %v974_v56 = vadd.f32 %v1915_v16, %v973_v52 }
 0x112   : > { %v1194_v54 = vmul.f32 %v1922_v21, %v1123_v50  ;;  %v847_v57 = vpop.f32.mrf.mxu0  ;;  %v975_v58 = vpop.f32.mrf.mxu1 }
 0x113   : > { %v1233_v59 = vadd.f32 %v1927_v26, %v1162_v53  ;;  %v1092_v61 = vmax.f32 %v846_v55, 0.0  ;;  %v1124_v62 = vmax.f32 %v974_v56, 0.0 }
 0x114   : > { %v1265_v60 = vadd.f32 %v1927_v26, %v1194_v54  ;;  %v850_v63 = vpop.f32.mrf.mxu0  ;;  %v978_v0 = vpop.f32.mrf.mxu1 }
 0x115   : > { %1298 = vst.msk [vmem:[%s1938_s14 + $0x10] sm:$0xff] %vm1295_vm2, %v1233_v59  ;;  %v1163_v1 = vmul.f32 %v1922_v21, %v1092_v61  ;;  %v1195_v2 = vmul.f32 %v1922_v21, %v1124_v62  ;;  %v851_v3 = vadd.f32 %v1915_v16, %v850_v63  ;;  %v979_v4 = vadd.f32 %v1915_v16, %v978_v0 }
 0x116   : > { %1330 = vst.msk [vmem:[%s1938_s14 + $0x110] sm:$0xff] %vm1295_vm2, %v1265_v60  ;;  %v852_v5 = vpop.f32.mrf.mxu0  ;;  %v980_v6 = vpop.f32.mrf.mxu1 }
 0x117   : > { %v1234_v7 = vadd.f32 %v1927_v26, %v1163_v1  ;;  %v1266_v8 = vadd.f32 %v1927_v26, %v1195_v2  ;;  %v1093_v9 = vmax.f32 %v851_v3, 0.0  ;;  %v1125_v10 = vmax.f32 %v979_v4, 0.0 }
 0x118   : > { %v853_v11 = vpop.f32.mrf.mxu0  ;;  %v981_v12 = vpop.f32.mrf.mxu1 }
 0x119   : > { %1299 = vst.msk [vmem:[%s1938_s14 + $0x18] sm:$0xff] %vm1295_vm2, %v1234_v7  ;;  %1331 = vst.msk [vmem:[%s1938_s14 + $0x118] sm:$0xff] %vm1295_vm2, %v1266_v8  ;;  %v1164_v13 = vmul.f32 %v1922_v21, %v1093_v9  ;;  %v1196_v14 = vmul.f32 %v1922_v21, %v1125_v10  ;;  %v854_v15 = vadd.f32 %v1915_v16, %v853_v11 }
 0x11a   : > { %v982_v17 = vadd.f32 %v1915_v16, %v981_v12  ;;  %v855_v18 = vpop.f32.mrf.mxu0  ;;  %v983_v19 = vpop.f32.mrf.mxu1 }
 0x11b   : > { %v1235_v20 = vadd.f32 %v1927_v26, %v1164_v13  ;;  %v1267_v22 = vadd.f32 %v1927_v26, %v1196_v14  ;;  %v1094_v23 = vmax.f32 %v854_v15, 0.0 }
 0x11c   : > { %v1126_v24 = vmax.f32 %v982_v17, 0.0  ;;  %v858_v25 = vpop.f32.mrf.mxu0  ;;  %v986_v27 = vpop.f32.mrf.mxu1 }
 0x11d   : > { %1300 = vst.msk [vmem:[%s1938_s14 + $0x20] sm:$0xff] %vm1295_vm2, %v1235_v20  ;;  %1332 = vst.msk [vmem:[%s1938_s14 + $0x120] sm:$0xff] %vm1295_vm2, %v1267_v22  ;;  %v1165_v28 = vmul.f32 %v1922_v21, %v1094_v23  ;;  %v859_v30 = vadd.f32 %v1915_v16, %v858_v25  ;;  %v987_v31 = vadd.f32 %v1915_v16, %v986_v27 }
 0x11e   : > { %v1197_v29 = vmul.f32 %v1922_v21, %v1126_v24  ;;  %v860_v32 = vpop.f32.mrf.mxu0  ;;  %v988_v33 = vpop.f32.mrf.mxu1 }
 0x11f   : > { %v1236_v34 = vadd.f32 %v1927_v26, %v1165_v28  ;;  %v1095_v36 = vmax.f32 %v859_v30, 0.0  ;;  %v1127_v37 = vmax.f32 %v987_v31, 0.0 }
 0x120   : > { %v1268_v35 = vadd.f32 %v1927_v26, %v1197_v29  ;;  %v861_v38 = vpop.f32.mrf.mxu0  ;;  %v989_v39 = vpop.f32.mrf.mxu1 }
 0x121   : > { %1301 = vst.msk [vmem:[%s1938_s14 + $0x28] sm:$0xff] %vm1295_vm2, %v1236_v34  ;;  %v1166_v40 = vmul.f32 %v1922_v21, %v1095_v36  ;;  %v1198_v41 = vmul.f32 %v1922_v21, %v1127_v37  ;;  %v862_v42 = vadd.f32 %v1915_v16, %v861_v38  ;;  %v990_v43 = vadd.f32 %v1915_v16, %v989_v39 }
 0x122   : > { %1333 = vst.msk [vmem:[%s1938_s14 + $0x128] sm:$0xff] %vm1295_vm2, %v1268_v35  ;;  %v863_v44 = vpop.f32.mrf.mxu0  ;;  %v991_v45 = vpop.f32.mrf.mxu1 }
 0x123   : > { %v1237_v46 = vadd.f32 %v1927_v26, %v1166_v40  ;;  %v1269_v47 = vadd.f32 %v1927_v26, %v1198_v41  ;;  %v1096_v48 = vmax.f32 %v862_v42, 0.0  ;;  %v1128_v49 = vmax.f32 %v990_v43, 0.0 }
 0x124   : > { %v866_v50 = vpop.f32.mrf.mxu0  ;;  %v994_v51 = vpop.f32.mrf.mxu1 }
 0x125   : > { %1302 = vst.msk [vmem:[%s1938_s14 + $0x30] sm:$0xff] %vm1295_vm2, %v1237_v46  ;;  %1334 = vst.msk [vmem:[%s1938_s14 + $0x130] sm:$0xff] %vm1295_vm2, %v1269_v47  ;;  %v1167_v52 = vmul.f32 %v1922_v21, %v1096_v48  ;;  %v1199_v53 = vmul.f32 %v1922_v21, %v1128_v49  ;;  %v867_v54 = vadd.f32 %v1915_v16, %v866_v50 }
 0x126   : > { %v995_v55 = vadd.f32 %v1915_v16, %v994_v51  ;;  %v868_v56 = vpop.f32.mrf.mxu0  ;;  %v996_v57 = vpop.f32.mrf.mxu1 }
 0x127   : > { %v1238_v58 = vadd.f32 %v1927_v26, %v1167_v52  ;;  %v1270_v59 = vadd.f32 %v1927_v26, %v1199_v53  ;;  %v1097_v60 = vmax.f32 %v867_v54, 0.0 }
 0x128   : > { %v1129_v61 = vmax.f32 %v995_v55, 0.0  ;;  %v869_v62 = vpop.f32.mrf.mxu0  ;;  %v997_v63 = vpop.f32.mrf.mxu1 }
 0x129   : > { %1303 = vst.msk [vmem:[%s1938_s14 + $0x38] sm:$0xff] %vm1295_vm2, %v1238_v58  ;;  %1335 = vst.msk [vmem:[%s1938_s14 + $0x138] sm:$0xff] %vm1295_vm2, %v1270_v59  ;;  %v1168_v0 = vmul.f32 %v1922_v21, %v1097_v60  ;;  %v870_v2 = vadd.f32 %v1915_v16, %v869_v62  ;;  %v998_v3 = vadd.f32 %v1915_v16, %v997_v63 }
 0x12a   : > { %v1200_v1 = vmul.f32 %v1922_v21, %v1129_v61  ;;  %v871_v4 = vpop.f32.mrf.mxu0  ;;  %v999_v5 = vpop.f32.mrf.mxu1 }
 0x12b   : > { %v1239_v6 = vadd.f32 %v1927_v26, %v1168_v0  ;;  %v1098_v8 = vmax.f32 %v870_v2, 0.0  ;;  %v1130_v9 = vmax.f32 %v998_v3, 0.0 }
 0x12c   : > { %v1271_v7 = vadd.f32 %v1927_v26, %v1200_v1  ;;  %v874_v10 = vpop.f32.mrf.mxu0  ;;  %v1002_v11 = vpop.f32.mrf.mxu1 }
 0x12d   : > { %1304 = vst.msk [vmem:[%s1938_s14 + $0x40] sm:$0xff] %vm1295_vm2, %v1239_v6  ;;  %v1169_v12 = vmul.f32 %v1922_v21, %v1098_v8  ;;  %v1201_v13 = vmul.f32 %v1922_v21, %v1130_v9  ;;  %v875_v14 = vadd.f32 %v1915_v16, %v874_v10  ;;  %v1003_v15 = vadd.f32 %v1915_v16, %v1002_v11 }
 0x12e   : > { %1336 = vst.msk [vmem:[%s1938_s14 + $0x140] sm:$0xff] %vm1295_vm2, %v1271_v7  ;;  %v876_v17 = vpop.f32.mrf.mxu0  ;;  %v1004_v18 = vpop.f32.mrf.mxu1 }
 0x12f   : > { %v1240_v19 = vadd.f32 %v1927_v26, %v1169_v12  ;;  %v1272_v20 = vadd.f32 %v1927_v26, %v1201_v13  ;;  %v1099_v22 = vmax.f32 %v875_v14, 0.0  ;;  %v1131_v23 = vmax.f32 %v1003_v15, 0.0 }
 0x130   : > { %v877_v24 = vpop.f32.mrf.mxu0  ;;  %v1005_v25 = vpop.f32.mrf.mxu1 }
 0x131   : > { %1305 = vst.msk [vmem:[%s1938_s14 + $0x48] sm:$0xff] %vm1295_vm2, %v1240_v19  ;;  %1337 = vst.msk [vmem:[%s1938_s14 + $0x148] sm:$0xff] %vm1295_vm2, %v1272_v20  ;;  %v1170_v27 = vmul.f32 %v1922_v21, %v1099_v22  ;;  %v1202_v28 = vmul.f32 %v1922_v21, %v1131_v23  ;;  %v878_v29 = vadd.f32 %v1915_v16, %v877_v24 }
 0x132   : > { %v1006_v30 = vadd.f32 %v1915_v16, %v1005_v25  ;;  %v879_v31 = vpop.f32.mrf.mxu0  ;;  %v1007_v32 = vpop.f32.mrf.mxu1 }
 0x133   : > { %v1241_v33 = vadd.f32 %v1927_v26, %v1170_v27  ;;  %v1273_v34 = vadd.f32 %v1927_v26, %v1202_v28  ;;  %v1100_v35 = vmax.f32 %v878_v29, 0.0 }
 0x134   : > { %v1132_v36 = vmax.f32 %v1006_v30, 0.0  ;;  %v882_v37 = vpop.f32.mrf.mxu0  ;;  %v1010_v38 = vpop.f32.mrf.mxu1 }
 0x135   : > { %1306 = vst.msk [vmem:[%s1938_s14 + $0x50] sm:$0xff] %vm1295_vm2, %v1241_v33  ;;  %1338 = vst.msk [vmem:[%s1938_s14 + $0x150] sm:$0xff] %vm1295_vm2, %v1273_v34  ;;  %v1171_v39 = vmul.f32 %v1922_v21, %v1100_v35  ;;  %v883_v41 = vadd.f32 %v1915_v16, %v882_v37  ;;  %v1011_v42 = vadd.f32 %v1915_v16, %v1010_v38 }
 0x136   : > { %v1203_v40 = vmul.f32 %v1922_v21, %v1132_v36  ;;  %v884_v43 = vpop.f32.mrf.mxu0  ;;  %v1012_v44 = vpop.f32.mrf.mxu1 }
 0x137   : > { %v1242_v45 = vadd.f32 %v1927_v26, %v1171_v39  ;;  %v1101_v47 = vmax.f32 %v883_v41, 0.0  ;;  %v1133_v48 = vmax.f32 %v1011_v42, 0.0 }
 0x138   : > { %v1274_v46 = vadd.f32 %v1927_v26, %v1203_v40  ;;  %v885_v49 = vpop.f32.mrf.mxu0  ;;  %v1013_v50 = vpop.f32.mrf.mxu1 }
 0x139   : > { %1307 = vst.msk [vmem:[%s1938_s14 + $0x58] sm:$0xff] %vm1295_vm2, %v1242_v45  ;;  %v1172_v51 = vmul.f32 %v1922_v21, %v1101_v47  ;;  %v1204_v52 = vmul.f32 %v1922_v21, %v1133_v48  ;;  %v886_v53 = vadd.f32 %v1915_v16, %v885_v49  ;;  %v1014_v54 = vadd.f32 %v1915_v16, %v1013_v50 }
 0x13a   : > { %1339 = vst.msk [vmem:[%s1938_s14 + $0x158] sm:$0xff] %vm1295_vm2, %v1274_v46  ;;  %v887_v55 = vpop.f32.mrf.mxu0  ;;  %v1015_v56 = vpop.f32.mrf.mxu1 }
 0x13b   : > { %v1243_v57 = vadd.f32 %v1927_v26, %v1172_v51  ;;  %v1275_v58 = vadd.f32 %v1927_v26, %v1204_v52  ;;  %v1102_v59 = vmax.f32 %v886_v53, 0.0  ;;  %v1134_v60 = vmax.f32 %v1014_v54, 0.0 }
 0x13c   : > { %v890_v61 = vpop.f32.mrf.mxu0  ;;  %v1018_v62 = vpop.f32.mrf.mxu1 }
 0x13d   : > { %1308 = vst.msk [vmem:[%s1938_s14 + $0x60] sm:$0xff] %vm1295_vm2, %v1243_v57  ;;  %1340 = vst.msk [vmem:[%s1938_s14 + $0x160] sm:$0xff] %vm1295_vm2, %v1275_v58  ;;  %v1173_v63 = vmul.f32 %v1922_v21, %v1102_v59  ;;  %v1205_v0 = vmul.f32 %v1922_v21, %v1134_v60  ;;  %v891_v1 = vadd.f32 %v1915_v16, %v890_v61 }
 0x13e   : > { %v1019_v2 = vadd.f32 %v1915_v16, %v1018_v62  ;;  %v892_v3 = vpop.f32.mrf.mxu0  ;;  %v1020_v4 = vpop.f32.mrf.mxu1 }
 0x13f   : > { %v1244_v5 = vadd.f32 %v1927_v26, %v1173_v63  ;;  %v1276_v6 = vadd.f32 %v1927_v26, %v1205_v0  ;;  %v1103_v7 = vmax.f32 %v891_v1, 0.0 }
 0x140   : > { %v1135_v8 = vmax.f32 %v1019_v2, 0.0  ;;  %v893_v9 = vpop.f32.mrf.mxu0  ;;  %v1021_v10 = vpop.f32.mrf.mxu1 }
 0x141   : > { %1309 = vst.msk [vmem:[%s1938_s14 + $0x68] sm:$0xff] %vm1295_vm2, %v1244_v5  ;;  %1341 = vst.msk [vmem:[%s1938_s14 + $0x168] sm:$0xff] %vm1295_vm2, %v1276_v6  ;;  %v1174_v11 = vmul.f32 %v1922_v21, %v1103_v7  ;;  %v894_v13 = vadd.f32 %v1915_v16, %v893_v9  ;;  %v1022_v14 = vadd.f32 %v1915_v16, %v1021_v10 }
 0x142   : > { %v1206_v12 = vmul.f32 %v1922_v21, %v1135_v8  ;;  %v895_v15 = vpop.f32.mrf.mxu0  ;;  %v1023_v17 = vpop.f32.mrf.mxu1 }
 0x143   : > { %v1245_v18 = vadd.f32 %v1927_v26, %v1174_v11  ;;  %v1104_v20 = vmax.f32 %v894_v13, 0.0  ;;  %v1136_v22 = vmax.f32 %v1022_v14, 0.0 }
 0x144   : > { %v1277_v19 = vadd.f32 %v1927_v26, %v1206_v12  ;;  %v898_v23 = vpop.f32.mrf.mxu0  ;;  %v1026_v24 = vpop.f32.mrf.mxu1 }
 0x145   : > { %1310 = vst.msk [vmem:[%s1938_s14 + $0x70] sm:$0xff] %vm1295_vm2, %v1245_v18  ;;  %v1175_v25 = vmul.f32 %v1922_v21, %v1104_v20  ;;  %v1207_v27 = vmul.f32 %v1922_v21, %v1136_v22  ;;  %v899_v28 = vadd.f32 %v1915_v16, %v898_v23  ;;  %v1027_v29 = vadd.f32 %v1915_v16, %v1026_v24 }
 0x146   : > { %1342 = vst.msk [vmem:[%s1938_s14 + $0x170] sm:$0xff] %vm1295_vm2, %v1277_v19  ;;  %v900_v30 = vpop.f32.mrf.mxu0  ;;  %v1028_v31 = vpop.f32.mrf.mxu1 }
 0x147   : > { %v1246_v32 = vadd.f32 %v1927_v26, %v1175_v25  ;;  %v1278_v33 = vadd.f32 %v1927_v26, %v1207_v27  ;;  %v1105_v34 = vmax.f32 %v899_v28, 0.0  ;;  %v1137_v35 = vmax.f32 %v1027_v29, 0.0 }
 0x148   : > { %v901_v36 = vpop.f32.mrf.mxu0  ;;  %v1029_v37 = vpop.f32.mrf.mxu1 }
 0x149   : > { %1311 = vst.msk [vmem:[%s1938_s14 + $0x78] sm:$0xff] %vm1295_vm2, %v1246_v32  ;;  %1343 = vst.msk [vmem:[%s1938_s14 + $0x178] sm:$0xff] %vm1295_vm2, %v1278_v33  ;;  %v1176_v38 = vmul.f32 %v1922_v21, %v1105_v34  ;;  %v1208_v39 = vmul.f32 %v1922_v21, %v1137_v35  ;;  %v902_v40 = vadd.f32 %v1915_v16, %v901_v36 }
 0x14a   : > { %v1030_v41 = vadd.f32 %v1915_v16, %v1029_v37  ;;  %v903_v42 = vpop.f32.mrf.mxu0  ;;  %v1031_v43 = vpop.f32.mrf.mxu1 }
 0x14b   : > { %v1247_v44 = vadd.f32 %v1927_v26, %v1176_v38  ;;  %v1279_v45 = vadd.f32 %v1927_v26, %v1208_v39  ;;  %v1106_v46 = vmax.f32 %v902_v40, 0.0 }
 0x14c   : > { %v1138_v47 = vmax.f32 %v1030_v41, 0.0  ;;  %v906_v48 = vpop.f32.mrf.mxu0  ;;  %v1034_v49 = vpop.f32.mrf.mxu1 }
 0x14d   : > { %1312 = vst.msk [vmem:[%s1938_s14 + $0x80] sm:$0xff] %vm1295_vm2, %v1247_v44  ;;  %1344 = vst.msk [vmem:[%s1938_s14 + $0x180] sm:$0xff] %vm1295_vm2, %v1279_v45  ;;  %v1177_v50 = vmul.f32 %v1922_v21, %v1106_v46  ;;  %v907_v52 = vadd.f32 %v1915_v16, %v906_v48  ;;  %v1035_v53 = vadd.f32 %v1915_v16, %v1034_v49 }
 0x14e   : > { %v1209_v51 = vmul.f32 %v1922_v21, %v1138_v47  ;;  %v908_v54 = vpop.f32.mrf.mxu0  ;;  %v1036_v55 = vpop.f32.mrf.mxu1 }
 0x14f   : > { %v1248_v56 = vadd.f32 %v1927_v26, %v1177_v50  ;;  %v1107_v58 = vmax.f32 %v907_v52, 0.0  ;;  %v1139_v59 = vmax.f32 %v1035_v53, 0.0 }
 0x150   : > { %v1280_v57 = vadd.f32 %v1927_v26, %v1209_v51  ;;  %v909_v60 = vpop.f32.mrf.mxu0  ;;  %v1037_v61 = vpop.f32.mrf.mxu1 }
 0x151   : > { %1313 = vst.msk [vmem:[%s1938_s14 + $0x88] sm:$0xff] %vm1295_vm2, %v1248_v56  ;;  %v1178_v62 = vmul.f32 %v1922_v21, %v1107_v58  ;;  %v1210_v63 = vmul.f32 %v1922_v21, %v1139_v59  ;;  %v910_v0 = vadd.f32 %v1915_v16, %v909_v60  ;;  %v1038_v1 = vadd.f32 %v1915_v16, %v1037_v61 }
 0x152   : > { %1345 = vst.msk [vmem:[%s1938_s14 + $0x188] sm:$0xff] %vm1295_vm2, %v1280_v57  ;;  %v911_v2 = vpop.f32.mrf.mxu0  ;;  %v1039_v3 = vpop.f32.mrf.mxu1 }
 0x153   : > { %v1249_v4 = vadd.f32 %v1927_v26, %v1178_v62  ;;  %v1281_v5 = vadd.f32 %v1927_v26, %v1210_v63  ;;  %v1108_v6 = vmax.f32 %v910_v0, 0.0  ;;  %v1140_v7 = vmax.f32 %v1038_v1, 0.0 }
 0x154   : > { %v914_v8 = vpop.f32.mrf.mxu0  ;;  %v1042_v9 = vpop.f32.mrf.mxu1 }
 0x155   : > { %1314 = vst.msk [vmem:[%s1938_s14 + $0x90] sm:$0xff] %vm1295_vm2, %v1249_v4  ;;  %1346 = vst.msk [vmem:[%s1938_s14 + $0x190] sm:$0xff] %vm1295_vm2, %v1281_v5  ;;  %v1179_v10 = vmul.f32 %v1922_v21, %v1108_v6  ;;  %v1211_v11 = vmul.f32 %v1922_v21, %v1140_v7  ;;  %v915_v12 = vadd.f32 %v1915_v16, %v914_v8 }
 0x156   : > { %v1043_v13 = vadd.f32 %v1915_v16, %v1042_v9  ;;  %v916_v14 = vpop.f32.mrf.mxu0  ;;  %v1044_v15 = vpop.f32.mrf.mxu1 }
 0x157   : > { %v1250_v17 = vadd.f32 %v1927_v26, %v1179_v10  ;;  %v1282_v18 = vadd.f32 %v1927_v26, %v1211_v11  ;;  %v1109_v19 = vmax.f32 %v915_v12, 0.0 }
 0x158   : > { %v1141_v20 = vmax.f32 %v1043_v13, 0.0  ;;  %v917_v22 = vpop.f32.mrf.mxu0  ;;  %v1045_v23 = vpop.f32.mrf.mxu1 }
 0x159   : > { %1315 = vst.msk [vmem:[%s1938_s14 + $0x98] sm:$0xff] %vm1295_vm2, %v1250_v17  ;;  %1347 = vst.msk [vmem:[%s1938_s14 + $0x198] sm:$0xff] %vm1295_vm2, %v1282_v18  ;;  %v1180_v24 = vmul.f32 %v1922_v21, %v1109_v19  ;;  %v918_v27 = vadd.f32 %v1915_v16, %v917_v22  ;;  %v1046_v28 = vadd.f32 %v1915_v16, %v1045_v23 }
 0x15a   : > { %v1212_v25 = vmul.f32 %v1922_v21, %v1141_v20  ;;  %v919_v29 = vpop.f32.mrf.mxu0  ;;  %v1047_v30 = vpop.f32.mrf.mxu1 }
 0x15b   : > { %v1251_v31 = vadd.f32 %v1927_v26, %v1180_v24  ;;  %v1110_v33 = vmax.f32 %v918_v27, 0.0  ;;  %v1142_v34 = vmax.f32 %v1046_v28, 0.0 }
 0x15c   : > { %v1283_v32 = vadd.f32 %v1927_v26, %v1212_v25  ;;  %v922_v35 = vpop.f32.mrf.mxu0  ;;  %v1050_v36 = vpop.f32.mrf.mxu1 }
 0x15d   : > { %1316 = vst.msk [vmem:[%s1938_s14 + $0xa0] sm:$0xff] %vm1295_vm2, %v1251_v31  ;;  %v1181_v37 = vmul.f32 %v1922_v21, %v1110_v33  ;;  %v1213_v38 = vmul.f32 %v1922_v21, %v1142_v34  ;;  %v923_v39 = vadd.f32 %v1915_v16, %v922_v35  ;;  %v1051_v40 = vadd.f32 %v1915_v16, %v1050_v36 }
 0x15e   : > { %1348 = vst.msk [vmem:[%s1938_s14 + $0x1a0] sm:$0xff] %vm1295_vm2, %v1283_v32  ;;  %v924_v41 = vpop.f32.mrf.mxu0  ;;  %v1052_v42 = vpop.f32.mrf.mxu1 }
 0x15f   : > { %v1252_v43 = vadd.f32 %v1927_v26, %v1181_v37  ;;  %v1284_v44 = vadd.f32 %v1927_v26, %v1213_v38  ;;  %v1111_v45 = vmax.f32 %v923_v39, 0.0  ;;  %v1143_v46 = vmax.f32 %v1051_v40, 0.0 }
 0x160   : > { %v925_v47 = vpop.f32.mrf.mxu0  ;;  %v1053_v48 = vpop.f32.mrf.mxu1 }
 0x161   : > { %1317 = vst.msk [vmem:[%s1938_s14 + $0xa8] sm:$0xff] %vm1295_vm2, %v1252_v43  ;;  %1349 = vst.msk [vmem:[%s1938_s14 + $0x1a8] sm:$0xff] %vm1295_vm2, %v1284_v44  ;;  %v1182_v49 = vmul.f32 %v1922_v21, %v1111_v45  ;;  %v1214_v50 = vmul.f32 %v1922_v21, %v1143_v46  ;;  %v926_v51 = vadd.f32 %v1915_v16, %v925_v47 }
 0x162   : > { %v1054_v52 = vadd.f32 %v1915_v16, %v1053_v48  ;;  %v927_v53 = vpop.f32.mrf.mxu0  ;;  %v1055_v54 = vpop.f32.mrf.mxu1 }
 0x163   : > { %v1253_v55 = vadd.f32 %v1927_v26, %v1182_v49  ;;  %v1285_v56 = vadd.f32 %v1927_v26, %v1214_v50  ;;  %v1112_v57 = vmax.f32 %v926_v51, 0.0 }
 0x164   : > { %v1144_v58 = vmax.f32 %v1054_v52, 0.0  ;;  %v930_v59 = vpop.f32.mrf.mxu0  ;;  %v1058_v60 = vpop.f32.mrf.mxu1 }
 0x165   : > { %1318 = vst.msk [vmem:[%s1938_s14 + $0xb0] sm:$0xff] %vm1295_vm2, %v1253_v55  ;;  %1350 = vst.msk [vmem:[%s1938_s14 + $0x1b0] sm:$0xff] %vm1295_vm2, %v1285_v56  ;;  %v1183_v61 = vmul.f32 %v1922_v21, %v1112_v57  ;;  %v931_v63 = vadd.f32 %v1915_v16, %v930_v59  ;;  %v1059_v0 = vadd.f32 %v1915_v16, %v1058_v60 }
 0x166   : > { %v1215_v62 = vmul.f32 %v1922_v21, %v1144_v58  ;;  %v932_v1 = vpop.f32.mrf.mxu0  ;;  %v1060_v2 = vpop.f32.mrf.mxu1 }
 0x167   : > { %v1254_v3 = vadd.f32 %v1927_v26, %v1183_v61  ;;  %v1113_v5 = vmax.f32 %v931_v63, 0.0  ;;  %v1145_v6 = vmax.f32 %v1059_v0, 0.0 }
 0x168   : > { %v1286_v4 = vadd.f32 %v1927_v26, %v1215_v62  ;;  %v933_v7 = vpop.f32.mrf.mxu0  ;;  %v1061_v8 = vpop.f32.mrf.mxu1 }
 0x169   : > { %1319 = vst.msk [vmem:[%s1938_s14 + $0xb8] sm:$0xff] %vm1295_vm2, %v1254_v3  ;;  %v1184_v9 = vmul.f32 %v1922_v21, %v1113_v5  ;;  %v1216_v10 = vmul.f32 %v1922_v21, %v1145_v6  ;;  %v934_v11 = vadd.f32 %v1915_v16, %v933_v7  ;;  %v1062_v12 = vadd.f32 %v1915_v16, %v1061_v8 }
 0x16a   : > { %1351 = vst.msk [vmem:[%s1938_s14 + $0x1b8] sm:$0xff] %vm1295_vm2, %v1286_v4  ;;  %v935_v13 = vpop.f32.mrf.mxu0  ;;  %v1063_v14 = vpop.f32.mrf.mxu1 }
 0x16b   : > { %v1255_v15 = vadd.f32 %v1927_v26, %v1184_v9  ;;  %v1287_v17 = vadd.f32 %v1927_v26, %v1216_v10  ;;  %v1114_v18 = vmax.f32 %v934_v11, 0.0  ;;  %v1146_v19 = vmax.f32 %v1062_v12, 0.0 }
 0x16c   : > { %v938_v20 = vpop.f32.mrf.mxu0  ;;  %v1066_v22 = vpop.f32.mrf.mxu1 }
 0x16d   : > { %1320 = vst.msk [vmem:[%s1938_s14 + $0xc0] sm:$0xff] %vm1295_vm2, %v1255_v15  ;;  %1352 = vst.msk [vmem:[%s1938_s14 + $0x1c0] sm:$0xff] %vm1295_vm2, %v1287_v17  ;;  %v1185_v23 = vmul.f32 %v1922_v21, %v1114_v18  ;;  %v1217_v24 = vmul.f32 %v1922_v21, %v1146_v19  ;;  %v939_v25 = vadd.f32 %v1915_v16, %v938_v20 }
 0x16e   : > { %v1067_v27 = vadd.f32 %v1915_v16, %v1066_v22  ;;  %v940_v28 = vpop.f32.mrf.mxu0  ;;  %v1068_v29 = vpop.f32.mrf.mxu1 }
 0x16f   : > { %v1256_v30 = vadd.f32 %v1927_v26, %v1185_v23  ;;  %v1288_v31 = vadd.f32 %v1927_v26, %v1217_v24  ;;  %v1115_v32 = vmax.f32 %v939_v25, 0.0 }
 0x170   : > { %v1147_v33 = vmax.f32 %v1067_v27, 0.0  ;;  %v941_v34 = vpop.f32.mrf.mxu0  ;;  %v1069_v35 = vpop.f32.mrf.mxu1 }
 0x171   : > { %1321 = vst.msk [vmem:[%s1938_s14 + $0xc8] sm:$0xff] %vm1295_vm2, %v1256_v30  ;;  %1353 = vst.msk [vmem:[%s1938_s14 + $0x1c8] sm:$0xff] %vm1295_vm2, %v1288_v31  ;;  %v1186_v36 = vmul.f32 %v1922_v21, %v1115_v32  ;;  %v942_v38 = vadd.f32 %v1915_v16, %v941_v34  ;;  %v1070_v39 = vadd.f32 %v1915_v16, %v1069_v35 }
 0x172   : > { %v1218_v37 = vmul.f32 %v1922_v21, %v1147_v33  ;;  %v943_v40 = vpop.f32.mrf.mxu0  ;;  %v1071_v41 = vpop.f32.mrf.mxu1 }
 0x173   : > { %v1257_v42 = vadd.f32 %v1927_v26, %v1186_v36  ;;  %v1116_v44 = vmax.f32 %v942_v38, 0.0  ;;  %v1148_v45 = vmax.f32 %v1070_v39, 0.0 }
 0x174   : > { %v1289_v43 = vadd.f32 %v1927_v26, %v1218_v37  ;;  %v946_v46 = vpop.f32.mrf.mxu0  ;;  %v1074_v47 = vpop.f32.mrf.mxu1 }
 0x175   : > { %1322 = vst.msk [vmem:[%s1938_s14 + $0xd0] sm:$0xff] %vm1295_vm2, %v1257_v42  ;;  %v1187_v48 = vmul.f32 %v1922_v21, %v1116_v44  ;;  %v1219_v49 = vmul.f32 %v1922_v21, %v1148_v45  ;;  %v947_v50 = vadd.f32 %v1915_v16, %v946_v46  ;;  %v1075_v51 = vadd.f32 %v1915_v16, %v1074_v47 }
 0x176   : > { %1354 = vst.msk [vmem:[%s1938_s14 + $0x1d0] sm:$0xff] %vm1295_vm2, %v1289_v43  ;;  %v948_v52 = vpop.f32.mrf.mxu0  ;;  %v1076_v53 = vpop.f32.mrf.mxu1 }
 0x177   : > { %v1258_v54 = vadd.f32 %v1927_v26, %v1187_v48  ;;  %v1290_v55 = vadd.f32 %v1927_v26, %v1219_v49  ;;  %v1117_v56 = vmax.f32 %v947_v50, 0.0  ;;  %v1149_v57 = vmax.f32 %v1075_v51, 0.0 }
 0x178   : > { %v949_v58 = vpop.f32.mrf.mxu0  ;;  %v1077_v59 = vpop.f32.mrf.mxu1 }
 0x179   : > { %1323 = vst.msk [vmem:[%s1938_s14 + $0xd8] sm:$0xff] %vm1295_vm2, %v1258_v54  ;;  %1355 = vst.msk [vmem:[%s1938_s14 + $0x1d8] sm:$0xff] %vm1295_vm2, %v1290_v55  ;;  %v1188_v60 = vmul.f32 %v1922_v21, %v1117_v56  ;;  %v1220_v61 = vmul.f32 %v1922_v21, %v1149_v57  ;;  %v950_v62 = vadd.f32 %v1915_v16, %v949_v58 }
 0x17a   : > { %v1078_v63 = vadd.f32 %v1915_v16, %v1077_v59  ;;  %v951_v0 = vpop.f32.mrf.mxu0  ;;  %v1079_v1 = vpop.f32.mrf.mxu1 }
 0x17b   : > { %v1259_v2 = vadd.f32 %v1927_v26, %v1188_v60  ;;  %v1291_v3 = vadd.f32 %v1927_v26, %v1220_v61  ;;  %v1118_v4 = vmax.f32 %v950_v62, 0.0 }
 0x17c   : > { %v1150_v5 = vmax.f32 %v1078_v63, 0.0  ;;  %v954_v6 = vpop.f32.mrf.mxu0  ;;  %v1082_v7 = vpop.f32.mrf.mxu1 }
 0x17d   : > { %1324 = vst.msk [vmem:[%s1938_s14 + $0xe0] sm:$0xff] %vm1295_vm2, %v1259_v2  ;;  %1356 = vst.msk [vmem:[%s1938_s14 + $0x1e0] sm:$0xff] %vm1295_vm2, %v1291_v3  ;;  %v1189_v8 = vmul.f32 %v1922_v21, %v1118_v4  ;;  %v955_v10 = vadd.f32 %v1915_v16, %v954_v6  ;;  %v1083_v11 = vadd.f32 %v1915_v16, %v1082_v7 }
 0x17e   : > { %v1221_v9 = vmul.f32 %v1922_v21, %v1150_v5  ;;  %v956_v12 = vpop.f32.mrf.mxu0  ;;  %v1084_v13 = vpop.f32.mrf.mxu1 }
 0x17f   : > { %v1260_v14 = vadd.f32 %v1927_v26, %v1189_v8  ;;  %v1119_v17 = vmax.f32 %v955_v10, 0.0  ;;  %v1151_v18 = vmax.f32 %v1083_v11, 0.0 }
 0x180   : > { %v1292_v15 = vadd.f32 %v1927_v26, %v1221_v9  ;;  %v957_v19 = vpop.f32.mrf.mxu0  ;;  %v1085_v20 = vpop.f32.mrf.mxu1 }
 0x181   : > { %1325 = vst.msk [vmem:[%s1938_s14 + $0xe8] sm:$0xff] %vm1295_vm2, %v1260_v14  ;;  %v1190_v22 = vmul.f32 %v1922_v21, %v1119_v17  ;;  %v1222_v23 = vmul.f32 %v1922_v21, %v1151_v18  ;;  %v958_v24 = vadd.f32 %v1915_v16, %v957_v19  ;;  %v1086_v25 = vadd.f32 %v1915_v16, %v1085_v20 }
 0x182   : > { %1357 = vst.msk [vmem:[%s1938_s14 + $0x1e8] sm:$0xff] %vm1295_vm2, %v1292_v15  ;;  %v959_v27 = vpop.f32.mrf.mxu0  ;;  %v1087_v28 = vpop.f32.mrf.mxu1 }
 0x183   : > { %v1261_v29 = vadd.f32 %v1927_v26, %v1190_v22  ;;  %v1293_v30 = vadd.f32 %v1927_v26, %v1222_v23  ;;  %v1120_v31 = vmax.f32 %v958_v24, 0.0  ;;  %v1152_v32 = vmax.f32 %v1086_v25, 0.0 }
 0x185   : > { %1326 = vst.msk [vmem:[%s1938_s14 + $0xf0] sm:$0xff] %vm1295_vm2, %v1261_v29  ;;  %1358 = vst.msk [vmem:[%s1938_s14 + $0x1f0] sm:$0xff] %vm1295_vm2, %v1293_v30  ;;  %v1191_v33 = vmul.f32 %v1922_v21, %v1120_v31  ;;  %v1223_v34 = vmul.f32 %v1922_v21, %v1152_v32 }
 0x187   : > { %v1262_v35 = vadd.f32 %v1927_v26, %v1191_v33  ;;  %v1294_v16 = vadd.f32 %v1927_v26, %v1223_v34 }
 0x189   : > { %1327 = vst.msk [vmem:[%s1938_s14 + $0xf8] sm:$0xff] %vm1295_vm2, %v1262_v35  ;;  %1359 = vst.msk [vmem:[%s1938_s14 + $0x1f8] sm:$0xff] %vm1295_vm2, %v1294_v16 }
 0x18a PF: > { %s15_s18 = sadd.s32 1, %s1695_s18  }
 0x18b   : > { %p12_p4 = scmp.ge.s32.totalorder %s15_s18, 6  }
 0x18d   :  { %14 = sbr.rel (!%p12_p4) target bundleno = 1 (0x1), region = 70 }

// kernel: forward.5
= control target key start
LH: loop header
LB: loop body
LE: loop exit
PB: predicated region body
PF: predicated region fallthrough
CT: control target
= control target key end

     0   :  { %s9264_s26 = smov 0   ;;  %s11650_s0 = inlined_call_operand.vmem [shape: bf16[2,12288], index: 0, kind: input, shape index: {}]   ;;  %s11651_s1 = inlined_call_operand.vmem [shape: bf16[12288,1024], index: 1, kind: input, shape index: {}]   ;;  %s11652_s2 = inlined_call_operand.vmem [shape: f32[1,1024], index: 2, kind: input, shape index: {}]   ;;  %s11653_s3 = inlined_call_operand.vmem [shape: bf16[1024,1024], index: 3, kind: input, shape index: {}]   ;;  %s11654_s4 = inlined_call_operand.vmem [shape: f32[1,1024], index: 4, kind: input, shape index: {}]   ;;  %s11655_s5 = inlined_call_operand.vmem [shape: f32[1,1024], index: 5, kind: input, shape index: {}]   ;;  %s11656_s6 = inlined_call_operand.<no memory space> [shape: f32[1,1], index: 6, kind: input, shape index: {}]   ;;  %s11657_s7 = inlined_call_operand.vmem [shape: f32[2,1], index: 7, kind: output, shape index: {}]  }
   0x1   :  { %v12_v0 = vstv %s11656_s6 }
   0x2   :  { %13 = vst [vmem:[#allocation3] sm:$0x1] %v12_v0 }
   0x3 LB: > { %s9270_s27 = sadd.s32 4294967295, %s9216_s26   ;;  %p8161_p0 = scmp.ge.s32.totalorder %s9216_s26, 1  ;;  %s9216_s26 = sphi %s9264_s26, %s19_s26  }
   0x4   : > { %p246_p1 = scmp.lt.s32.totalorder %s9216_s26, 13 }
   0x6   : > { %p247_p2 = pnand %p8161_p0, %p246_p1 }
   0x7   : > { %s8162_s6 = sshll.u32 (!%p247_p2), %s9270_s27, 3  ;;  %s8163_s28 = sshll.u32 (!%p247_p2), %s9270_s27, 7 }
   0x8   : > { %250 = sbr.rel (%p247_p2) target bundleno = 1612 (0x64c), region = 48  ;;  %p279_p3 = scmp.lt.s32.totalorder (!%p247_p2), %s8162_s6, 95 }
   0x9   : > { %p284_p4 = scmp.lt.s32.totalorder (!%p247_p2), %s8163_s28, 1535  ;;  %p8166_p5 = scmp.ne.s32.totalorder (!%p247_p2), %s9270_s27, 0 }
   0xd   : > { %s11659_s6 = smov (!%p279_p3, %s8162_s6), 95  ;;  %s11661_s28 = smov (!%p284_p4, %s8163_s28), 1535 }
   0xe   : > { %s281_s8 = scalar_lea.vmem %s11650_s0, %s11659_s6  ;;  %s9195_s9 = sshll.u32 %s11661_s28, 5 }
   0xf   : > { %s9285_s12 = scalar_lea.vmem %s11651_s1, %s9195_s9  ;;  %293 = sbr.rel (%p8166_p5) target bundleno = 22 (0x16), region = 52 }
  0x14   : > { %v9218_v1 = vmov 0.0  }
  0x15   : > { %294 = vst [vmem:[#allocation2] sm:$0xff] %v9218_v1  ;;  %295 = vst [vmem:[#allocation2 + $0x8] sm:$0xff] %v9218_v1 }
  0x16 PF: > { %v355_v2 = vld [vmem:[%s9285_s12 + $0x1c0] sm:$0xff]  ;;  %v9219_v34 = vmov 1966171168   ;;  %v816_v36 = vlaneseq  ;;  %p8679_p6 = scmp.ne.s32.totalorder %s9270_s27, 11 }
  0x17   : > { %v359_v3 = vld [vmem:[%s9285_s12 + $0x1e0] sm:$0xff]  ;;  %v814_v35 = vunpack.c.l.s4 %v9219_v34 }
  0x18   : > { %v483_v4 = vld [vmem:[%s9285_s12 + $0x5c0] sm:$0xff]  ;;  %v8224_v5 = vcombine.high %v355_v2, %v359_v3  ;;  %v8223_v7 = vcombine.low %v355_v2, %v359_v3  ;;  %v9310_v46 = vshrl.u32 %v816_v36, 7 }
  0x19   : > { %v487_v6 = vld [vmem:[%s9285_s12 + $0x5e0] sm:$0xff]  ;;  %v815_v45 = vunpack.c.0.s8 %v814_v35 }
  0x1a   : > { %v347_v8 = vld [vmem:[%s9285_s12 + $0x180] sm:$0xff]  ;;  %v8352_v10 = vcombine.high %v483_v4, %v487_v6  ;;  %v8351_v11 = vcombine.low %v483_v4, %v487_v6  ;;  %3429 = vmatprep.subr.bf16.mxu0 %v8224_v5 }
  0x1b   : > { %v351_v9 = vld [vmem:[%s9285_s12 + $0x1a0] sm:$0xff]  ;;  %3430 = vmatpush1.bf16.msra.mxu0 %v8223_v7  ;;  %v9317_v55 = vsub.s32 %v815_v45, %v9310_v46 }
  0x1c   : > { %v8216_v12 = vcombine.high %v347_v8, %v351_v9  ;;  %v475_v13 = vld [vmem:[%s9285_s12 + $0x580] sm:$0xff]  ;;  %3470 = vmatprep.subr.bf16.mxu1 %v8352_v10  ;;  %v8215_v20 = vcombine.low %v347_v8, %v351_v9 }
  0x1d   : > { %v479_v14 = vld [vmem:[%s9285_s12 + $0x5a0] sm:$0xff]  ;;  %3471 = vmatpush1.bf16.msra.mxu1 %v8351_v11 }
  0x1e   : > { %v339_v15 = vld [vmem:[%s9285_s12 + $0x140] sm:$0xff]  ;;  %v8344_v16 = vcombine.high %v475_v13, %v479_v14  ;;  %3431 = vmatprep.subr.bf16.mxu0 %v8216_v12  ;;  %v8343_v21 = vcombine.low %v475_v13, %v479_v14 }
  0x1f   : > { %v343_v17 = vld [vmem:[%s9285_s12 + $0x160] sm:$0xff]  ;;  %3432 = vmatpush1.bf16.msra.mxu0 %v8215_v20 }
  0x20   : > { %v467_v18 = vld [vmem:[%s9285_s12 + $0x540] sm:$0xff]  ;;  %v8208_v22 = vcombine.high %v339_v15, %v343_v17  ;;  %3472 = vmatprep.subr.bf16.mxu1 %v8344_v16  ;;  %v8207_v28 = vcombine.low %v339_v15, %v343_v17 }
  0x21   : > { %v471_v19 = vld [vmem:[%s9285_s12 + $0x560] sm:$0xff]  ;;  %3473 = vmatpush1.bf16.msra.mxu1 %v8343_v21 }
  0x22   : > { %v8336_v23 = vcombine.high %v467_v18, %v471_v19  ;;  %v331_v24 = vld [vmem:[%s9285_s12 + $0x100] sm:$0xff]  ;;  %3433 = vmatprep.subr.bf16.mxu0 %v8208_v22  ;;  %v8335_v29 = vcombine.low %v467_v18, %v471_v19 }
  0x23   : > { %v335_v25 = vld [vmem:[%s9285_s12 + $0x120] sm:$0xff]  ;;  %3434 = vmatpush1.bf16.msra.mxu0 %v8207_v28 }
  0x24   : > { %v459_v26 = vld [vmem:[%s9285_s12 + $0x500] sm:$0xff]  ;;  %v8200_v30 = vcombine.high %v331_v24, %v335_v25  ;;  %3474 = vmatprep.subr.bf16.mxu1 %v8336_v23  ;;  %v8199_v39 = vcombine.low %v331_v24, %v335_v25 }
  0x25   : > { %v463_v27 = vld [vmem:[%s9285_s12 + $0x520] sm:$0xff]  ;;  %3475 = vmatpush1.bf16.msra.mxu1 %v8335_v29 }
  0x26   : > { %v8328_v31 = vcombine.high %v459_v26, %v463_v27  ;;  %v323_v32 = vld [vmem:[%s9285_s12 + $0xc0] sm:$0xff]  ;;  %3435 = vmatprep.subr.bf16.mxu0 %v8200_v30  ;;  %v8327_v40 = vcombine.low %v459_v26, %v463_v27 }
  0x27   : > { %v327_v33 = vld [vmem:[%s9285_s12 + $0xe0] sm:$0xff]  ;;  %3436 = vmatpush1.bf16.msra.mxu0 %v8199_v39 }
  0x28   : > { %v451_v37 = vld [vmem:[%s9285_s12 + $0x4c0] sm:$0xff]  ;;  %v8192_v41 = vcombine.high %v323_v32, %v327_v33  ;;  %3476 = vmatprep.subr.bf16.mxu1 %v8328_v31  ;;  %v8191_v49 = vcombine.low %v323_v32, %v327_v33 }
  0x29   : > { %v455_v38 = vld [vmem:[%s9285_s12 + $0x4e0] sm:$0xff]  ;;  %3477 = vmatpush1.bf16.msra.mxu1 %v8327_v40 }
  0x2a   : > { %v8320_v42 = vcombine.high %v451_v37, %v455_v38  ;;  %v315_v43 = vld [vmem:[%s9285_s12 + $0x80] sm:$0xff]  ;;  %3437 = vmatprep.subr.bf16.mxu0 %v8192_v41  ;;  %v8319_v50 = vcombine.low %v451_v37, %v455_v38 }
  0x2b   : > { %v319_v44 = vld [vmem:[%s9285_s12 + $0xa0] sm:$0xff]  ;;  %3438 = vmatpush1.bf16.msra.mxu0 %v8191_v49 }
  0x2c   : > { %v443_v47 = vld [vmem:[%s9285_s12 + $0x480] sm:$0xff]  ;;  %v8184_v51 = vcombine.high %v315_v43, %v319_v44  ;;  %3478 = vmatprep.subr.bf16.mxu1 %v8320_v42  ;;  %v8183_v58 = vcombine.low %v315_v43, %v319_v44 }
  0x2d   : > { %v447_v48 = vld [vmem:[%s9285_s12 + $0x4a0] sm:$0xff]  ;;  %3479 = vmatpush1.bf16.msra.mxu1 %v8319_v50 }
  0x2e   : > { %v8312_v52 = vcombine.high %v443_v47, %v447_v48  ;;  %v307_v53 = vld [vmem:[%s9285_s12 + $0x40] sm:$0xff]  ;;  %3439 = vmatprep.subr.bf16.mxu0 %v8184_v51  ;;  %v8311_v59 = vcombine.low %v443_v47, %v447_v48 }
  0x2f   : > { %v311_v54 = vld [vmem:[%s9285_s12 + $0x60] sm:$0xff]  ;;  %3440 = vmatpush1.bf16.msra.mxu0 %v8183_v58 }
  0x30   : > { %v435_v56 = vld [vmem:[%s9285_s12 + $0x440] sm:$0xff]  ;;  %v8176_v60 = vcombine.high %v307_v53, %v311_v54  ;;  %3480 = vmatprep.subr.bf16.mxu1 %v8312_v52  ;;  %v8175_v4 = vcombine.low %v307_v53, %v311_v54 }
  0x31   : > { %v439_v57 = vld [vmem:[%s9285_s12 + $0x460] sm:$0xff]  ;;  %3481 = vmatpush1.bf16.msra.mxu1 %v8311_v59 }
  0x32   : > { %v298_v61 = vld [vmem:[%s281_s8] sm:$0xff]  ;;  %v8304_v62 = vcombine.high %v435_v56, %v439_v57  ;;  %3441 = vmatprep.subr.bf16.mxu0 %v8176_v60  ;;  %v8303_v6 = vcombine.low %v435_v56, %v439_v57 }
  0x33   : > { %v299_v63 = vld [vmem:[%s9285_s12] sm:$0xff]  ;;  %v9329_v1 = vrot.slane %v298_v61, %v9317_v55  ;;  %3442 = vmatpush1.bf16.msra.mxu0 %v8175_v4  ;;  %v812_v21 = vcombine.high %v298_v61, %v298_v61 }
  0x34   : > { %v303_v0 = vld [vmem:[%s9285_s12 + $0x20] sm:$0xff]  ;;  %3482 = vmatprep.subr.bf16.mxu1 %v8304_v62 }
  0x35   : > { %v427_v2 = vld [vmem:[%s9285_s12 + $0x400] sm:$0xff]  ;;  %v827_v5 = vcombine.high %v9329_v1, %v9329_v1  ;;  %v8168_v7 = vcombine.high %v299_v63, %v303_v0  ;;  %v8167_v14 = vcombine.low %v299_v63, %v303_v0  ;;  %3483 = vmatpush1.bf16.msra.mxu1 %v8303_v6  ;;  %v9355_v30 = vrot.slane %v812_v21, %v9317_v55 }
  0x36   : > { %v431_v3 = vld [vmem:[%s9285_s12 + $0x420] sm:$0xff] }
  0x37   : > { %v8296_v8 = vcombine.high %v427_v2, %v431_v3  ;;  %v419_v9 = vld [vmem:[%s9285_s12 + $0x3c0] sm:$0xff]  ;;  %v9338_v11 = vrot.slane %v827_v5, %v9317_v55  ;;  %3443 = vmatprep.subr.bf16.mxu0 %v8168_v7  ;;  %v8295_v16 = vcombine.low %v427_v2, %v431_v3  ;;  %v9361_v34 = vrot.slane %v9355_v30, %v9317_v55 }
  0x38   : > { %v423_v10 = vld [vmem:[%s9285_s12 + $0x3e0] sm:$0xff]  ;;  %3444 = vmatpush1.bf16.msra.mxu0 %v8167_v14 }
  0x39   : > { %v547_v12 = vld [vmem:[%s9285_s12 + $0x7c0] sm:$0xff]  ;;  %3461 = vmatprep.mubr.bf16.mxu0 %v9338_v11  ;;  %v9345_v15 = vcombine.high %v9338_v11, %v9338_v11  ;;  %v8288_v17 = vcombine.high %v419_v9, %v423_v10  ;;  %3484 = vmatprep.subr.bf16.mxu1 %v8296_v8  ;;  %v8287_v24 = vcombine.low %v419_v9, %v423_v10 }
  0x3a   : > { %v551_v13 = vld [vmem:[%s9285_s12 + $0x7e0] sm:$0xff]  ;;  %3485 = vmatpush1.bf16.msra.mxu1 %v8295_v16 }
  0x3b   : > { %v8416_v18 = vcombine.high %v547_v12, %v551_v13  ;;  %v411_v19 = vld [vmem:[%s9285_s12 + $0x380] sm:$0xff]  ;;  %3502 = vmatprep.mubr.bf16.mxu1 %v9345_v15  ;;  %3445 = vmatprep.subr.bf16.mxu0 %v8288_v17  ;;  %v8415_v25 = vcombine.low %v547_v12, %v551_v13 }
  0x3c   : > { %v415_v20 = vld [vmem:[%s9285_s12 + $0x3a0] sm:$0xff]  ;;  %3446 = vmatpush2.bf16.msra.mxu0 %v8287_v24 }
  0x3d   : > { %v539_v22 = vld [vmem:[%s9285_s12 + $0x780] sm:$0xff]  ;;  %v8280_v26 = vcombine.high %v411_v19, %v415_v20  ;;  %3486 = vmatprep.subr.bf16.mxu1 %v8416_v18  ;;  %v8279_v33 = vcombine.low %v411_v19, %v415_v20 }
  0x3e   : > { %v543_v23 = vld [vmem:[%s9285_s12 + $0x7a0] sm:$0xff]  ;;  %3487 = vmatpush2.bf16.msra.mxu1 %v8415_v25  ;;  %v9391_v25 = vrot.slane %v9329_v1, %v9317_v55 }
  0x3f   : > { %v8408_v27 = vcombine.high %v539_v22, %v543_v23  ;;  %v403_v28 = vld [vmem:[%s9285_s12 + $0x340] sm:$0xff]  ;;  %3447 = vmatprep.subr.bf16.mxu0 %v8280_v26  ;;  %v8407_v35 = vcombine.low %v539_v22, %v543_v23  ;;  %v828_v23 = vcombine.high %v9355_v30, %v9355_v30 }
  0x40   : > { %v407_v29 = vld [vmem:[%s9285_s12 + $0x360] sm:$0xff]  ;;  %3448 = vmatpush2.bf16.msra.mxu0 %v8279_v33  ;;  %v9402_v1 = vcombine.high %v9391_v25, %v9391_v25 }
  0x41   : > { %v531_v31 = vld [vmem:[%s9285_s12 + $0x740] sm:$0xff]  ;;  %v8272_v36 = vcombine.high %v403_v28, %v407_v29  ;;  %3488 = vmatprep.subr.bf16.mxu1 %v8408_v27  ;;  %v8271_v42 = vcombine.low %v403_v28, %v407_v29  ;;  %v9398_v33 = vrot.slane %v828_v23, %v9317_v55 }
  0x42   : > { %v535_v32 = vld [vmem:[%s9285_s12 + $0x760] sm:$0xff]  ;;  %3489 = vmatpush2.bf16.msra.mxu1 %v8407_v35 }
  0x43   : > { %v8400_v37 = vcombine.high %v531_v31, %v535_v32  ;;  %v395_v38 = vld [vmem:[%s9285_s12 + $0x300] sm:$0xff]  ;;  %3449 = vmatprep.subr.bf16.mxu0 %v8272_v36  ;;  %v8399_v43 = vcombine.low %v531_v31, %v535_v32 }
  0x44   : > { %v399_v39 = vld [vmem:[%s9285_s12 + $0x320] sm:$0xff]  ;;  %3450 = vmatpush2.bf16.msra.mxu0 %v8271_v42  ;;  %v9411_v42 = vcombine.high %v9398_v33, %v9398_v33 }
  0x45   : > { %v523_v40 = vld [vmem:[%s9285_s12 + $0x700] sm:$0xff]  ;;  %v8264_v44 = vcombine.high %v395_v38, %v399_v39  ;;  %3490 = vmatprep.subr.bf16.mxu1 %v8400_v37  ;;  %v8263_v51 = vcombine.low %v395_v38, %v399_v39 }
  0x46   : > { %v527_v41 = vld [vmem:[%s9285_s12 + $0x720] sm:$0xff]  ;;  %3491 = vmatpush2.bf16.msra.mxu1 %v8399_v43 }
  0x47   : > { %v8392_v45 = vcombine.high %v523_v40, %v527_v41  ;;  %v387_v47 = vld [vmem:[%s9285_s12 + $0x2c0] sm:$0xff]  ;;  %3451 = vmatprep.subr.bf16.mxu0 %v8264_v44  ;;  %v8391_v52 = vcombine.low %v523_v40, %v527_v41 }
  0x48   : > { %v391_v48 = vld [vmem:[%s9285_s12 + $0x2e0] sm:$0xff]  ;;  %3452 = vmatpush2.bf16.msra.mxu0 %v8263_v51 }
  0x49   : > { %v515_v49 = vld [vmem:[%s9285_s12 + $0x6c0] sm:$0xff]  ;;  %v8256_v53 = vcombine.high %v387_v47, %v391_v48  ;;  %3492 = vmatprep.subr.bf16.mxu1 %v8392_v45  ;;  %v8255_v60 = vcombine.low %v387_v47, %v391_v48 }
  0x4a   : > { %v519_v50 = vld [vmem:[%s9285_s12 + $0x6e0] sm:$0xff]  ;;  %3493 = vmatpush2.bf16.msra.mxu1 %v8391_v52 }
  0x4b   : > { %v8384_v54 = vcombine.high %v515_v49, %v519_v50  ;;  %v379_v56 = vld [vmem:[%s9285_s12 + $0x280] sm:$0xff]  ;;  %3453 = vmatprep.subr.bf16.mxu0 %v8256_v53  ;;  %v8383_v61 = vcombine.low %v515_v49, %v519_v50 }
  0x4c   : > { %v383_v57 = vld [vmem:[%s9285_s12 + $0x2a0] sm:$0xff]  ;;  %3454 = vmatpush2.bf16.msra.mxu0 %v8255_v60 }
  0x4d   : > { %v507_v58 = vld [vmem:[%s9285_s12 + $0x680] sm:$0xff]  ;;  %v8248_v62 = vcombine.high %v379_v56, %v383_v57  ;;  %3494 = vmatprep.subr.bf16.mxu1 %v8384_v54  ;;  %v8247_v5 = vcombine.low %v379_v56, %v383_v57 }
  0x4e   : > { %v511_v59 = vld [vmem:[%s9285_s12 + $0x6a0] sm:$0xff]  ;;  %3495 = vmatpush2.bf16.msra.mxu1 %v8383_v61 }
  0x4f   : > { %v8376_v63 = vcombine.high %v507_v58, %v511_v59  ;;  %v371_v0 = vld [vmem:[%s9285_s12 + $0x240] sm:$0xff]  ;;  %3455 = vmatprep.subr.bf16.mxu0 %v8248_v62  ;;  %v8375_v6 = vcombine.low %v507_v58, %v511_v59 }
  0x50   : > { %v375_v2 = vld [vmem:[%s9285_s12 + $0x260] sm:$0xff]  ;;  %3456 = vmatpush2.bf16.msra.mxu0 %v8247_v5 }
  0x51   : > { %v499_v3 = vld [vmem:[%s9285_s12 + $0x640] sm:$0xff]  ;;  %v8240_v7 = vcombine.high %v371_v0, %v375_v2  ;;  %3496 = vmatprep.subr.bf16.mxu1 %v8376_v63  ;;  %v8239_v14 = vcombine.low %v371_v0, %v375_v2 }
  0x52   : > { %v503_v4 = vld [vmem:[%s9285_s12 + $0x660] sm:$0xff]  ;;  %3497 = vmatpush2.bf16.msra.mxu1 %v8375_v6 }
  0x53   : > { %v8368_v8 = vcombine.high %v499_v3, %v503_v4  ;;  %v363_v9 = vld [vmem:[%s9285_s12 + $0x200] sm:$0xff]  ;;  %3457 = vmatprep.subr.bf16.mxu0 %v8240_v7  ;;  %v8367_v16 = vcombine.low %v499_v3, %v503_v4 }
  0x54   : > { %v367_v10 = vld [vmem:[%s9285_s12 + $0x220] sm:$0xff]  ;;  %3458 = vmatpush2.bf16.msra.mxu0 %v8239_v14 }
  0x55   : > { %v491_v12 = vld [vmem:[%s9285_s12 + $0x600] sm:$0xff]  ;;  %v8232_v17 = vcombine.high %v363_v9, %v367_v10  ;;  %3498 = vmatprep.subr.bf16.mxu1 %v8368_v8  ;;  %v8231_v24 = vcombine.low %v363_v9, %v367_v10 }
  0x56   : > { %v495_v13 = vld [vmem:[%s9285_s12 + $0x620] sm:$0xff]  ;;  %3499 = vmatpush2.bf16.msra.mxu1 %v8367_v16 }
  0x57   : > { %v8360_v18 = vcombine.high %v491_v12, %v495_v13  ;;  %v611_v19 = vld [vmem:[%s9285_s12 + $0x9c0] sm:$0xff]  ;;  %3459 = vmatprep.subr.bf16.mxu0 %v8232_v17  ;;  %v8359_v26 = vcombine.low %v491_v12, %v495_v13 }
  0x58   : > { %v615_v20 = vld [vmem:[%s9285_s12 + $0x9e0] sm:$0xff]  ;;  %3460 = vmatpush2.bf16.msra.mxu0 %v8231_v24 }
  0x59   : > { %v739_v21 = vld [vmem:[%s9285_s12 + $0xdc0] sm:$0xff]  ;;  %v8480_v27 = vcombine.high %v611_v19, %v615_v20  ;;  %3500 = vmatprep.subr.bf16.mxu1 %v8360_v18  ;;  %v8479_v35 = vcombine.low %v611_v19, %v615_v20 }
  0x5a   : > { %v743_v22 = vld [vmem:[%s9285_s12 + $0xde0] sm:$0xff]  ;;  %3501 = vmatpush2.bf16.msra.mxu1 %v8359_v26 }
  0x5b   : > { %v8608_v28 = vcombine.high %v739_v21, %v743_v22  ;;  %v603_v29 = vld [vmem:[%s9285_s12 + $0x980] sm:$0xff]  ;;  %3511 = vmatprep.subr.bf16.mxu0 %v8480_v27  ;;  %v8607_v36 = vcombine.low %v739_v21, %v743_v22  ;;  %3462 = vmatmul.mubr.bf16.vlgmr.msra.gmra.mxu0 %v9391_v25 }
  0x5c   : > { %v607_v31 = vld [vmem:[%s9285_s12 + $0x9a0] sm:$0xff]  ;;  %3512 = vmatpush1.bf16.msra.mxu0 %v8479_v35  ;;  %3543 = vmatprep.mubr.bf16.mxu0 %v9398_v33 }
  0x5d   : > { %v731_v32 = vld [vmem:[%s9285_s12 + $0xd80] sm:$0xff]  ;;  %v8472_v37 = vcombine.high %v603_v29, %v607_v31  ;;  %3552 = vmatprep.subr.bf16.mxu1 %v8608_v28  ;;  %3503 = vmatmul.mubr.bf16.vlgmr.msra.gmra.mxu1 %v9402_v1  ;;  %v8471_v43 = vcombine.low %v603_v29, %v607_v31 }
  0x5e   : > { %v735_v30 = vld [vmem:[%s9285_s12 + $0xda0] sm:$0xff]  ;;  %3553 = vmatpush1.bf16.msra.mxu1 %v8607_v36  ;;  %3584 = vmatprep.mubr.bf16.mxu1 %v9411_v42 }
  0x5f   : > { %v8600_v38 = vcombine.high %v731_v32, %v735_v30  ;;  %v595_v39 = vld [vmem:[%s9285_s12 + $0x940] sm:$0xff]  ;;  %3513 = vmatprep.subr.bf16.mxu0 %v8472_v37  ;;  %v8599_v44 = vcombine.low %v731_v32, %v735_v30 }
  0x60   : > { %v599_v40 = vld [vmem:[%s9285_s12 + $0x960] sm:$0xff]  ;;  %3514 = vmatpush1.bf16.msra.mxu0 %v8471_v43 }
  0x61   : > { %v723_v55 = vld [vmem:[%s9285_s12 + $0xd40] sm:$0xff]  ;;  %v8464_v45 = vcombine.high %v595_v39, %v599_v40  ;;  %3554 = vmatprep.subr.bf16.mxu1 %v8600_v38  ;;  %v8463_v52 = vcombine.low %v595_v39, %v599_v40 }
  0x62   : > { %v727_v41 = vld [vmem:[%s9285_s12 + $0xd60] sm:$0xff]  ;;  %3555 = vmatpush1.bf16.msra.mxu1 %v8599_v44 }
  0x63   : > { %v8592_v47 = vcombine.high %v723_v55, %v727_v41  ;;  %v587_v48 = vld [vmem:[%s9285_s12 + $0x900] sm:$0xff]  ;;  %3515 = vmatprep.subr.bf16.mxu0 %v8464_v45  ;;  %v8591_v53 = vcombine.low %v723_v55, %v727_v41 }
  0x64   : > { %v591_v49 = vld [vmem:[%s9285_s12 + $0x920] sm:$0xff]  ;;  %3516 = vmatpush1.bf16.msra.mxu0 %v8463_v52 }
  0x65   : > { %v715_v50 = vld [vmem:[%s9285_s12 + $0xd00] sm:$0xff]  ;;  %v8456_v54 = vcombine.high %v587_v48, %v591_v49  ;;  %3556 = vmatprep.subr.bf16.mxu1 %v8592_v47  ;;  %v8455_v61 = vcombine.low %v587_v48, %v591_v49 }
  0x66   : > { %v719_v51 = vld [vmem:[%s9285_s12 + $0xd20] sm:$0xff]  ;;  %3557 = vmatpush1.bf16.msra.mxu1 %v8591_v53 }
  0x67   : > { %v8584_v56 = vcombine.high %v715_v50, %v719_v51  ;;  %v579_v57 = vld [vmem:[%s9285_s12 + $0x8c0] sm:$0xff]  ;;  %3517 = vmatprep.subr.bf16.mxu0 %v8456_v54  ;;  %v8583_v62 = vcombine.low %v715_v50, %v719_v51 }
  0x68   : > { %v583_v58 = vld [vmem:[%s9285_s12 + $0x8e0] sm:$0xff]  ;;  %3518 = vmatpush1.bf16.msra.mxu0 %v8455_v61 }
  0x69   : > { %v707_v59 = vld [vmem:[%s9285_s12 + $0xcc0] sm:$0xff]  ;;  %v8448_v63 = vcombine.high %v579_v57, %v583_v58  ;;  %3558 = vmatprep.subr.bf16.mxu1 %v8584_v56  ;;  %v8447_v6 = vcombine.low %v579_v57, %v583_v58 }
  0x6a   : > { %v711_v60 = vld [vmem:[%s9285_s12 + $0xce0] sm:$0xff]  ;;  %3559 = vmatpush1.bf16.msra.mxu1 %v8583_v62 }
  0x6b   : > { %v8576_v0 = vcombine.high %v707_v59, %v711_v60  ;;  %v571_v2 = vld [vmem:[%s9285_s12 + $0x880] sm:$0xff]  ;;  %3519 = vmatprep.subr.bf16.mxu0 %v8448_v63  ;;  %v8575_v7 = vcombine.low %v707_v59, %v711_v60 }
  0x6c   : > { %v575_v3 = vld [vmem:[%s9285_s12 + $0x8a0] sm:$0xff]  ;;  %3520 = vmatpush1.bf16.msra.mxu0 %v8447_v6 }
  0x6d   : > { %v699_v4 = vld [vmem:[%s9285_s12 + $0xc80] sm:$0xff]  ;;  %v8440_v8 = vcombine.high %v571_v2, %v575_v3  ;;  %3560 = vmatprep.subr.bf16.mxu1 %v8576_v0  ;;  %v8439_v16 = vcombine.low %v571_v2, %v575_v3 }
  0x6e   : > { %v703_v5 = vld [vmem:[%s9285_s12 + $0xca0] sm:$0xff]  ;;  %3561 = vmatpush1.bf16.msra.mxu1 %v8575_v7 }
  0x6f   : > { %v8568_v9 = vcombine.high %v699_v4, %v703_v5  ;;  %v563_v10 = vld [vmem:[%s9285_s12 + $0x840] sm:$0xff]  ;;  %3521 = vmatprep.subr.bf16.mxu0 %v8440_v8  ;;  %v8567_v17 = vcombine.low %v699_v4, %v703_v5 }
  0x70   : > { %v567_v12 = vld [vmem:[%s9285_s12 + $0x860] sm:$0xff]  ;;  %3522 = vmatpush1.bf16.msra.mxu0 %v8439_v16 }
  0x71   : > { %v691_v13 = vld [vmem:[%s9285_s12 + $0xc40] sm:$0xff]  ;;  %v8432_v18 = vcombine.high %v563_v10, %v567_v12  ;;  %3562 = vmatprep.subr.bf16.mxu1 %v8568_v9  ;;  %v8431_v24 = vcombine.low %v563_v10, %v567_v12 }
  0x72   : > { %v695_v14 = vld [vmem:[%s9285_s12 + $0xc60] sm:$0xff]  ;;  %3563 = vmatpush1.bf16.msra.mxu1 %v8567_v17 }
  0x73   : > { %v8560_v19 = vcombine.high %v691_v13, %v695_v14  ;;  %v555_v20 = vld [vmem:[%s9285_s12 + $0x800] sm:$0xff]  ;;  %3523 = vmatprep.subr.bf16.mxu0 %v8432_v18  ;;  %v8559_v26 = vcombine.low %v691_v13, %v695_v14 }
  0x74   : > { %v559_v21 = vld [vmem:[%s9285_s12 + $0x820] sm:$0xff]  ;;  %3524 = vmatpush1.bf16.msra.mxu0 %v8431_v24 }
  0x75   : > { %v683_v22 = vld [vmem:[%s9285_s12 + $0xc00] sm:$0xff]  ;;  %v8424_v27 = vcombine.high %v555_v20, %v559_v21  ;;  %3564 = vmatprep.subr.bf16.mxu1 %v8560_v19  ;;  %v8423_v35 = vcombine.low %v555_v20, %v559_v21 }
  0x76   : > { %v687_v23 = vld [vmem:[%s9285_s12 + $0xc20] sm:$0xff]  ;;  %3565 = vmatpush1.bf16.msra.mxu1 %v8559_v26 }
  0x77   : > { %v8552_v28 = vcombine.high %v683_v22, %v687_v23  ;;  %v675_v29 = vld [vmem:[%s9285_s12 + $0xbc0] sm:$0xff]  ;;  %3525 = vmatprep.subr.bf16.mxu0 %v8424_v27  ;;  %v8551_v36 = vcombine.low %v683_v22, %v687_v23 }
  0x78   : > { %v679_v31 = vld [vmem:[%s9285_s12 + $0xbe0] sm:$0xff]  ;;  %3526 = vmatpush1.bf16.msra.mxu0 %v8423_v35 }
  0x79   : > { %v803_v32 = vld [vmem:[%s9285_s12 + $0xfc0] sm:$0xff]  ;;  %v8544_v37 = vcombine.high %v675_v29, %v679_v31  ;;  %3566 = vmatprep.subr.bf16.mxu1 %v8552_v28  ;;  %v8543_v43 = vcombine.low %v675_v29, %v679_v31 }
  0x7a   : > { %v807_v30 = vld [vmem:[%s9285_s12 + $0xfe0] sm:$0xff]  ;;  %3567 = vmatpush1.bf16.msra.mxu1 %v8551_v36 }
  0x7b   : > { %v8672_v38 = vcombine.high %v803_v32, %v807_v30  ;;  %v667_v39 = vld [vmem:[%s9285_s12 + $0xb80] sm:$0xff]  ;;  %3527 = vmatprep.subr.bf16.mxu0 %v8544_v37  ;;  %v8671_v44 = vcombine.low %v803_v32, %v807_v30 }
  0x7c   : > { %v671_v40 = vld [vmem:[%s9285_s12 + $0xba0] sm:$0xff]  ;;  %3528 = vmatpush2.bf16.msra.mxu0 %v8543_v43 }
  0x7d   : > { %v795_v55 = vld [vmem:[%s9285_s12 + $0xf80] sm:$0xff]  ;;  %v8536_v45 = vcombine.high %v667_v39, %v671_v40  ;;  %3568 = vmatprep.subr.bf16.mxu1 %v8672_v38  ;;  %v8535_v52 = vcombine.low %v667_v39, %v671_v40  ;;  %v356_v39 = vld [vmem:[%s9285_s12 + $0x1c8] sm:$0xff] }
  0x7e   : > { %v799_v41 = vld [vmem:[%s9285_s12 + $0xfa0] sm:$0xff]  ;;  %3569 = vmatpush2.bf16.msra.mxu1 %v8671_v44  ;;  %v360_v40 = vld [vmem:[%s9285_s12 + $0x1e8] sm:$0xff] }
  0x7f   : > { %v8664_v47 = vcombine.high %v795_v55, %v799_v41  ;;  %v659_v48 = vld [vmem:[%s9285_s12 + $0xb40] sm:$0xff]  ;;  %3529 = vmatprep.subr.bf16.mxu0 %v8536_v45  ;;  %v8663_v53 = vcombine.low %v795_v55, %v799_v41  ;;  %v484_v55 = vld [vmem:[%s9285_s12 + $0x5c8] sm:$0xff]  ;;  %v8226_v45 = vcombine.high %v356_v39, %v360_v40 }
  0x80   : > { %v663_v49 = vld [vmem:[%s9285_s12 + $0xb60] sm:$0xff]  ;;  %3530 = vmatpush2.bf16.msra.mxu0 %v8535_v52  ;;  %v488_v41 = vld [vmem:[%s9285_s12 + $0x5e8] sm:$0xff]  ;;  %v9478_v52 = vcombine.high %v9361_v34, %v9361_v34 }
  0x81   : > { %v787_v50 = vld [vmem:[%s9285_s12 + $0xf40] sm:$0xff]  ;;  %v8528_v54 = vcombine.high %v659_v48, %v663_v49  ;;  %3570 = vmatprep.subr.bf16.mxu1 %v8664_v47  ;;  %v8527_v61 = vcombine.low %v659_v48, %v663_v49  ;;  %v8354_v47 = vcombine.high %v484_v55, %v488_v41  ;;  %v348_v48 = vld [vmem:[%s9285_s12 + $0x188] sm:$0xff] }
  0x82   : > { %v791_v51 = vld [vmem:[%s9285_s12 + $0xf60] sm:$0xff]  ;;  %3571 = vmatpush2.bf16.msra.mxu1 %v8663_v53  ;;  %v352_v49 = vld [vmem:[%s9285_s12 + $0x1a8] sm:$0xff]  ;;  %v8225_v53 = vcombine.low %v356_v39, %v360_v40 }
  0x83   : > { %v8656_v56 = vcombine.high %v787_v50, %v791_v51  ;;  %v651_v57 = vld [vmem:[%s9285_s12 + $0xb00] sm:$0xff]  ;;  %3531 = vmatprep.subr.bf16.mxu0 %v8528_v54  ;;  %v8655_v62 = vcombine.low %v787_v50, %v791_v51  ;;  %v476_v50 = vld [vmem:[%s9285_s12 + $0x588] sm:$0xff]  ;;  %v8353_v54 = vcombine.low %v484_v55, %v488_v41 }
  0x84   : > { %v655_v58 = vld [vmem:[%s9285_s12 + $0xb20] sm:$0xff]  ;;  %3532 = vmatpush2.bf16.msra.mxu0 %v8527_v61  ;;  %v480_v51 = vld [vmem:[%s9285_s12 + $0x5a8] sm:$0xff] }
  0x85   : > { %v779_v59 = vld [vmem:[%s9285_s12 + $0xf00] sm:$0xff]  ;;  %v8520_v63 = vcombine.high %v651_v57, %v655_v58  ;;  %3572 = vmatprep.subr.bf16.mxu1 %v8656_v56  ;;  %v8519_v6 = vcombine.low %v651_v57, %v655_v58  ;;  %v8218_v56 = vcombine.high %v348_v48, %v352_v49  ;;  %v8346_v57 = vcombine.high %v476_v50, %v480_v51  ;;  %v340_v58 = vld [vmem:[%s9285_s12 + $0x148] sm:$0xff] }
  0x86   : > { %v783_v60 = vld [vmem:[%s9285_s12 + $0xf20] sm:$0xff]  ;;  %3573 = vmatpush2.bf16.msra.mxu1 %v8655_v62  ;;  %v472_v61 = vld [vmem:[%s9285_s12 + $0x568] sm:$0xff]  ;;  %v8217_v62 = vcombine.low %v348_v48, %v352_v49 }
  0x87   : > { %v8648_v0 = vcombine.high %v779_v59, %v783_v60  ;;  %v643_v2 = vld [vmem:[%s9285_s12 + $0xac0] sm:$0xff]  ;;  %3533 = vmatprep.subr.bf16.mxu0 %v8520_v63  ;;  %v8647_v7 = vcombine.low %v779_v59, %v783_v60  ;;  %v344_v59 = vld [vmem:[%s9285_s12 + $0x168] sm:$0xff]  ;;  %v8345_v63 = vcombine.low %v476_v50, %v480_v51 }
  0x88   : > { %v647_v3 = vld [vmem:[%s9285_s12 + $0xae0] sm:$0xff]  ;;  %3534 = vmatpush2.bf16.msra.mxu0 %v8519_v6  ;;  %v468_v60 = vld [vmem:[%s9285_s12 + $0x548] sm:$0xff] }
  0x89   : > { %v771_v4 = vld [vmem:[%s9285_s12 + $0xec0] sm:$0xff]  ;;  %v8512_v8 = vcombine.high %v643_v2, %v647_v3  ;;  %3574 = vmatprep.subr.bf16.mxu1 %v8648_v0  ;;  %v8511_v16 = vcombine.low %v643_v2, %v647_v3  ;;  %v8210_v0 = vcombine.high %v340_v58, %v344_v59  ;;  %v8338_v2 = vcombine.high %v468_v60, %v472_v61  ;;  %v332_v3 = vld [vmem:[%s9285_s12 + $0x108] sm:$0xff] }
  0x8a   : > { %v775_v5 = vld [vmem:[%s9285_s12 + $0xee0] sm:$0xff]  ;;  %3575 = vmatpush2.bf16.msra.mxu1 %v8647_v7  ;;  %v464_v6 = vld [vmem:[%s9285_s12 + $0x528] sm:$0xff]  ;;  %v8209_v7 = vcombine.low %v340_v58, %v344_v59 }
  0x8b   : > { %v8640_v9 = vcombine.high %v771_v4, %v775_v5  ;;  %v635_v10 = vld [vmem:[%s9285_s12 + $0xa80] sm:$0xff]  ;;  %3535 = vmatprep.subr.bf16.mxu0 %v8512_v8  ;;  %v8639_v17 = vcombine.low %v771_v4, %v775_v5  ;;  %v336_v4 = vld [vmem:[%s9285_s12 + $0x128] sm:$0xff]  ;;  %v8337_v8 = vcombine.low %v468_v60, %v472_v61 }
  0x8c   : > { %v639_v12 = vld [vmem:[%s9285_s12 + $0xaa0] sm:$0xff]  ;;  %3536 = vmatpush2.bf16.msra.mxu0 %v8511_v16  ;;  %v460_v5 = vld [vmem:[%s9285_s12 + $0x508] sm:$0xff] }
  0x8d   : > { %v763_v13 = vld [vmem:[%s9285_s12 + $0xe80] sm:$0xff]  ;;  %v8504_v18 = vcombine.high %v635_v10, %v639_v12  ;;  %3576 = vmatprep.subr.bf16.mxu1 %v8640_v9  ;;  %v8503_v24 = vcombine.low %v635_v10, %v639_v12  ;;  %v8202_v9 = vcombine.high %v332_v3, %v336_v4  ;;  %v8330_v10 = vcombine.high %v460_v5, %v464_v6  ;;  %v324_v12 = vld [vmem:[%s9285_s12 + $0xc8] sm:$0xff] }
  0x8e   : > { %v767_v14 = vld [vmem:[%s9285_s12 + $0xea0] sm:$0xff]  ;;  %3577 = vmatpush2.bf16.msra.mxu1 %v8639_v17  ;;  %v456_v16 = vld [vmem:[%s9285_s12 + $0x4e8] sm:$0xff]  ;;  %v8201_v17 = vcombine.low %v332_v3, %v336_v4 }
  0x8f   : > { %v8632_v19 = vcombine.high %v763_v13, %v767_v14  ;;  %v627_v20 = vld [vmem:[%s9285_s12 + $0xa40] sm:$0xff]  ;;  %3537 = vmatprep.subr.bf16.mxu0 %v8504_v18  ;;  %v8631_v26 = vcombine.low %v763_v13, %v767_v14  ;;  %v328_v13 = vld [vmem:[%s9285_s12 + $0xe8] sm:$0xff]  ;;  %v8329_v18 = vcombine.low %v460_v5, %v464_v6 }
  0x90   : > { %v631_v21 = vld [vmem:[%s9285_s12 + $0xa60] sm:$0xff]  ;;  %3538 = vmatpush2.bf16.msra.mxu0 %v8503_v24  ;;  %v452_v14 = vld [vmem:[%s9285_s12 + $0x4c8] sm:$0xff] }
  0x91   : > { %v755_v22 = vld [vmem:[%s9285_s12 + $0xe40] sm:$0xff]  ;;  %v8496_v27 = vcombine.high %v627_v20, %v631_v21  ;;  %3578 = vmatprep.subr.bf16.mxu1 %v8632_v19  ;;  %v8495_v35 = vcombine.low %v627_v20, %v631_v21  ;;  %v8194_v19 = vcombine.high %v324_v12, %v328_v13  ;;  %v8322_v20 = vcombine.high %v452_v14, %v456_v16  ;;  %v316_v21 = vld [vmem:[%s9285_s12 + $0x88] sm:$0xff] }
  0x92   : > { %v759_v23 = vld [vmem:[%s9285_s12 + $0xe60] sm:$0xff]  ;;  %3579 = vmatpush2.bf16.msra.mxu1 %v8631_v26  ;;  %v448_v24 = vld [vmem:[%s9285_s12 + $0x4a8] sm:$0xff]  ;;  %v8193_v26 = vcombine.low %v324_v12, %v328_v13 }
  0x93   : > { %v8624_v28 = vcombine.high %v755_v22, %v759_v23  ;;  %v619_v29 = vld [vmem:[%s9285_s12 + $0xa00] sm:$0xff]  ;;  %3539 = vmatprep.subr.bf16.mxu0 %v8496_v27  ;;  %v8623_v36 = vcombine.low %v755_v22, %v759_v23  ;;  %v320_v22 = vld [vmem:[%s9285_s12 + $0xa8] sm:$0xff]  ;;  %v8321_v27 = vcombine.low %v452_v14, %v456_v16 }
  0x94   : > { %v623_v31 = vld [vmem:[%s9285_s12 + $0xa20] sm:$0xff]  ;;  %3540 = vmatpush2.bf16.msra.mxu0 %v8495_v35  ;;  %v444_v23 = vld [vmem:[%s9285_s12 + $0x488] sm:$0xff] }
  0x95   : > { %v747_v32 = vld [vmem:[%s9285_s12 + $0xe00] sm:$0xff]  ;;  %v8488_v37 = vcombine.high %v619_v29, %v623_v31  ;;  %3580 = vmatprep.subr.bf16.mxu1 %v8624_v28  ;;  %v8487_v43 = vcombine.low %v619_v29, %v623_v31  ;;  %v8186_v28 = vcombine.high %v316_v21, %v320_v22  ;;  %v8314_v29 = vcombine.high %v444_v23, %v448_v24  ;;  %v308_v31 = vld [vmem:[%s9285_s12 + $0x48] sm:$0xff] }
  0x96   : > { %v751_v30 = vld [vmem:[%s9285_s12 + $0xe20] sm:$0xff]  ;;  %3581 = vmatpush2.bf16.msra.mxu1 %v8623_v36  ;;  %v440_v35 = vld [vmem:[%s9285_s12 + $0x468] sm:$0xff]  ;;  %v8185_v36 = vcombine.low %v316_v21, %v320_v22 }
  0x97   : > { %v8616_v38 = vcombine.high %v747_v32, %v751_v30  ;;  %3541 = vmatprep.subr.bf16.mxu0 %v8488_v37  ;;  %v8615_v44 = vcombine.low %v747_v32, %v751_v30  ;;  %v312_v32 = vld [vmem:[%s9285_s12 + $0x68] sm:$0xff]  ;;  %v8313_v37 = vcombine.low %v444_v23, %v448_v24 }
  0x98   : > { %3542 = vmatpush2.bf16.msra.mxu0 %v8487_v43  ;;  %v436_v30 = vld [vmem:[%s9285_s12 + $0x448] sm:$0xff] }
  0x99   : > { %3582 = vmatprep.subr.bf16.mxu1 %v8616_v38  ;;  %3593 = vmatprep.subr.bf16.mxu0 %v8226_v45  ;;  %v8178_v38 = vcombine.high %v308_v31, %v312_v32  ;;  %v8306_v39 = vcombine.high %v436_v30, %v440_v35  ;;  %v300_v40 = vld [vmem:[%s9285_s12 + $0x8] sm:$0xff]  ;;  %v8305_v45 = vcombine.low %v436_v30, %v440_v35 }
  0x9a   : > { %3583 = vmatpush2.bf16.msra.mxu1 %v8615_v44  ;;  %v304_v55 = vld [vmem:[%s9285_s12 + $0x28] sm:$0xff]  ;;  %v8177_v44 = vcombine.low %v308_v31, %v312_v32 }
  0x9b   : > { %3634 = vmatprep.subr.bf16.mxu1 %v8354_v47  ;;  %3544 = vmatmul.mubr.bf16.vlgmr.msra.gmra.mxu0 %v9361_v34  ;;  %v428_v41 = vld [vmem:[%s9285_s12 + $0x408] sm:$0xff]  ;;  %v8170_v47 = vcombine.high %v300_v40, %v304_v55 }
  0x9c   : > { %3594 = vmatpush1.bf16.msra.mxu0 %v8225_v53  ;;  %3625 = vmatprep.mubr.bf16.mxu0 %v9338_v11  ;;  %v432_v43 = vld [vmem:[%s9285_s12 + $0x428] sm:$0xff] }
  0x9d   : > { %3585 = vmatmul.mubr.bf16.vlgmr.msra.gmra.mxu1 %v9478_v52  ;;  %3595 = vmatprep.subr.bf16.mxu0 %v8218_v56  ;;  %v8298_v48 = vcombine.high %v428_v41, %v432_v43  ;;  %v420_v49 = vld [vmem:[%s9285_s12 + $0x3c8] sm:$0xff]  ;;  %v8297_v56 = vcombine.low %v428_v41, %v432_v43 }
  0x9e   : > { %3635 = vmatpush1.bf16.msra.mxu1 %v8353_v54  ;;  %3666 = vmatprep.mubr.bf16.mxu1 %v9345_v15  ;;  %v424_v50 = vld [vmem:[%s9285_s12 + $0x3e8] sm:$0xff]  ;;  %v8169_v54 = vcombine.low %v300_v40, %v304_v55 }
  0x9f   : > { %3636 = vmatprep.subr.bf16.mxu1 %v8346_v57  ;;  %v548_v51 = vld [vmem:[%s9285_s12 + $0x7c8] sm:$0xff]  ;;  %v8290_v57 = vcombine.high %v420_v49, %v424_v50 }
  0xa0   : > { %3596 = vmatpush1.bf16.msra.mxu0 %v8217_v62  ;;  %v552_v53 = vld [vmem:[%s9285_s12 + $0x7e8] sm:$0xff] }
  0xa1   : > { %3597 = vmatprep.subr.bf16.mxu0 %v8210_v0  ;;  %v8418_v58 = vcombine.high %v548_v51, %v552_v53  ;;  %v412_v59 = vld [vmem:[%s9285_s12 + $0x388] sm:$0xff]  ;;  %v8417_v0 = vcombine.low %v548_v51, %v552_v53 }
  0xa2   : > { %3637 = vmatpush1.bf16.msra.mxu1 %v8345_v63  ;;  %v416_v60 = vld [vmem:[%s9285_s12 + $0x3a8] sm:$0xff]  ;;  %v8289_v63 = vcombine.low %v420_v49, %v424_v50 }
  0xa3   : > { %3638 = vmatprep.subr.bf16.mxu1 %v8338_v2  ;;  %v540_v61 = vld [vmem:[%s9285_s12 + $0x788] sm:$0xff]  ;;  %v8282_v2 = vcombine.high %v412_v59, %v416_v60 }
  0xa4   : > { %3598 = vmatpush1.bf16.msra.mxu0 %v8209_v7  ;;  %v544_v62 = vld [vmem:[%s9285_s12 + $0x7a8] sm:$0xff] }
  0xa5   : > { %3599 = vmatprep.subr.bf16.mxu0 %v8202_v9  ;;  %v8410_v3 = vcombine.high %v540_v61, %v544_v62  ;;  %v404_v4 = vld [vmem:[%s9285_s12 + $0x348] sm:$0xff]  ;;  %v8409_v9 = vcombine.low %v540_v61, %v544_v62 }
  0xa6   : > { %3639 = vmatpush1.bf16.msra.mxu1 %v8337_v8  ;;  %v408_v5 = vld [vmem:[%s9285_s12 + $0x368] sm:$0xff]  ;;  %v8281_v8 = vcombine.low %v412_v59, %v416_v60 }
  0xa7   : > { %3640 = vmatprep.subr.bf16.mxu1 %v8330_v10  ;;  %v532_v6 = vld [vmem:[%s9285_s12 + $0x748] sm:$0xff]  ;;  %v8274_v10 = vcombine.high %v404_v4, %v408_v5 }
  0xa8   : > { %3600 = vmatpush1.bf16.msra.mxu0 %v8201_v17  ;;  %v536_v7 = vld [vmem:[%s9285_s12 + $0x768] sm:$0xff] }
  0xa9   : > { %3601 = vmatprep.subr.bf16.mxu0 %v8194_v19  ;;  %v8402_v12 = vcombine.high %v532_v6, %v536_v7  ;;  %v396_v13 = vld [vmem:[%s9285_s12 + $0x308] sm:$0xff]  ;;  %v8401_v19 = vcombine.low %v532_v6, %v536_v7 }
  0xaa   : > { %3641 = vmatpush1.bf16.msra.mxu1 %v8329_v18  ;;  %v400_v14 = vld [vmem:[%s9285_s12 + $0x328] sm:$0xff]  ;;  %v8273_v18 = vcombine.low %v404_v4, %v408_v5 }
  0xab   : > { %3642 = vmatprep.subr.bf16.mxu1 %v8322_v20  ;;  %v524_v16 = vld [vmem:[%s9285_s12 + $0x708] sm:$0xff]  ;;  %v8266_v20 = vcombine.high %v396_v13, %v400_v14 }
  0xac   : > { %3602 = vmatpush1.bf16.msra.mxu0 %v8193_v26  ;;  %v528_v17 = vld [vmem:[%s9285_s12 + $0x728] sm:$0xff] }
  0xad   : > { %3603 = vmatprep.subr.bf16.mxu0 %v8186_v28  ;;  %v8394_v21 = vcombine.high %v524_v16, %v528_v17  ;;  %v388_v22 = vld [vmem:[%s9285_s12 + $0x2c8] sm:$0xff]  ;;  %v8393_v28 = vcombine.low %v524_v16, %v528_v17 }
  0xae   : > { %3643 = vmatpush1.bf16.msra.mxu1 %v8321_v27  ;;  %v392_v23 = vld [vmem:[%s9285_s12 + $0x2e8] sm:$0xff]  ;;  %v8265_v27 = vcombine.low %v396_v13, %v400_v14 }
  0xaf   : > { %3644 = vmatprep.subr.bf16.mxu1 %v8314_v29  ;;  %v516_v24 = vld [vmem:[%s9285_s12 + $0x6c8] sm:$0xff]  ;;  %v8258_v29 = vcombine.high %v388_v22, %v392_v23 }
  0xb0   : > { %3604 = vmatpush1.bf16.msra.mxu0 %v8185_v36  ;;  %v520_v26 = vld [vmem:[%s9285_s12 + $0x6e8] sm:$0xff] }
  0xb1   : > { %3605 = vmatprep.subr.bf16.mxu0 %v8178_v38  ;;  %v8386_v31 = vcombine.high %v516_v24, %v520_v26  ;;  %v380_v32 = vld [vmem:[%s9285_s12 + $0x288] sm:$0xff]  ;;  %v8385_v38 = vcombine.low %v516_v24, %v520_v26 }
  0xb2   : > { %3645 = vmatpush1.bf16.msra.mxu1 %v8313_v37  ;;  %v384_v30 = vld [vmem:[%s9285_s12 + $0x2a8] sm:$0xff]  ;;  %v8257_v37 = vcombine.low %v388_v22, %v392_v23 }
  0xb3   : > { %3646 = vmatprep.subr.bf16.mxu1 %v8306_v39  ;;  %v508_v35 = vld [vmem:[%s9285_s12 + $0x688] sm:$0xff]  ;;  %v8250_v39 = vcombine.high %v380_v32, %v384_v30 }
  0xb4   : > { %3606 = vmatpush1.bf16.msra.mxu0 %v8177_v44  ;;  %v512_v36 = vld [vmem:[%s9285_s12 + $0x6a8] sm:$0xff] }
  0xb5   : > { %3607 = vmatprep.subr.bf16.mxu0 %v8170_v47  ;;  %v8378_v40 = vcombine.high %v508_v35, %v512_v36  ;;  %v372_v55 = vld [vmem:[%s9285_s12 + $0x248] sm:$0xff]  ;;  %v8377_v47 = vcombine.low %v508_v35, %v512_v36 }
  0xb6   : > { %3647 = vmatpush1.bf16.msra.mxu1 %v8305_v45  ;;  %v376_v41 = vld [vmem:[%s9285_s12 + $0x268] sm:$0xff]  ;;  %v8249_v45 = vcombine.low %v380_v32, %v384_v30 }
  0xb7   : > { %3648 = vmatprep.subr.bf16.mxu1 %v8298_v48  ;;  %v500_v43 = vld [vmem:[%s9285_s12 + $0x648] sm:$0xff]  ;;  %v8242_v48 = vcombine.high %v372_v55, %v376_v41 }
  0xb8   : > { %3608 = vmatpush1.bf16.msra.mxu0 %v8169_v54  ;;  %v504_v44 = vld [vmem:[%s9285_s12 + $0x668] sm:$0xff] }
  0xb9   : > { %3609 = vmatprep.subr.bf16.mxu0 %v8290_v57  ;;  %v8370_v49 = vcombine.high %v500_v43, %v504_v44  ;;  %v364_v50 = vld [vmem:[%s9285_s12 + $0x208] sm:$0xff]  ;;  %v8369_v57 = vcombine.low %v500_v43, %v504_v44 }
  0xba   : > { %3649 = vmatpush1.bf16.msra.mxu1 %v8297_v56  ;;  %v368_v51 = vld [vmem:[%s9285_s12 + $0x228] sm:$0xff]  ;;  %v8241_v56 = vcombine.low %v372_v55, %v376_v41 }
  0xbb   : > { %3650 = vmatprep.subr.bf16.mxu1 %v8418_v58  ;;  %v492_v53 = vld [vmem:[%s9285_s12 + $0x608] sm:$0xff]  ;;  %v8234_v58 = vcombine.high %v364_v50, %v368_v51 }
  0xbc   : > { %3610 = vmatpush2.bf16.msra.mxu0 %v8289_v63  ;;  %v496_v54 = vld [vmem:[%s9285_s12 + $0x628] sm:$0xff] }
  0xbd   : > { %3611 = vmatprep.subr.bf16.mxu0 %v8282_v2  ;;  %v8362_v59 = vcombine.high %v492_v53, %v496_v54  ;;  %v612_v60 = vld [vmem:[%s9285_s12 + $0x9c8] sm:$0xff]  ;;  %v8361_v2 = vcombine.low %v492_v53, %v496_v54 }
  0xbe   : > { %3651 = vmatpush2.bf16.msra.mxu1 %v8417_v0  ;;  %v616_v61 = vld [vmem:[%s9285_s12 + $0x9e8] sm:$0xff]  ;;  %v8233_v0 = vcombine.low %v364_v50, %v368_v51 }
  0xbf   : > { %3652 = vmatprep.subr.bf16.mxu1 %v8410_v3  ;;  %v740_v62 = vld [vmem:[%s9285_s12 + $0xdc8] sm:$0xff]  ;;  %v8482_v3 = vcombine.high %v612_v60, %v616_v61 }
  0xc0   : > { %3612 = vmatpush2.bf16.msra.mxu0 %v8281_v8  ;;  %v744_v63 = vld [vmem:[%s9285_s12 + $0xde8] sm:$0xff] }
  0xc1   : > { %3613 = vmatprep.subr.bf16.mxu0 %v8274_v10  ;;  %v8610_v4 = vcombine.high %v740_v62, %v744_v63  ;;  %v604_v5 = vld [vmem:[%s9285_s12 + $0x988] sm:$0xff]  ;;  %v8609_v10 = vcombine.low %v740_v62, %v744_v63 }
  0xc2   : > { %3653 = vmatpush2.bf16.msra.mxu1 %v8409_v9  ;;  %v608_v6 = vld [vmem:[%s9285_s12 + $0x9a8] sm:$0xff]  ;;  %v8481_v9 = vcombine.low %v612_v60, %v616_v61 }
  0xc3   : > { %3654 = vmatprep.subr.bf16.mxu1 %v8402_v12  ;;  %v732_v7 = vld [vmem:[%s9285_s12 + $0xd88] sm:$0xff]  ;;  %v8474_v12 = vcombine.high %v604_v5, %v608_v6 }
  0xc4   : > { %3614 = vmatpush2.bf16.msra.mxu0 %v8273_v18  ;;  %v736_v8 = vld [vmem:[%s9285_s12 + $0xda8] sm:$0xff] }
  0xc5   : > { %3615 = vmatprep.subr.bf16.mxu0 %v8266_v20  ;;  %v8602_v13 = vcombine.high %v732_v7, %v736_v8  ;;  %v596_v14 = vld [vmem:[%s9285_s12 + $0x948] sm:$0xff]  ;;  %v8601_v20 = vcombine.low %v732_v7, %v736_v8 }
  0xc6   : > { %3655 = vmatpush2.bf16.msra.mxu1 %v8401_v19  ;;  %v600_v16 = vld [vmem:[%s9285_s12 + $0x968] sm:$0xff]  ;;  %v8473_v19 = vcombine.low %v604_v5, %v608_v6 }
  0xc7   : > { %3656 = vmatprep.subr.bf16.mxu1 %v8394_v21  ;;  %v724_v17 = vld [vmem:[%s9285_s12 + $0xd48] sm:$0xff]  ;;  %v8466_v21 = vcombine.high %v596_v14, %v600_v16 }
  0xc8   : > { %3616 = vmatpush2.bf16.msra.mxu0 %v8265_v27  ;;  %v728_v18 = vld [vmem:[%s9285_s12 + $0xd68] sm:$0xff] }
  0xc9   : > { %3617 = vmatprep.subr.bf16.mxu0 %v8258_v29  ;;  %v8594_v22 = vcombine.high %v724_v17, %v728_v18  ;;  %v588_v23 = vld [vmem:[%s9285_s12 + $0x908] sm:$0xff]  ;;  %v8593_v29 = vcombine.low %v724_v17, %v728_v18 }
  0xca   : > { %3657 = vmatpush2.bf16.msra.mxu1 %v8393_v28  ;;  %v592_v24 = vld [vmem:[%s9285_s12 + $0x928] sm:$0xff]  ;;  %v8465_v28 = vcombine.low %v596_v14, %v600_v16 }
  0xcb   : > { %3658 = vmatprep.subr.bf16.mxu1 %v8386_v31  ;;  %v716_v26 = vld [vmem:[%s9285_s12 + $0xd08] sm:$0xff]  ;;  %v8458_v31 = vcombine.high %v588_v23, %v592_v24 }
  0xcc   : > { %3618 = vmatpush2.bf16.msra.mxu0 %v8257_v37  ;;  %v720_v27 = vld [vmem:[%s9285_s12 + $0xd28] sm:$0xff] }
  0xcd   : > { %3619 = vmatprep.subr.bf16.mxu0 %v8250_v39  ;;  %v8586_v32 = vcombine.high %v716_v26, %v720_v27  ;;  %v580_v30 = vld [vmem:[%s9285_s12 + $0x8c8] sm:$0xff]  ;;  %v8585_v39 = vcombine.low %v716_v26, %v720_v27 }
  0xce   : > { %3659 = vmatpush2.bf16.msra.mxu1 %v8385_v38  ;;  %v584_v35 = vld [vmem:[%s9285_s12 + $0x8e8] sm:$0xff]  ;;  %v8457_v38 = vcombine.low %v588_v23, %v592_v24 }
  0xcf   : > { %3660 = vmatprep.subr.bf16.mxu1 %v8378_v40  ;;  %v708_v36 = vld [vmem:[%s9285_s12 + $0xcc8] sm:$0xff]  ;;  %v8450_v40 = vcombine.high %v580_v30, %v584_v35 }
  0xd0   : > { %3620 = vmatpush2.bf16.msra.mxu0 %v8249_v45  ;;  %v712_v37 = vld [vmem:[%s9285_s12 + $0xce8] sm:$0xff] }
  0xd1   : > { %3621 = vmatprep.subr.bf16.mxu0 %v8242_v48  ;;  %v8578_v55 = vcombine.high %v708_v36, %v712_v37  ;;  %v572_v41 = vld [vmem:[%s9285_s12 + $0x888] sm:$0xff]  ;;  %v8577_v48 = vcombine.low %v708_v36, %v712_v37 }
  0xd2   : > { %3661 = vmatpush2.bf16.msra.mxu1 %v8377_v47  ;;  %v576_v43 = vld [vmem:[%s9285_s12 + $0x8a8] sm:$0xff]  ;;  %v8449_v47 = vcombine.low %v580_v30, %v584_v35 }
  0xd3   : > { %3662 = vmatprep.subr.bf16.mxu1 %v8370_v49  ;;  %v700_v44 = vld [vmem:[%s9285_s12 + $0xc88] sm:$0xff]  ;;  %v8442_v49 = vcombine.high %v572_v41, %v576_v43 }
  0xd4   : > { %3622 = vmatpush2.bf16.msra.mxu0 %v8241_v56  ;;  %v704_v45 = vld [vmem:[%s9285_s12 + $0xca8] sm:$0xff] }
  0xd5   : > { %3623 = vmatprep.subr.bf16.mxu0 %v8234_v58  ;;  %v8570_v50 = vcombine.high %v700_v44, %v704_v45  ;;  %v564_v51 = vld [vmem:[%s9285_s12 + $0x848] sm:$0xff]  ;;  %v8569_v58 = vcombine.low %v700_v44, %v704_v45 }
  0xd6   : > { %3663 = vmatpush2.bf16.msra.mxu1 %v8369_v57  ;;  %v568_v53 = vld [vmem:[%s9285_s12 + $0x868] sm:$0xff]  ;;  %v8441_v57 = vcombine.low %v572_v41, %v576_v43 }
  0xd7   : > { %3664 = vmatprep.subr.bf16.mxu1 %v8362_v59  ;;  %v692_v54 = vld [vmem:[%s9285_s12 + $0xc48] sm:$0xff]  ;;  %v8434_v59 = vcombine.high %v564_v51, %v568_v53 }
  0xd8   : > { %3624 = vmatpush2.bf16.msra.mxu0 %v8233_v0  ;;  %v696_v56 = vld [vmem:[%s9285_s12 + $0xc68] sm:$0xff] }
  0xd9   : > { %3675 = vmatprep.subr.bf16.mxu0 %v8482_v3  ;;  %v8562_v60 = vcombine.high %v692_v54, %v696_v56  ;;  %v556_v61 = vld [vmem:[%s9285_s12 + $0x808] sm:$0xff]  ;;  %v8561_v3 = vcombine.low %v692_v54, %v696_v56 }
  0xda   : > { %3665 = vmatpush2.bf16.msra.mxu1 %v8361_v2  ;;  %v560_v62 = vld [vmem:[%s9285_s12 + $0x828] sm:$0xff]  ;;  %v8433_v2 = vcombine.low %v564_v51, %v568_v53 }
  0xdb   : > { %3716 = vmatprep.subr.bf16.mxu1 %v8610_v4  ;;  %3626 = vmatmul.mubr.bf16.vlgmr.msra.gmra.mxu0 %v9391_v25  ;;  %v684_v63 = vld [vmem:[%s9285_s12 + $0xc08] sm:$0xff]  ;;  %v8426_v4 = vcombine.high %v556_v61, %v560_v62 }
  0xdc   : > { %3676 = vmatpush1.bf16.msra.mxu0 %v8481_v9  ;;  %3707 = vmatprep.mubr.bf16.mxu0 %v9398_v33  ;;  %v688_v0 = vld [vmem:[%s9285_s12 + $0xc28] sm:$0xff] }
  0xdd   : > { %3667 = vmatmul.mubr.bf16.vlgmr.msra.gmra.mxu1 %v9402_v1  ;;  %3677 = vmatprep.subr.bf16.mxu0 %v8474_v12  ;;  %v8554_v5 = vcombine.high %v684_v63, %v688_v0  ;;  %v676_v6 = vld [vmem:[%s9285_s12 + $0xbc8] sm:$0xff]  ;;  %v8553_v12 = vcombine.low %v684_v63, %v688_v0 }
  0xde   : > { %3717 = vmatpush1.bf16.msra.mxu1 %v8609_v10  ;;  %3748 = vmatprep.mubr.bf16.mxu1 %v9411_v42  ;;  %v680_v7 = vld [vmem:[%s9285_s12 + $0xbe8] sm:$0xff]  ;;  %v8425_v10 = vcombine.low %v556_v61, %v560_v62 }
  0xdf   : > { %3718 = vmatprep.subr.bf16.mxu1 %v8602_v13  ;;  %v804_v8 = vld [vmem:[%s9285_s12 + $0xfc8] sm:$0xff]  ;;  %v8546_v13 = vcombine.high %v676_v6, %v680_v7 }
  0xe0   : > { %3678 = vmatpush1.bf16.msra.mxu0 %v8473_v19  ;;  %v808_v9 = vld [vmem:[%s9285_s12 + $0xfe8] sm:$0xff] }
  0xe1   : > { %3679 = vmatprep.subr.bf16.mxu0 %v8466_v21  ;;  %v8674_v14 = vcombine.high %v804_v8, %v808_v9  ;;  %v668_v16 = vld [vmem:[%s9285_s12 + $0xb88] sm:$0xff]  ;;  %v8673_v21 = vcombine.low %v804_v8, %v808_v9 }
  0xe2   : > { %3719 = vmatpush1.bf16.msra.mxu1 %v8601_v20  ;;  %v672_v17 = vld [vmem:[%s9285_s12 + $0xba8] sm:$0xff]  ;;  %v8545_v20 = vcombine.low %v676_v6, %v680_v7 }
  0xe3   : > { %3720 = vmatprep.subr.bf16.mxu1 %v8594_v22  ;;  %v796_v18 = vld [vmem:[%s9285_s12 + $0xf88] sm:$0xff]  ;;  %v8538_v22 = vcombine.high %v668_v16, %v672_v17 }
  0xe4   : > { %3680 = vmatpush1.bf16.msra.mxu0 %v8465_v28  ;;  %v800_v19 = vld [vmem:[%s9285_s12 + $0xfa8] sm:$0xff] }
  0xe5   : > { %3681 = vmatprep.subr.bf16.mxu0 %v8458_v31  ;;  %v8666_v23 = vcombine.high %v796_v18, %v800_v19  ;;  %v660_v24 = vld [vmem:[%s9285_s12 + $0xb48] sm:$0xff]  ;;  %v8665_v31 = vcombine.low %v796_v18, %v800_v19  ;;  %v361_v18 = vld [vmem:[%s9285_s12 + $0x1f0] sm:$0xff] }
  0xe6   : > { %3721 = vmatpush1.bf16.msra.mxu1 %v8593_v29  ;;  %v664_v26 = vld [vmem:[%s9285_s12 + $0xb68] sm:$0xff]  ;;  %v8537_v29 = vcombine.low %v668_v16, %v672_v17  ;;  %v357_v17 = vld [vmem:[%s9285_s12 + $0x1d0] sm:$0xff] }
  0xe7   : > { %3722 = vmatprep.subr.bf16.mxu1 %v8586_v32  ;;  %v788_v27 = vld [vmem:[%s9285_s12 + $0xf48] sm:$0xff]  ;;  %v8530_v32 = vcombine.high %v660_v24, %v664_v26  ;;  %v485_v19 = vld [vmem:[%s9285_s12 + $0x5d0] sm:$0xff] }
  0xe8   : > { %3682 = vmatpush1.bf16.msra.mxu0 %v8457_v38  ;;  %v792_v28 = vld [vmem:[%s9285_s12 + $0xf68] sm:$0xff] }
  0xe9   : > { %3683 = vmatprep.subr.bf16.mxu0 %v8450_v40  ;;  %v8658_v30 = vcombine.high %v788_v27, %v792_v28  ;;  %v652_v35 = vld [vmem:[%s9285_s12 + $0xb08] sm:$0xff]  ;;  %v8657_v40 = vcombine.low %v788_v27, %v792_v28  ;;  %v353_v27 = vld [vmem:[%s9285_s12 + $0x1b0] sm:$0xff] }
  0xea   : > { %3723 = vmatpush1.bf16.msra.mxu1 %v8585_v39  ;;  %v656_v36 = vld [vmem:[%s9285_s12 + $0xb28] sm:$0xff]  ;;  %v8529_v39 = vcombine.low %v660_v24, %v664_v26  ;;  %v349_v26 = vld [vmem:[%s9285_s12 + $0x190] sm:$0xff] }
  0xeb   : > { %3724 = vmatprep.subr.bf16.mxu1 %v8578_v55  ;;  %v780_v37 = vld [vmem:[%s9285_s12 + $0xf08] sm:$0xff]  ;;  %v8522_v55 = vcombine.high %v652_v35, %v656_v36  ;;  %v477_v28 = vld [vmem:[%s9285_s12 + $0x590] sm:$0xff] }
  0xec   : > { %3684 = vmatpush1.bf16.msra.mxu0 %v8449_v47  ;;  %v784_v38 = vld [vmem:[%s9285_s12 + $0xf28] sm:$0xff] }
  0xed   : > { %3685 = vmatprep.subr.bf16.mxu0 %v8442_v49  ;;  %v8650_v41 = vcombine.high %v780_v37, %v784_v38  ;;  %v644_v43 = vld [vmem:[%s9285_s12 + $0xac8] sm:$0xff]  ;;  %v8649_v49 = vcombine.low %v780_v37, %v784_v38  ;;  %v345_v37 = vld [vmem:[%s9285_s12 + $0x170] sm:$0xff] }
  0xee   : > { %3725 = vmatpush1.bf16.msra.mxu1 %v8577_v48  ;;  %v648_v44 = vld [vmem:[%s9285_s12 + $0xae8] sm:$0xff]  ;;  %v8521_v48 = vcombine.low %v652_v35, %v656_v36  ;;  %v341_v36 = vld [vmem:[%s9285_s12 + $0x150] sm:$0xff] }
  0xef   : > { %3726 = vmatprep.subr.bf16.mxu1 %v8570_v50  ;;  %v772_v45 = vld [vmem:[%s9285_s12 + $0xec8] sm:$0xff]  ;;  %v8514_v50 = vcombine.high %v644_v43, %v648_v44 }
  0xf0   : > { %3686 = vmatpush1.bf16.msra.mxu0 %v8441_v57  ;;  %v776_v47 = vld [vmem:[%s9285_s12 + $0xee8] sm:$0xff] }
  0xf1   : > { %3687 = vmatprep.subr.bf16.mxu0 %v8434_v59  ;;  %v8642_v51 = vcombine.high %v772_v45, %v776_v47  ;;  %v636_v53 = vld [vmem:[%s9285_s12 + $0xa88] sm:$0xff]  ;;  %v8641_v59 = vcombine.low %v772_v45, %v776_v47  ;;  %v8212_v47 = vcombine.high %v341_v36, %v345_v37 }
  0xf2   : > { %3727 = vmatpush1.bf16.msra.mxu1 %v8569_v58  ;;  %v640_v54 = vld [vmem:[%s9285_s12 + $0xaa8] sm:$0xff]  ;;  %v8513_v58 = vcombine.low %v644_v43, %v648_v44 }
  0xf3   : > { %3728 = vmatprep.subr.bf16.mxu1 %v8562_v60  ;;  %v764_v56 = vld [vmem:[%s9285_s12 + $0xe88] sm:$0xff]  ;;  %v8506_v60 = vcombine.high %v636_v53, %v640_v54 }
  0xf4   : > { %3688 = vmatpush1.bf16.msra.mxu0 %v8433_v2  ;;  %v768_v57 = vld [vmem:[%s9285_s12 + $0xea8] sm:$0xff] }
  0xf5   : > { %3689 = vmatprep.subr.bf16.mxu0 %v8426_v4  ;;  %v8634_v61 = vcombine.high %v764_v56, %v768_v57  ;;  %v628_v62 = vld [vmem:[%s9285_s12 + $0xa48] sm:$0xff]  ;;  %v8633_v4 = vcombine.low %v764_v56, %v768_v57  ;;  %v461_v56 = vld [vmem:[%s9285_s12 + $0x510] sm:$0xff] }
  0xf6   : > { %3729 = vmatpush1.bf16.msra.mxu1 %v8561_v3  ;;  %v632_v63 = vld [vmem:[%s9285_s12 + $0xa68] sm:$0xff]  ;;  %v8505_v3 = vcombine.low %v636_v53, %v640_v54  ;;  %v465_v57 = vld [vmem:[%s9285_s12 + $0x530] sm:$0xff] }
  0xf7   : > { %3730 = vmatprep.subr.bf16.mxu1 %v8554_v5  ;;  %v756_v0 = vld [vmem:[%s9285_s12 + $0xe48] sm:$0xff]  ;;  %v8498_v5 = vcombine.high %v628_v62, %v632_v63 }
  0xf8   : > { %3690 = vmatpush1.bf16.msra.mxu0 %v8425_v10  ;;  %v760_v2 = vld [vmem:[%s9285_s12 + $0xe68] sm:$0xff] }
  0xf9   : > { %3691 = vmatprep.subr.bf16.mxu0 %v8546_v13  ;;  %v8626_v6 = vcombine.high %v756_v0, %v760_v2  ;;  %v620_v7 = vld [vmem:[%s9285_s12 + $0xa08] sm:$0xff]  ;;  %v8625_v13 = vcombine.low %v756_v0, %v760_v2  ;;  %v8332_v0 = vcombine.high %v461_v56, %v465_v57  ;;  %v325_v2 = vld [vmem:[%s9285_s12 + $0xd0] sm:$0xff] }
  0xfa   : > { %3731 = vmatpush1.bf16.msra.mxu1 %v8553_v12  ;;  %v624_v8 = vld [vmem:[%s9285_s12 + $0xa28] sm:$0xff]  ;;  %v8497_v12 = vcombine.low %v628_v62, %v632_v63 }
  0xfb   : > { %3732 = vmatprep.subr.bf16.mxu1 %v8674_v14  ;;  %v748_v9 = vld [vmem:[%s9285_s12 + $0xe08] sm:$0xff]  ;;  %v8490_v14 = vcombine.high %v620_v7, %v624_v8 }
  0xfc   : > { %3692 = vmatpush2.bf16.msra.mxu0 %v8545_v20  ;;  %v752_v10 = vld [vmem:[%s9285_s12 + $0xe28] sm:$0xff]  ;;  %v489_v20 = vld [vmem:[%s9285_s12 + $0x5f0] sm:$0xff] }
  0xfd   : > { %3693 = vmatprep.subr.bf16.mxu0 %v8538_v22  ;;  %v8618_v16 = vcombine.high %v748_v9, %v752_v10  ;;  %v8617_v22 = vcombine.low %v748_v9, %v752_v10  ;;  %v8356_v24 = vcombine.high %v485_v19, %v489_v20  ;;  %v317_v10 = vld [vmem:[%s9285_s12 + $0x90] sm:$0xff] }
  0xfe   : > { %3733 = vmatpush2.bf16.msra.mxu1 %v8673_v21  ;;  %v8489_v21 = vcombine.low %v620_v7, %v624_v8  ;;  %v8331_v7 = vcombine.low %v461_v56, %v465_v57 }
  0xff   : > { %3734 = vmatprep.subr.bf16.mxu1 %v8666_v23  ;;  %v8228_v23 = vcombine.high %v357_v17, %v361_v18 }
 0x100   : > { %3694 = vmatpush2.bf16.msra.mxu0 %v8537_v29  ;;  %v481_v29 = vld [vmem:[%s9285_s12 + $0x5b0] sm:$0xff] }
 0x101   : > { %3695 = vmatprep.subr.bf16.mxu0 %v8530_v32  ;;  %v8355_v32 = vcombine.low %v485_v19, %v489_v20  ;;  %v8348_v35 = vcombine.high %v477_v28, %v481_v29  ;;  %v8347_v45 = vcombine.low %v477_v28, %v481_v29  ;;  %v309_v20 = vld [vmem:[%s9285_s12 + $0x50] sm:$0xff] }
 0x102   : > { %3735 = vmatpush2.bf16.msra.mxu1 %v8665_v31  ;;  %v8227_v31 = vcombine.low %v357_v17, %v361_v18  ;;  %v301_v29 = vld [vmem:[%s9285_s12 + $0x10] sm:$0xff] }
 0x103   : > { %3736 = vmatprep.subr.bf16.mxu1 %v8658_v30  ;;  %v8220_v30 = vcombine.high %v349_v26, %v353_v27 }
 0x104   : > { %3696 = vmatpush2.bf16.msra.mxu0 %v8529_v39  ;;  %v469_v39 = vld [vmem:[%s9285_s12 + $0x550] sm:$0xff] }
 0x105   : > { %3697 = vmatprep.subr.bf16.mxu0 %v8522_v55 }
 0x106   : > { %3737 = vmatpush2.bf16.msra.mxu1 %v8657_v40  ;;  %v473_v40 = vld [vmem:[%s9285_s12 + $0x570] sm:$0xff] }
 0x107   : > { %3738 = vmatprep.subr.bf16.mxu1 %v8650_v41  ;;  %v8219_v41 = vcombine.low %v349_v26, %v353_v27 }
 0x108   : > { %3698 = vmatpush2.bf16.msra.mxu0 %v8521_v48 }
 0x109   : > { %3699 = vmatprep.subr.bf16.mxu0 %v8514_v50  ;;  %v333_v50 = vld [vmem:[%s9285_s12 + $0x110] sm:$0xff] }
 0x10a   : > { %3739 = vmatpush2.bf16.msra.mxu1 %v8649_v49  ;;  %v8340_v49 = vcombine.high %v469_v39, %v473_v40 }
 0x10b   : > { %3740 = vmatprep.subr.bf16.mxu1 %v8642_v51  ;;  %v337_v51 = vld [vmem:[%s9285_s12 + $0x130] sm:$0xff] }
 0x10c   : > { %3700 = vmatpush2.bf16.msra.mxu0 %v8513_v58  ;;  %v8204_v62 = vcombine.high %v333_v50, %v337_v51 }
 0x10d   : > { %3701 = vmatprep.subr.bf16.mxu0 %v8506_v60 }
 0x10e   : > { %3741 = vmatpush2.bf16.msra.mxu1 %v8641_v59  ;;  %v8211_v59 = vcombine.low %v341_v36, %v345_v37 }
 0x10f   : > { %3742 = vmatprep.subr.bf16.mxu1 %v8634_v61  ;;  %v8339_v61 = vcombine.low %v469_v39, %v473_v40  ;;  %v421_v39 = vld [vmem:[%s9285_s12 + $0x3d0] sm:$0xff] }
 0x110   : > { %3702 = vmatpush2.bf16.msra.mxu0 %v8505_v3  ;;  %v329_v3 = vld [vmem:[%s9285_s12 + $0xf0] sm:$0xff] }
 0x111   : > { %3703 = vmatprep.subr.bf16.mxu0 %v8498_v5  ;;  %v457_v5 = vld [vmem:[%s9285_s12 + $0x4f0] sm:$0xff]  ;;  %v8196_v8 = vcombine.high %v325_v2, %v329_v3 }
 0x112   : > { %3743 = vmatpush2.bf16.msra.mxu1 %v8633_v4  ;;  %v453_v4 = vld [vmem:[%s9285_s12 + $0x4d0] sm:$0xff] }
 0x113   : > { %3744 = vmatprep.subr.bf16.mxu1 %v8626_v6  ;;  %v8203_v6 = vcombine.low %v333_v50, %v337_v51  ;;  %v8324_v9 = vcombine.high %v453_v4, %v457_v5  ;;  %v8323_v17 = vcombine.low %v453_v4, %v457_v5  ;;  %v425_v40 = vld [vmem:[%s9285_s12 + $0x3f0] sm:$0xff] }
 0x114   : > { %3704 = vmatpush2.bf16.msra.mxu0 %v8497_v12  ;;  %v321_v12 = vld [vmem:[%s9285_s12 + $0xb0] sm:$0xff]  ;;  %v8291_v56 = vcombine.low %v421_v39, %v425_v40 }
 0x115   : > { %3705 = vmatprep.subr.bf16.mxu0 %v8490_v14  ;;  %v449_v14 = vld [vmem:[%s9285_s12 + $0x4b0] sm:$0xff]  ;;  %v8188_v18 = vcombine.high %v317_v10, %v321_v12 }
 0x116   : > { %3745 = vmatpush2.bf16.msra.mxu1 %v8625_v13  ;;  %v445_v13 = vld [vmem:[%s9285_s12 + $0x490] sm:$0xff] }
 0x117   : > { %3746 = vmatprep.subr.bf16.mxu1 %v8618_v16  ;;  %v8195_v16 = vcombine.low %v325_v2, %v329_v3  ;;  %v8316_v19 = vcombine.high %v445_v13, %v449_v14  ;;  %v8315_v26 = vcombine.low %v445_v13, %v449_v14  ;;  %v417_v50 = vld [vmem:[%s9285_s12 + $0x3b0] sm:$0xff] }
 0x118   : > { %3706 = vmatpush2.bf16.msra.mxu0 %v8489_v21  ;;  %v313_v21 = vld [vmem:[%s9285_s12 + $0x70] sm:$0xff] }
 0x119   : > { %3757 = vmatprep.subr.bf16.mxu0 %v8228_v23  ;;  %v441_v23 = vld [vmem:[%s9285_s12 + $0x470] sm:$0xff]  ;;  %v8180_v27 = vcombine.high %v309_v20, %v313_v21 }
 0x11a   : > { %3747 = vmatpush2.bf16.msra.mxu1 %v8617_v22  ;;  %v437_v22 = vld [vmem:[%s9285_s12 + $0x450] sm:$0xff] }
 0x11b   : > { %3798 = vmatprep.subr.bf16.mxu1 %v8356_v24  ;;  %v3463_v38 = vpop.f32.mrf.mxu0  ;;  %3708 = vmatmul.mubr.bf16.vlgmr.msra.gmra.mxu0 %v9361_v34  ;;  %v8187_v24 = vcombine.low %v317_v10, %v321_v12  ;;  %v8308_v28 = vcombine.high %v437_v22, %v441_v23  ;;  %v8307_v36 = vcombine.low %v437_v22, %v441_v23  ;;  %v541_v51 = vld [vmem:[%s9285_s12 + $0x790] sm:$0xff] }
 0x11c   : > { %3758 = vmatpush1.bf16.msra.mxu0 %v8227_v31  ;;  %3789 = vmatprep.mubr.bf16.mxu0 %v9338_v11  ;;  %v305_v31 = vld [vmem:[%s9285_s12 + $0x30] sm:$0xff] }
 0x11d   : > { %v3504_v55 = vpop.f32.mrf.mxu1  ;;  %3749 = vmatmul.mubr.bf16.vlgmr.msra.gmra.mxu1 %v9478_v52  ;;  %v3465_v44 = vpop.f32.mrf.mxu0  ;;  %3759 = vmatprep.subr.bf16.mxu0 %v8220_v30  ;;  %v433_v30 = vld [vmem:[%s9285_s12 + $0x430] sm:$0xff]  ;;  %v8172_v37 = vcombine.high %v301_v29, %v305_v31 }
 0x11e   : > { %v9622_v43 = vadd.f32 %v3504_v55, %v3463_v38  ;;  %3799 = vmatpush1.bf16.msra.mxu1 %v8355_v32  ;;  %3830 = vmatprep.mubr.bf16.mxu1 %v9345_v15  ;;  %v429_v32 = vld [vmem:[%s9285_s12 + $0x410] sm:$0xff] }
 0x11f   : > { %v3506_v48 = vpop.f32.mrf.mxu1  ;;  %3800 = vmatprep.subr.bf16.mxu1 %v8348_v35  ;;  %v3467_v54 = vpop.f32.mrf.mxu0  ;;  %v8179_v35 = vcombine.low %v309_v20, %v313_v21  ;;  %v8300_v38 = vcombine.high %v429_v32, %v433_v30  ;;  %v549_v55 = vld [vmem:[%s9285_s12 + $0x7d0] sm:$0xff] }
 0x120   : > { %v9627_v53 = vadd.f32 %v3506_v48, %v3465_v44  ;;  %3760 = vmatpush1.bf16.msra.mxu0 %v8219_v41  ;;  %v553_v41 = vld [vmem:[%s9285_s12 + $0x7f0] sm:$0xff]  ;;  %v8171_v44 = vcombine.low %v301_v29, %v305_v31 }
 0x121   : > { %v3508_v58 = vpop.f32.mrf.mxu1  ;;  %v3468_v60 = vpop.f32.mrf.mxu0  ;;  %3761 = vmatprep.subr.bf16.mxu0 %v8212_v47  ;;  %v8292_v47 = vcombine.high %v421_v39, %v425_v40  ;;  %v8420_v48 = vcombine.high %v549_v55, %v553_v41  ;;  %v545_v54 = vld [vmem:[%s9285_s12 + $0x7b0] sm:$0xff]  ;;  %v8419_v57 = vcombine.low %v549_v55, %v553_v41 }
 0x122   : > { %3801 = vmatpush1.bf16.msra.mxu1 %v8347_v45  ;;  %v8299_v45 = vcombine.low %v429_v32, %v433_v30  ;;  %v405_v60 = vld [vmem:[%s9285_s12 + $0x350] sm:$0xff]  ;;  %v8411_v2 = vcombine.low %v541_v51, %v545_v54 }
 0x123   : > { %v3509_v63 = vpop.f32.mrf.mxu1  ;;  %3802 = vmatprep.subr.bf16.mxu1 %v8340_v49  ;;  %v413_v49 = vld [vmem:[%s9285_s12 + $0x390] sm:$0xff] }
 0x124   : > { %3762 = vmatpush1.bf16.msra.mxu0 %v8211_v59  ;;  %v8284_v58 = vcombine.high %v413_v49, %v417_v50  ;;  %v8412_v59 = vcombine.high %v541_v51, %v545_v54  ;;  %v537_v63 = vld [vmem:[%s9285_s12 + $0x770] sm:$0xff] }
 0x125   : > { %3763 = vmatprep.subr.bf16.mxu0 %v8204_v62  ;;  %v533_v62 = vld [vmem:[%s9285_s12 + $0x750] sm:$0xff] }
 0x126   : > { %3803 = vmatpush1.bf16.msra.mxu1 %v8339_v61  ;;  %v409_v61 = vld [vmem:[%s9285_s12 + $0x370] sm:$0xff]  ;;  %v8404_v4 = vcombine.high %v533_v62, %v537_v63  ;;  %v8403_v10 = vcombine.low %v533_v62, %v537_v63 }
 0x127   : > { %3804 = vmatprep.subr.bf16.mxu1 %v8332_v0  ;;  %v8283_v0 = vcombine.low %v413_v49, %v417_v50  ;;  %v8276_v3 = vcombine.high %v405_v60, %v409_v61  ;;  %v397_v5 = vld [vmem:[%s9285_s12 + $0x310] sm:$0xff] }
 0x128   : > { %3764 = vmatpush1.bf16.msra.mxu0 %v8203_v6  ;;  %v401_v6 = vld [vmem:[%s9285_s12 + $0x330] sm:$0xff] }
 0x129   : > { %3765 = vmatprep.subr.bf16.mxu0 %v8196_v8  ;;  %v529_v8 = vld [vmem:[%s9285_s12 + $0x730] sm:$0xff]  ;;  %v8268_v12 = vcombine.high %v397_v5, %v401_v6 }
 0x12a   : > { %3805 = vmatpush1.bf16.msra.mxu1 %v8331_v7  ;;  %v525_v7 = vld [vmem:[%s9285_s12 + $0x710] sm:$0xff] }
 0x12b   : > { %3806 = vmatprep.subr.bf16.mxu1 %v8324_v9  ;;  %v8275_v9 = vcombine.low %v405_v60, %v409_v61  ;;  %v8396_v13 = vcombine.high %v525_v7, %v529_v8  ;;  %v389_v14 = vld [vmem:[%s9285_s12 + $0x2d0] sm:$0xff]  ;;  %v8395_v20 = vcombine.low %v525_v7, %v529_v8 }
 0x12c   : > { %3766 = vmatpush1.bf16.msra.mxu0 %v8195_v16  ;;  %v393_v16 = vld [vmem:[%s9285_s12 + $0x2f0] sm:$0xff] }
 0x12d   : > { %3767 = vmatprep.subr.bf16.mxu0 %v8188_v18  ;;  %v521_v18 = vld [vmem:[%s9285_s12 + $0x6f0] sm:$0xff]  ;;  %v8260_v21 = vcombine.high %v389_v14, %v393_v16 }
 0x12e   : > { %3807 = vmatpush1.bf16.msra.mxu1 %v8323_v17  ;;  %v517_v17 = vld [vmem:[%s9285_s12 + $0x6d0] sm:$0xff] }
 0x12f   : > { %3808 = vmatprep.subr.bf16.mxu1 %v8316_v19  ;;  %v8267_v19 = vcombine.low %v397_v5, %v401_v6  ;;  %v8388_v22 = vcombine.high %v517_v17, %v521_v18  ;;  %v381_v23 = vld [vmem:[%s9285_s12 + $0x290] sm:$0xff]  ;;  %v8387_v29 = vcombine.low %v517_v17, %v521_v18 }
 0x130   : > { %3768 = vmatpush1.bf16.msra.mxu0 %v8187_v24  ;;  %v385_v24 = vld [vmem:[%s9285_s12 + $0x2b0] sm:$0xff] }
 0x131   : > { %3769 = vmatprep.subr.bf16.mxu0 %v8180_v27  ;;  %v513_v27 = vld [vmem:[%s9285_s12 + $0x6b0] sm:$0xff]  ;;  %v8252_v31 = vcombine.high %v381_v23, %v385_v24 }
 0x132   : > { %3809 = vmatpush1.bf16.msra.mxu1 %v8315_v26  ;;  %v509_v26 = vld [vmem:[%s9285_s12 + $0x690] sm:$0xff] }
 0x133   : > { %3810 = vmatprep.subr.bf16.mxu1 %v8308_v28  ;;  %v8259_v28 = vcombine.low %v389_v14, %v393_v16  ;;  %v8380_v32 = vcombine.high %v509_v26, %v513_v27  ;;  %v373_v30 = vld [vmem:[%s9285_s12 + $0x250] sm:$0xff]  ;;  %v8379_v39 = vcombine.low %v509_v26, %v513_v27 }
 0x134   : > { %3770 = vmatpush1.bf16.msra.mxu0 %v8179_v35  ;;  %v377_v35 = vld [vmem:[%s9285_s12 + $0x270] sm:$0xff] }
 0x135   : > { %3771 = vmatprep.subr.bf16.mxu0 %v8172_v37  ;;  %v505_v37 = vld [vmem:[%s9285_s12 + $0x670] sm:$0xff]  ;;  %v8244_v40 = vcombine.high %v373_v30, %v377_v35 }
 0x136   : > { %3811 = vmatpush1.bf16.msra.mxu1 %v8307_v36  ;;  %v501_v36 = vld [vmem:[%s9285_s12 + $0x650] sm:$0xff] }
 0x137   : > { %3812 = vmatprep.subr.bf16.mxu1 %v8300_v38  ;;  %v8251_v38 = vcombine.low %v381_v23, %v385_v24  ;;  %v8372_v55 = vcombine.high %v501_v36, %v505_v37  ;;  %v365_v41 = vld [vmem:[%s9285_s12 + $0x210] sm:$0xff]  ;;  %v8371_v49 = vcombine.low %v501_v36, %v505_v37 }
 0x138   : > { %3772 = vmatpush1.bf16.msra.mxu0 %v8171_v44  ;;  %v369_v44 = vld [vmem:[%s9285_s12 + $0x230] sm:$0xff] }
 0x139   : > { %3773 = vmatprep.subr.bf16.mxu0 %v8292_v47  ;;  %v497_v47 = vld [vmem:[%s9285_s12 + $0x630] sm:$0xff]  ;;  %v8236_v50 = vcombine.high %v365_v41, %v369_v44 }
 0x13a   : > { %3813 = vmatpush1.bf16.msra.mxu1 %v8299_v45  ;;  %v493_v45 = vld [vmem:[%s9285_s12 + $0x610] sm:$0xff] }
 0x13b   : > { %3814 = vmatprep.subr.bf16.mxu1 %v8420_v48  ;;  %v8243_v48 = vcombine.low %v373_v30, %v377_v35  ;;  %v8364_v51 = vcombine.high %v493_v45, %v497_v47  ;;  %v613_v54 = vld [vmem:[%s9285_s12 + $0x9d0] sm:$0xff]  ;;  %v8363_v60 = vcombine.low %v493_v45, %v497_v47 }
 0x13c   : > { %3774 = vmatpush2.bf16.msra.mxu0 %v8291_v56  ;;  %v617_v56 = vld [vmem:[%s9285_s12 + $0x9f0] sm:$0xff] }
 0x13d   : > { %3775 = vmatprep.subr.bf16.mxu0 %v8284_v58  ;;  %v745_v58 = vld [vmem:[%s9285_s12 + $0xdf0] sm:$0xff]  ;;  %v8484_v61 = vcombine.high %v613_v54, %v617_v56 }
 0x13e   : > { %3815 = vmatpush2.bf16.msra.mxu1 %v8419_v57  ;;  %v741_v57 = vld [vmem:[%s9285_s12 + $0xdd0] sm:$0xff] }
 0x13f   : > { %3816 = vmatprep.subr.bf16.mxu1 %v8412_v59  ;;  %v8235_v59 = vcombine.low %v365_v41, %v369_v44  ;;  %v8612_v62 = vcombine.high %v741_v57, %v745_v58  ;;  %v605_v63 = vld [vmem:[%s9285_s12 + $0x990] sm:$0xff]  ;;  %v8611_v5 = vcombine.low %v741_v57, %v745_v58 }
 0x140   : > { %3776 = vmatpush2.bf16.msra.mxu0 %v8283_v0  ;;  %v609_v0 = vld [vmem:[%s9285_s12 + $0x9b0] sm:$0xff] }
 0x141   : > { %3777 = vmatprep.subr.bf16.mxu0 %v8276_v3  ;;  %v737_v3 = vld [vmem:[%s9285_s12 + $0xdb0] sm:$0xff]  ;;  %v8476_v6 = vcombine.high %v605_v63, %v609_v0  ;;  %v8475_v17 = vcombine.low %v605_v63, %v609_v0 }
 0x142   : > { %3817 = vmatpush2.bf16.msra.mxu1 %v8411_v2  ;;  %v733_v2 = vld [vmem:[%s9285_s12 + $0xd90] sm:$0xff] }
 0x143   : > { %3818 = vmatprep.subr.bf16.mxu1 %v8404_v4  ;;  %v8483_v4 = vcombine.low %v613_v54, %v617_v56  ;;  %v8604_v7 = vcombine.high %v733_v2, %v737_v3  ;;  %v597_v8 = vld [vmem:[%s9285_s12 + $0x950] sm:$0xff] }
 0x144   : > { %3778 = vmatpush2.bf16.msra.mxu0 %v8275_v9  ;;  %v601_v9 = vld [vmem:[%s9285_s12 + $0x970] sm:$0xff] }
 0x145   : > { %3779 = vmatprep.subr.bf16.mxu0 %v8268_v12  ;;  %v725_v12 = vld [vmem:[%s9285_s12 + $0xd50] sm:$0xff] }
 0x146   : > { %3819 = vmatpush2.bf16.msra.mxu1 %v8403_v10  ;;  %v589_v24 = vld [vmem:[%s9285_s12 + $0x910] sm:$0xff] }
 0x147   : > { %3820 = vmatprep.subr.bf16.mxu1 %v8396_v13  ;;  %v729_v13 = vld [vmem:[%s9285_s12 + $0xd70] sm:$0xff] }
 0x148   : > { %3780 = vmatpush2.bf16.msra.mxu0 %v8267_v19  ;;  %v8603_v19 = vcombine.low %v733_v2, %v737_v3  ;;  %v593_v26 = vld [vmem:[%s9285_s12 + $0x930] sm:$0xff]  ;;  %v8595_v35 = vcombine.low %v725_v12, %v729_v13 }
 0x149   : > { %3781 = vmatprep.subr.bf16.mxu0 %v8260_v21  ;;  %v8460_v36 = vcombine.high %v589_v24, %v593_v26  ;;  %v709_v41 = vld [vmem:[%s9285_s12 + $0xcd0] sm:$0xff]  ;;  %v8459_v45 = vcombine.low %v589_v24, %v593_v26 }
 0x14a   : > { %3821 = vmatpush2.bf16.msra.mxu1 %v8395_v20  ;;  %v8468_v20 = vcombine.high %v597_v8, %v601_v9  ;;  %v713_v44 = vld [vmem:[%s9285_s12 + $0xcf0] sm:$0xff] }
 0x14b   : > { %3822 = vmatprep.subr.bf16.mxu1 %v8388_v22  ;;  %v701_v54 = vld [vmem:[%s9285_s12 + $0xc90] sm:$0xff]  ;;  %v8579_v58 = vcombine.low %v709_v41, %v713_v44 }
 0x14c   : > { %3782 = vmatpush2.bf16.msra.mxu0 %v8259_v28  ;;  %v717_v28 = vld [vmem:[%s9285_s12 + $0xd10] sm:$0xff] }
 0x14d   : > { %3783 = vmatprep.subr.bf16.mxu0 %v8252_v31  ;;  %v705_v56 = vld [vmem:[%s9285_s12 + $0xcb0] sm:$0xff] }
 0x14e   : > { %3823 = vmatpush2.bf16.msra.mxu1 %v8387_v29  ;;  %v721_v29 = vld [vmem:[%s9285_s12 + $0xd30] sm:$0xff]  ;;  %v8571_v3 = vcombine.low %v701_v54, %v705_v56 }
 0x14f   : > { %3824 = vmatprep.subr.bf16.mxu1 %v8380_v32  ;;  %v8587_v47 = vcombine.low %v717_v28, %v721_v29  ;;  %v693_v63 = vld [vmem:[%s9285_s12 + $0xc50] sm:$0xff] }
 0x150   : > { %3784 = vmatpush2.bf16.msra.mxu0 %v8251_v38  ;;  %v697_v0 = vld [vmem:[%s9285_s12 + $0xc70] sm:$0xff] }
 0x151   : > { %3785 = vmatprep.subr.bf16.mxu0 %v8244_v40  ;;  %v581_v40 = vld [vmem:[%s9285_s12 + $0x8d0] sm:$0xff] }
 0x152   : > { %3825 = vmatpush2.bf16.msra.mxu1 %v8379_v39  ;;  %v8588_v39 = vcombine.high %v717_v28, %v721_v29  ;;  %v669_v24 = vld [vmem:[%s9285_s12 + $0xb90] sm:$0xff] }
 0x153   : > { %3826 = vmatprep.subr.bf16.mxu1 %v8372_v55  ;;  %v585_v55 = vld [vmem:[%s9285_s12 + $0x8f0] sm:$0xff] }
 0x154   : > { %3786 = vmatpush2.bf16.msra.mxu0 %v8243_v48  ;;  %v8452_v48 = vcombine.high %v581_v40, %v585_v55  ;;  %v8451_v57 = vcombine.low %v581_v40, %v585_v55  ;;  %v673_v26 = vld [vmem:[%s9285_s12 + $0xbb0] sm:$0xff] }
 0x155   : > { %3787 = vmatprep.subr.bf16.mxu0 %v8236_v50  ;;  %v573_v50 = vld [vmem:[%s9285_s12 + $0x890] sm:$0xff]  ;;  %v8539_v40 = vcombine.low %v669_v24, %v673_v26 }
 0x156   : > { %3827 = vmatpush2.bf16.msra.mxu1 %v8371_v49  ;;  %v8580_v49 = vcombine.high %v709_v41, %v713_v44  ;;  %v801_v28 = vld [vmem:[%s9285_s12 + $0xfb0] sm:$0xff] }
 0x157   : > { %3828 = vmatprep.subr.bf16.mxu1 %v8364_v51  ;;  %v577_v51 = vld [vmem:[%s9285_s12 + $0x8b0] sm:$0xff] }
 0x158   : > { %3788 = vmatpush2.bf16.msra.mxu0 %v8235_v59  ;;  %v8444_v59 = vcombine.high %v573_v50, %v577_v51  ;;  %v8443_v2 = vcombine.low %v573_v50, %v577_v51 }
 0x159   : > { %3839 = vmatprep.subr.bf16.mxu0 %v8484_v61  ;;  %v565_v61 = vld [vmem:[%s9285_s12 + $0x850] sm:$0xff] }
 0x15a   : > { %3829 = vmatpush2.bf16.msra.mxu1 %v8363_v60  ;;  %v8572_v60 = vcombine.high %v701_v54, %v705_v56 }
 0x15b   : > { %3880 = vmatprep.subr.bf16.mxu1 %v8612_v62  ;;  %v3545_v10 = vpop.f32.mrf.mxu0  ;;  %3790 = vmatmul.mubr.bf16.vlgmr.msra.gmra.mxu0 %v9391_v25  ;;  %v569_v62 = vld [vmem:[%s9285_s12 + $0x870] sm:$0xff] }
 0x15c   : > { %v3546_v14 = vadd.f32 %v3545_v10, %v9622_v43  ;;  %3840 = vmatpush1.bf16.msra.mxu0 %v8483_v4  ;;  %v8596_v43 = vcombine.high %v725_v12, %v729_v13  ;;  %3871 = vmatprep.mubr.bf16.mxu0 %v9398_v33  ;;  %v8436_v4 = vcombine.high %v565_v61, %v569_v62 }
 0x15d   : > { %v3586_v16 = vpop.f32.mrf.mxu1  ;;  %3831 = vmatmul.mubr.bf16.vlgmr.msra.gmra.mxu1 %v9402_v1  ;;  %v3547_v18 = vpop.f32.mrf.mxu0  ;;  %3841 = vmatprep.subr.bf16.mxu0 %v8476_v6  ;;  %v557_v6 = vld [vmem:[%s9285_s12 + $0x810] sm:$0xff]  ;;  %v8435_v10 = vcombine.low %v565_v61, %v569_v62  ;;  %v8563_v12 = vcombine.low %v693_v63, %v697_v0 }
 0x15e   : > { %3881 = vmatpush1.bf16.msra.mxu1 %v8611_v5  ;;  %v9695_v21 = vadd.f32 %v3586_v16, %v3546_v14  ;;  %v3548_v22 = vadd.f32 %v3547_v18, %v9627_v53  ;;  %3912 = vmatprep.mubr.bf16.mxu1 %v9411_v42  ;;  %v8467_v53 = vcombine.low %v597_v8, %v601_v9  ;;  %v685_v8 = vld [vmem:[%s9285_s12 + $0xc10] sm:$0xff] }
 0x15f   : > { %v3588_v23 = vpop.f32.mrf.mxu1  ;;  %3882 = vmatprep.subr.bf16.mxu1 %v8604_v7  ;;  %v3549_v27 = vpop.f32.mrf.mxu0  ;;  %v8564_v5 = vcombine.high %v693_v63, %v697_v0  ;;  %v561_v7 = vld [vmem:[%s9285_s12 + $0x830] sm:$0xff] }
 0x160   : > { %v9704_v31 = vadd.f32 %v3588_v23, %v3548_v22  ;;  %3842 = vmatpush1.bf16.msra.mxu0 %v8475_v17  ;;  %v689_v9 = vld [vmem:[%s9285_s12 + $0xc30] sm:$0xff]  ;;  %v8428_v13 = vcombine.high %v557_v6, %v561_v7 }
 0x161   : > { %v3590_v32 = vpop.f32.mrf.mxu1  ;;  %v3550_v30 = vpop.f32.mrf.mxu0  ;;  %3843 = vmatprep.subr.bf16.mxu0 %v8468_v20  ;;  %v8556_v14 = vcombine.high %v685_v8, %v689_v9  ;;  %v677_v16 = vld [vmem:[%s9285_s12 + $0xbd0] sm:$0xff]  ;;  %v8427_v20 = vcombine.low %v557_v6, %v561_v7  ;;  %v8555_v22 = vcombine.low %v685_v8, %v689_v9 }
 0x162   : > { %3883 = vmatpush1.bf16.msra.mxu1 %v8603_v19  ;;  %v4093_v37 = vcombine.low %v9695_v21, %v9704_v31  ;;  %v681_v17 = vld [vmem:[%s9285_s12 + $0xbf0] sm:$0xff]  ;;  %v702_v21 = vld [vmem:[%s9285_s12 + $0xc98] sm:$0xff] }
 0x163   : > { %v3591_v38 = vpop.f32.mrf.mxu1  ;;  %3884 = vmatprep.subr.bf16.mxu1 %v8596_v43  ;;  %v805_v18 = vld [vmem:[%s9285_s12 + $0xfd0] sm:$0xff]  ;;  %v8548_v23 = vcombine.high %v677_v16, %v681_v17  ;;  %v8547_v29 = vcombine.low %v677_v16, %v681_v17  ;;  %v706_v31 = vld [vmem:[%s9285_s12 + $0xcb8] sm:$0xff] }
 0x164   : > { %3844 = vmatpush1.bf16.msra.mxu0 %v8467_v53  ;;  %v809_v19 = vld [vmem:[%s9285_s12 + $0xff0] sm:$0xff]  ;;  %v8540_v53 = vcombine.high %v669_v24, %v673_v26 }
 0x165   : > { %3845 = vmatprep.subr.bf16.mxu0 %v8460_v36  ;;  %v8676_v43 = vcombine.high %v805_v18, %v809_v19  ;;  %v797_v27 = vld [vmem:[%s9285_s12 + $0xf90] sm:$0xff]  ;;  %v8675_v32 = vcombine.low %v805_v18, %v809_v19 }
 0x166   : > { %3885 = vmatpush1.bf16.msra.mxu1 %v8595_v35  ;;  %v8668_v30 = vcombine.high %v797_v27, %v801_v28  ;;  %v661_v35 = vld [vmem:[%s9285_s12 + $0xb50] sm:$0xff]  ;;  %v8667_v55 = vcombine.low %v797_v27, %v801_v28 }
 0x167   : > { %3886 = vmatprep.subr.bf16.mxu1 %v8588_v39  ;;  %v665_v36 = vld [vmem:[%s9285_s12 + $0xb70] sm:$0xff] }
 0x168   : > { %3846 = vmatpush1.bf16.msra.mxu0 %v8459_v45  ;;  %v789_v38 = vld [vmem:[%s9285_s12 + $0xf50] sm:$0xff]  ;;  %v8532_v41 = vcombine.high %v661_v35, %v665_v36  ;;  %v8531_v50 = vcombine.low %v661_v35, %v665_v36 }
 0x169   : > { %3847 = vmatprep.subr.bf16.mxu0 %v8452_v48  ;;  %v793_v39 = vld [vmem:[%s9285_s12 + $0xf70] sm:$0xff] }
 0x16a   : > { %3887 = vmatpush1.bf16.msra.mxu1 %v8587_v47  ;;  %v8660_v44 = vcombine.high %v789_v38, %v793_v39  ;;  %v653_v45 = vld [vmem:[%s9285_s12 + $0xb10] sm:$0xff]  ;;  %v8659_v51 = vcombine.low %v789_v38, %v793_v39 }
 0x16b   : > { %3888 = vmatprep.subr.bf16.mxu1 %v8580_v49  ;;  %v657_v47 = vld [vmem:[%s9285_s12 + $0xb30] sm:$0xff] }
 0x16c   : > { %3848 = vmatpush1.bf16.msra.mxu0 %v8451_v57  ;;  %v781_v48 = vld [vmem:[%s9285_s12 + $0xf10] sm:$0xff]  ;;  %v8524_v54 = vcombine.high %v653_v45, %v657_v47  ;;  %v8523_v61 = vcombine.low %v653_v45, %v657_v47 }
 0x16d   : > { %3849 = vmatprep.subr.bf16.mxu0 %v8444_v59  ;;  %v785_v49 = vld [vmem:[%s9285_s12 + $0xf30] sm:$0xff] }
 0x16e   : > { %3889 = vmatpush1.bf16.msra.mxu1 %v8579_v58  ;;  %v8652_v56 = vcombine.high %v781_v48, %v785_v49  ;;  %v645_v57 = vld [vmem:[%s9285_s12 + $0xad0] sm:$0xff]  ;;  %v8651_v62 = vcombine.low %v781_v48, %v785_v49 }
 0x16f   : > { %3890 = vmatprep.subr.bf16.mxu1 %v8572_v60  ;;  %v649_v58 = vld [vmem:[%s9285_s12 + $0xaf0] sm:$0xff] }
 0x170   : > { %3850 = vmatpush1.bf16.msra.mxu0 %v8443_v2  ;;  %v773_v59 = vld [vmem:[%s9285_s12 + $0xed0] sm:$0xff]  ;;  %v8516_v63 = vcombine.high %v645_v57, %v649_v58  ;;  %v8515_v6 = vcombine.low %v645_v57, %v649_v58  ;;  %v474_v57 = vld [vmem:[%s9285_s12 + $0x578] sm:$0xff] }
 0x171   : > { %3851 = vmatprep.subr.bf16.mxu0 %v8436_v4  ;;  %v777_v60 = vld [vmem:[%s9285_s12 + $0xef0] sm:$0xff] }
 0x172   : > { %3891 = vmatpush1.bf16.msra.mxu1 %v8571_v3  ;;  %v8644_v0 = vcombine.high %v773_v59, %v777_v60  ;;  %v637_v2 = vld [vmem:[%s9285_s12 + $0xa90] sm:$0xff]  ;;  %v8643_v7 = vcombine.low %v773_v59, %v777_v60 }
 0x173   : > { %3892 = vmatprep.subr.bf16.mxu1 %v8564_v5  ;;  %v641_v3 = vld [vmem:[%s9285_s12 + $0xab0] sm:$0xff] }
 0x174   : > { %3852 = vmatpush1.bf16.msra.mxu0 %v8435_v10  ;;  %v765_v4 = vld [vmem:[%s9285_s12 + $0xe90] sm:$0xff]  ;;  %v8508_v8 = vcombine.high %v637_v2, %v641_v3  ;;  %v8507_v16 = vcombine.low %v637_v2, %v641_v3  ;;  %v334_v2 = vld [vmem:[%s9285_s12 + $0x118] sm:$0xff] }
 0x175   : > { %3853 = vmatprep.subr.bf16.mxu0 %v8428_v13  ;;  %v769_v5 = vld [vmem:[%s9285_s12 + $0xeb0] sm:$0xff]  ;;  %v338_v3 = vld [vmem:[%s9285_s12 + $0x138] sm:$0xff] }
 0x176   : > { %3893 = vmatpush1.bf16.msra.mxu1 %v8563_v12  ;;  %v8636_v9 = vcombine.high %v765_v4, %v769_v5  ;;  %v629_v10 = vld [vmem:[%s9285_s12 + $0xa50] sm:$0xff]  ;;  %v8635_v17 = vcombine.low %v765_v4, %v769_v5  ;;  %v462_v5 = vld [vmem:[%s9285_s12 + $0x518] sm:$0xff] }
 0x177   : > { %3894 = vmatprep.subr.bf16.mxu1 %v8556_v14  ;;  %v633_v12 = vld [vmem:[%s9285_s12 + $0xa70] sm:$0xff] }
 0x178   : > { %3854 = vmatpush1.bf16.msra.mxu0 %v8427_v20  ;;  %v757_v13 = vld [vmem:[%s9285_s12 + $0xe50] sm:$0xff]  ;;  %v8500_v18 = vcombine.high %v629_v10, %v633_v12  ;;  %v8499_v24 = vcombine.low %v629_v10, %v633_v12  ;;  %v8206_v12 = vcombine.high %v334_v2, %v338_v3 }
 0x179   : > { %3855 = vmatprep.subr.bf16.mxu0 %v8548_v23  ;;  %v761_v14 = vld [vmem:[%s9285_s12 + $0xe70] sm:$0xff] }
 0x17a   : > { %3895 = vmatpush1.bf16.msra.mxu1 %v8555_v22  ;;  %v8628_v19 = vcombine.high %v757_v13, %v761_v14  ;;  %v621_v20 = vld [vmem:[%s9285_s12 + $0xa10] sm:$0xff]  ;;  %v8627_v26 = vcombine.low %v757_v13, %v761_v14  ;;  %v326_v14 = vld [vmem:[%s9285_s12 + $0xd8] sm:$0xff] }
 0x17b   : > { %3896 = vmatprep.subr.bf16.mxu1 %v8676_v43  ;;  %v625_v22 = vld [vmem:[%s9285_s12 + $0xa30] sm:$0xff] }
 0x17c   : > { %3856 = vmatpush2.bf16.msra.mxu0 %v8547_v29  ;;  %v749_v23 = vld [vmem:[%s9285_s12 + $0xe10] sm:$0xff]  ;;  %v8492_v27 = vcombine.high %v621_v20, %v625_v22  ;;  %v358_v29 = vld [vmem:[%s9285_s12 + $0x1d8] sm:$0xff]  ;;  %v8491_v35 = vcombine.low %v621_v20, %v625_v22 }
 0x17d   : > { %3857 = vmatprep.subr.bf16.mxu0 %v8540_v53  ;;  %v753_v43 = vld [vmem:[%s9285_s12 + $0xe30] sm:$0xff]  ;;  %v486_v53 = vld [vmem:[%s9285_s12 + $0x5d8] sm:$0xff] }
 0x17e   : > { %3897 = vmatpush2.bf16.msra.mxu1 %v8675_v32  ;;  %v8620_v28 = vcombine.high %v749_v23, %v753_v43  ;;  %v362_v32 = vld [vmem:[%s9285_s12 + $0x1f8] sm:$0xff]  ;;  %v8619_v36 = vcombine.low %v749_v23, %v753_v43 }
 0x17f   : > { %3898 = vmatprep.subr.bf16.mxu1 %v8668_v30  ;;  %v490_v30 = vld [vmem:[%s9285_s12 + $0x5f8] sm:$0xff]  ;;  %v8230_v38 = vcombine.high %v358_v29, %v362_v32  ;;  %v8229_v45 = vcombine.low %v358_v29, %v362_v32 }
 0x180   : > { %3858 = vmatpush2.bf16.msra.mxu0 %v8539_v40  ;;  %v8358_v39 = vcombine.high %v486_v53, %v490_v30  ;;  %v350_v40 = vld [vmem:[%s9285_s12 + $0x198] sm:$0xff]  ;;  %v8357_v47 = vcombine.low %v486_v53, %v490_v30 }
 0x181   : > { %3859 = vmatprep.subr.bf16.mxu0 %v8532_v41  ;;  %v478_v41 = vld [vmem:[%s9285_s12 + $0x598] sm:$0xff] }
 0x182   : > { %3899 = vmatpush2.bf16.msra.mxu1 %v8667_v55  ;;  %v354_v55 = vld [vmem:[%s9285_s12 + $0x1b8] sm:$0xff] }
 0x183   : > { %3900 = vmatprep.subr.bf16.mxu1 %v8660_v44  ;;  %v482_v44 = vld [vmem:[%s9285_s12 + $0x5b8] sm:$0xff]  ;;  %v8222_v48 = vcombine.high %v350_v40, %v354_v55  ;;  %v8221_v59 = vcombine.low %v350_v40, %v354_v55 }
 0x184   : > { %3860 = vmatpush2.bf16.msra.mxu0 %v8531_v50  ;;  %v8350_v49 = vcombine.high %v478_v41, %v482_v44  ;;  %v342_v50 = vld [vmem:[%s9285_s12 + $0x158] sm:$0xff] }
 0x185   : > { %3861 = vmatprep.subr.bf16.mxu0 %v8524_v54  ;;  %v318_v23 = vld [vmem:[%s9285_s12 + $0x98] sm:$0xff] }
 0x186   : > { %3901 = vmatpush2.bf16.msra.mxu1 %v8659_v51  ;;  %v346_v51 = vld [vmem:[%s9285_s12 + $0x178] sm:$0xff] }
 0x187   : > { %3902 = vmatprep.subr.bf16.mxu1 %v8652_v56  ;;  %v470_v56 = vld [vmem:[%s9285_s12 + $0x558] sm:$0xff] }
 0x188   : > { %3862 = vmatpush2.bf16.msra.mxu0 %v8523_v61  ;;  %v8349_v61 = vcombine.low %v478_v41, %v482_v44  ;;  %v8341_v10 = vcombine.low %v470_v56, %v474_v57  ;;  %v322_v43 = vld [vmem:[%s9285_s12 + $0xb8] sm:$0xff] }
 0x189   : > { %3863 = vmatprep.subr.bf16.mxu0 %v8516_v63  ;;  %v8190_v29 = vcombine.high %v318_v23, %v322_v43  ;;  %v310_v53 = vld [vmem:[%s9285_s12 + $0x58] sm:$0xff] }
 0x18a   : > { %3903 = vmatpush2.bf16.msra.mxu1 %v8651_v62  ;;  %v8214_v62 = vcombine.high %v342_v50, %v346_v51  ;;  %v314_v30 = vld [vmem:[%s9285_s12 + $0x78] sm:$0xff] }
 0x18b   : > { %3904 = vmatprep.subr.bf16.mxu1 %v8644_v0  ;;  %v8342_v0 = vcombine.high %v470_v56, %v474_v57  ;;  %v8182_v40 = vcombine.high %v310_v53, %v314_v30  ;;  %v302_v41 = vld [vmem:[%s9285_s12 + $0x18] sm:$0xff] }
 0x18c   : > { %3864 = vmatpush2.bf16.msra.mxu0 %v8515_v6  ;;  %v466_v6 = vld [vmem:[%s9285_s12 + $0x538] sm:$0xff] }
 0x18d   : > { %3865 = vmatprep.subr.bf16.mxu0 %v8508_v8  ;;  %v8213_v8 = vcombine.low %v342_v50, %v346_v51  ;;  %v306_v44 = vld [vmem:[%s9285_s12 + $0x38] sm:$0xff] }
 0x18e   : > { %3905 = vmatpush2.bf16.msra.mxu1 %v8643_v7  ;;  %v8174_v50 = vcombine.high %v302_v41, %v306_v44  ;;  %v422_v56 = vld [vmem:[%s9285_s12 + $0x3d8] sm:$0xff] }
 0x18f   : > { %3906 = vmatprep.subr.bf16.mxu1 %v8636_v9  ;;  %v426_v57 = vld [vmem:[%s9285_s12 + $0x3f8] sm:$0xff] }
 0x190   : > { %3866 = vmatpush2.bf16.msra.mxu0 %v8507_v16  ;;  %v330_v16 = vld [vmem:[%s9285_s12 + $0xf8] sm:$0xff] }
 0x191   : > { %3867 = vmatprep.subr.bf16.mxu0 %v8500_v18  ;;  %v458_v18 = vld [vmem:[%s9285_s12 + $0x4f8] sm:$0xff]  ;;  %v8198_v20 = vcombine.high %v326_v14, %v330_v16 }
 0x192   : > { %3907 = vmatpush2.bf16.msra.mxu1 %v8635_v17  ;;  %v454_v17 = vld [vmem:[%s9285_s12 + $0x4d8] sm:$0xff] }
 0x193   : > { %3908 = vmatprep.subr.bf16.mxu1 %v8628_v19  ;;  %v8333_v19 = vcombine.low %v462_v5, %v466_v6  ;;  %v8326_v22 = vcombine.high %v454_v17, %v458_v18 }
 0x194   : > { %3868 = vmatpush2.bf16.msra.mxu0 %v8499_v24  ;;  %v446_v24 = vld [vmem:[%s9285_s12 + $0x498] sm:$0xff] }
 0x195   : > { %3869 = vmatprep.subr.bf16.mxu0 %v8492_v27  ;;  %v8197_v27 = vcombine.low %v326_v14, %v330_v16  ;;  %v534_v14 = vld [vmem:[%s9285_s12 + $0x758] sm:$0xff] }
 0x196   : > { %3909 = vmatpush2.bf16.msra.mxu1 %v8627_v26  ;;  %v450_v26 = vld [vmem:[%s9285_s12 + $0x4b8] sm:$0xff] }
 0x197   : > { %3910 = vmatprep.subr.bf16.mxu1 %v8620_v28  ;;  %v8325_v28 = vcombine.low %v454_v17, %v458_v18  ;;  %v8318_v32 = vcombine.high %v446_v24, %v450_v26  ;;  %v538_v16 = vld [vmem:[%s9285_s12 + $0x778] sm:$0xff] }
 0x198   : > { %3870 = vmatpush2.bf16.msra.mxu0 %v8491_v35  ;;  %v438_v35 = vld [vmem:[%s9285_s12 + $0x458] sm:$0xff] }
 0x199   : > { %3921 = vmatprep.subr.bf16.mxu0 %v8230_v38  ;;  %v8189_v38 = vcombine.low %v318_v23, %v322_v43  ;;  %v526_v23 = vld [vmem:[%s9285_s12 + $0x718] sm:$0xff] }
 0x19a   : > { %3911 = vmatpush2.bf16.msra.mxu1 %v8619_v36  ;;  %v442_v36 = vld [vmem:[%s9285_s12 + $0x478] sm:$0xff] }
 0x19b   : > { %3962 = vmatprep.subr.bf16.mxu1 %v8358_v39  ;;  %v9766_v54 = vpop.f32.mrf.mxu0  ;;  %3872 = vmatmul.mubr.bf16.vlgmr.msra.gmra.mxu0 %v9361_v34  ;;  %v8317_v39 = vcombine.low %v446_v24, %v450_v26  ;;  %v8310_v55 = vcombine.high %v438_v35, %v442_v36  ;;  %v530_v43 = vld [vmem:[%s9285_s12 + $0x738] sm:$0xff]  ;;  %v8405_v26 = vcombine.low %v534_v14, %v538_v16 }
 0x19c   : > { %3922 = vmatpush1.bf16.msra.mxu0 %v8229_v45  ;;  %3953 = vmatprep.mubr.bf16.mxu0 %v9338_v11  ;;  %v8334_v11 = vcombine.high %v462_v5, %v466_v6  ;;  %v430_v45 = vld [vmem:[%s9285_s12 + $0x418] sm:$0xff] }
 0x19d   : > { %v9771_v58 = vpop.f32.mrf.mxu1  ;;  %3913 = vmatmul.mubr.bf16.vlgmr.msra.gmra.mxu1 %v9478_v52  ;;  %v9774_v60 = vpop.f32.mrf.mxu0  ;;  %3923 = vmatprep.subr.bf16.mxu0 %v8222_v48  ;;  %v8181_v48 = vcombine.low %v310_v53, %v314_v30  ;;  %v418_v5 = vld [vmem:[%s9285_s12 + $0x3b8] sm:$0xff] }
 0x19e   : > { %3963 = vmatpush1.bf16.msra.mxu1 %v8357_v47  ;;  %3994 = vmatprep.mubr.bf16.mxu1 %v9345_v15  ;;  %v8205_v15 = vcombine.low %v334_v2, %v338_v3  ;;  %v434_v47 = vld [vmem:[%s9285_s12 + $0x438] sm:$0xff]  ;;  %v8294_v2 = vcombine.high %v422_v56, %v426_v57 }
 0x19f   : > { %v9776_v63 = vpop.f32.mrf.mxu1  ;;  %3964 = vmatprep.subr.bf16.mxu1 %v8350_v49  ;;  %v3631_v4 = vpop.f32.mrf.mxu0  ;;  %v8309_v49 = vcombine.low %v438_v35, %v442_v36  ;;  %v8302_v51 = vcombine.high %v430_v45, %v434_v47  ;;  %v542_v6 = vld [vmem:[%s9285_s12 + $0x798] sm:$0xff]  ;;  %v8397_v36 = vcombine.low %v526_v23, %v530_v43 }
 0x1a0   : > { %3924 = vmatpush1.bf16.msra.mxu0 %v8221_v59  ;;  %v550_v59 = vld [vmem:[%s9285_s12 + $0x7d8] sm:$0xff] }
 0x1a1   : > { %v3672_v7 = vpop.f32.mrf.mxu1  ;;  %v3632_v9 = vpop.f32.mrf.mxu0  ;;  %3925 = vmatprep.subr.bf16.mxu0 %v8214_v62  ;;  %v8173_v62 = vcombine.low %v302_v41, %v306_v44  ;;  %v414_v4 = vld [vmem:[%s9285_s12 + $0x398] sm:$0xff] }
 0x1a2   : > { %3965 = vmatpush1.bf16.msra.mxu1 %v8349_v61  ;;  %v554_v61 = vld [vmem:[%s9285_s12 + $0x7f8] sm:$0xff]  ;;  %v8285_v17 = vcombine.low %v414_v4, %v418_v5 }
 0x1a3   : > { %v3673_v13 = vpop.f32.mrf.mxu1  ;;  %3966 = vmatprep.subr.bf16.mxu1 %v8342_v0  ;;  %v8301_v0 = vcombine.low %v430_v45, %v434_v47  ;;  %v8422_v3 = vcombine.high %v550_v59, %v554_v61  ;;  %v546_v7 = vld [vmem:[%s9285_s12 + $0x7b8] sm:$0xff]  ;;  %v8421_v9 = vcombine.low %v550_v59, %v554_v61 }
 0x1a4   : > { %3926 = vmatpush1.bf16.msra.mxu0 %v8213_v8  ;;  %v8293_v8 = vcombine.low %v422_v56, %v426_v57  ;;  %v406_v13 = vld [vmem:[%s9285_s12 + $0x358] sm:$0xff]  ;;  %v8413_v18 = vcombine.low %v542_v6, %v546_v7 }
 0x1a5   : > { %3927 = vmatprep.subr.bf16.mxu0 %v8206_v12  ;;  %v8414_v12 = vcombine.high %v542_v6, %v546_v7  ;;  %v518_v53 = vld [vmem:[%s9285_s12 + $0x6d8] sm:$0xff] }
 0x1a6   : > { %3967 = vmatpush1.bf16.msra.mxu1 %v8341_v10  ;;  %v8286_v10 = vcombine.high %v414_v4, %v418_v5  ;;  %v522_v30 = vld [vmem:[%s9285_s12 + $0x6f8] sm:$0xff] }
 0x1a7   : > { %3968 = vmatprep.subr.bf16.mxu1 %v8334_v11  ;;  %v410_v11 = vld [vmem:[%s9285_s12 + $0x378] sm:$0xff]  ;;  %v8389_v47 = vcombine.low %v518_v53, %v522_v30 }
 0x1a8   : > { %3928 = vmatpush1.bf16.msra.mxu0 %v8205_v15  ;;  %v8278_v15 = vcombine.high %v406_v13, %v410_v11  ;;  %v8277_v24 = vcombine.low %v406_v13, %v410_v11  ;;  %v510_v41 = vld [vmem:[%s9285_s12 + $0x698] sm:$0xff] }
 0x1a9   : > { %3929 = vmatprep.subr.bf16.mxu0 %v8198_v20  ;;  %v398_v20 = vld [vmem:[%s9285_s12 + $0x318] sm:$0xff] }
 0x1aa   : > { %3969 = vmatpush1.bf16.msra.mxu1 %v8333_v19  ;;  %v8406_v19 = vcombine.high %v534_v14, %v538_v16  ;;  %v514_v44 = vld [vmem:[%s9285_s12 + $0x6b8] sm:$0xff] }
 0x1ab   : > { %3970 = vmatprep.subr.bf16.mxu1 %v8326_v22  ;;  %v402_v22 = vld [vmem:[%s9285_s12 + $0x338] sm:$0xff]  ;;  %v8381_v61 = vcombine.low %v510_v41, %v514_v44 }
 0x1ac   : > { %3930 = vmatpush1.bf16.msra.mxu0 %v8197_v27  ;;  %v8270_v27 = vcombine.high %v398_v20, %v402_v22  ;;  %v8269_v35 = vcombine.low %v398_v20, %v402_v22  ;;  %v502_v56 = vld [vmem:[%s9285_s12 + $0x658] sm:$0xff] }
 0x1ad   : > { %3931 = vmatprep.subr.bf16.mxu0 %v8190_v29  ;;  %v390_v29 = vld [vmem:[%s9285_s12 + $0x2d8] sm:$0xff] }
 0x1ae   : > { %3971 = vmatpush1.bf16.msra.mxu1 %v8325_v28  ;;  %v8398_v28 = vcombine.high %v526_v23, %v530_v43  ;;  %v506_v57 = vld [vmem:[%s9285_s12 + $0x678] sm:$0xff]  ;;  %v9220_v23 = vmov 1983009808  }
 0x1af   : > { %3972 = vmatprep.subr.bf16.mxu1 %v8318_v32  ;;  %v394_v32 = vld [vmem:[%s9285_s12 + $0x2f8] sm:$0xff]  ;;  %v8373_v7 = vcombine.low %v502_v56, %v506_v57  ;;  %v4096_v43 = vunpack.c.l.s4 %v9220_v23 }
 0x1b0   : > { %3932 = vmatpush1.bf16.msra.mxu0 %v8189_v38  ;;  %v8262_v38 = vcombine.high %v390_v29, %v394_v32  ;;  %v8261_v45 = vcombine.low %v390_v29, %v394_v32  ;;  %v494_v4 = vld [vmem:[%s9285_s12 + $0x618] sm:$0xff] }
 0x1b1   : > { %3933 = vmatprep.subr.bf16.mxu0 %v8182_v40  ;;  %v382_v40 = vld [vmem:[%s9285_s12 + $0x298] sm:$0xff] }
 0x1b2   : > { %3973 = vmatpush1.bf16.msra.mxu1 %v8317_v39  ;;  %v8390_v39 = vcombine.high %v518_v53, %v522_v30  ;;  %v498_v5 = vld [vmem:[%s9285_s12 + $0x638] sm:$0xff] }
 0x1b3   : > { %3974 = vmatprep.subr.bf16.mxu1 %v8310_v55  ;;  %v386_v55 = vld [vmem:[%s9285_s12 + $0x2b8] sm:$0xff]  ;;  %v8365_v16 = vcombine.low %v494_v4, %v498_v5 }
 0x1b4   : > { %3934 = vmatpush1.bf16.msra.mxu0 %v8181_v48  ;;  %v8254_v48 = vcombine.high %v382_v40, %v386_v55  ;;  %v8253_v59 = vcombine.low %v382_v40, %v386_v55  ;;  %v742_v13 = vld [vmem:[%s9285_s12 + $0xdd8] sm:$0xff] }
 0x1b5   : > { %3935 = vmatprep.subr.bf16.mxu0 %v8174_v50  ;;  %v374_v50 = vld [vmem:[%s9285_s12 + $0x258] sm:$0xff] }
 0x1b6   : > { %3975 = vmatpush1.bf16.msra.mxu1 %v8309_v49  ;;  %v8382_v49 = vcombine.high %v510_v41, %v514_v44  ;;  %v746_v11 = vld [vmem:[%s9285_s12 + $0xdf8] sm:$0xff] }
 0x1b7   : > { %3976 = vmatprep.subr.bf16.mxu1 %v8302_v51  ;;  %v378_v51 = vld [vmem:[%s9285_s12 + $0x278] sm:$0xff] }
 0x1b8   : > { %3936 = vmatpush1.bf16.msra.mxu0 %v8173_v62  ;;  %v8246_v62 = vcombine.high %v374_v50, %v378_v51  ;;  %v8245_v6 = vcombine.low %v374_v50, %v378_v51  ;;  %v734_v20 = vld [vmem:[%s9285_s12 + $0xd98] sm:$0xff] }
 0x1b9   : > { %3937 = vmatprep.subr.bf16.mxu0 %v8294_v2  ;;  %v366_v2 = vld [vmem:[%s9285_s12 + $0x218] sm:$0xff] }
 0x1ba   : > { %3977 = vmatpush1.bf16.msra.mxu1 %v8301_v0  ;;  %v8374_v0 = vcombine.high %v502_v56, %v506_v57  ;;  %v738_v22 = vld [vmem:[%s9285_s12 + $0xdb8] sm:$0xff] }
 0x1bb   : > { %3978 = vmatprep.subr.bf16.mxu1 %v8422_v3  ;;  %v370_v3 = vld [vmem:[%s9285_s12 + $0x238] sm:$0xff]  ;;  %v8606_v29 = vcombine.high %v734_v20, %v738_v22 }
 0x1bc   : > { %3938 = vmatpush2.bf16.msra.mxu0 %v8293_v8  ;;  %v8238_v8 = vcombine.high %v366_v2, %v370_v3  ;;  %v8237_v14 = vcombine.low %v366_v2, %v370_v3  ;;  %v598_v32 = vld [vmem:[%s9285_s12 + $0x958] sm:$0xff] }
 0x1bd   : > { %3939 = vmatprep.subr.bf16.mxu0 %v8286_v10  ;;  %v614_v10 = vld [vmem:[%s9285_s12 + $0x9d8] sm:$0xff] }
 0x1be   : > { %3979 = vmatpush2.bf16.msra.mxu1 %v8421_v9  ;;  %v8366_v9 = vcombine.high %v494_v4, %v498_v5  ;;  %v602_v53 = vld [vmem:[%s9285_s12 + $0x978] sm:$0xff] }
 0x1bf   : > { %3980 = vmatprep.subr.bf16.mxu1 %v8414_v12  ;;  %v618_v12 = vld [vmem:[%s9285_s12 + $0x9f8] sm:$0xff]  ;;  %v8470_v41 = vcombine.high %v598_v32, %v602_v53 }
 0x1c0   : > { %3940 = vmatpush2.bf16.msra.mxu0 %v8285_v17  ;;  %v8486_v17 = vcombine.high %v614_v10, %v618_v12  ;;  %v582_v3 = vld [vmem:[%s9285_s12 + $0x8d8] sm:$0xff] }
 0x1c1   : > { %3941 = vmatprep.subr.bf16.mxu0 %v8278_v15  ;;  %v606_v15 = vld [vmem:[%s9285_s12 + $0x998] sm:$0xff] }
 0x1c2   : > { %3981 = vmatpush2.bf16.msra.mxu1 %v8413_v18  ;;  %v8614_v18 = vcombine.high %v742_v13, %v746_v11  ;;  %v586_v4 = vld [vmem:[%s9285_s12 + $0x8f8] sm:$0xff] }
 0x1c3   : > { %3982 = vmatprep.subr.bf16.mxu1 %v8406_v19  ;;  %v610_v19 = vld [vmem:[%s9285_s12 + $0x9b8] sm:$0xff] }
 0x1c4   : > { %3942 = vmatpush2.bf16.msra.mxu0 %v8277_v24  ;;  %v8485_v24 = vcombine.low %v614_v10, %v618_v12  ;;  %v710_v5 = vld [vmem:[%s9285_s12 + $0xcd8] sm:$0xff]  ;;  %v296_v10 = vld [vmem:[#allocation2] sm:$0xff] }
 0x1c5   : > { %3943 = vmatprep.subr.bf16.mxu0 %v8270_v27  ;;  %v8478_v27 = vcombine.high %v606_v15, %v610_v19  ;;  %v570_v23 = vld [vmem:[%s9285_s12 + $0x878] sm:$0xff] }
 0x1c6   : > { %3983 = vmatpush2.bf16.msra.mxu1 %v8405_v26  ;;  %v8613_v26 = vcombine.low %v742_v13, %v746_v11  ;;  %v8454_v13 = vcombine.high %v582_v3, %v586_v4 }
 0x1c7   : > { %3984 = vmatprep.subr.bf16.mxu1 %v8398_v28  ;;  %v3669_v28 = vadd.f32 %v9771_v58, %v9766_v54  ;;  %v8477_v54 = vcombine.low %v606_v15, %v610_v19 }
 0x1c8   : > { %3944 = vmatpush2.bf16.msra.mxu0 %v8269_v35  ;;  %v726_v35 = vld [vmem:[%s9285_s12 + $0xd58] sm:$0xff] }
 0x1c9   : > { %3945 = vmatprep.subr.bf16.mxu0 %v8262_v38  ;;  %v4097_v38 = vunpack.c.0.s8 %v4096_v43  ;;  %v694_v43 = vld [vmem:[%s9285_s12 + $0xc58] sm:$0xff] }
 0x1ca   : > { %3985 = vmatpush2.bf16.msra.mxu1 %v8397_v36  ;;  %v730_v36 = vld [vmem:[%s9285_s12 + $0xd78] sm:$0xff] }
 0x1cb   : > { %3986 = vmatprep.subr.bf16.mxu1 %v8390_v39  ;;  %v3671_v39 = vadd.f32 %v9776_v63, %v9774_v60  ;;  %v594_v60 = vld [vmem:[%s9285_s12 + $0x938] sm:$0xff]  ;;  %v9857_v50 = vsub.s32 %v4097_v38, %v9310_v46 }
 0x1cc   : > { %3946 = vmatpush2.bf16.msra.mxu0 %v8261_v45 }
 0x1cd   : > { %3947 = vmatprep.subr.bf16.mxu0 %v8254_v48  ;;  %v590_v48 = vld [vmem:[%s9285_s12 + $0x918] sm:$0xff] }
 0x1ce   : > { %3987 = vmatpush2.bf16.msra.mxu1 %v8389_v47  ;;  %v8598_v47 = vcombine.high %v726_v35, %v730_v36 }
 0x1cf   : > { %3988 = vmatprep.subr.bf16.mxu1 %v8382_v49  ;;  %v718_v49 = vld [vmem:[%s9285_s12 + $0xd18] sm:$0xff] }
 0x1d0   : > { %3948 = vmatpush2.bf16.msra.mxu0 %v8253_v59  ;;  %v8469_v59 = vcombine.low %v598_v32, %v602_v53  ;;  %v558_v32 = vld [vmem:[%s9285_s12 + $0x818] sm:$0xff] }
 0x1d1   : > { %3949 = vmatprep.subr.bf16.mxu0 %v8246_v62  ;;  %v8462_v62 = vcombine.high %v590_v48, %v594_v60  ;;  %v562_v53 = vld [vmem:[%s9285_s12 + $0x838] sm:$0xff] }
 0x1d2   : > { %3989 = vmatpush2.bf16.msra.mxu1 %v8381_v61 }
 0x1d3   : > { %3990 = vmatprep.subr.bf16.mxu1 %v8374_v0 }
 0x1d4   : > { %3950 = vmatpush2.bf16.msra.mxu0 %v8245_v6  ;;  %v714_v6 = vld [vmem:[%s9285_s12 + $0xcf8] sm:$0xff] }
 0x1d5   : > { %3951 = vmatprep.subr.bf16.mxu0 %v8238_v8  ;;  %v8581_v15 = vcombine.low %v710_v5, %v714_v6 }
 0x1d6   : > { %3991 = vmatpush2.bf16.msra.mxu1 %v8373_v7  ;;  %v4101_v7 = vrot.slane %v4093_v37, %v9857_v50 }
 0x1d7   : > { %3992 = vmatprep.subr.bf16.mxu1 %v8366_v9  ;;  %v8461_v9 = vcombine.low %v590_v48, %v594_v60  ;;  %v670_v48 = vld [vmem:[%s9285_s12 + $0xb98] sm:$0xff] }
 0x1d8   : > { %3952 = vmatpush2.bf16.msra.mxu0 %v8237_v14  ;;  %v8582_v14 = vcombine.high %v710_v5, %v714_v6  ;;  %v674_v60 = vld [vmem:[%s9285_s12 + $0xbb8] sm:$0xff] }
 0x1d9   : > { %4003 = vmatprep.subr.bf16.mxu0 %v8486_v17  ;;  %v578_v17 = vld [vmem:[%s9285_s12 + $0x8b8] sm:$0xff] }
 0x1da   : > { %3993 = vmatpush2.bf16.msra.mxu1 %v8365_v16  ;;  %v574_v16 = vld [vmem:[%s9285_s12 + $0x898] sm:$0xff] }
 0x1db   : > { %4044 = vmatprep.subr.bf16.mxu1 %v8614_v18  ;;  %v3709_v30 = vpop.f32.mrf.mxu0  ;;  %3954 = vmatmul.mubr.bf16.vlgmr.msra.gmra.mxu0 %v9391_v25  ;;  %v8605_v25 = vcombine.low %v734_v20, %v738_v22  ;;  %v8453_v18 = vcombine.low %v582_v3, %v586_v4  ;;  %v8446_v19 = vcombine.high %v574_v16, %v578_v17  ;;  %v566_v22 = vld [vmem:[%s9285_s12 + $0x858] sm:$0xff] }
 0x1dc   : > { %v3710_v40 = vadd.f32 %v3709_v30, %v3669_v28  ;;  %4004 = vmatpush1.bf16.msra.mxu0 %v8485_v24  ;;  %4035 = vmatprep.mubr.bf16.mxu0 %v9398_v33  ;;  %v8597_v33 = vcombine.low %v726_v35, %v730_v36  ;;  %v8574_v20 = vcombine.high %v702_v21, %v706_v31  ;;  %v698_v24 = vld [vmem:[%s9285_s12 + $0xc78] sm:$0xff] }
 0x1dd   : > { %v3750_v55 = vpop.f32.mrf.mxu1  ;;  %3995 = vmatmul.mubr.bf16.vlgmr.msra.gmra.mxu1 %v9402_v1  ;;  %v3711_v58 = vpop.f32.mrf.mxu0  ;;  %4005 = vmatprep.subr.bf16.mxu0 %v8478_v27  ;;  %v722_v1 = vld [vmem:[%s9285_s12 + $0xd38] sm:$0xff]  ;;  %v8573_v27 = vcombine.low %v702_v21, %v706_v31  ;;  %v8438_v28 = vcombine.high %v566_v22, %v570_v23  ;;  %v8437_v36 = vcombine.low %v566_v22, %v570_v23 }
 0x1de   : > { %4045 = vmatpush1.bf16.msra.mxu1 %v8613_v26  ;;  %v3712_v44 = vadd.f32 %v3711_v58, %v3671_v39  ;;  %4076 = vmatprep.mubr.bf16.mxu1 %v9411_v42  ;;  %v3751_v51 = vadd.f32 %v3750_v55, %v3710_v40  ;;  %v8590_v42 = vcombine.high %v718_v49, %v722_v1  ;;  %v686_v30 = vld [vmem:[%s9285_s12 + $0xc18] sm:$0xff] }
 0x1df   : > { %v3752_v45 = vpop.f32.mrf.mxu1  ;;  %4046 = vmatprep.subr.bf16.mxu1 %v8606_v29  ;;  %v3713_v63 = vpop.f32.mrf.mxu0  ;;  %v8589_v12 = vcombine.low %v718_v49, %v722_v1  ;;  %v8445_v26 = vcombine.low %v574_v16, %v578_v17  ;;  %v8566_v29 = vcombine.high %v694_v43, %v698_v24  ;;  %v690_v35 = vld [vmem:[%s9285_s12 + $0xc38] sm:$0xff]  ;;  %v8565_v38 = vcombine.low %v694_v43, %v698_v24 }
 0x1e0   : > { %v3753_v56 = vadd.f32 %v3752_v45, %v3712_v44  ;;  %4006 = vmatpush1.bf16.msra.mxu0 %v8477_v54  ;;  %v8430_v39 = vcombine.high %v558_v32, %v562_v53  ;;  %v8558_v40 = vcombine.high %v686_v30, %v690_v35  ;;  %v678_v55 = vld [vmem:[%s9285_s12 + $0xbd8] sm:$0xff]  ;;  %v8557_v44 = vcombine.low %v686_v30, %v690_v35 }
 0x1e1   : > { %v3754_v57 = vpop.f32.mrf.mxu1  ;;  %v3714_v61 = vpop.f32.mrf.mxu0  ;;  %4007 = vmatprep.subr.bf16.mxu0 %v8470_v41  ;;  %v682_v54 = vld [vmem:[%s9285_s12 + $0xbf8] sm:$0xff]  ;;  %v8429_v41 = vcombine.low %v558_v32, %v562_v53 }
 0x1e2   : > { %4047 = vmatpush1.bf16.msra.mxu1 %v8605_v25  ;;  %v4094_v0 = vcombine.low %v3751_v51, %v3753_v56  ;;  %v806_v58 = vld [vmem:[%s9285_s12 + $0xfd8] sm:$0xff]  ;;  %v8550_v45 = vcombine.high %v678_v55, %v682_v54  ;;  %v8549_v1 = vcombine.low %v678_v55, %v682_v54  ;;  %v8542_v56 = vcombine.high %v670_v48, %v674_v60 }
 0x1e3   : > { %v3755_v2 = vpop.f32.mrf.mxu1  ;;  %4048 = vmatprep.subr.bf16.mxu1 %v8598_v47  ;;  %v810_v25 = vld [vmem:[%s9285_s12 + $0xff8] sm:$0xff] }
 0x1e4   : > { %v4108_v8 = vrot.slane %v4094_v0, %v9857_v50  ;;  %4008 = vmatpush1.bf16.msra.mxu0 %v8469_v59  ;;  %v8678_v47 = vcombine.high %v806_v58, %v810_v25  ;;  %v798_v63 = vld [vmem:[%s9285_s12 + $0xf98] sm:$0xff]  ;;  %v8677_v51 = vcombine.low %v806_v58, %v810_v25  ;;  %v8541_v0 = vcombine.low %v670_v48, %v674_v60 }
 0x1e5   : > { %4009 = vmatprep.subr.bf16.mxu0 %v8462_v62  ;;  %v802_v49 = vld [vmem:[%s9285_s12 + $0xfb8] sm:$0xff] }
 0x1e6   : > { %4049 = vmatpush1.bf16.msra.mxu1 %v8597_v33  ;;  %v4109_v11 = vcombine.low %v4101_v7, %v4108_v8  ;;  %v8670_v57 = vcombine.high %v798_v63, %v802_v49  ;;  %v662_v59 = vld [vmem:[%s9285_s12 + $0xb58] sm:$0xff]  ;;  %v8669_v2 = vcombine.low %v798_v63, %v802_v49 }
 0x1e7   : > { %4050 = vmatprep.subr.bf16.mxu1 %v8590_v42  ;;  %v666_v61 = vld [vmem:[%s9285_s12 + $0xb78] sm:$0xff] }
 0x1e8   : > { %v4129_v37 = vadd.f32 %v4109_v11, %v296_v10  ;;  %4010 = vmatpush1.bf16.msra.mxu0 %v8461_v9  ;;  %v790_v33 = vld [vmem:[%s9285_s12 + $0xf58] sm:$0xff]  ;;  %v8534_v42 = vcombine.high %v662_v59, %v666_v61  ;;  %v8533_v8 = vcombine.low %v662_v59, %v666_v61 }
 0x1e9   : > { %4011 = vmatprep.subr.bf16.mxu0 %v8454_v13  ;;  %v794_v62 = vld [vmem:[%s9285_s12 + $0xf78] sm:$0xff] }
 0x1ea   : > { %4051 = vmatpush1.bf16.msra.mxu1 %v8589_v12  ;;  %4131 = vst [vmem:[#allocation2] sm:$0xff] %v4129_v37  ;;  %v8662_v3 = vcombine.high %v790_v33, %v794_v62  ;;  %v654_v4 = vld [vmem:[%s9285_s12 + $0xb18] sm:$0xff]  ;;  %v8661_v9 = vcombine.low %v790_v33, %v794_v62 }
 0x1eb   : > { %4052 = vmatprep.subr.bf16.mxu1 %v8582_v14  ;;  %v658_v5 = vld [vmem:[%s9285_s12 + $0xb38] sm:$0xff] }
 0x1ec   : > { %4012 = vmatpush1.bf16.msra.mxu0 %v8453_v18  ;;  %v782_v6 = vld [vmem:[%s9285_s12 + $0xf18] sm:$0xff]  ;;  %v8526_v10 = vcombine.high %v654_v4, %v658_v5  ;;  %v8525_v17 = vcombine.low %v654_v4, %v658_v5 }
 0x1ed   : > { %4013 = vmatprep.subr.bf16.mxu0 %v8446_v19  ;;  %v786_v7 = vld [vmem:[%s9285_s12 + $0xf38] sm:$0xff] }
 0x1ee   : > { %4053 = vmatpush1.bf16.msra.mxu1 %v8581_v15  ;;  %v8654_v12 = vcombine.high %v782_v6, %v786_v7  ;;  %v646_v13 = vld [vmem:[%s9285_s12 + $0xad8] sm:$0xff]  ;;  %v8653_v21 = vcombine.low %v782_v6, %v786_v7 }
 0x1ef   : > { %4054 = vmatprep.subr.bf16.mxu1 %v8574_v20  ;;  %v650_v11 = vld [vmem:[%s9285_s12 + $0xaf8] sm:$0xff] }
 0x1f0   : > { %4014 = vmatpush1.bf16.msra.mxu0 %v8445_v26  ;;  %v774_v14 = vld [vmem:[%s9285_s12 + $0xed8] sm:$0xff]  ;;  %v8518_v31 = vcombine.high %v646_v13, %v650_v11  ;;  %v8517_v22 = vcombine.low %v646_v13, %v650_v11 }
 0x1f1   : > { %4015 = vmatprep.subr.bf16.mxu0 %v8438_v28  ;;  %v778_v16 = vld [vmem:[%s9285_s12 + $0xef8] sm:$0xff] }
 0x1f2   : > { %4055 = vmatpush1.bf16.msra.mxu1 %v8573_v27  ;;  %v8646_v37 = vcombine.high %v774_v14, %v778_v16  ;;  %v638_v18 = vld [vmem:[%s9285_s12 + $0xa98] sm:$0xff]  ;;  %v8645_v23 = vcombine.low %v774_v14, %v778_v16 }
 0x1f3   : > { %4056 = vmatprep.subr.bf16.mxu1 %v8566_v29  ;;  %v642_v15 = vld [vmem:[%s9285_s12 + $0xab8] sm:$0xff] }
 0x1f4   : > { %4016 = vmatpush1.bf16.msra.mxu0 %v8437_v36  ;;  %v766_v19 = vld [vmem:[%s9285_s12 + $0xe98] sm:$0xff]  ;;  %v8510_v43 = vcombine.high %v638_v18, %v642_v15  ;;  %v8509_v32 = vcombine.low %v638_v18, %v642_v15 }
 0x1f5   : > { %4017 = vmatprep.subr.bf16.mxu0 %v8430_v39  ;;  %v770_v20 = vld [vmem:[%s9285_s12 + $0xeb8] sm:$0xff] }
 0x1f6   : > { %4057 = vmatpush1.bf16.msra.mxu1 %v8565_v38  ;;  %v8638_v24 = vcombine.high %v766_v19, %v770_v20  ;;  %v630_v26 = vld [vmem:[%s9285_s12 + $0xa58] sm:$0xff]  ;;  %v8637_v53 = vcombine.low %v766_v19, %v770_v20 }
 0x1f7   : > { %4058 = vmatprep.subr.bf16.mxu1 %v8558_v40  ;;  %v634_v27 = vld [vmem:[%s9285_s12 + $0xa78] sm:$0xff] }
 0x1f8   : > { %4018 = vmatpush1.bf16.msra.mxu0 %v8429_v41  ;;  %v758_v28 = vld [vmem:[%s9285_s12 + $0xe58] sm:$0xff]  ;;  %v8502_v30 = vcombine.high %v630_v26, %v634_v27  ;;  %v8501_v55 = vcombine.low %v630_v26, %v634_v27 }
 0x1f9   : > { %4019 = vmatprep.subr.bf16.mxu0 %v8550_v45  ;;  %v762_v29 = vld [vmem:[%s9285_s12 + $0xe78] sm:$0xff] }
 0x1fa   : > { %4059 = vmatpush1.bf16.msra.mxu1 %v8557_v44  ;;  %v8630_v35 = vcombine.high %v758_v28, %v762_v29  ;;  %v622_v36 = vld [vmem:[%s9285_s12 + $0xa18] sm:$0xff]  ;;  %v8629_v54 = vcombine.low %v758_v28, %v762_v29 }
 0x1fb   : > { %4060 = vmatprep.subr.bf16.mxu1 %v8678_v47  ;;  %v626_v38 = vld [vmem:[%s9285_s12 + $0xa38] sm:$0xff] }
 0x1fc   : > { %4020 = vmatpush2.bf16.msra.mxu0 %v8549_v1  ;;  %v750_v39 = vld [vmem:[%s9285_s12 + $0xe18] sm:$0xff]  ;;  %v8494_v58 = vcombine.high %v622_v36, %v626_v38  ;;  %v8493_v41 = vcombine.low %v622_v36, %v626_v38 }
 0x1fd   : > { %4021 = vmatprep.subr.bf16.mxu0 %v8542_v56  ;;  %v754_v40 = vld [vmem:[%s9285_s12 + $0xe38] sm:$0xff] }
 0x1fe   : > { %4061 = vmatpush2.bf16.msra.mxu1 %v8677_v51  ;;  %v8622_v25 = vcombine.high %v750_v39, %v754_v40  ;;  %v8621_v44 = vcombine.low %v750_v39, %v754_v40 }
 0x1ff   : > { %4062 = vmatprep.subr.bf16.mxu1 %v8670_v57 }
 0x200   : > { %4022 = vmatpush2.bf16.msra.mxu0 %v8541_v0 }
 0x201   : > { %4023 = vmatprep.subr.bf16.mxu0 %v8534_v42 }
 0x202   : > { %4063 = vmatpush2.bf16.msra.mxu1 %v8669_v2 }
 0x203   : > { %4064 = vmatprep.subr.bf16.mxu1 %v8662_v3 }
 0x204   : > { %4024 = vmatpush2.bf16.msra.mxu0 %v8533_v8 }
 0x205   : > { %4025 = vmatprep.subr.bf16.mxu0 %v8526_v10 }
 0x206   : > { %4065 = vmatpush2.bf16.msra.mxu1 %v8661_v9 }
 0x207   : > { %4066 = vmatprep.subr.bf16.mxu1 %v8654_v12 }
 0x208   : > { %4026 = vmatpush2.bf16.msra.mxu0 %v8525_v17 }
 0x209   : > { %4027 = vmatprep.subr.bf16.mxu0 %v8518_v31 }
 0x20a   : > { %4067 = vmatpush2.bf16.msra.mxu1 %v8653_v21 }
 0x20b   : > { %4068 = vmatprep.subr.bf16.mxu1 %v8646_v37 }
 0x20c   : > { %4028 = vmatpush2.bf16.msra.mxu0 %v8517_v22 }
 0x20d   : > { %4029 = vmatprep.subr.bf16.mxu0 %v8510_v43 }
 0x20e   : > { %4069 = vmatpush2.bf16.msra.mxu1 %v8645_v23 }
 0x20f   : > { %4070 = vmatprep.subr.bf16.mxu1 %v8638_v24 }
 0x210   : > { %4030 = vmatpush2.bf16.msra.mxu0 %v8509_v32  ;;  %v297_v32 = vld [vmem:[#allocation2 + $0x8] sm:$0xff] }
 0x211   : > { %4031 = vmatprep.subr.bf16.mxu0 %v8502_v30 }
 0x212   : > { %4071 = vmatpush2.bf16.msra.mxu1 %v8637_v53 }
 0x213   : > { %4072 = vmatprep.subr.bf16.mxu1 %v8630_v35 }
 0x214   : > { %4032 = vmatpush2.bf16.msra.mxu0 %v8501_v55 }
 0x215   : > { %4033 = vmatprep.subr.bf16.mxu0 %v8494_v58 }
 0x216   : > { %4073 = vmatpush2.bf16.msra.mxu1 %v8629_v54 }
 0x217   : > { %4074 = vmatprep.subr.bf16.mxu1 %v8622_v25 }
 0x218   : > { %4034 = vmatpush2.bf16.msra.mxu0 %v8493_v41 }
 0x21a   : > { %4075 = vmatpush2.bf16.msra.mxu1 %v8621_v44 }
 0x21b   : > { %v3791_v45 = vpop.f32.mrf.mxu0  ;;  %4036 = vmatmul.mubr.bf16.vlgmr.msra.gmra.mxu0 %v9361_v34 }
 0x21d   : > { %v3832_v47 = vpop.f32.mrf.mxu1  ;;  %4077 = vmatmul.mubr.bf16.vlgmr.msra.gmra.mxu1 %v9478_v52  ;;  %v3793_v60 = vpop.f32.mrf.mxu0 }
 0x21e   : > { %v3833_v48 = vadd.f32 %v3832_v47, %v3791_v45 }
 0x21f   : > { %v3834_v63 = vpop.f32.mrf.mxu1  ;;  %v3795_v1 = vpop.f32.mrf.mxu0 }
 0x220   : > { %v3835_v49 = vadd.f32 %v3834_v63, %v3793_v60 }
 0x221   : > { %v3836_v51 = vpop.f32.mrf.mxu1  ;;  %v3796_v56 = vpop.f32.mrf.mxu0 }
 0x223   : > { %v3837_v57 = vpop.f32.mrf.mxu1 }
 0x25b   : > { %v3873_v59 = vpop.f32.mrf.mxu0 }
 0x25c   : > { %v3874_v61 = vadd.f32 %v3873_v59, %v3833_v48 }
 0x25d   : > { %v3914_v33 = vpop.f32.mrf.mxu1  ;;  %v3875_v62 = vpop.f32.mrf.mxu0 }
 0x25e   : > { %v3915_v0 = vadd.f32 %v3914_v33, %v3874_v61  ;;  %v3876_v2 = vadd.f32 %v3875_v62, %v3835_v49 }
 0x25f   : > { %v3916_v42 = vpop.f32.mrf.mxu1  ;;  %v3877_v3 = vpop.f32.mrf.mxu0 }
 0x260   : > { %v3917_v34 = vadd.f32 %v3916_v42, %v3876_v2 }
 0x261   : > { %v3918_v4 = vpop.f32.mrf.mxu1  ;;  %v3878_v5 = vpop.f32.mrf.mxu0 }
 0x262   : > { %v4110_v52 = vcombine.low %v3915_v0, %v3917_v34 }
 0x263   : > { %v3919_v6 = vpop.f32.mrf.mxu1 }
 0x264   : > { %v4118_v28 = vrot.slane %v4110_v52, %v9857_v50 }
 0x29b   : > { %v3955_v7 = vpop.f32.mrf.mxu0 }
 0x29d   : > { %v3996_v8 = vpop.f32.mrf.mxu1  ;;  %v3957_v9 = vpop.f32.mrf.mxu0 }
 0x29e   : > { %v3997_v16 = vadd.f32 %v3996_v8, %v3955_v7 }
 0x29f   : > { %v3998_v10 = vpop.f32.mrf.mxu1  ;;  %v3959_v12 = vpop.f32.mrf.mxu0 }
 0x2a0   : > { %v3999_v21 = vadd.f32 %v3998_v10, %v3957_v9 }
 0x2a1   : > { %v4000_v13 = vpop.f32.mrf.mxu1  ;;  %v3960_v11 = vpop.f32.mrf.mxu0 }
 0x2a3   : > { %v4001_v14 = vpop.f32.mrf.mxu1 }
 0x2db   : > { %v4037_v17 = vpop.f32.mrf.mxu0 }
 0x2dc   : > { %v4038_v31 = vadd.f32 %v4037_v17, %v3997_v16 }
 0x2dd   : > { %v4078_v37 = vpop.f32.mrf.mxu1  ;;  %v4039_v18 = vpop.f32.mrf.mxu0 }
 0x2de   : > { %v4040_v15 = vadd.f32 %v4039_v18, %v3999_v21  ;;  %v4079_v22 = vadd.f32 %v4078_v37, %v4038_v31 }
 0x2df   : > { %v4080_v19 = vpop.f32.mrf.mxu1  ;;  %v4041_v20 = vpop.f32.mrf.mxu0 }
 0x2e0   : > { %v4081_v23 = vadd.f32 %v4080_v19, %v4040_v15 }
 0x2e1   : > { %v4082_v43 = vpop.f32.mrf.mxu1  ;;  %v4042_v24 = vpop.f32.mrf.mxu0 }
 0x2e2   : > { %v4111_v26 = vcombine.low %v4079_v22, %v4081_v23 }
 0x2e3   : > { %v4083_v27 = vpop.f32.mrf.mxu1 }
 0x2e4   : > { %v4125_v29 = vrot.slane %v4111_v26, %v9857_v50 }
 0x2e6   : > { %v4126_v53 = vcombine.low %v4118_v28, %v4125_v29  ;;  %4136 = sbr.rel (%p8679_p6) target bundleno = 1612 (0x64c), region = 56 }
 0x2e8   : > { %v4130_v30 = vadd.f32 %v4126_v53, %v297_v32 }
 0x2ea   : > { %4132 = vst [vmem:[#allocation2 + $0x8] sm:$0xff] %v4130_v30 }
 0x2eb   : > { %v4321_v35 = vld [vmem:[%s11653_s3 + $0x1c0] sm:$0xff]  ;;  %v9996_v15 = vsub.s32 0, %v9310_v46  ;;  %v9999_v19 = vsub.s32 1, %v9310_v46  ;;  %v10008_v23 = vsub.s32 2, %v9310_v46  ;;  %v10011_v43 = vsub.s32 3, %v9310_v46 }
 0x2ec   : > { %v4325_v36 = vld [vmem:[%s11653_s3 + $0x1e0] sm:$0xff]  ;;  %vm8093_vm0 = vcmask 1041408   ;;  %vm8119_vm1 = vcmask 1024  }
 0x2ed   : > { %v4449_v38 = vld [vmem:[%s11653_s3 + $0x5c0] sm:$0xff]  ;;  %v8737_v39 = vcombine.high %v4321_v35, %v4325_v36  ;;  %v8736_v55 = vcombine.low %v4321_v35, %v4325_v36 }
 0x2ee   : > { %v4453_v40 = vld [vmem:[%s11653_s3 + $0x5e0] sm:$0xff] }
 0x2ef   : > { %v4313_v54 = vld [vmem:[%s11653_s3 + $0x180] sm:$0xff]  ;;  %v8865_v25 = vcombine.high %v4449_v38, %v4453_v40  ;;  %v8864_v41 = vcombine.low %v4449_v38, %v4453_v40  ;;  %7379 = vmatprep.subr.bf16.mxu0 %v8737_v39 }
 0x2f0   : > { %v4317_v58 = vld [vmem:[%s11653_s3 + $0x1a0] sm:$0xff]  ;;  %7380 = vmatpush1.bf16.msra.mxu0 %v8736_v55 }
 0x2f1   : > { %v8729_v44 = vcombine.high %v4313_v54, %v4317_v58  ;;  %v4441_v45 = vld [vmem:[%s11653_s3 + $0x580] sm:$0xff]  ;;  %7420 = vmatprep.subr.bf16.mxu1 %v8865_v25  ;;  %v8728_v51 = vcombine.low %v4313_v54, %v4317_v58 }
 0x2f2   : > { %v4445_v47 = vld [vmem:[%s11653_s3 + $0x5a0] sm:$0xff]  ;;  %7421 = vmatpush1.bf16.msra.mxu1 %v8864_v41 }
 0x2f3   : > { %v4305_v48 = vld [vmem:[%s11653_s3 + $0x140] sm:$0xff]  ;;  %v8857_v60 = vcombine.high %v4441_v45, %v4445_v47  ;;  %7381 = vmatprep.subr.bf16.mxu0 %v8729_v44  ;;  %v8856_v56 = vcombine.low %v4441_v45, %v4445_v47 }
 0x2f4   : > { %v4309_v63 = vld [vmem:[%s11653_s3 + $0x160] sm:$0xff]  ;;  %7382 = vmatpush1.bf16.msra.mxu0 %v8728_v51 }
 0x2f5   : > { %v4433_v49 = vld [vmem:[%s11653_s3 + $0x540] sm:$0xff]  ;;  %v8721_v57 = vcombine.high %v4305_v48, %v4309_v63  ;;  %7422 = vmatprep.subr.bf16.mxu1 %v8857_v60  ;;  %v8720_v2 = vcombine.low %v4305_v48, %v4309_v63 }
 0x2f6   : > { %v4437_v1 = vld [vmem:[%s11653_s3 + $0x560] sm:$0xff]  ;;  %7423 = vmatpush1.bf16.msra.mxu1 %v8856_v56 }
 0x2f7   : > { %v8849_v59 = vcombine.high %v4433_v49, %v4437_v1  ;;  %v4297_v61 = vld [vmem:[%s11653_s3 + $0x100] sm:$0xff]  ;;  %7383 = vmatprep.subr.bf16.mxu0 %v8721_v57  ;;  %v8848_v42 = vcombine.low %v4433_v49, %v4437_v1 }
 0x2f8   : > { %v4301_v33 = vld [vmem:[%s11653_s3 + $0x120] sm:$0xff]  ;;  %7384 = vmatpush1.bf16.msra.mxu0 %v8720_v2 }
 0x2f9   : > { %v4425_v62 = vld [vmem:[%s11653_s3 + $0x500] sm:$0xff]  ;;  %v8713_v3 = vcombine.high %v4297_v61, %v4301_v33  ;;  %7424 = vmatprep.subr.bf16.mxu1 %v8849_v59  ;;  %v8712_v7 = vcombine.low %v4297_v61, %v4301_v33 }
 0x2fa   : > { %v4429_v0 = vld [vmem:[%s11653_s3 + $0x520] sm:$0xff]  ;;  %7425 = vmatpush1.bf16.msra.mxu1 %v8848_v42 }
 0x2fb   : > { %v8841_v34 = vcombine.high %v4425_v62, %v4429_v0  ;;  %v4289_v4 = vld [vmem:[%s11653_s3 + $0xc0] sm:$0xff]  ;;  %7385 = vmatprep.subr.bf16.mxu0 %v8713_v3  ;;  %v8840_v8 = vcombine.low %v4425_v62, %v4429_v0 }
 0x2fc   : > { %v4293_v5 = vld [vmem:[%s11653_s3 + $0xe0] sm:$0xff]  ;;  %7386 = vmatpush1.bf16.msra.mxu0 %v8712_v7 }
 0x2fd   : > { %v4417_v52 = vld [vmem:[%s11653_s3 + $0x4c0] sm:$0xff]  ;;  %v8705_v9 = vcombine.high %v4289_v4, %v4293_v5  ;;  %7426 = vmatprep.subr.bf16.mxu1 %v8841_v34  ;;  %v8704_v16 = vcombine.low %v4289_v4, %v4293_v5 }
 0x2fe   : > { %v4421_v6 = vld [vmem:[%s11653_s3 + $0x4e0] sm:$0xff]  ;;  %7427 = vmatpush1.bf16.msra.mxu1 %v8840_v8 }
 0x2ff   : > { %v8833_v10 = vcombine.high %v4417_v52, %v4421_v6  ;;  %v4281_v12 = vld [vmem:[%s11653_s3 + $0x80] sm:$0xff]  ;;  %7387 = vmatprep.subr.bf16.mxu0 %v8705_v9  ;;  %v8832_v17 = vcombine.low %v4417_v52, %v4421_v6 }
 0x300   : > { %v4285_v13 = vld [vmem:[%s11653_s3 + $0xa0] sm:$0xff]  ;;  %7388 = vmatpush1.bf16.msra.mxu0 %v8704_v16 }
 0x301   : > { %v4409_v11 = vld [vmem:[%s11653_s3 + $0x480] sm:$0xff]  ;;  %v8697_v21 = vcombine.high %v4281_v12, %v4285_v13  ;;  %7428 = vmatprep.subr.bf16.mxu1 %v8833_v10  ;;  %v8696_v24 = vcombine.low %v4281_v12, %v4285_v13 }
 0x302   : > { %v4413_v14 = vld [vmem:[%s11653_s3 + $0x4a0] sm:$0xff]  ;;  %7429 = vmatpush1.bf16.msra.mxu1 %v8832_v17 }
 0x303   : > { %v8825_v31 = vcombine.high %v4409_v11, %v4413_v14  ;;  %v4273_v37 = vld [vmem:[%s11653_s3 + $0x40] sm:$0xff]  ;;  %7389 = vmatprep.subr.bf16.mxu0 %v8697_v21  ;;  %v8824_v26 = vcombine.low %v4409_v11, %v4413_v14 }
 0x304   : > { %v4277_v18 = vld [vmem:[%s11653_s3 + $0x60] sm:$0xff]  ;;  %7390 = vmatpush1.bf16.msra.mxu0 %v8696_v24 }
 0x305   : > { %v4401_v20 = vld [vmem:[%s11653_s3 + $0x440] sm:$0xff]  ;;  %v8689_v27 = vcombine.high %v4273_v37, %v4277_v18  ;;  %7430 = vmatprep.subr.bf16.mxu1 %v8825_v31  ;;  %v8688_v55 = vcombine.low %v4273_v37, %v4277_v18 }
 0x306   : > { %v4405_v22 = vld [vmem:[%s11653_s3 + $0x460] sm:$0xff]  ;;  %7431 = vmatpush1.bf16.msra.mxu1 %v8824_v26  ;;  %v10101_v26 = vsub.s32 4, %v9310_v46 }
 0x307   : > { %v10016_v28 = vld [vmem:[%s11652_s2] sm:$0xff]  ;;  %v8817_v29 = vcombine.high %v4401_v20, %v4405_v22  ;;  %7391 = vmatprep.subr.bf16.mxu0 %v8689_v27  ;;  %v8816_v58 = vcombine.low %v4401_v20, %v4405_v22 }
 0x308   : > { %v4265_v32 = vld [vmem:[%s11653_s3] sm:$0xff]  ;;  %v4144_v30 = vrot.slane %v10016_v28, %v9996_v15  ;;  %v4148_v35 = vrot.slane %v10016_v28, %v9999_v19  ;;  %v4152_v39 = vrot.slane %v10016_v28, %v10008_v23  ;;  %v4156_v40 = vrot.slane %v10016_v28, %v10011_v43  ;;  %7392 = vmatpush1.bf16.msra.mxu0 %v8688_v55 }
 0x309   : > { %v4269_v53 = vld [vmem:[%s11653_s3 + $0x20] sm:$0xff]  ;;  %7432 = vmatprep.subr.bf16.mxu1 %v8817_v29  ;;  %v10104_v29 = vsub.s32 5, %v9310_v46 }
 0x30a   : > { %v4393_v36 = vld [vmem:[%s11653_s3 + $0x400] sm:$0xff]  ;;  %v4173_v54 = vcombine.low %v4144_v30, %v4148_v35  ;;  %v8681_v25 = vcombine.high %v4265_v32, %v4269_v53  ;;  %v4174_v41 = vcombine.low %v4152_v39, %v4156_v40  ;;  %v8680_v1 = vcombine.low %v4265_v32, %v4269_v53  ;;  %7433 = vmatpush1.bf16.msra.mxu1 %v8816_v58 }
 0x30b   : > { %v4397_v38 = vld [vmem:[%s11653_s3 + $0x420] sm:$0xff]  ;;  %v10107_v32 = vsub.s32 6, %v9310_v46  ;;  %v10118_v39 = vsub.s32 7, %v9310_v46  ;;  %v4160_v58 = vrot.slane %v10016_v28, %v10101_v26 }
 0x30c   : > { %v8809_v44 = vcombine.high %v4393_v36, %v4397_v38  ;;  %v4385_v45 = vld [vmem:[%s11653_s3 + $0x3c0] sm:$0xff]  ;;  %v4181_v48 = vrot.slane %v4173_v54, %v9857_v50  ;;  %v4188_v49 = vrot.slane %v4174_v41, %v9857_v50  ;;  %7393 = vmatprep.subr.bf16.mxu0 %v8681_v25  ;;  %v8808_v56 = vcombine.low %v4393_v36, %v4397_v38 }
 0x30d   : > { %v4389_v47 = vld [vmem:[%s11653_s3 + $0x3e0] sm:$0xff]  ;;  %7394 = vmatpush1.bf16.msra.mxu0 %v8680_v1 }
 0x30e   : > { %v4513_v60 = vld [vmem:[%s11653_s3 + $0x7c0] sm:$0xff]  ;;  %v8801_v57 = vcombine.high %v4385_v45, %v4389_v47  ;;  %v4189_v59 = vcombine.low %v4181_v48, %v4188_v49  ;;  %7434 = vmatprep.subr.bf16.mxu1 %v8809_v44  ;;  %v8800_v3 = vcombine.low %v4385_v45, %v4389_v47  ;;  %v4164_v44 = vrot.slane %v10016_v28, %v10104_v29 }
 0x30f   : > { %v4517_v63 = vld [vmem:[%s11653_s3 + $0x7e0] sm:$0xff]  ;;  %7435 = vmatpush1.bf16.msra.mxu1 %v8808_v56  ;;  %v4168_v45 = vrot.slane %v10016_v28, %v10107_v32  ;;  %v4172_v47 = vrot.slane %v10016_v28, %v10118_v39 }
 0x310   : > { %v4137_v51 = vld [vmem:[#allocation2] sm:$0xff]  ;;  %v8929_v61 = vcombine.high %v4513_v60, %v4517_v63  ;;  %7395 = vmatprep.subr.bf16.mxu0 %v8801_v57  ;;  %v8928_v34 = vcombine.low %v4513_v60, %v4517_v63 }
 0x311   : > { %v4377_v33 = vld [vmem:[%s11653_s3 + $0x380] sm:$0xff]  ;;  %v4209_v42 = vadd.f32 %v4189_v59, %v4137_v51  ;;  %7396 = vmatpush2.bf16.msra.mxu0 %v8800_v3  ;;  %v4190_v51 = vcombine.low %v4160_v58, %v4164_v44  ;;  %v4191_v28 = vcombine.low %v4168_v45, %v4172_v47 }
 0x312   : > { %v4381_v62 = vld [vmem:[%s11653_s3 + $0x3a0] sm:$0xff]  ;;  %7436 = vmatprep.subr.bf16.mxu1 %v8929_v61 }
 0x313   : > { %v4505_v0 = vld [vmem:[%s11653_s3 + $0x780] sm:$0xff]  ;;  %v8793_v4 = vcombine.high %v4377_v33, %v4381_v62  ;;  %v4211_v5 = vmax.f32 %v4209_v42, 0.0  ;;  %v8792_v13 = vcombine.low %v4377_v33, %v4381_v62  ;;  %7437 = vmatpush2.bf16.msra.mxu1 %v8928_v34  ;;  %v4198_v61 = vrot.slane %v4190_v51, %v9857_v50  ;;  %v4138_v42 = vld [vmem:[#allocation2 + $0x8] sm:$0xff] }
 0x314   : > { %v4509_v2 = vld [vmem:[%s11653_s3 + $0x7a0] sm:$0xff]  ;;  %v4205_v33 = vrot.slane %v4191_v28, %v9857_v50 }
 0x315   : > { %v8921_v52 = vcombine.high %v4505_v0, %v4509_v2  ;;  %v4369_v6 = vld [vmem:[%s11653_s3 + $0x340] sm:$0xff]  ;;  %v10077_v10 = vrot.slane %v4211_v5, %v9857_v50  ;;  %v4215_v12 = vcombine.high %v4211_v5, %v4211_v5  ;;  %v8920_v11 = vcombine.low %v4505_v0, %v4509_v2  ;;  %7397 = vmatprep.subr.bf16.mxu0 %v8793_v4 }
 0x316   : > { %v4373_v7 = vld [vmem:[%s11653_s3 + $0x360] sm:$0xff]  ;;  %7398 = vmatpush2.bf16.msra.mxu0 %v8792_v13  ;;  %v4206_v4 = vcombine.low %v4198_v61, %v4205_v33 }
 0x317   : > { %v4497_v8 = vld [vmem:[%s11653_s3 + $0x740] sm:$0xff]  ;;  %v8785_v14 = vcombine.high %v4369_v6, %v4373_v7  ;;  %v4230_v16 = vcombine.high %v10077_v10, %v10077_v10  ;;  %v10082_v17 = vrot.slane %v4215_v12, %v9857_v50  ;;  %7438 = vmatprep.subr.bf16.mxu1 %v8921_v52  ;;  %v8784_v27 = vcombine.low %v4369_v6, %v4373_v7 }
 0x318   : > { %v4501_v9 = vld [vmem:[%s11653_s3 + $0x760] sm:$0xff]  ;;  %7439 = vmatpush2.bf16.msra.mxu1 %v8920_v11  ;;  %v4210_v7 = vadd.f32 %v4206_v4, %v4138_v42 }
 0x319   : > { %v8913_v21 = vcombine.high %v4497_v8, %v4501_v9  ;;  %v4361_v31 = vld [vmem:[%s11653_s3 + $0x300] sm:$0xff]  ;;  %v10096_v22 = vpack.c.bf16 %v4230_v16, %v4230_v16  ;;  %v4231_v24 = vcombine.high %v10082_v17, %v10082_v17  ;;  %7399 = vmatprep.subr.bf16.mxu0 %v8785_v14  ;;  %v8912_v53 = vcombine.low %v4497_v8, %v4501_v9 }
 0x31a   : > { %v4365_v37 = vld [vmem:[%s11653_s3 + $0x320] sm:$0xff]  ;;  %7400 = vmatpush2.bf16.msra.mxu0 %v8784_v27  ;;  %v4212_v14 = vmax.f32 %v4210_v7, 0.0  ;;  %v10214_v47 = vpack.c.bf16 %v10082_v17, %v10082_v17 }
 0x31b   : > { %v4489_v18 = vld [vmem:[%s11653_s3 + $0x700] sm:$0xff]  ;;  %v8777_v30 = vcombine.high %v4361_v31, %v4365_v37  ;;  %v10115_v38 = vpack.c.bf16 %v4231_v24, %v4231_v24  ;;  %7440 = vmatprep.subr.bf16.mxu1 %v8913_v21  ;;  %7411 = vmatprep.mubr.bf16.mxu0 %v10096_v22  ;;  %v8776_v46 = vcombine.low %v4361_v31, %v4365_v37 }
 0x31c   : > { %v4493_v20 = vld [vmem:[%s11653_s3 + $0x720] sm:$0xff]  ;;  %7441 = vmatpush2.bf16.msra.mxu1 %v8912_v53  ;;  %v4232_v37 = vcombine.high %v4212_v14, %v4212_v14  ;;  %v10181_v27 = vrot.slane %v4212_v14, %v9857_v50 }
 0x31d   : > { %v4353_v35 = vld [vmem:[%s11653_s3 + $0x2c0] sm:$0xff]  ;;  %v8905_v40 = vcombine.high %v4489_v18, %v4493_v20  ;;  %7452 = vmatprep.mubr.bf16.mxu1 %v10115_v38  ;;  %v8904_v25 = vcombine.low %v4489_v18, %v4493_v20  ;;  %7401 = vmatprep.subr.bf16.mxu0 %v8777_v30 }
 0x31e   : > { %v4357_v36 = vld [vmem:[%s11653_s3 + $0x2e0] sm:$0xff]  ;;  %7402 = vmatpush2.bf16.msra.mxu0 %v8776_v46 }
 0x31f   : > { %v4481_v55 = vld [vmem:[%s11653_s3 + $0x6c0] sm:$0xff]  ;;  %v8769_v41 = vcombine.high %v4353_v35, %v4357_v36  ;;  %7442 = vmatprep.subr.bf16.mxu1 %v8905_v40  ;;  %v8768_v56 = vcombine.low %v4353_v35, %v4357_v36  ;;  %v10190_v35 = vrot.slane %v4232_v37, %v9857_v50  ;;  %v4247_v50 = vcombine.high %v10181_v27, %v10181_v27 }
 0x320   : > { %v4485_v54 = vld [vmem:[%s11653_s3 + $0x6e0] sm:$0xff]  ;;  %7443 = vmatpush2.bf16.msra.mxu1 %v8904_v25  ;;  %v10202_v25 = vpack.c.bf16 %v10077_v10, %v10077_v10 }
 0x321   : > { %v8897_v48 = vcombine.high %v4481_v55, %v4485_v54  ;;  %v4345_v60 = vld [vmem:[%s11653_s3 + $0x280] sm:$0xff]  ;;  %v8896_v57 = vcombine.low %v4481_v55, %v4485_v54  ;;  %7403 = vmatprep.subr.bf16.mxu0 %v8769_v41  ;;  %v4248_v45 = vcombine.high %v10190_v35, %v10190_v35  ;;  %v10222_v51 = vpack.c.bf16 %v4247_v50, %v4247_v50 }
 0x322   : > { %v4349_v63 = vld [vmem:[%s11653_s3 + $0x2a0] sm:$0xff]  ;;  %7404 = vmatpush2.bf16.msra.mxu0 %v8768_v56 }
 0x323   : > { %v4473_v49 = vld [vmem:[%s11653_s3 + $0x680] sm:$0xff]  ;;  %v8761_v59 = vcombine.high %v4345_v60, %v4349_v63  ;;  %7444 = vmatprep.subr.bf16.mxu1 %v8897_v48  ;;  %v8760_v5 = vcombine.low %v4345_v60, %v4349_v63  ;;  %v10231_v56 = vpack.c.bf16 %v4248_v45, %v4248_v45 }
 0x324   : > { %v4477_v1 = vld [vmem:[%s11653_s3 + $0x6a0] sm:$0xff]  ;;  %7445 = vmatpush2.bf16.msra.mxu1 %v8896_v57 }
 0x325   : > { %v8889_v62 = vcombine.high %v4473_v49, %v4477_v1  ;;  %v4337_v0 = vld [vmem:[%s11653_s3 + $0x240] sm:$0xff]  ;;  %7405 = vmatprep.subr.bf16.mxu0 %v8761_v59  ;;  %v8888_v52 = vcombine.low %v4473_v49, %v4477_v1 }
 0x326   : > { %v4341_v2 = vld [vmem:[%s11653_s3 + $0x260] sm:$0xff]  ;;  %7406 = vmatpush2.bf16.msra.mxu0 %v8760_v5 }
 0x327   : > { %v4465_v3 = vld [vmem:[%s11653_s3 + $0x640] sm:$0xff]  ;;  %v8753_v6 = vcombine.high %v4337_v0, %v4341_v2  ;;  %7446 = vmatprep.subr.bf16.mxu1 %v8889_v62  ;;  %v8752_v16 = vcombine.low %v4337_v0, %v4341_v2 }
 0x328   : > { %v4469_v34 = vld [vmem:[%s11653_s3 + $0x660] sm:$0xff]  ;;  %7447 = vmatpush2.bf16.msra.mxu1 %v8888_v52 }
 0x329   : > { %v8881_v8 = vcombine.high %v4465_v3, %v4469_v34  ;;  %v4329_v9 = vld [vmem:[%s11653_s3 + $0x200] sm:$0xff]  ;;  %7407 = vmatprep.subr.bf16.mxu0 %v8753_v6  ;;  %v8880_v21 = vcombine.low %v4465_v3, %v4469_v34 }
 0x32a   : > { %v4333_v12 = vld [vmem:[%s11653_s3 + $0x220] sm:$0xff]  ;;  %7408 = vmatpush2.bf16.msra.mxu0 %v8752_v16 }
 0x32b   : > { %v4457_v13 = vld [vmem:[%s11653_s3 + $0x600] sm:$0xff]  ;;  %v8745_v31 = vcombine.high %v4329_v9, %v4333_v12  ;;  %7448 = vmatprep.subr.bf16.mxu1 %v8881_v8  ;;  %v8744_v36 = vcombine.low %v4329_v9, %v4333_v12 }
 0x32c   : > { %v4461_v11 = vld [vmem:[%s11653_s3 + $0x620] sm:$0xff]  ;;  %7449 = vmatpush2.bf16.msra.mxu1 %v8880_v21 }
 0x32d   : > { %v8873_v18 = vcombine.high %v4457_v13, %v4461_v11  ;;  %v4577_v20 = vld [vmem:[%s11653_s3 + $0x9c0] sm:$0xff]  ;;  %7409 = vmatprep.subr.bf16.mxu0 %v8745_v31  ;;  %v8872_v40 = vcombine.low %v4457_v13, %v4461_v11 }
 0x32e   : > { %v4581_v24 = vld [vmem:[%s11653_s3 + $0x9e0] sm:$0xff]  ;;  %7410 = vmatpush2.bf16.msra.mxu0 %v8744_v36 }
 0x32f   : > { %v4705_v53 = vld [vmem:[%s11653_s3 + $0xdc0] sm:$0xff]  ;;  %v8993_v55 = vcombine.high %v4577_v20, %v4581_v24  ;;  %7450 = vmatprep.subr.bf16.mxu1 %v8873_v18  ;;  %v8992_v48 = vcombine.low %v4577_v20, %v4581_v24 }
 0x330   : > { %v4709_v30 = vld [vmem:[%s11653_s3 + $0xde0] sm:$0xff]  ;;  %7451 = vmatpush2.bf16.msra.mxu1 %v8872_v40 }
 0x331   : > { %v9121_v54 = vcombine.high %v4705_v53, %v4709_v30  ;;  %v4569_v58 = vld [vmem:[%s11653_s3 + $0x980] sm:$0xff]  ;;  %7461 = vmatprep.subr.bf16.mxu0 %v8993_v55  ;;  %v9120_v10 = vcombine.low %v4705_v53, %v4709_v30  ;;  %7412 = vmatmul.mubr.bf16.vlgmr.msra.gmra.mxu0 %v10202_v25 }
 0x332   : > { %v4573_v46 = vld [vmem:[%s11653_s3 + $0x9a0] sm:$0xff]  ;;  %7462 = vmatpush1.bf16.msra.mxu0 %v8992_v48  ;;  %7493 = vmatprep.mubr.bf16.mxu0 %v10222_v51 }
 0x333   : > { %v4697_v41 = vld [vmem:[%s11653_s3 + $0xd80] sm:$0xff]  ;;  %v8985_v60 = vcombine.high %v4569_v58, %v4573_v46  ;;  %7502 = vmatprep.subr.bf16.mxu1 %v9121_v54  ;;  %7453 = vmatmul.mubr.bf16.vlgmr.msra.gmra.mxu1 %v10214_v47  ;;  %v8984_v57 = vcombine.low %v4569_v58, %v4573_v46 }
 0x334   : > { %v4701_v44 = vld [vmem:[%s11653_s3 + $0xda0] sm:$0xff]  ;;  %7503 = vmatpush1.bf16.msra.mxu1 %v9120_v10  ;;  %7534 = vmatprep.mubr.bf16.mxu1 %v10231_v56 }
 0x335   : > { %v9113_v63 = vcombine.high %v4697_v41, %v4701_v44  ;;  %v4561_v49 = vld [vmem:[%s11653_s3 + $0x940] sm:$0xff]  ;;  %7463 = vmatprep.subr.bf16.mxu0 %v8985_v60  ;;  %v9112_v59 = vcombine.low %v4697_v41, %v4701_v44 }
 0x336   : > { %v4565_v1 = vld [vmem:[%s11653_s3 + $0x960] sm:$0xff]  ;;  %7464 = vmatpush1.bf16.msra.mxu0 %v8984_v57 }
 0x337   : > { %v4689_v17 = vld [vmem:[%s11653_s3 + $0xd40] sm:$0xff]  ;;  %v8977_v61 = vcombine.high %v4561_v49, %v4565_v1  ;;  %7504 = vmatprep.subr.bf16.mxu1 %v9113_v63  ;;  %v8976_v3 = vcombine.low %v4561_v49, %v4565_v1 }
 0x338   : > { %v4693_v28 = vld [vmem:[%s11653_s3 + $0xd60] sm:$0xff]  ;;  %7505 = vmatpush1.bf16.msra.mxu1 %v9112_v59 }
 0x339   : > { %v9105_v33 = vcombine.high %v4689_v17, %v4693_v28  ;;  %v4553_v62 = vld [vmem:[%s11653_s3 + $0x900] sm:$0xff]  ;;  %7465 = vmatprep.subr.bf16.mxu0 %v8977_v61  ;;  %v9104_v34 = vcombine.low %v4689_v17, %v4693_v28 }
 0x33a   : > { %v4557_v0 = vld [vmem:[%s11653_s3 + $0x920] sm:$0xff]  ;;  %7466 = vmatpush1.bf16.msra.mxu0 %v8976_v3 }
 0x33b   : > { %v4681_v2 = vld [vmem:[%s11653_s3 + $0xd00] sm:$0xff]  ;;  %v8969_v4 = vcombine.high %v4553_v62, %v4557_v0  ;;  %7506 = vmatprep.subr.bf16.mxu1 %v9105_v33  ;;  %v8968_v9 = vcombine.low %v4553_v62, %v4557_v0 }
 0x33c   : > { %v4685_v42 = vld [vmem:[%s11653_s3 + $0xd20] sm:$0xff]  ;;  %7507 = vmatpush1.bf16.msra.mxu1 %v9104_v34 }
 0x33d   : > { %v9097_v5 = vcombine.high %v4681_v2, %v4685_v42  ;;  %v4545_v52 = vld [vmem:[%s11653_s3 + $0x8c0] sm:$0xff]  ;;  %7467 = vmatprep.subr.bf16.mxu0 %v8969_v4  ;;  %v9096_v12 = vcombine.low %v4681_v2, %v4685_v42 }
 0x33e   : > { %v4549_v6 = vld [vmem:[%s11653_s3 + $0x8e0] sm:$0xff]  ;;  %7468 = vmatpush1.bf16.msra.mxu0 %v8968_v9 }
 0x33f   : > { %v4673_v7 = vld [vmem:[%s11653_s3 + $0xcc0] sm:$0xff]  ;;  %v8961_v13 = vcombine.high %v4545_v52, %v4549_v6  ;;  %7508 = vmatprep.subr.bf16.mxu1 %v9097_v5  ;;  %v8960_v37 = vcombine.low %v4545_v52, %v4549_v6 }
 0x340   : > { %v4677_v8 = vld [vmem:[%s11653_s3 + $0xce0] sm:$0xff]  ;;  %7509 = vmatpush1.bf16.msra.mxu1 %v9096_v12 }
 0x341   : > { %v9089_v11 = vcombine.high %v4673_v7, %v4677_v8  ;;  %v4537_v14 = vld [vmem:[%s11653_s3 + $0x880] sm:$0xff]  ;;  %7469 = vmatprep.subr.bf16.mxu0 %v8961_v13  ;;  %v9088_v18 = vcombine.low %v4673_v7, %v4677_v8 }
 0x342   : > { %v4541_v16 = vld [vmem:[%s11653_s3 + $0x8a0] sm:$0xff]  ;;  %7470 = vmatpush1.bf16.msra.mxu0 %v8960_v37 }
 0x343   : > { %v4665_v21 = vld [vmem:[%s11653_s3 + $0xc80] sm:$0xff]  ;;  %v8953_v20 = vcombine.high %v4537_v14, %v4541_v16  ;;  %7510 = vmatprep.subr.bf16.mxu1 %v9089_v11  ;;  %v8952_v55 = vcombine.low %v4537_v14, %v4541_v16 }
 0x344   : > { %v4669_v31 = vld [vmem:[%s11653_s3 + $0xca0] sm:$0xff]  ;;  %7511 = vmatpush1.bf16.msra.mxu1 %v9088_v18 }
 0x345   : > { %v9081_v24 = vcombine.high %v4665_v21, %v4669_v31  ;;  %v4529_v53 = vld [vmem:[%s11653_s3 + $0x840] sm:$0xff]  ;;  %7471 = vmatprep.subr.bf16.mxu0 %v8953_v20  ;;  %v9080_v54 = vcombine.low %v4665_v21, %v4669_v31 }
 0x346   : > { %v4533_v30 = vld [vmem:[%s11653_s3 + $0x860] sm:$0xff]  ;;  %7472 = vmatpush1.bf16.msra.mxu0 %v8952_v55 }
 0x347   : > { %v4657_v36 = vld [vmem:[%s11653_s3 + $0xc40] sm:$0xff]  ;;  %v8945_v58 = vcombine.high %v4529_v53, %v4533_v30  ;;  %7512 = vmatprep.subr.bf16.mxu1 %v9081_v24  ;;  %v8944_v48 = vcombine.low %v4529_v53, %v4533_v30 }
 0x348   : > { %v4661_v40 = vld [vmem:[%s11653_s3 + $0xc60] sm:$0xff]  ;;  %7513 = vmatpush1.bf16.msra.mxu1 %v9080_v54 }
 0x349   : > { %v9073_v46 = vcombine.high %v4657_v36, %v4661_v40  ;;  %v4521_v50 = vld [vmem:[%s11653_s3 + $0x800] sm:$0xff]  ;;  %7473 = vmatprep.subr.bf16.mxu0 %v8945_v58  ;;  %v9072_v10 = vcombine.low %v4657_v36, %v4661_v40 }
 0x34a   : > { %v4525_v41 = vld [vmem:[%s11653_s3 + $0x820] sm:$0xff]  ;;  %7474 = vmatpush1.bf16.msra.mxu0 %v8944_v48 }
 0x34b   : > { %v4649_v44 = vld [vmem:[%s11653_s3 + $0xc00] sm:$0xff]  ;;  %v8937_v60 = vcombine.high %v4521_v50, %v4525_v41  ;;  %7514 = vmatprep.subr.bf16.mxu1 %v9073_v46  ;;  %v8936_v57 = vcombine.low %v4521_v50, %v4525_v41 }
 0x34c   : > { %v4653_v45 = vld [vmem:[%s11653_s3 + $0xc20] sm:$0xff]  ;;  %7515 = vmatpush1.bf16.msra.mxu1 %v9072_v10 }
 0x34d   : > { %v9065_v63 = vcombine.high %v4649_v44, %v4653_v45  ;;  %v4641_v49 = vld [vmem:[%s11653_s3 + $0xbc0] sm:$0xff]  ;;  %7475 = vmatprep.subr.bf16.mxu0 %v8937_v60  ;;  %v9064_v59 = vcombine.low %v4649_v44, %v4653_v45 }
 0x34e   : > { %v4645_v1 = vld [vmem:[%s11653_s3 + $0xbe0] sm:$0xff]  ;;  %7476 = vmatpush1.bf16.msra.mxu0 %v8936_v57 }
 0x34f   : > { %v4769_v17 = vld [vmem:[%s11653_s3 + $0xfc0] sm:$0xff]  ;;  %v9057_v61 = vcombine.high %v4641_v49, %v4645_v1  ;;  %7516 = vmatprep.subr.bf16.mxu1 %v9065_v63  ;;  %v9056_v3 = vcombine.low %v4641_v49, %v4645_v1 }
 0x350   : > { %v4773_v28 = vld [vmem:[%s11653_s3 + $0xfe0] sm:$0xff]  ;;  %7517 = vmatpush1.bf16.msra.mxu1 %v9064_v59 }
 0x351   : > { %v9185_v33 = vcombine.high %v4769_v17, %v4773_v28  ;;  %v4633_v62 = vld [vmem:[%s11653_s3 + $0xb80] sm:$0xff]  ;;  %7477 = vmatprep.subr.bf16.mxu0 %v9057_v61  ;;  %v9184_v34 = vcombine.low %v4769_v17, %v4773_v28 }
 0x352   : > { %v4637_v0 = vld [vmem:[%s11653_s3 + $0xba0] sm:$0xff]  ;;  %7478 = vmatpush2.bf16.msra.mxu0 %v9056_v3 }
 0x353   : > { %v4761_v2 = vld [vmem:[%s11653_s3 + $0xf80] sm:$0xff]  ;;  %v9049_v4 = vcombine.high %v4633_v62, %v4637_v0  ;;  %7518 = vmatprep.subr.bf16.mxu1 %v9185_v33  ;;  %v9048_v9 = vcombine.low %v4633_v62, %v4637_v0 }
 0x354   : > { %v4765_v42 = vld [vmem:[%s11653_s3 + $0xfa0] sm:$0xff]  ;;  %7519 = vmatpush2.bf16.msra.mxu1 %v9184_v34 }
 0x355   : > { %v9177_v5 = vcombine.high %v4761_v2, %v4765_v42  ;;  %v4625_v52 = vld [vmem:[%s11653_s3 + $0xb40] sm:$0xff]  ;;  %7479 = vmatprep.subr.bf16.mxu0 %v9049_v4  ;;  %v9176_v12 = vcombine.low %v4761_v2, %v4765_v42 }
 0x356   : > { %v4629_v6 = vld [vmem:[%s11653_s3 + $0xb60] sm:$0xff]  ;;  %7480 = vmatpush2.bf16.msra.mxu0 %v9048_v9 }
 0x357   : > { %v4753_v7 = vld [vmem:[%s11653_s3 + $0xf40] sm:$0xff]  ;;  %v9041_v13 = vcombine.high %v4625_v52, %v4629_v6  ;;  %7520 = vmatprep.subr.bf16.mxu1 %v9177_v5  ;;  %v9040_v37 = vcombine.low %v4625_v52, %v4629_v6  ;;  %v4322_v52 = vld [vmem:[%s11653_s3 + $0x1c8] sm:$0xff] }
 0x358   : > { %v4757_v8 = vld [vmem:[%s11653_s3 + $0xf60] sm:$0xff]  ;;  %7521 = vmatpush2.bf16.msra.mxu1 %v9176_v12  ;;  %v4326_v6 = vld [vmem:[%s11653_s3 + $0x1e8] sm:$0xff] }
 0x359   : > { %v9169_v11 = vcombine.high %v4753_v7, %v4757_v8  ;;  %v4617_v14 = vld [vmem:[%s11653_s3 + $0xb00] sm:$0xff]  ;;  %7481 = vmatprep.subr.bf16.mxu0 %v9041_v13  ;;  %v9168_v18 = vcombine.low %v4753_v7, %v4757_v8  ;;  %v4450_v7 = vld [vmem:[%s11653_s3 + $0x5c8] sm:$0xff]  ;;  %v8739_v13 = vcombine.high %v4322_v52, %v4326_v6 }
 0x35a   : > { %v4621_v16 = vld [vmem:[%s11653_s3 + $0xb20] sm:$0xff]  ;;  %7482 = vmatpush2.bf16.msra.mxu0 %v9040_v37  ;;  %v4454_v8 = vld [vmem:[%s11653_s3 + $0x5e8] sm:$0xff] }
 0x35b   : > { %v4745_v21 = vld [vmem:[%s11653_s3 + $0xf00] sm:$0xff]  ;;  %v9033_v20 = vcombine.high %v4617_v14, %v4621_v16  ;;  %7522 = vmatprep.subr.bf16.mxu1 %v9169_v11  ;;  %v9032_v55 = vcombine.low %v4617_v14, %v4621_v16  ;;  %v8867_v11 = vcombine.high %v4450_v7, %v4454_v8  ;;  %v4314_v14 = vld [vmem:[%s11653_s3 + $0x188] sm:$0xff] }
 0x35c   : > { %v4749_v31 = vld [vmem:[%s11653_s3 + $0xf20] sm:$0xff]  ;;  %7523 = vmatpush2.bf16.msra.mxu1 %v9168_v18  ;;  %v4318_v16 = vld [vmem:[%s11653_s3 + $0x1a8] sm:$0xff]  ;;  %v10422_v18 = vpack.c.bf16 %v10190_v35, %v10190_v35 }
 0x35d   : > { %v9161_v24 = vcombine.high %v4745_v21, %v4749_v31  ;;  %v4609_v53 = vld [vmem:[%s11653_s3 + $0xac0] sm:$0xff]  ;;  %7483 = vmatprep.subr.bf16.mxu0 %v9033_v20  ;;  %v9160_v54 = vcombine.low %v4745_v21, %v4749_v31  ;;  %v10412_v21 = vpack.c.bf16 %v10181_v27, %v10181_v27  ;;  %v4442_v31 = vld [vmem:[%s11653_s3 + $0x588] sm:$0xff]  ;;  %v8738_v20 = vcombine.low %v4322_v52, %v4326_v6 }
 0x35e   : > { %v4613_v30 = vld [vmem:[%s11653_s3 + $0xae0] sm:$0xff]  ;;  %7484 = vmatpush2.bf16.msra.mxu0 %v9032_v55  ;;  %v4446_v37 = vld [vmem:[%s11653_s3 + $0x5a8] sm:$0xff]  ;;  %v8730_v55 = vcombine.low %v4314_v14, %v4318_v16 }
 0x35f   : > { %v4737_v36 = vld [vmem:[%s11653_s3 + $0xec0] sm:$0xff]  ;;  %v9025_v58 = vcombine.high %v4609_v53, %v4613_v30  ;;  %7524 = vmatprep.subr.bf16.mxu1 %v9161_v24  ;;  %v9024_v48 = vcombine.low %v4609_v53, %v4613_v30  ;;  %v8866_v24 = vcombine.low %v4450_v7, %v4454_v8  ;;  %v8731_v53 = vcombine.high %v4314_v14, %v4318_v16  ;;  %v4306_v30 = vld [vmem:[%s11653_s3 + $0x148] sm:$0xff] }
 0x360   : > { %v4741_v40 = vld [vmem:[%s11653_s3 + $0xee0] sm:$0xff]  ;;  %7525 = vmatpush2.bf16.msra.mxu1 %v9160_v54  ;;  %v8859_v27 = vcombine.high %v4442_v31, %v4446_v37  ;;  %v4434_v35 = vld [vmem:[%s11653_s3 + $0x548] sm:$0xff]  ;;  %v8858_v54 = vcombine.low %v4442_v31, %v4446_v37 }
 0x361   : > { %v9153_v46 = vcombine.high %v4737_v36, %v4741_v40  ;;  %v4601_v50 = vld [vmem:[%s11653_s3 + $0xa80] sm:$0xff]  ;;  %7485 = vmatprep.subr.bf16.mxu0 %v9025_v58  ;;  %v9152_v10 = vcombine.low %v4737_v36, %v4741_v40  ;;  %v4310_v36 = vld [vmem:[%s11653_s3 + $0x168] sm:$0xff] }
 0x362   : > { %v4605_v41 = vld [vmem:[%s11653_s3 + $0xaa0] sm:$0xff]  ;;  %7486 = vmatpush2.bf16.msra.mxu0 %v9024_v48  ;;  %v4438_v40 = vld [vmem:[%s11653_s3 + $0x568] sm:$0xff]  ;;  %v8723_v58 = vcombine.high %v4306_v30, %v4310_v36  ;;  %v8722_v48 = vcombine.low %v4306_v30, %v4310_v36 }
 0x363   : > { %v4729_v44 = vld [vmem:[%s11653_s3 + $0xe80] sm:$0xff]  ;;  %v9017_v60 = vcombine.high %v4601_v50, %v4605_v41  ;;  %7526 = vmatprep.subr.bf16.mxu1 %v9153_v46  ;;  %v9016_v57 = vcombine.low %v4601_v50, %v4605_v41  ;;  %v8851_v46 = vcombine.high %v4434_v35, %v4438_v40  ;;  %v4298_v50 = vld [vmem:[%s11653_s3 + $0x108] sm:$0xff] }
 0x364   : > { %v4733_v45 = vld [vmem:[%s11653_s3 + $0xea0] sm:$0xff]  ;;  %7527 = vmatpush2.bf16.msra.mxu1 %v9152_v10  ;;  %v4302_v41 = vld [vmem:[%s11653_s3 + $0x128] sm:$0xff]  ;;  %v8850_v10 = vcombine.low %v4434_v35, %v4438_v40 }
 0x365   : > { %v9145_v63 = vcombine.high %v4729_v44, %v4733_v45  ;;  %v4593_v49 = vld [vmem:[%s11653_s3 + $0xa40] sm:$0xff]  ;;  %7487 = vmatprep.subr.bf16.mxu0 %v9017_v60  ;;  %v9144_v59 = vcombine.low %v4729_v44, %v4733_v45  ;;  %v4426_v44 = vld [vmem:[%s11653_s3 + $0x508] sm:$0xff]  ;;  %v8715_v60 = vcombine.high %v4298_v50, %v4302_v41 }
 0x366   : > { %v4597_v1 = vld [vmem:[%s11653_s3 + $0xa60] sm:$0xff]  ;;  %7488 = vmatpush2.bf16.msra.mxu0 %v9016_v57  ;;  %v4430_v45 = vld [vmem:[%s11653_s3 + $0x528] sm:$0xff]  ;;  %v8714_v57 = vcombine.low %v4298_v50, %v4302_v41 }
 0x367   : > { %v4721_v17 = vld [vmem:[%s11653_s3 + $0xe40] sm:$0xff]  ;;  %v9009_v61 = vcombine.high %v4593_v49, %v4597_v1  ;;  %7528 = vmatprep.subr.bf16.mxu1 %v9145_v63  ;;  %v9008_v3 = vcombine.low %v4593_v49, %v4597_v1  ;;  %v8843_v63 = vcombine.high %v4426_v44, %v4430_v45  ;;  %v4290_v49 = vld [vmem:[%s11653_s3 + $0xc8] sm:$0xff] }
 0x368   : > { %v4725_v28 = vld [vmem:[%s11653_s3 + $0xe60] sm:$0xff]  ;;  %7529 = vmatpush2.bf16.msra.mxu1 %v9144_v59  ;;  %v4294_v1 = vld [vmem:[%s11653_s3 + $0xe8] sm:$0xff]  ;;  %v8842_v59 = vcombine.low %v4426_v44, %v4430_v45 }
 0x369   : > { %v9137_v33 = vcombine.high %v4721_v17, %v4725_v28  ;;  %v4585_v62 = vld [vmem:[%s11653_s3 + $0xa00] sm:$0xff]  ;;  %7489 = vmatprep.subr.bf16.mxu0 %v9009_v61  ;;  %v9136_v34 = vcombine.low %v4721_v17, %v4725_v28  ;;  %v4418_v17 = vld [vmem:[%s11653_s3 + $0x4c8] sm:$0xff]  ;;  %v8707_v61 = vcombine.high %v4290_v49, %v4294_v1 }
 0x36a   : > { %v4589_v0 = vld [vmem:[%s11653_s3 + $0xa20] sm:$0xff]  ;;  %7490 = vmatpush2.bf16.msra.mxu0 %v9008_v3  ;;  %v4422_v28 = vld [vmem:[%s11653_s3 + $0x4e8] sm:$0xff]  ;;  %v8706_v3 = vcombine.low %v4290_v49, %v4294_v1 }
 0x36b   : > { %v4713_v2 = vld [vmem:[%s11653_s3 + $0xe00] sm:$0xff]  ;;  %v9001_v4 = vcombine.high %v4585_v62, %v4589_v0  ;;  %7530 = vmatprep.subr.bf16.mxu1 %v9137_v33  ;;  %v9000_v9 = vcombine.low %v4585_v62, %v4589_v0  ;;  %v8835_v33 = vcombine.high %v4418_v17, %v4422_v28  ;;  %v4282_v62 = vld [vmem:[%s11653_s3 + $0x88] sm:$0xff] }
 0x36c   : > { %v4717_v42 = vld [vmem:[%s11653_s3 + $0xe20] sm:$0xff]  ;;  %7531 = vmatpush2.bf16.msra.mxu1 %v9136_v34  ;;  %v4286_v0 = vld [vmem:[%s11653_s3 + $0xa8] sm:$0xff]  ;;  %v8834_v34 = vcombine.low %v4418_v17, %v4422_v28 }
 0x36d   : > { %v9129_v5 = vcombine.high %v4713_v2, %v4717_v42  ;;  %7491 = vmatprep.subr.bf16.mxu0 %v9001_v4  ;;  %v9128_v12 = vcombine.low %v4713_v2, %v4717_v42  ;;  %v4410_v2 = vld [vmem:[%s11653_s3 + $0x488] sm:$0xff]  ;;  %v8699_v4 = vcombine.high %v4282_v62, %v4286_v0 }
 0x36e   : > { %7492 = vmatpush2.bf16.msra.mxu0 %v9000_v9  ;;  %v4414_v42 = vld [vmem:[%s11653_s3 + $0x4a8] sm:$0xff]  ;;  %v8698_v9 = vcombine.low %v4282_v62, %v4286_v0 }
 0x36f   : > { %7532 = vmatprep.subr.bf16.mxu1 %v9129_v5  ;;  %7543 = vmatprep.subr.bf16.mxu0 %v8739_v13  ;;  %v8827_v5 = vcombine.high %v4410_v2, %v4414_v42  ;;  %v4274_v52 = vld [vmem:[%s11653_s3 + $0x48] sm:$0xff] }
 0x370   : > { %7533 = vmatpush2.bf16.msra.mxu1 %v9128_v12  ;;  %v4278_v6 = vld [vmem:[%s11653_s3 + $0x68] sm:$0xff]  ;;  %v8826_v12 = vcombine.low %v4410_v2, %v4414_v42 }
 0x371   : > { %7584 = vmatprep.subr.bf16.mxu1 %v8867_v11  ;;  %7494 = vmatmul.mubr.bf16.vlgmr.msra.gmra.mxu0 %v10412_v21  ;;  %v4402_v7 = vld [vmem:[%s11653_s3 + $0x448] sm:$0xff]  ;;  %v8691_v13 = vcombine.high %v4274_v52, %v4278_v6 }
 0x372   : > { %7544 = vmatpush1.bf16.msra.mxu0 %v8738_v20  ;;  %7575 = vmatprep.mubr.bf16.mxu0 %v10096_v22  ;;  %v4406_v8 = vld [vmem:[%s11653_s3 + $0x468] sm:$0xff]  ;;  %v8690_v20 = vcombine.low %v4274_v52, %v4278_v6 }
 0x373   : > { %7535 = vmatmul.mubr.bf16.vlgmr.msra.gmra.mxu1 %v10422_v18  ;;  %7545 = vmatprep.subr.bf16.mxu0 %v8731_v53  ;;  %v8819_v11 = vcombine.high %v4402_v7, %v4406_v8  ;;  %v4266_v14 = vld [vmem:[%s11653_s3 + $0x8] sm:$0xff] }
 0x374   : > { %7585 = vmatpush1.bf16.msra.mxu1 %v8866_v24  ;;  %7616 = vmatprep.mubr.bf16.mxu1 %v10115_v38  ;;  %v4270_v16 = vld [vmem:[%s11653_s3 + $0x28] sm:$0xff]  ;;  %v8818_v24 = vcombine.low %v4402_v7, %v4406_v8 }
 0x375   : > { %7586 = vmatprep.subr.bf16.mxu1 %v8859_v27  ;;  %v4394_v31 = vld [vmem:[%s11653_s3 + $0x408] sm:$0xff]  ;;  %v8683_v53 = vcombine.high %v4266_v14, %v4270_v16 }
 0x376   : > { %7546 = vmatpush1.bf16.msra.mxu0 %v8730_v55  ;;  %v4398_v37 = vld [vmem:[%s11653_s3 + $0x428] sm:$0xff]  ;;  %v8682_v55 = vcombine.low %v4266_v14, %v4270_v16 }
 0x377   : > { %7547 = vmatprep.subr.bf16.mxu0 %v8723_v58  ;;  %v8811_v27 = vcombine.high %v4394_v31, %v4398_v37  ;;  %v4386_v30 = vld [vmem:[%s11653_s3 + $0x3c8] sm:$0xff] }
 0x378   : > { %7587 = vmatpush1.bf16.msra.mxu1 %v8858_v54  ;;  %v4390_v36 = vld [vmem:[%s11653_s3 + $0x3e8] sm:$0xff]  ;;  %v8810_v54 = vcombine.low %v4394_v31, %v4398_v37 }
 0x379   : > { %7588 = vmatprep.subr.bf16.mxu1 %v8851_v46  ;;  %v4514_v35 = vld [vmem:[%s11653_s3 + $0x7c8] sm:$0xff]  ;;  %v8803_v58 = vcombine.high %v4386_v30, %v4390_v36 }
 0x37a   : > { %7548 = vmatpush1.bf16.msra.mxu0 %v8722_v48  ;;  %v4518_v40 = vld [vmem:[%s11653_s3 + $0x7e8] sm:$0xff]  ;;  %v8802_v48 = vcombine.low %v4386_v30, %v4390_v36 }
 0x37b   : > { %7549 = vmatprep.subr.bf16.mxu0 %v8715_v60  ;;  %v8931_v46 = vcombine.high %v4514_v35, %v4518_v40  ;;  %v4378_v50 = vld [vmem:[%s11653_s3 + $0x388] sm:$0xff] }
 0x37c   : > { %7589 = vmatpush1.bf16.msra.mxu1 %v8850_v10  ;;  %v4382_v41 = vld [vmem:[%s11653_s3 + $0x3a8] sm:$0xff]  ;;  %v8930_v10 = vcombine.low %v4514_v35, %v4518_v40 }
 0x37d   : > { %7590 = vmatprep.subr.bf16.mxu1 %v8843_v63  ;;  %v4506_v44 = vld [vmem:[%s11653_s3 + $0x788] sm:$0xff]  ;;  %v8795_v60 = vcombine.high %v4378_v50, %v4382_v41 }
 0x37e   : > { %7550 = vmatpush1.bf16.msra.mxu0 %v8714_v57  ;;  %v4510_v45 = vld [vmem:[%s11653_s3 + $0x7a8] sm:$0xff]  ;;  %v8794_v57 = vcombine.low %v4378_v50, %v4382_v41 }
 0x37f   : > { %7551 = vmatprep.subr.bf16.mxu0 %v8707_v61  ;;  %v8923_v63 = vcombine.high %v4506_v44, %v4510_v45  ;;  %v4370_v49 = vld [vmem:[%s11653_s3 + $0x348] sm:$0xff] }
 0x380   : > { %7591 = vmatpush1.bf16.msra.mxu1 %v8842_v59  ;;  %v4374_v1 = vld [vmem:[%s11653_s3 + $0x368] sm:$0xff]  ;;  %v8922_v59 = vcombine.low %v4506_v44, %v4510_v45 }
 0x381   : > { %7592 = vmatprep.subr.bf16.mxu1 %v8835_v33  ;;  %v4498_v17 = vld [vmem:[%s11653_s3 + $0x748] sm:$0xff]  ;;  %v8787_v61 = vcombine.high %v4370_v49, %v4374_v1 }
 0x382   : > { %7552 = vmatpush1.bf16.msra.mxu0 %v8706_v3  ;;  %v4502_v28 = vld [vmem:[%s11653_s3 + $0x768] sm:$0xff]  ;;  %v8786_v3 = vcombine.low %v4370_v49, %v4374_v1 }
 0x383   : > { %7553 = vmatprep.subr.bf16.mxu0 %v8699_v4  ;;  %v8915_v33 = vcombine.high %v4498_v17, %v4502_v28  ;;  %v4362_v62 = vld [vmem:[%s11653_s3 + $0x308] sm:$0xff] }
 0x384   : > { %7593 = vmatpush1.bf16.msra.mxu1 %v8834_v34  ;;  %v4366_v0 = vld [vmem:[%s11653_s3 + $0x328] sm:$0xff]  ;;  %v8914_v34 = vcombine.low %v4498_v17, %v4502_v28 }
 0x385   : > { %7594 = vmatprep.subr.bf16.mxu1 %v8827_v5  ;;  %v4490_v2 = vld [vmem:[%s11653_s3 + $0x708] sm:$0xff]  ;;  %v8779_v4 = vcombine.high %v4362_v62, %v4366_v0 }
 0x386   : > { %7554 = vmatpush1.bf16.msra.mxu0 %v8698_v9  ;;  %v4494_v42 = vld [vmem:[%s11653_s3 + $0x728] sm:$0xff]  ;;  %v8778_v9 = vcombine.low %v4362_v62, %v4366_v0 }
 0x387   : > { %7555 = vmatprep.subr.bf16.mxu0 %v8691_v13  ;;  %v8907_v5 = vcombine.high %v4490_v2, %v4494_v42  ;;  %v4354_v52 = vld [vmem:[%s11653_s3 + $0x2c8] sm:$0xff] }
 0x388   : > { %7595 = vmatpush1.bf16.msra.mxu1 %v8826_v12  ;;  %v4358_v6 = vld [vmem:[%s11653_s3 + $0x2e8] sm:$0xff]  ;;  %v8906_v12 = vcombine.low %v4490_v2, %v4494_v42 }
 0x389   : > { %7596 = vmatprep.subr.bf16.mxu1 %v8819_v11  ;;  %v4482_v7 = vld [vmem:[%s11653_s3 + $0x6c8] sm:$0xff]  ;;  %v8771_v13 = vcombine.high %v4354_v52, %v4358_v6 }
 0x38a   : > { %7556 = vmatpush1.bf16.msra.mxu0 %v8690_v20  ;;  %v4486_v8 = vld [vmem:[%s11653_s3 + $0x6e8] sm:$0xff]  ;;  %v8770_v20 = vcombine.low %v4354_v52, %v4358_v6 }
 0x38b   : > { %7557 = vmatprep.subr.bf16.mxu0 %v8683_v53  ;;  %v8899_v11 = vcombine.high %v4482_v7, %v4486_v8  ;;  %v4346_v14 = vld [vmem:[%s11653_s3 + $0x288] sm:$0xff] }
 0x38c   : > { %7597 = vmatpush1.bf16.msra.mxu1 %v8818_v24  ;;  %v4350_v16 = vld [vmem:[%s11653_s3 + $0x2a8] sm:$0xff]  ;;  %v8898_v24 = vcombine.low %v4482_v7, %v4486_v8 }
 0x38d   : > { %7598 = vmatprep.subr.bf16.mxu1 %v8811_v27  ;;  %v4474_v31 = vld [vmem:[%s11653_s3 + $0x688] sm:$0xff]  ;;  %v8763_v53 = vcombine.high %v4346_v14, %v4350_v16 }
 0x38e   : > { %7558 = vmatpush1.bf16.msra.mxu0 %v8682_v55  ;;  %v4478_v37 = vld [vmem:[%s11653_s3 + $0x6a8] sm:$0xff]  ;;  %v8762_v55 = vcombine.low %v4346_v14, %v4350_v16 }
 0x38f   : > { %7559 = vmatprep.subr.bf16.mxu0 %v8803_v58  ;;  %v8891_v27 = vcombine.high %v4474_v31, %v4478_v37  ;;  %v4338_v30 = vld [vmem:[%s11653_s3 + $0x248] sm:$0xff] }
 0x390   : > { %7599 = vmatpush1.bf16.msra.mxu1 %v8810_v54  ;;  %v4342_v36 = vld [vmem:[%s11653_s3 + $0x268] sm:$0xff]  ;;  %v8890_v54 = vcombine.low %v4474_v31, %v4478_v37 }
 0x391   : > { %7600 = vmatprep.subr.bf16.mxu1 %v8931_v46  ;;  %v4466_v35 = vld [vmem:[%s11653_s3 + $0x648] sm:$0xff]  ;;  %v8755_v58 = vcombine.high %v4338_v30, %v4342_v36 }
 0x392   : > { %7560 = vmatpush2.bf16.msra.mxu0 %v8802_v48  ;;  %v4470_v40 = vld [vmem:[%s11653_s3 + $0x668] sm:$0xff]  ;;  %v8754_v48 = vcombine.low %v4338_v30, %v4342_v36 }
 0x393   : > { %7561 = vmatprep.subr.bf16.mxu0 %v8795_v60  ;;  %v8883_v46 = vcombine.high %v4466_v35, %v4470_v40  ;;  %v4330_v50 = vld [vmem:[%s11653_s3 + $0x208] sm:$0xff] }
 0x394   : > { %7601 = vmatpush2.bf16.msra.mxu1 %v8930_v10  ;;  %v4334_v41 = vld [vmem:[%s11653_s3 + $0x228] sm:$0xff]  ;;  %v8882_v10 = vcombine.low %v4466_v35, %v4470_v40 }
 0x395   : > { %7602 = vmatprep.subr.bf16.mxu1 %v8923_v63  ;;  %v4458_v44 = vld [vmem:[%s11653_s3 + $0x608] sm:$0xff]  ;;  %v8747_v60 = vcombine.high %v4330_v50, %v4334_v41 }
 0x396   : > { %7562 = vmatpush2.bf16.msra.mxu0 %v8794_v57  ;;  %v4462_v45 = vld [vmem:[%s11653_s3 + $0x628] sm:$0xff]  ;;  %v8746_v57 = vcombine.low %v4330_v50, %v4334_v41 }
 0x397   : > { %7563 = vmatprep.subr.bf16.mxu0 %v8787_v61  ;;  %v8875_v63 = vcombine.high %v4458_v44, %v4462_v45  ;;  %v4578_v49 = vld [vmem:[%s11653_s3 + $0x9c8] sm:$0xff] }
 0x398   : > { %7603 = vmatpush2.bf16.msra.mxu1 %v8922_v59  ;;  %v4582_v1 = vld [vmem:[%s11653_s3 + $0x9e8] sm:$0xff]  ;;  %v8874_v59 = vcombine.low %v4458_v44, %v4462_v45 }
 0x399   : > { %7604 = vmatprep.subr.bf16.mxu1 %v8915_v33  ;;  %v4706_v17 = vld [vmem:[%s11653_s3 + $0xdc8] sm:$0xff]  ;;  %v8995_v61 = vcombine.high %v4578_v49, %v4582_v1 }
 0x39a   : > { %7564 = vmatpush2.bf16.msra.mxu0 %v8786_v3  ;;  %v4710_v28 = vld [vmem:[%s11653_s3 + $0xde8] sm:$0xff]  ;;  %v8994_v3 = vcombine.low %v4578_v49, %v4582_v1 }
 0x39b   : > { %7565 = vmatprep.subr.bf16.mxu0 %v8779_v4  ;;  %v9123_v33 = vcombine.high %v4706_v17, %v4710_v28  ;;  %v4570_v62 = vld [vmem:[%s11653_s3 + $0x988] sm:$0xff] }
 0x39c   : > { %7605 = vmatpush2.bf16.msra.mxu1 %v8914_v34  ;;  %v4574_v0 = vld [vmem:[%s11653_s3 + $0x9a8] sm:$0xff]  ;;  %v9122_v34 = vcombine.low %v4706_v17, %v4710_v28 }
 0x39d   : > { %7606 = vmatprep.subr.bf16.mxu1 %v8907_v5  ;;  %v4698_v2 = vld [vmem:[%s11653_s3 + $0xd88] sm:$0xff]  ;;  %v8987_v4 = vcombine.high %v4570_v62, %v4574_v0 }
 0x39e   : > { %7566 = vmatpush2.bf16.msra.mxu0 %v8778_v9  ;;  %v4702_v42 = vld [vmem:[%s11653_s3 + $0xda8] sm:$0xff]  ;;  %v8986_v9 = vcombine.low %v4570_v62, %v4574_v0 }
 0x39f   : > { %7567 = vmatprep.subr.bf16.mxu0 %v8771_v13  ;;  %v9115_v5 = vcombine.high %v4698_v2, %v4702_v42  ;;  %v4562_v52 = vld [vmem:[%s11653_s3 + $0x948] sm:$0xff] }
 0x3a0   : > { %7607 = vmatpush2.bf16.msra.mxu1 %v8906_v12  ;;  %v4566_v6 = vld [vmem:[%s11653_s3 + $0x968] sm:$0xff]  ;;  %v9114_v12 = vcombine.low %v4698_v2, %v4702_v42 }
 0x3a1   : > { %7608 = vmatprep.subr.bf16.mxu1 %v8899_v11  ;;  %v4690_v7 = vld [vmem:[%s11653_s3 + $0xd48] sm:$0xff]  ;;  %v8979_v13 = vcombine.high %v4562_v52, %v4566_v6 }
 0x3a2   : > { %7568 = vmatpush2.bf16.msra.mxu0 %v8770_v20  ;;  %v4694_v8 = vld [vmem:[%s11653_s3 + $0xd68] sm:$0xff]  ;;  %v8978_v20 = vcombine.low %v4562_v52, %v4566_v6 }
 0x3a3   : > { %7569 = vmatprep.subr.bf16.mxu0 %v8763_v53  ;;  %v9107_v11 = vcombine.high %v4690_v7, %v4694_v8  ;;  %v4554_v14 = vld [vmem:[%s11653_s3 + $0x908] sm:$0xff] }
 0x3a4   : > { %7609 = vmatpush2.bf16.msra.mxu1 %v8898_v24  ;;  %v4558_v16 = vld [vmem:[%s11653_s3 + $0x928] sm:$0xff]  ;;  %v9106_v24 = vcombine.low %v4690_v7, %v4694_v8 }
 0x3a5   : > { %7610 = vmatprep.subr.bf16.mxu1 %v8891_v27  ;;  %v4682_v31 = vld [vmem:[%s11653_s3 + $0xd08] sm:$0xff]  ;;  %v8971_v53 = vcombine.high %v4554_v14, %v4558_v16 }
 0x3a6   : > { %7570 = vmatpush2.bf16.msra.mxu0 %v8762_v55  ;;  %v4686_v37 = vld [vmem:[%s11653_s3 + $0xd28] sm:$0xff]  ;;  %v8970_v55 = vcombine.low %v4554_v14, %v4558_v16 }
 0x3a7   : > { %7571 = vmatprep.subr.bf16.mxu0 %v8755_v58  ;;  %v9099_v27 = vcombine.high %v4682_v31, %v4686_v37  ;;  %v4546_v30 = vld [vmem:[%s11653_s3 + $0x8c8] sm:$0xff] }
 0x3a8   : > { %7611 = vmatpush2.bf16.msra.mxu1 %v8890_v54  ;;  %v4550_v36 = vld [vmem:[%s11653_s3 + $0x8e8] sm:$0xff]  ;;  %v9098_v54 = vcombine.low %v4682_v31, %v4686_v37 }
 0x3a9   : > { %7612 = vmatprep.subr.bf16.mxu1 %v8883_v46  ;;  %v4674_v35 = vld [vmem:[%s11653_s3 + $0xcc8] sm:$0xff]  ;;  %v8963_v58 = vcombine.high %v4546_v30, %v4550_v36 }
 0x3aa   : > { %7572 = vmatpush2.bf16.msra.mxu0 %v8754_v48  ;;  %v4678_v40 = vld [vmem:[%s11653_s3 + $0xce8] sm:$0xff]  ;;  %v8962_v48 = vcombine.low %v4546_v30, %v4550_v36 }
 0x3ab   : > { %7573 = vmatprep.subr.bf16.mxu0 %v8747_v60  ;;  %v9091_v46 = vcombine.high %v4674_v35, %v4678_v40  ;;  %v4538_v50 = vld [vmem:[%s11653_s3 + $0x888] sm:$0xff] }
 0x3ac   : > { %7613 = vmatpush2.bf16.msra.mxu1 %v8882_v10  ;;  %v4542_v41 = vld [vmem:[%s11653_s3 + $0x8a8] sm:$0xff]  ;;  %v9090_v10 = vcombine.low %v4674_v35, %v4678_v40 }
 0x3ad   : > { %7614 = vmatprep.subr.bf16.mxu1 %v8875_v63  ;;  %v4666_v44 = vld [vmem:[%s11653_s3 + $0xc88] sm:$0xff]  ;;  %v8955_v60 = vcombine.high %v4538_v50, %v4542_v41 }
 0x3ae   : > { %7574 = vmatpush2.bf16.msra.mxu0 %v8746_v57  ;;  %v4670_v45 = vld [vmem:[%s11653_s3 + $0xca8] sm:$0xff]  ;;  %v8954_v57 = vcombine.low %v4538_v50, %v4542_v41 }
 0x3af   : > { %7625 = vmatprep.subr.bf16.mxu0 %v8995_v61  ;;  %v9083_v63 = vcombine.high %v4666_v44, %v4670_v45  ;;  %v4530_v49 = vld [vmem:[%s11653_s3 + $0x848] sm:$0xff] }
 0x3b0   : > { %7615 = vmatpush2.bf16.msra.mxu1 %v8874_v59  ;;  %v4534_v1 = vld [vmem:[%s11653_s3 + $0x868] sm:$0xff]  ;;  %v9082_v59 = vcombine.low %v4666_v44, %v4670_v45 }
 0x3b1   : > { %7666 = vmatprep.subr.bf16.mxu1 %v9123_v33  ;;  %7576 = vmatmul.mubr.bf16.vlgmr.msra.gmra.mxu0 %v10202_v25  ;;  %v4658_v17 = vld [vmem:[%s11653_s3 + $0xc48] sm:$0xff]  ;;  %v8947_v61 = vcombine.high %v4530_v49, %v4534_v1 }
 0x3b2   : > { %7626 = vmatpush1.bf16.msra.mxu0 %v8994_v3  ;;  %7657 = vmatprep.mubr.bf16.mxu0 %v10222_v51  ;;  %v4662_v28 = vld [vmem:[%s11653_s3 + $0xc68] sm:$0xff]  ;;  %v8946_v3 = vcombine.low %v4530_v49, %v4534_v1 }
 0x3b3   : > { %7617 = vmatmul.mubr.bf16.vlgmr.msra.gmra.mxu1 %v10214_v47  ;;  %7627 = vmatprep.subr.bf16.mxu0 %v8987_v4  ;;  %v9075_v33 = vcombine.high %v4658_v17, %v4662_v28  ;;  %v4522_v62 = vld [vmem:[%s11653_s3 + $0x808] sm:$0xff] }
 0x3b4   : > { %7667 = vmatpush1.bf16.msra.mxu1 %v9122_v34  ;;  %7698 = vmatprep.mubr.bf16.mxu1 %v10231_v56  ;;  %v4526_v0 = vld [vmem:[%s11653_s3 + $0x828] sm:$0xff]  ;;  %v9074_v34 = vcombine.low %v4658_v17, %v4662_v28 }
 0x3b5   : > { %7668 = vmatprep.subr.bf16.mxu1 %v9115_v5  ;;  %v4650_v2 = vld [vmem:[%s11653_s3 + $0xc08] sm:$0xff]  ;;  %v8939_v4 = vcombine.high %v4522_v62, %v4526_v0 }
 0x3b6   : > { %7628 = vmatpush1.bf16.msra.mxu0 %v8986_v9  ;;  %v4654_v42 = vld [vmem:[%s11653_s3 + $0xc28] sm:$0xff]  ;;  %v8938_v9 = vcombine.low %v4522_v62, %v4526_v0 }
 0x3b7   : > { %7629 = vmatprep.subr.bf16.mxu0 %v8979_v13  ;;  %v9067_v5 = vcombine.high %v4650_v2, %v4654_v42  ;;  %v4642_v52 = vld [vmem:[%s11653_s3 + $0xbc8] sm:$0xff] }
 0x3b8   : > { %7669 = vmatpush1.bf16.msra.mxu1 %v9114_v12  ;;  %v4646_v6 = vld [vmem:[%s11653_s3 + $0xbe8] sm:$0xff]  ;;  %v9066_v12 = vcombine.low %v4650_v2, %v4654_v42 }
 0x3b9   : > { %7670 = vmatprep.subr.bf16.mxu1 %v9107_v11  ;;  %v4770_v7 = vld [vmem:[%s11653_s3 + $0xfc8] sm:$0xff]  ;;  %v9059_v13 = vcombine.high %v4642_v52, %v4646_v6 }
 0x3ba   : > { %7630 = vmatpush1.bf16.msra.mxu0 %v8978_v20  ;;  %v4774_v8 = vld [vmem:[%s11653_s3 + $0xfe8] sm:$0xff]  ;;  %v9058_v20 = vcombine.low %v4642_v52, %v4646_v6 }
 0x3bb   : > { %7631 = vmatprep.subr.bf16.mxu0 %v8971_v53  ;;  %v9187_v11 = vcombine.high %v4770_v7, %v4774_v8  ;;  %v4634_v14 = vld [vmem:[%s11653_s3 + $0xb88] sm:$0xff] }
 0x3bc   : > { %7671 = vmatpush1.bf16.msra.mxu1 %v9106_v24  ;;  %v4638_v16 = vld [vmem:[%s11653_s3 + $0xba8] sm:$0xff]  ;;  %v9186_v24 = vcombine.low %v4770_v7, %v4774_v8 }
 0x3bd   : > { %7672 = vmatprep.subr.bf16.mxu1 %v9099_v27  ;;  %v4762_v31 = vld [vmem:[%s11653_s3 + $0xf88] sm:$0xff]  ;;  %v9051_v53 = vcombine.high %v4634_v14, %v4638_v16 }
 0x3be   : > { %7632 = vmatpush1.bf16.msra.mxu0 %v8970_v55  ;;  %v4766_v37 = vld [vmem:[%s11653_s3 + $0xfa8] sm:$0xff]  ;;  %v9050_v55 = vcombine.low %v4634_v14, %v4638_v16 }
 0x3bf   : > { %7633 = vmatprep.subr.bf16.mxu0 %v8963_v58  ;;  %v9179_v27 = vcombine.high %v4762_v31, %v4766_v37  ;;  %v4626_v30 = vld [vmem:[%s11653_s3 + $0xb48] sm:$0xff] }
 0x3c0   : > { %7673 = vmatpush1.bf16.msra.mxu1 %v9098_v54  ;;  %v4630_v36 = vld [vmem:[%s11653_s3 + $0xb68] sm:$0xff]  ;;  %v9178_v54 = vcombine.low %v4762_v31, %v4766_v37 }
 0x3c1   : > { %7674 = vmatprep.subr.bf16.mxu1 %v9091_v46  ;;  %v4754_v35 = vld [vmem:[%s11653_s3 + $0xf48] sm:$0xff]  ;;  %v9043_v58 = vcombine.high %v4626_v30, %v4630_v36 }
 0x3c2   : > { %7634 = vmatpush1.bf16.msra.mxu0 %v8962_v48  ;;  %v4758_v40 = vld [vmem:[%s11653_s3 + $0xf68] sm:$0xff]  ;;  %v9042_v48 = vcombine.low %v4626_v30, %v4630_v36  ;;  %v4323_v30 = vld [vmem:[%s11653_s3 + $0x1d0] sm:$0xff] }
 0x3c3   : > { %7635 = vmatprep.subr.bf16.mxu0 %v8955_v60  ;;  %v9171_v46 = vcombine.high %v4754_v35, %v4758_v40  ;;  %v4618_v50 = vld [vmem:[%s11653_s3 + $0xb08] sm:$0xff]  ;;  %v4327_v36 = vld [vmem:[%s11653_s3 + $0x1f0] sm:$0xff] }
 0x3c4   : > { %7675 = vmatpush1.bf16.msra.mxu1 %v9090_v10  ;;  %v4622_v41 = vld [vmem:[%s11653_s3 + $0xb28] sm:$0xff]  ;;  %v9170_v10 = vcombine.low %v4754_v35, %v4758_v40  ;;  %v4451_v35 = vld [vmem:[%s11653_s3 + $0x5d0] sm:$0xff] }
 0x3c5   : > { %7676 = vmatprep.subr.bf16.mxu1 %v9083_v63  ;;  %v4746_v44 = vld [vmem:[%s11653_s3 + $0xf08] sm:$0xff]  ;;  %v9035_v60 = vcombine.high %v4618_v50, %v4622_v41  ;;  %v4455_v40 = vld [vmem:[%s11653_s3 + $0x5f0] sm:$0xff] }
 0x3c6   : > { %7636 = vmatpush1.bf16.msra.mxu0 %v8954_v57  ;;  %v4750_v45 = vld [vmem:[%s11653_s3 + $0xf28] sm:$0xff]  ;;  %v9034_v57 = vcombine.low %v4618_v50, %v4622_v41  ;;  %v8869_v50 = vcombine.high %v4451_v35, %v4455_v40  ;;  %v4315_v41 = vld [vmem:[%s11653_s3 + $0x190] sm:$0xff] }
 0x3c7   : > { %7637 = vmatprep.subr.bf16.mxu0 %v8947_v61  ;;  %v9163_v63 = vcombine.high %v4746_v44, %v4750_v45  ;;  %v4610_v49 = vld [vmem:[%s11653_s3 + $0xac8] sm:$0xff] }
 0x3c8   : > { %7677 = vmatpush1.bf16.msra.mxu1 %v9082_v59  ;;  %v4614_v1 = vld [vmem:[%s11653_s3 + $0xae8] sm:$0xff]  ;;  %v9162_v59 = vcombine.low %v4746_v44, %v4750_v45  ;;  %v4319_v44 = vld [vmem:[%s11653_s3 + $0x1b0] sm:$0xff] }
 0x3c9   : > { %7678 = vmatprep.subr.bf16.mxu1 %v9075_v33  ;;  %v4738_v17 = vld [vmem:[%s11653_s3 + $0xec8] sm:$0xff]  ;;  %v9027_v61 = vcombine.high %v4610_v49, %v4614_v1  ;;  %v4443_v45 = vld [vmem:[%s11653_s3 + $0x590] sm:$0xff] }
 0x3ca   : > { %7638 = vmatpush1.bf16.msra.mxu0 %v8946_v3  ;;  %v4742_v28 = vld [vmem:[%s11653_s3 + $0xee8] sm:$0xff]  ;;  %v9026_v3 = vcombine.low %v4610_v49, %v4614_v1  ;;  %v8733_v49 = vcombine.high %v4315_v41, %v4319_v44 }
 0x3cb   : > { %7639 = vmatprep.subr.bf16.mxu0 %v8939_v4  ;;  %v9155_v33 = vcombine.high %v4738_v17, %v4742_v28  ;;  %v4602_v62 = vld [vmem:[%s11653_s3 + $0xa88] sm:$0xff] }
 0x3cc   : > { %7679 = vmatpush1.bf16.msra.mxu1 %v9074_v34  ;;  %v4606_v0 = vld [vmem:[%s11653_s3 + $0xaa8] sm:$0xff]  ;;  %v9154_v34 = vcombine.low %v4738_v17, %v4742_v28  ;;  %v4307_v28 = vld [vmem:[%s11653_s3 + $0x150] sm:$0xff] }
 0x3cd   : > { %7680 = vmatprep.subr.bf16.mxu1 %v9067_v5  ;;  %v4730_v2 = vld [vmem:[%s11653_s3 + $0xe88] sm:$0xff]  ;;  %v9019_v4 = vcombine.high %v4602_v62, %v4606_v0 }
 0x3ce   : > { %7640 = vmatpush1.bf16.msra.mxu0 %v8938_v9  ;;  %v4734_v42 = vld [vmem:[%s11653_s3 + $0xea8] sm:$0xff]  ;;  %v9018_v9 = vcombine.low %v4602_v62, %v4606_v0 }
 0x3cf   : > { %7641 = vmatprep.subr.bf16.mxu0 %v9059_v13  ;;  %v9147_v5 = vcombine.high %v4730_v2, %v4734_v42  ;;  %v4594_v52 = vld [vmem:[%s11653_s3 + $0xa48] sm:$0xff] }
 0x3d0   : > { %7681 = vmatpush1.bf16.msra.mxu1 %v9066_v12  ;;  %v4598_v6 = vld [vmem:[%s11653_s3 + $0xa68] sm:$0xff]  ;;  %v9146_v12 = vcombine.low %v4730_v2, %v4734_v42  ;;  %v8732_v2 = vcombine.low %v4315_v41, %v4319_v44  ;;  %v4287_v41 = vld [vmem:[%s11653_s3 + $0xb0] sm:$0xff] }
 0x3d1   : > { %7682 = vmatprep.subr.bf16.mxu1 %v9187_v11  ;;  %v4722_v7 = vld [vmem:[%s11653_s3 + $0xe48] sm:$0xff]  ;;  %v9011_v13 = vcombine.high %v4594_v52, %v4598_v6  ;;  %v4411_v44 = vld [vmem:[%s11653_s3 + $0x490] sm:$0xff] }
 0x3d2   : > { %7642 = vmatpush2.bf16.msra.mxu0 %v9058_v20  ;;  %v4726_v8 = vld [vmem:[%s11653_s3 + $0xe68] sm:$0xff]  ;;  %v9010_v20 = vcombine.low %v4594_v52, %v4598_v6 }
 0x3d3   : > { %7643 = vmatprep.subr.bf16.mxu0 %v9051_v53  ;;  %v9139_v11 = vcombine.high %v4722_v7, %v4726_v8  ;;  %v4586_v14 = vld [vmem:[%s11653_s3 + $0xa08] sm:$0xff] }
 0x3d4   : > { %7683 = vmatpush2.bf16.msra.mxu1 %v9186_v24  ;;  %v4590_v16 = vld [vmem:[%s11653_s3 + $0xa28] sm:$0xff]  ;;  %v9138_v24 = vcombine.low %v4722_v7, %v4726_v8  ;;  %v4299_v7 = vld [vmem:[%s11653_s3 + $0x110] sm:$0xff] }
 0x3d5   : > { %7684 = vmatprep.subr.bf16.mxu1 %v9179_v27  ;;  %v4714_v31 = vld [vmem:[%s11653_s3 + $0xe08] sm:$0xff]  ;;  %v9003_v53 = vcombine.high %v4586_v14, %v4590_v16  ;;  %v4303_v8 = vld [vmem:[%s11653_s3 + $0x130] sm:$0xff] }
 0x3d6   : > { %7644 = vmatpush2.bf16.msra.mxu0 %v9050_v55  ;;  %v4718_v37 = vld [vmem:[%s11653_s3 + $0xe28] sm:$0xff]  ;;  %v9002_v55 = vcombine.low %v4586_v14, %v4590_v16 }
 0x3d7   : > { %7645 = vmatprep.subr.bf16.mxu0 %v9043_v58  ;;  %v9131_v27 = vcombine.high %v4714_v31, %v4718_v37  ;;  %v10807_v58 = vld [vmem:[%s11654_s4] sm:$0xff] }
 0x3d8   : > { %7685 = vmatpush2.bf16.msra.mxu1 %v9178_v54  ;;  %v9130_v54 = vcombine.low %v4714_v31, %v4718_v37  ;;  %v4786_v1 = vrot.slane %v10807_v58, %v9999_v19 }
 0x3d9   : > { %7686 = vmatprep.subr.bf16.mxu1 %v9171_v46  ;;  %v8741_v46 = vcombine.high %v4323_v30, %v4327_v36 }
 0x3da   : > { %7646 = vmatpush2.bf16.msra.mxu0 %v9042_v48  ;;  %v4447_v48 = vld [vmem:[%s11653_s3 + $0x5b0] sm:$0xff] }
 0x3db   : > { %7647 = vmatprep.subr.bf16.mxu0 %v9035_v60  ;;  %v8740_v60 = vcombine.low %v4323_v30, %v4327_v36  ;;  %v8861_v17 = vcombine.high %v4443_v45, %v4447_v48  ;;  %v4295_v30 = vld [vmem:[%s11653_s3 + $0xf0] sm:$0xff] }
 0x3dc   : > { %7687 = vmatpush2.bf16.msra.mxu1 %v9170_v10  ;;  %v4782_v10 = vrot.slane %v10807_v58, %v9996_v15  ;;  %v4419_v36 = vld [vmem:[%s11653_s3 + $0x4d0] sm:$0xff] }
 0x3dd   : > { %7688 = vmatprep.subr.bf16.mxu1 %v9163_v63  ;;  %v8868_v63 = vcombine.low %v4451_v35, %v4455_v40  ;;  %v4423_v35 = vld [vmem:[%s11653_s3 + $0x4f0] sm:$0xff]  ;;  %v8716_v40 = vcombine.low %v4299_v7, %v4303_v8 }
 0x3de   : > { %7648 = vmatpush2.bf16.msra.mxu0 %v9034_v57  ;;  %v4311_v57 = vld [vmem:[%s11653_s3 + $0x170] sm:$0xff] }
 0x3df   : > { %7649 = vmatprep.subr.bf16.mxu0 %v9027_v61  ;;  %v4435_v61 = vld [vmem:[%s11653_s3 + $0x550] sm:$0xff]  ;;  %v8724_v16 = vcombine.low %v4307_v28, %v4311_v57 }
 0x3e0   : > { %7689 = vmatpush2.bf16.msra.mxu1 %v9162_v59 }
 0x3e1   : > { %7690 = vmatprep.subr.bf16.mxu1 %v9155_v33  ;;  %v4439_v33 = vld [vmem:[%s11653_s3 + $0x570] sm:$0xff] }
 0x3e2   : > { %7650 = vmatpush2.bf16.msra.mxu0 %v9026_v3  ;;  %v8860_v3 = vcombine.low %v4443_v45, %v4447_v48  ;;  %v8853_v6 = vcombine.high %v4435_v61, %v4439_v33  ;;  %v8852_v37 = vcombine.low %v4435_v61, %v4439_v33  ;;  %v4415_v45 = vld [vmem:[%s11653_s3 + $0x4b0] sm:$0xff] }
 0x3e3   : > { %7651 = vmatprep.subr.bf16.mxu0 %v9019_v4 }
 0x3e4   : > { %7691 = vmatpush2.bf16.msra.mxu1 %v9154_v34  ;;  %v8725_v34 = vcombine.high %v4307_v28, %v4311_v57  ;;  %v4407_v28 = vld [vmem:[%s11653_s3 + $0x470] sm:$0xff] }
 0x3e5   : > { %7692 = vmatprep.subr.bf16.mxu1 %v9147_v5 }
 0x3e6   : > { %7652 = vmatpush2.bf16.msra.mxu0 %v9018_v9 }
 0x3e7   : > { %7653 = vmatprep.subr.bf16.mxu0 %v9011_v13  ;;  %v4431_v13 = vld [vmem:[%s11653_s3 + $0x530] sm:$0xff] }
 0x3e8   : > { %7693 = vmatpush2.bf16.msra.mxu1 %v9146_v12  ;;  %v4427_v12 = vld [vmem:[%s11653_s3 + $0x510] sm:$0xff] }
 0x3e9   : > { %7694 = vmatprep.subr.bf16.mxu1 %v9139_v11 }
 0x3ea   : > { %7654 = vmatpush2.bf16.msra.mxu0 %v9010_v20  ;;  %v8717_v20 = vcombine.high %v4299_v7, %v4303_v8  ;;  %v4391_v7 = vld [vmem:[%s11653_s3 + $0x3f0] sm:$0xff] }
 0x3eb   : > { %7655 = vmatprep.subr.bf16.mxu0 %v9003_v53  ;;  %v8845_v53 = vcombine.high %v4427_v12, %v4431_v13  ;;  %v4515_v8 = vld [vmem:[%s11653_s3 + $0x7d0] sm:$0xff] }
 0x3ec   : > { %7695 = vmatpush2.bf16.msra.mxu1 %v9138_v24 }
 0x3ed   : > { %7696 = vmatprep.subr.bf16.mxu1 %v9131_v27  ;;  %v4291_v27 = vld [vmem:[%s11653_s3 + $0xd0] sm:$0xff] }
 0x3ee   : > { %7656 = vmatpush2.bf16.msra.mxu0 %v9002_v55  ;;  %v8844_v55 = vcombine.low %v4427_v12, %v4431_v13  ;;  %v8708_v48 = vcombine.low %v4291_v27, %v4295_v30 }
 0x3ef   : > { %7707 = vmatprep.subr.bf16.mxu0 %v8741_v46  ;;  %v8837_v46 = vcombine.high %v4419_v36, %v4423_v35 }
 0x3f0   : > { %7697 = vmatpush2.bf16.msra.mxu1 %v9130_v54  ;;  %v8709_v54 = vcombine.high %v4291_v27, %v4295_v30 }
 0x3f1   : > { %7748 = vmatprep.subr.bf16.mxu1 %v8869_v50  ;;  %v7413_v59 = vpop.f32.mrf.mxu0  ;;  %7658 = vmatmul.mubr.bf16.vlgmr.msra.gmra.mxu0 %v10412_v21  ;;  %v4283_v50 = vld [vmem:[%s11653_s3 + $0x90] sm:$0xff] }
 0x3f2   : > { %v7414_v62 = vadd.f32 %v7413_v59, %v4782_v10  ;;  %7708 = vmatpush1.bf16.msra.mxu0 %v8740_v60  ;;  %7739 = vmatprep.mubr.bf16.mxu0 %v10096_v22  ;;  %v8836_v10 = vcombine.low %v4419_v36, %v4423_v35  ;;  %v8701_v60 = vcombine.high %v4283_v50, %v4287_v41  ;;  %v4371_v35 = vld [vmem:[%s11653_s3 + $0x350] sm:$0xff] }
 0x3f3   : > { %v7454_v0 = vpop.f32.mrf.mxu1  ;;  %7699 = vmatmul.mubr.bf16.vlgmr.msra.gmra.mxu1 %v10422_v18  ;;  %v7415_v42 = vpop.f32.mrf.mxu0  ;;  %7709 = vmatprep.subr.bf16.mxu0 %v8733_v49  ;;  %v4275_v49 = vld [vmem:[%s11653_s3 + $0x50] sm:$0xff]  ;;  %v8700_v57 = vcombine.low %v4283_v50, %v4287_v41  ;;  %v8828_v59 = vcombine.low %v4411_v44, %v4415_v45 }
 0x3f4   : > { %7749 = vmatpush1.bf16.msra.mxu1 %v8868_v63  ;;  %v10839_v4 = vadd.f32 %v7454_v0, %v7414_v62  ;;  %v7416_v5 = vadd.f32 %v7415_v42, %v4786_v1  ;;  %7780 = vmatprep.mubr.bf16.mxu1 %v10115_v38  ;;  %v8829_v63 = vcombine.high %v4411_v44, %v4415_v45  ;;  %v4279_v1 = vld [vmem:[%s11653_s3 + $0x70] sm:$0xff] }
 0x3f5   : > { %v7456_v52 = vpop.f32.mrf.mxu1  ;;  %7750 = vmatprep.subr.bf16.mxu1 %v8861_v17  ;;  %v7417_v9 = vpop.f32.mrf.mxu0  ;;  %v4403_v17 = vld [vmem:[%s11653_s3 + $0x450] sm:$0xff]  ;;  %v8693_v61 = vcombine.high %v4275_v49, %v4279_v1 }
 0x3f6   : > { %v10855_v11 = vadd.f32 %v7456_v52, %v7416_v5  ;;  %7710 = vmatpush1.bf16.msra.mxu0 %v8732_v2  ;;  %v8821_v33 = vcombine.high %v4403_v17, %v4407_v28  ;;  %v4267_v62 = vld [vmem:[%s11653_s3 + $0x10] sm:$0xff] }
 0x3f7   : > { %v7458_v14 = vpop.f32.mrf.mxu1  ;;  %v7418_v31 = vpop.f32.mrf.mxu0  ;;  %7711 = vmatprep.subr.bf16.mxu0 %v8725_v34  ;;  %v4271_v0 = vld [vmem:[%s11653_s3 + $0x30] sm:$0xff]  ;;  %v8820_v34 = vcombine.low %v4403_v17, %v4407_v28 }
 0x3f8   : > { %7751 = vmatpush1.bf16.msra.mxu1 %v8860_v3  ;;  %v4395_v2 = vld [vmem:[%s11653_s3 + $0x410] sm:$0xff]  ;;  %v8692_v3 = vcombine.low %v4275_v49, %v4279_v1  ;;  %v8685_v5 = vcombine.high %v4267_v62, %v4271_v0  ;;  %v8684_v12 = vcombine.low %v4267_v62, %v4271_v0 }
 0x3f9   : > { %v7459_v24 = vpop.f32.mrf.mxu1  ;;  %7752 = vmatprep.subr.bf16.mxu1 %v8853_v6  ;;  %v4399_v42 = vld [vmem:[%s11653_s3 + $0x430] sm:$0xff] }
 0x3fa   : > { %7712 = vmatpush1.bf16.msra.mxu0 %v8724_v16  ;;  %v8813_v52 = vcombine.high %v4395_v2, %v4399_v42  ;;  %v4387_v6 = vld [vmem:[%s11653_s3 + $0x3d0] sm:$0xff]  ;;  %v8812_v13 = vcombine.low %v4395_v2, %v4399_v42 }
 0x3fb   : > { %7713 = vmatprep.subr.bf16.mxu0 %v8717_v20  ;;  %v4519_v9 = vld [vmem:[%s11653_s3 + $0x7f0] sm:$0xff]  ;;  %v8805_v14 = vcombine.high %v4387_v6, %v4391_v7 }
 0x3fc   : > { %7753 = vmatpush1.bf16.msra.mxu1 %v8852_v37  ;;  %v8933_v16 = vcombine.high %v4515_v8, %v4519_v9  ;;  %v4379_v31 = vld [vmem:[%s11653_s3 + $0x390] sm:$0xff]  ;;  %v8932_v27 = vcombine.low %v4515_v8, %v4519_v9 }
 0x3fd   : > { %7754 = vmatprep.subr.bf16.mxu1 %v8845_v53  ;;  %v4383_v37 = vld [vmem:[%s11653_s3 + $0x3b0] sm:$0xff]  ;;  %v8804_v53 = vcombine.low %v4387_v6, %v4391_v7 }
 0x3fe   : > { %7714 = vmatpush1.bf16.msra.mxu0 %v8716_v40  ;;  %v4507_v20 = vld [vmem:[%s11653_s3 + $0x790] sm:$0xff]  ;;  %v8797_v30 = vcombine.high %v4379_v31, %v4383_v37 }
 0x3ff   : > { %7715 = vmatprep.subr.bf16.mxu0 %v8709_v54  ;;  %v4511_v24 = vld [vmem:[%s11653_s3 + $0x7b0] sm:$0xff] }
 0x400   : > { %7755 = vmatpush1.bf16.msra.mxu1 %v8844_v55  ;;  %v8925_v36 = vcombine.high %v4507_v20, %v4511_v24  ;;  %v4375_v40 = vld [vmem:[%s11653_s3 + $0x370] sm:$0xff]  ;;  %v8924_v50 = vcombine.low %v4507_v20, %v4511_v24 }
 0x401   : > { %7756 = vmatprep.subr.bf16.mxu1 %v8837_v46  ;;  %v4499_v55 = vld [vmem:[%s11653_s3 + $0x750] sm:$0xff]  ;;  %v8796_v46 = vcombine.low %v4379_v31, %v4383_v37  ;;  %v8789_v41 = vcombine.high %v4371_v35, %v4375_v40 }
 0x402   : > { %7716 = vmatpush1.bf16.msra.mxu0 %v8708_v48  ;;  %v4503_v54 = vld [vmem:[%s11653_s3 + $0x770] sm:$0xff] }
 0x403   : > { %7717 = vmatprep.subr.bf16.mxu0 %v8701_v60  ;;  %v8917_v44 = vcombine.high %v4499_v55, %v4503_v54  ;;  %v4363_v45 = vld [vmem:[%s11653_s3 + $0x310] sm:$0xff]  ;;  %v8916_v49 = vcombine.low %v4499_v55, %v4503_v54 }
 0x404   : > { %7757 = vmatpush1.bf16.msra.mxu1 %v8836_v10  ;;  %v4367_v48 = vld [vmem:[%s11653_s3 + $0x330] sm:$0xff] }
 0x405   : > { %7758 = vmatprep.subr.bf16.mxu1 %v8829_v63  ;;  %v4491_v10 = vld [vmem:[%s11653_s3 + $0x710] sm:$0xff]  ;;  %v8788_v63 = vcombine.low %v4371_v35, %v4375_v40  ;;  %v8781_v1 = vcombine.high %v4363_v45, %v4367_v48 }
 0x406   : > { %7718 = vmatpush1.bf16.msra.mxu0 %v8700_v57  ;;  %v4495_v60 = vld [vmem:[%s11653_s3 + $0x730] sm:$0xff] }
 0x407   : > { %7719 = vmatprep.subr.bf16.mxu0 %v8693_v61  ;;  %v8909_v17 = vcombine.high %v4491_v10, %v4495_v60  ;;  %v4355_v28 = vld [vmem:[%s11653_s3 + $0x2d0] sm:$0xff]  ;;  %v8908_v62 = vcombine.low %v4491_v10, %v4495_v60 }
 0x408   : > { %7759 = vmatpush1.bf16.msra.mxu1 %v8828_v59  ;;  %v4359_v57 = vld [vmem:[%s11653_s3 + $0x2f0] sm:$0xff] }
 0x409   : > { %7760 = vmatprep.subr.bf16.mxu1 %v8821_v33  ;;  %v4483_v59 = vld [vmem:[%s11653_s3 + $0x6d0] sm:$0xff]  ;;  %v8780_v33 = vcombine.low %v4363_v45, %v4367_v48  ;;  %v8773_v0 = vcombine.high %v4355_v28, %v4359_v57 }
 0x40a   : > { %7720 = vmatpush1.bf16.msra.mxu0 %v8692_v3  ;;  %v4487_v61 = vld [vmem:[%s11653_s3 + $0x6f0] sm:$0xff] }
 0x40b   : > { %7721 = vmatprep.subr.bf16.mxu0 %v8685_v5  ;;  %v8901_v2 = vcombine.high %v4483_v59, %v4487_v61  ;;  %v4347_v42 = vld [vmem:[%s11653_s3 + $0x290] sm:$0xff]  ;;  %v8900_v6 = vcombine.low %v4483_v59, %v4487_v61  ;;  %v11028_v59 = vld [vmem:[%s11655_s5] sm:$0xff] }
 0x40c   : > { %7761 = vmatpush1.bf16.msra.mxu1 %v8820_v34  ;;  %v4351_v3 = vld [vmem:[%s11653_s3 + $0x2b0] sm:$0xff] }
 0x40d   : > { %7762 = vmatprep.subr.bf16.mxu1 %v8813_v52  ;;  %v4475_v34 = vld [vmem:[%s11653_s3 + $0x690] sm:$0xff]  ;;  %v8772_v52 = vcombine.low %v4355_v28, %v4359_v57  ;;  %v8765_v7 = vcombine.high %v4347_v42, %v4351_v3 }
 0x40e   : > { %7722 = vmatpush1.bf16.msra.mxu0 %v8684_v12  ;;  %v4479_v5 = vld [vmem:[%s11653_s3 + $0x6b0] sm:$0xff] }
 0x40f   : > { %7723 = vmatprep.subr.bf16.mxu0 %v8805_v14  ;;  %v8893_v8 = vcombine.high %v4475_v34, %v4479_v5  ;;  %v4339_v9 = vld [vmem:[%s11653_s3 + $0x250] sm:$0xff]  ;;  %v8892_v31 = vcombine.low %v4475_v34, %v4479_v5 }
 0x410   : > { %7763 = vmatpush1.bf16.msra.mxu1 %v8812_v13  ;;  %v4343_v12 = vld [vmem:[%s11653_s3 + $0x270] sm:$0xff] }
 0x411   : > { %7764 = vmatprep.subr.bf16.mxu1 %v8933_v16  ;;  %v4467_v13 = vld [vmem:[%s11653_s3 + $0x650] sm:$0xff]  ;;  %v8764_v16 = vcombine.low %v4347_v42, %v4351_v3  ;;  %v8757_v37 = vcombine.high %v4339_v9, %v4343_v12 }
 0x412   : > { %7724 = vmatpush2.bf16.msra.mxu0 %v8804_v53  ;;  %v4471_v14 = vld [vmem:[%s11653_s3 + $0x670] sm:$0xff] }
 0x413   : > { %7725 = vmatprep.subr.bf16.mxu0 %v8797_v30  ;;  %v8885_v20 = vcombine.high %v4467_v13, %v4471_v14  ;;  %v4331_v24 = vld [vmem:[%s11653_s3 + $0x210] sm:$0xff]  ;;  %v8884_v35 = vcombine.low %v4467_v13, %v4471_v14 }
 0x414   : > { %7765 = vmatpush2.bf16.msra.mxu1 %v8932_v27  ;;  %v4335_v53 = vld [vmem:[%s11653_s3 + $0x230] sm:$0xff] }
 0x415   : > { %7766 = vmatprep.subr.bf16.mxu1 %v8925_v36  ;;  %v4459_v27 = vld [vmem:[%s11653_s3 + $0x610] sm:$0xff]  ;;  %v8756_v36 = vcombine.low %v4339_v9, %v4343_v12  ;;  %v8749_v40 = vcombine.high %v4331_v24, %v4335_v53 }
 0x416   : > { %7726 = vmatpush2.bf16.msra.mxu0 %v8796_v46  ;;  %v4463_v30 = vld [vmem:[%s11653_s3 + $0x630] sm:$0xff] }
 0x417   : > { %7727 = vmatprep.subr.bf16.mxu0 %v8789_v41  ;;  %v8877_v55 = vcombine.high %v4459_v27, %v4463_v30  ;;  %v4579_v54 = vld [vmem:[%s11653_s3 + $0x9d0] sm:$0xff]  ;;  %v8876_v45 = vcombine.low %v4459_v27, %v4463_v30 }
 0x418   : > { %7767 = vmatpush2.bf16.msra.mxu1 %v8924_v50  ;;  %v4583_v46 = vld [vmem:[%s11653_s3 + $0x9f0] sm:$0xff] }
 0x419   : > { %7768 = vmatprep.subr.bf16.mxu1 %v8917_v44  ;;  %v4707_v50 = vld [vmem:[%s11653_s3 + $0xdd0] sm:$0xff]  ;;  %v8748_v44 = vcombine.low %v4331_v24, %v4335_v53  ;;  %v8997_v48 = vcombine.high %v4579_v54, %v4583_v46  ;;  %v8052_v24 = vrot.slane %v11028_v59, %v9999_v19 }
 0x41a   : > { %7728 = vmatpush2.bf16.msra.mxu0 %v8788_v63  ;;  %v4711_v41 = vld [vmem:[%s11653_s3 + $0xdf0] sm:$0xff] }
 0x41b   : > { %7729 = vmatprep.subr.bf16.mxu0 %v8781_v1  ;;  %v9125_v10 = vcombine.high %v4707_v50, %v4711_v41  ;;  %v4571_v60 = vld [vmem:[%s11653_s3 + $0x990] sm:$0xff]  ;;  %v9124_v28 = vcombine.low %v4707_v50, %v4711_v41 }
 0x41c   : > { %7769 = vmatpush2.bf16.msra.mxu1 %v8916_v49  ;;  %v4575_v63 = vld [vmem:[%s11653_s3 + $0x9b0] sm:$0xff] }
 0x41d   : > { %7770 = vmatprep.subr.bf16.mxu1 %v8909_v17  ;;  %v4699_v49 = vld [vmem:[%s11653_s3 + $0xd90] sm:$0xff]  ;;  %v8996_v17 = vcombine.low %v4579_v54, %v4583_v46  ;;  %v8989_v57 = vcombine.high %v4571_v60, %v4575_v63  ;;  %v8988_v5 = vcombine.low %v4571_v60, %v4575_v63 }
 0x41e   : > { %7730 = vmatpush2.bf16.msra.mxu0 %v8780_v33  ;;  %v4703_v1 = vld [vmem:[%s11653_s3 + $0xdb0] sm:$0xff] }
 0x41f   : > { %7731 = vmatprep.subr.bf16.mxu0 %v8773_v0  ;;  %v9117_v61 = vcombine.high %v4699_v49, %v4703_v1  ;;  %v4563_v33 = vld [vmem:[%s11653_s3 + $0x950] sm:$0xff] }
 0x420   : > { %7771 = vmatpush2.bf16.msra.mxu1 %v8908_v62  ;;  %v4567_v62 = vld [vmem:[%s11653_s3 + $0x970] sm:$0xff] }
 0x421   : > { %7772 = vmatprep.subr.bf16.mxu1 %v8901_v2  ;;  %v4691_v2 = vld [vmem:[%s11653_s3 + $0xd50] sm:$0xff]  ;;  %v8980_v27 = vcombine.low %v4563_v33, %v4567_v62 }
 0x422   : > { %7732 = vmatpush2.bf16.msra.mxu0 %v8772_v52  ;;  %v4695_v42 = vld [vmem:[%s11653_s3 + $0xd70] sm:$0xff]  ;;  %v8048_v52 = vrot.slane %v11028_v59, %v9996_v15 }
 0x423   : > { %7733 = vmatprep.subr.bf16.mxu0 %v8765_v7  ;;  %v9116_v7 = vcombine.low %v4699_v49, %v4703_v1  ;;  %v9109_v14 = vcombine.high %v4691_v2, %v4695_v42  ;;  %v4547_v50 = vld [vmem:[%s11653_s3 + $0x8d0] sm:$0xff] }
 0x424   : > { %7773 = vmatpush2.bf16.msra.mxu1 %v8900_v6  ;;  %v4551_v19 = vld [vmem:[%s11653_s3 + $0x8f0] sm:$0xff] }
 0x425   : > { %7774 = vmatprep.subr.bf16.mxu1 %v8893_v8  ;;  %v8981_v8 = vcombine.high %v4563_v33, %v4567_v62  ;;  %v4675_v41 = vld [vmem:[%s11653_s3 + $0xcd0] sm:$0xff]  ;;  %v8965_v60 = vcombine.high %v4547_v50, %v4551_v19  ;;  %v8964_v62 = vcombine.low %v4547_v50, %v4551_v19 }
 0x426   : > { %7734 = vmatpush2.bf16.msra.mxu0 %v8764_v16  ;;  %v4559_v16 = vld [vmem:[%s11653_s3 + $0x930] sm:$0xff] }
 0x427   : > { %7735 = vmatprep.subr.bf16.mxu0 %v8757_v37  ;;  %v4671_v33 = vld [vmem:[%s11653_s3 + $0xcb0] sm:$0xff] }
 0x428   : > { %7775 = vmatpush2.bf16.msra.mxu1 %v8892_v31  ;;  %v4683_v31 = vld [vmem:[%s11653_s3 + $0xd10] sm:$0xff] }
 0x429   : > { %7776 = vmatprep.subr.bf16.mxu1 %v8885_v20 }
 0x42a   : > { %7736 = vmatpush2.bf16.msra.mxu0 %v8756_v36  ;;  %v9108_v36 = vcombine.low %v4691_v2, %v4695_v42 }
 0x42b   : > { %7737 = vmatprep.subr.bf16.mxu0 %v8749_v40 }
 0x42c   : > { %7777 = vmatpush2.bf16.msra.mxu1 %v8884_v35 }
 0x42d   : > { %7778 = vmatprep.subr.bf16.mxu1 %v8877_v55 }
 0x42e   : > { %7738 = vmatpush2.bf16.msra.mxu0 %v8748_v44  ;;  %v4679_v44 = vld [vmem:[%s11653_s3 + $0xcf0] sm:$0xff] }
 0x42f   : > { %7789 = vmatprep.subr.bf16.mxu0 %v8997_v48  ;;  %v9093_v1 = vcombine.high %v4675_v41, %v4679_v44 }
 0x430   : > { %7779 = vmatpush2.bf16.msra.mxu1 %v8876_v45 }
 0x431   : > { %7830 = vmatprep.subr.bf16.mxu1 %v9125_v10  ;;  %v7495_v0 = vpop.f32.mrf.mxu0  ;;  %7740 = vmatmul.mubr.bf16.vlgmr.msra.gmra.mxu0 %v10202_v25 }
 0x432   : > { %v7496_v3 = vadd.f32 %v7495_v0, %v10839_v4  ;;  %7790 = vmatpush1.bf16.msra.mxu0 %v8996_v17  ;;  %v4555_v4 = vld [vmem:[%s11653_s3 + $0x910] sm:$0xff]  ;;  %7821 = vmatprep.mubr.bf16.mxu0 %v10222_v51  ;;  %v9092_v0 = vcombine.low %v4675_v41, %v4679_v44 }
 0x433   : > { %v7536_v34 = vpop.f32.mrf.mxu1  ;;  %7781 = vmatmul.mubr.bf16.vlgmr.msra.gmra.mxu1 %v10214_v47  ;;  %v7497_v6 = vpop.f32.mrf.mxu0  ;;  %7791 = vmatprep.subr.bf16.mxu0 %v8989_v57  ;;  %v8973_v35 = vcombine.high %v4555_v4, %v4559_v16  ;;  %v8972_v48 = vcombine.low %v4555_v4, %v4559_v16  ;;  %v4539_v17 = vld [vmem:[%s11653_s3 + $0x890] sm:$0xff] }
 0x434   : > { %7831 = vmatpush1.bf16.msra.mxu1 %v9124_v28  ;;  %v7537_v9 = vadd.f32 %v7536_v34, %v7496_v3  ;;  %v7498_v12 = vadd.f32 %v7497_v6, %v10855_v11  ;;  %v4687_v11 = vld [vmem:[%s11653_s3 + $0xd30] sm:$0xff]  ;;  %7862 = vmatprep.mubr.bf16.mxu1 %v10231_v56 }
 0x435   : > { %v7538_v13 = vpop.f32.mrf.mxu1  ;;  %7832 = vmatprep.subr.bf16.mxu1 %v9117_v61  ;;  %v7499_v15 = vpop.f32.mrf.mxu0  ;;  %v9101_v46 = vcombine.high %v4683_v31, %v4687_v11  ;;  %v9100_v10 = vcombine.low %v4683_v31, %v4687_v11  ;;  %v4543_v28 = vld [vmem:[%s11653_s3 + $0x8b0] sm:$0xff] }
 0x436   : > { %v8035_v37 = vmax.f32 %v7537_v9, 0.0  ;;  %v7539_v20 = vadd.f32 %v7538_v13, %v7498_v12  ;;  %7792 = vmatpush1.bf16.msra.mxu0 %v8988_v5  ;;  %v4667_v61 = vld [vmem:[%s11653_s3 + $0xc90] sm:$0xff]  ;;  %v8957_v2 = vcombine.high %v4539_v17, %v4543_v28  ;;  %v8956_v6 = vcombine.low %v4539_v17, %v4543_v28 }
 0x437   : > { %v7540_v53 = vpop.f32.mrf.mxu1  ;;  %v7500_v30 = vpop.f32.mrf.mxu0  ;;  %7793 = vmatprep.subr.bf16.mxu0 %v8981_v8  ;;  %v9085_v42 = vcombine.high %v4667_v61, %v4671_v33  ;;  %v4531_v3 = vld [vmem:[%s11653_s3 + $0x850] sm:$0xff] }
 0x438   : > { %7833 = vmatpush1.bf16.msra.mxu1 %v9116_v7  ;;  %v8085_v40 = vmul.f32 %v8048_v52, %v8035_v37  ;;  %v8036_v55 = vmax.f32 %v7539_v20, 0.0  ;;  %v4535_v34 = vld [vmem:[%s11653_s3 + $0x870] sm:$0xff]  ;;  %v9084_v7 = vcombine.low %v4667_v61, %v4671_v33 }
 0x439   : > { %v7541_v54 = vpop.f32.mrf.mxu1  ;;  %7834 = vmatprep.subr.bf16.mxu1 %v9109_v14  ;;  %v4659_v5 = vld [vmem:[%s11653_s3 + $0xc50] sm:$0xff]  ;;  %v8949_v8 = vcombine.high %v4531_v3, %v4535_v34  ;;  %v8948_v16 = vcombine.low %v4531_v3, %v4535_v34 }
 0x43a   : > { %v8086_v45 = vmul.f32 %v8052_v24, %v8036_v55  ;;  %7794 = vmatpush1.bf16.msra.mxu0 %v8980_v27  ;;  %v8094_v63 = vsel %vm8093_vm0, %v8085_v40, 0.0  ;;  %v4663_v52 = vld [vmem:[%s11653_s3 + $0xc70] sm:$0xff] }
 0x43b   : > { %7795 = vmatprep.subr.bf16.mxu0 %v8973_v35  ;;  %v9077_v9 = vcombine.high %v4659_v5, %v4663_v52  ;;  %v4523_v12 = vld [vmem:[%s11653_s3 + $0x810] sm:$0xff]  ;;  %v9076_v15 = vcombine.low %v4659_v5, %v4663_v52 }
 0x43c   : > { %7835 = vmatpush1.bf16.msra.mxu1 %v9108_v36  ;;  %v8095_v49 = vsel %vm8093_vm0, %v8086_v45, 0.0  ;;  %v4527_v13 = vld [vmem:[%s11653_s3 + $0x830] sm:$0xff] }
 0x43d   : > { %7836 = vmatprep.subr.bf16.mxu1 %v9101_v46  ;;  %v11084_v57 = vadd.f32 %v8095_v49, %v8094_v63  ;;  %v4651_v14 = vld [vmem:[%s11653_s3 + $0xc10] sm:$0xff]  ;;  %v8941_v31 = vcombine.high %v4523_v12, %v4527_v13  ;;  %v8940_v27 = vcombine.low %v4523_v12, %v4527_v13 }
 0x43e   : > { %7796 = vmatpush1.bf16.msra.mxu0 %v8972_v48  ;;  %v4655_v4 = vld [vmem:[%s11653_s3 + $0xc30] sm:$0xff] }
 0x43f   : > { %7797 = vmatprep.subr.bf16.mxu0 %v8965_v60  ;;  %v9069_v11 = vcombine.high %v4651_v14, %v4655_v4  ;;  %v4643_v37 = vld [vmem:[%s11653_s3 + $0xbd0] sm:$0xff]  ;;  %v9068_v30 = vcombine.low %v4651_v14, %v4655_v4 }
 0x440   : > { %7837 = vmatpush1.bf16.msra.mxu1 %v9100_v10  ;;  %v4647_v20 = vld [vmem:[%s11653_s3 + $0xbf0] sm:$0xff] }
 0x441   : > { %7838 = vmatprep.subr.bf16.mxu1 %v9093_v1  ;;  %v4771_v24 = vld [vmem:[%s11653_s3 + $0xfd0] sm:$0xff]  ;;  %v9061_v36 = vcombine.high %v4643_v37, %v4647_v20  ;;  %v9060_v50 = vcombine.low %v4643_v37, %v4647_v20 }
 0x442   : > { %7798 = vmatpush1.bf16.msra.mxu0 %v8964_v62  ;;  %v4775_v53 = vld [vmem:[%s11653_s3 + $0xff0] sm:$0xff] }
 0x443   : > { %7799 = vmatprep.subr.bf16.mxu0 %v8957_v2  ;;  %v9189_v35 = vcombine.high %v4771_v24, %v4775_v53  ;;  %v4635_v40 = vld [vmem:[%s11653_s3 + $0xb90] sm:$0xff]  ;;  %v9188_v19 = vcombine.low %v4771_v24, %v4775_v53 }
 0x444   : > { %7839 = vmatpush1.bf16.msra.mxu1 %v9092_v0  ;;  %v4639_v55 = vld [vmem:[%s11653_s3 + $0xbb0] sm:$0xff] }
 0x445   : > { %7840 = vmatprep.subr.bf16.mxu1 %v9085_v42  ;;  %v4763_v54 = vld [vmem:[%s11653_s3 + $0xf90] sm:$0xff]  ;;  %v9053_v41 = vcombine.high %v4635_v40, %v4639_v55  ;;  %v9052_v63 = vcombine.low %v4635_v40, %v4639_v55 }
 0x446   : > { %7800 = vmatpush1.bf16.msra.mxu0 %v8956_v6  ;;  %v4767_v46 = vld [vmem:[%s11653_s3 + $0xfb0] sm:$0xff] }
 0x447   : > { %7801 = vmatprep.subr.bf16.mxu0 %v8949_v8  ;;  %v9181_v44 = vcombine.high %v4763_v54, %v4767_v46  ;;  %v4627_v45 = vld [vmem:[%s11653_s3 + $0xb50] sm:$0xff]  ;;  %v9180_v49 = vcombine.low %v4763_v54, %v4767_v46 }
 0x448   : > { %7841 = vmatpush1.bf16.msra.mxu1 %v9084_v7  ;;  %v4631_v48 = vld [vmem:[%s11653_s3 + $0xb70] sm:$0xff] }
 0x449   : > { %7842 = vmatprep.subr.bf16.mxu1 %v9077_v9  ;;  %v4755_v10 = vld [vmem:[%s11653_s3 + $0xf50] sm:$0xff]  ;;  %v9045_v1 = vcombine.high %v4627_v45, %v4631_v48  ;;  %v9044_v0 = vcombine.low %v4627_v45, %v4631_v48  ;;  %v4324_v48 = vld [vmem:[%s11653_s3 + $0x1d8] sm:$0xff] }
 0x44a   : > { %7802 = vmatpush1.bf16.msra.mxu0 %v8948_v16  ;;  %v4759_v60 = vld [vmem:[%s11653_s3 + $0xf70] sm:$0xff] }
 0x44b   : > { %7803 = vmatprep.subr.bf16.mxu0 %v8941_v31  ;;  %v9173_v17 = vcombine.high %v4755_v10, %v4759_v60  ;;  %v4619_v28 = vld [vmem:[%s11653_s3 + $0xb10] sm:$0xff]  ;;  %v9172_v2 = vcombine.low %v4755_v10, %v4759_v60  ;;  %v4328_v10 = vld [vmem:[%s11653_s3 + $0x1f8] sm:$0xff] }
 0x44c   : > { %7843 = vmatpush1.bf16.msra.mxu1 %v9076_v15  ;;  %v4623_v61 = vld [vmem:[%s11653_s3 + $0xb30] sm:$0xff]  ;;  %v4452_v60 = vld [vmem:[%s11653_s3 + $0x5d8] sm:$0xff] }
 0x44d   : > { %7844 = vmatprep.subr.bf16.mxu1 %v9069_v11  ;;  %v4747_v33 = vld [vmem:[%s11653_s3 + $0xf10] sm:$0xff]  ;;  %v9037_v42 = vcombine.high %v4619_v28, %v4623_v61  ;;  %v9036_v7 = vcombine.low %v4619_v28, %v4623_v61  ;;  %v4316_v61 = vld [vmem:[%s11653_s3 + $0x198] sm:$0xff] }
 0x44e   : > { %7804 = vmatpush1.bf16.msra.mxu0 %v8940_v27  ;;  %v4751_v62 = vld [vmem:[%s11653_s3 + $0xf30] sm:$0xff] }
 0x44f   : > { %7805 = vmatprep.subr.bf16.mxu0 %v9061_v36  ;;  %v9165_v3 = vcombine.high %v4747_v33, %v4751_v62  ;;  %v4611_v34 = vld [vmem:[%s11653_s3 + $0xad0] sm:$0xff]  ;;  %v9164_v8 = vcombine.low %v4747_v33, %v4751_v62  ;;  %v4320_v33 = vld [vmem:[%s11653_s3 + $0x1b8] sm:$0xff] }
 0x450   : > { %7845 = vmatpush1.bf16.msra.mxu1 %v9068_v30  ;;  %v4615_v5 = vld [vmem:[%s11653_s3 + $0xaf0] sm:$0xff]  ;;  %v4444_v62 = vld [vmem:[%s11653_s3 + $0x598] sm:$0xff] }
 0x451   : > { %7846 = vmatprep.subr.bf16.mxu1 %v9189_v35  ;;  %v4739_v52 = vld [vmem:[%s11653_s3 + $0xed0] sm:$0xff]  ;;  %v9029_v9 = vcombine.high %v4611_v34, %v4615_v5  ;;  %v9028_v15 = vcombine.low %v4611_v34, %v4615_v5  ;;  %v8735_v34 = vcombine.high %v4316_v61, %v4320_v33  ;;  %v4794_v5 = vrot.slane %v10807_v58, %v10011_v43 }
 0x452   : > { %7806 = vmatpush2.bf16.msra.mxu0 %v9060_v50  ;;  %v4743_v6 = vld [vmem:[%s11653_s3 + $0xef0] sm:$0xff] }
 0x453   : > { %7807 = vmatprep.subr.bf16.mxu0 %v9053_v41  ;;  %v9157_v12 = vcombine.high %v4739_v52, %v4743_v6  ;;  %v4603_v13 = vld [vmem:[%s11653_s3 + $0xa90] sm:$0xff]  ;;  %v9156_v31 = vcombine.low %v4739_v52, %v4743_v6  ;;  %v4308_v6 = vld [vmem:[%s11653_s3 + $0x158] sm:$0xff] }
 0x454   : > { %7847 = vmatpush2.bf16.msra.mxu1 %v9188_v19  ;;  %v4607_v14 = vld [vmem:[%s11653_s3 + $0xab0] sm:$0xff] }
 0x455   : > { %7848 = vmatprep.subr.bf16.mxu1 %v9181_v44  ;;  %v4731_v4 = vld [vmem:[%s11653_s3 + $0xe90] sm:$0xff]  ;;  %v9021_v11 = vcombine.high %v4603_v13, %v4607_v14  ;;  %v9020_v30 = vcombine.low %v4603_v13, %v4607_v14  ;;  %v8734_v14 = vcombine.low %v4316_v61, %v4320_v33 }
 0x456   : > { %7808 = vmatpush2.bf16.msra.mxu0 %v9052_v63  ;;  %v4735_v16 = vld [vmem:[%s11653_s3 + $0xeb0] sm:$0xff]  ;;  %v4456_v63 = vld [vmem:[%s11653_s3 + $0x5f8] sm:$0xff] }
 0x457   : > { %7809 = vmatprep.subr.bf16.mxu0 %v9045_v1  ;;  %v9149_v37 = vcombine.high %v4731_v4, %v4735_v16  ;;  %v4595_v20 = vld [vmem:[%s11653_s3 + $0xa50] sm:$0xff]  ;;  %v9148_v36 = vcombine.low %v4731_v4, %v4735_v16  ;;  %v8871_v28 = vcombine.high %v4452_v60, %v4456_v63 }
 0x458   : > { %7849 = vmatpush2.bf16.msra.mxu1 %v9180_v49  ;;  %v4599_v24 = vld [vmem:[%s11653_s3 + $0xa70] sm:$0xff] }
 0x459   : > { %7850 = vmatprep.subr.bf16.mxu1 %v9173_v17  ;;  %v4723_v53 = vld [vmem:[%s11653_s3 + $0xe50] sm:$0xff]  ;;  %v9013_v35 = vcombine.high %v4595_v20, %v4599_v24  ;;  %v9012_v19 = vcombine.low %v4595_v20, %v4599_v24  ;;  %v8743_v17 = vcombine.high %v4324_v48, %v4328_v10  ;;  %v4300_v24 = vld [vmem:[%s11653_s3 + $0x118] sm:$0xff] }
 0x45a   : > { %7810 = vmatpush2.bf16.msra.mxu0 %v9044_v0  ;;  %v4727_v27 = vld [vmem:[%s11653_s3 + $0xe70] sm:$0xff]  ;;  %v4448_v0 = vld [vmem:[%s11653_s3 + $0x5b8] sm:$0xff] }
 0x45b   : > { %7811 = vmatprep.subr.bf16.mxu0 %v9037_v42  ;;  %v9141_v40 = vcombine.high %v4723_v53, %v4727_v27  ;;  %v4587_v55 = vld [vmem:[%s11653_s3 + $0xa10] sm:$0xff]  ;;  %v9140_v41 = vcombine.low %v4723_v53, %v4727_v27  ;;  %v8742_v42 = vcombine.low %v4324_v48, %v4328_v10  ;;  %v8863_v52 = vcombine.high %v4444_v62, %v4448_v0  ;;  %v4304_v53 = vld [vmem:[%s11653_s3 + $0x138] sm:$0xff] }
 0x45c   : > { %7851 = vmatpush2.bf16.msra.mxu1 %v9172_v2  ;;  %v4591_v54 = vld [vmem:[%s11653_s3 + $0xa30] sm:$0xff]  ;;  %v4790_v2 = vrot.slane %v10807_v58, %v10008_v23  ;;  %v4440_v58 = vld [vmem:[%s11653_s3 + $0x578] sm:$0xff]  ;;  %v8862_v16 = vcombine.low %v4444_v62, %v4448_v0  ;;  %v8718_v48 = vcombine.low %v4300_v24, %v4304_v53 }
 0x45d   : > { %7852 = vmatprep.subr.bf16.mxu1 %v9165_v3  ;;  %v4715_v46 = vld [vmem:[%s11653_s3 + $0xe10] sm:$0xff]  ;;  %v9005_v44 = vcombine.high %v4587_v55, %v4591_v54  ;;  %v9004_v49 = vcombine.low %v4587_v55, %v4591_v54  ;;  %v8870_v3 = vcombine.low %v4452_v60, %v4456_v63 }
 0x45e   : > { %7812 = vmatpush2.bf16.msra.mxu0 %v9036_v7  ;;  %v4719_v50 = vld [vmem:[%s11653_s3 + $0xe30] sm:$0xff]  ;;  %v4312_v7 = vld [vmem:[%s11653_s3 + $0x178] sm:$0xff] }
 0x45f   : > { %7813 = vmatprep.subr.bf16.mxu0 %v9029_v9  ;;  %v9133_v45 = vcombine.high %v4715_v46, %v4719_v50  ;;  %v9132_v1 = vcombine.low %v4715_v46, %v4719_v50  ;;  %v4436_v9 = vld [vmem:[%s11653_s3 + $0x558] sm:$0xff]  ;;  %v8726_v55 = vcombine.low %v4308_v6, %v4312_v7  ;;  %v8719_v46 = vcombine.high %v4300_v24, %v4304_v53 }
 0x460   : > { %7853 = vmatpush2.bf16.msra.mxu1 %v9164_v8  ;;  %v8855_v20 = vcombine.high %v4436_v9, %v4440_v58 }
 0x461   : > { %7854 = vmatprep.subr.bf16.mxu1 %v9157_v12 }
 0x462   : > { %7814 = vmatpush2.bf16.msra.mxu0 %v9028_v15  ;;  %v8727_v15 = vcombine.high %v4308_v6, %v4312_v7 }
 0x463   : > { %7815 = vmatprep.subr.bf16.mxu0 %v9021_v11 }
 0x464   : > { %7855 = vmatpush2.bf16.msra.mxu1 %v9156_v31 }
 0x465   : > { %7856 = vmatprep.subr.bf16.mxu1 %v9149_v37 }
 0x466   : > { %7816 = vmatpush2.bf16.msra.mxu0 %v9020_v30  ;;  %v4428_v30 = vld [vmem:[%s11653_s3 + $0x518] sm:$0xff] }
 0x467   : > { %7817 = vmatprep.subr.bf16.mxu0 %v9013_v35 }
 0x468   : > { %7857 = vmatpush2.bf16.msra.mxu1 %v9148_v36  ;;  %v4432_v36 = vld [vmem:[%s11653_s3 + $0x538] sm:$0xff] }
 0x469   : > { %7858 = vmatprep.subr.bf16.mxu1 %v9141_v40  ;;  %v8846_v10 = vcombine.low %v4428_v30, %v4432_v36 }
 0x46a   : > { %7818 = vmatpush2.bf16.msra.mxu0 %v9012_v19  ;;  %v8847_v19 = vcombine.high %v4428_v30, %v4432_v36  ;;  %v4380_v36 = vld [vmem:[%s11653_s3 + $0x398] sm:$0xff] }
 0x46b   : > { %7819 = vmatprep.subr.bf16.mxu0 %v9005_v44  ;;  %v4420_v44 = vld [vmem:[%s11653_s3 + $0x4d8] sm:$0xff] }
 0x46c   : > { %7859 = vmatpush2.bf16.msra.mxu1 %v9140_v41  ;;  %v4292_v41 = vld [vmem:[%s11653_s3 + $0xd8] sm:$0xff] }
 0x46d   : > { %7860 = vmatprep.subr.bf16.mxu1 %v9133_v45  ;;  %v4424_v45 = vld [vmem:[%s11653_s3 + $0x4f8] sm:$0xff] }
 0x46e   : > { %7820 = vmatpush2.bf16.msra.mxu0 %v9004_v49  ;;  %v8839_v63 = vcombine.high %v4420_v44, %v4424_v45  ;;  %v4284_v49 = vld [vmem:[%s11653_s3 + $0x98] sm:$0xff]  ;;  %v8838_v33 = vcombine.low %v4420_v44, %v4424_v45 }
 0x46f   : > { %7871 = vmatprep.subr.bf16.mxu0 %v8743_v17  ;;  %v4412_v17 = vld [vmem:[%s11653_s3 + $0x498] sm:$0xff] }
 0x470   : > { %7861 = vmatpush2.bf16.msra.mxu1 %v9132_v1  ;;  %v4288_v1 = vld [vmem:[%s11653_s3 + $0xb8] sm:$0xff] }
 0x471   : > { %7912 = vmatprep.subr.bf16.mxu1 %v8871_v28  ;;  %v7577_v8 = vpop.f32.mrf.mxu0  ;;  %7822 = vmatmul.mubr.bf16.vlgmr.msra.gmra.mxu0 %v10412_v21  ;;  %v4416_v28 = vld [vmem:[%s11653_s3 + $0x4b8] sm:$0xff]  ;;  %v8703_v62 = vcombine.high %v4284_v49, %v4288_v1 }
 0x472   : > { %v7578_v12 = vadd.f32 %v7577_v8, %v4790_v2  ;;  %7872 = vmatpush1.bf16.msra.mxu0 %v8742_v42  ;;  %7903 = vmatprep.mubr.bf16.mxu0 %v10096_v22  ;;  %v8854_v22 = vcombine.low %v4436_v9, %v4440_v58  ;;  %v8831_v0 = vcombine.high %v4412_v17, %v4416_v28  ;;  %v4276_v2 = vld [vmem:[%s11653_s3 + $0x58] sm:$0xff] }
 0x473   : > { %v7618_v13 = vpop.f32.mrf.mxu1  ;;  %7863 = vmatmul.mubr.bf16.vlgmr.msra.gmra.mxu1 %v10422_v18  ;;  %v7579_v4 = vpop.f32.mrf.mxu0  ;;  %7873 = vmatprep.subr.bf16.mxu0 %v8735_v34  ;;  %v4280_v42 = vld [vmem:[%s11653_s3 + $0x78] sm:$0xff] }
 0x474   : > { %7913 = vmatpush1.bf16.msra.mxu1 %v8870_v3  ;;  %v11254_v31 = vadd.f32 %v7618_v13, %v7578_v12  ;;  %v7580_v11 = vadd.f32 %v7579_v4, %v4794_v5  ;;  %7944 = vmatprep.mubr.bf16.mxu1 %v10115_v38  ;;  %v4296_v38 = vld [vmem:[%s11653_s3 + $0xf8] sm:$0xff]  ;;  %v8702_v5 = vcombine.low %v4284_v49, %v4288_v1 }
 0x475   : > { %v7620_v37 = vpop.f32.mrf.mxu1  ;;  %7914 = vmatprep.subr.bf16.mxu1 %v8863_v52  ;;  %v7581_v27 = vpop.f32.mrf.mxu0  ;;  %v8711_v60 = vcombine.high %v4292_v41, %v4296_v38  ;;  %v8710_v61 = vcombine.low %v4292_v41, %v4296_v38  ;;  %v4404_v3 = vld [vmem:[%s11653_s3 + $0x458] sm:$0xff]  ;;  %v8830_v52 = vcombine.low %v4412_v17, %v4416_v28  ;;  %v8695_v6 = vcombine.high %v4276_v2, %v4280_v42 }
 0x476   : > { %v11270_v35 = vadd.f32 %v7620_v37, %v7580_v11  ;;  %7874 = vmatpush1.bf16.msra.mxu0 %v8734_v14  ;;  %v4408_v34 = vld [vmem:[%s11653_s3 + $0x478] sm:$0xff]  ;;  %v8694_v13 = vcombine.low %v4276_v2, %v4280_v42 }
 0x477   : > { %v7622_v40 = vpop.f32.mrf.mxu1  ;;  %v7582_v54 = vpop.f32.mrf.mxu0  ;;  %7875 = vmatprep.subr.bf16.mxu0 %v8727_v15  ;;  %v8823_v7 = vcombine.high %v4404_v3, %v4408_v34  ;;  %v4268_v8 = vld [vmem:[%s11653_s3 + $0x18] sm:$0xff]  ;;  %v8822_v14 = vcombine.low %v4404_v3, %v4408_v34 }
 0x478   : > { %7915 = vmatpush1.bf16.msra.mxu1 %v8862_v16  ;;  %v4272_v9 = vld [vmem:[%s11653_s3 + $0x38] sm:$0xff] }
 0x479   : > { %v7623_v50 = vpop.f32.mrf.mxu1  ;;  %7916 = vmatprep.subr.bf16.mxu1 %v8855_v20  ;;  %v4396_v58 = vld [vmem:[%s11653_s3 + $0x418] sm:$0xff]  ;;  %v8687_v4 = vcombine.high %v4268_v8, %v4272_v9  ;;  %v8686_v24 = vcombine.low %v4268_v8, %v4272_v9 }
 0x47a   : > { %7876 = vmatpush1.bf16.msra.mxu0 %v8726_v55  ;;  %v4400_v12 = vld [vmem:[%s11653_s3 + $0x438] sm:$0xff] }
 0x47b   : > { %7877 = vmatprep.subr.bf16.mxu0 %v8719_v46  ;;  %v8815_v16 = vcombine.high %v4396_v58, %v4400_v12  ;;  %v4388_v15 = vld [vmem:[%s11653_s3 + $0x3d8] sm:$0xff]  ;;  %v8814_v53 = vcombine.low %v4396_v58, %v4400_v12 }
 0x47c   : > { %7917 = vmatpush1.bf16.msra.mxu1 %v8854_v22  ;;  %v4392_v11 = vld [vmem:[%s11653_s3 + $0x3f8] sm:$0xff] }
 0x47d   : > { %7918 = vmatprep.subr.bf16.mxu1 %v8847_v19  ;;  %v4516_v37 = vld [vmem:[%s11653_s3 + $0x7d8] sm:$0xff]  ;;  %v8807_v27 = vcombine.high %v4388_v15, %v4392_v11  ;;  %v8806_v22 = vcombine.low %v4388_v15, %v4392_v11 }
 0x47e   : > { %7878 = vmatpush1.bf16.msra.mxu0 %v8718_v48  ;;  %v4520_v20 = vld [vmem:[%s11653_s3 + $0x7f8] sm:$0xff] }
 0x47f   : > { %7879 = vmatprep.subr.bf16.mxu0 %v8711_v60  ;;  %v8935_v30 = vcombine.high %v4516_v37, %v4520_v20  ;;  %v4384_v40 = vld [vmem:[%s11653_s3 + $0x3b8] sm:$0xff]  ;;  %v8934_v46 = vcombine.low %v4516_v37, %v4520_v20 }
 0x480   : > { %7919 = vmatpush1.bf16.msra.mxu1 %v8846_v10  ;;  %v4508_v55 = vld [vmem:[%s11653_s3 + $0x798] sm:$0xff]  ;;  %v8799_v50 = vcombine.high %v4380_v36, %v4384_v40  ;;  %v8798_v48 = vcombine.low %v4380_v36, %v4384_v40 }
 0x481   : > { %7920 = vmatprep.subr.bf16.mxu1 %v8839_v63  ;;  %v4512_v54 = vld [vmem:[%s11653_s3 + $0x7b8] sm:$0xff] }
 0x482   : > { %7880 = vmatpush1.bf16.msra.mxu0 %v8710_v61  ;;  %v8927_v19 = vcombine.high %v4508_v55, %v4512_v54  ;;  %v4372_v41 = vld [vmem:[%s11653_s3 + $0x358] sm:$0xff]  ;;  %v8926_v10 = vcombine.low %v4508_v55, %v4512_v54 }
 0x483   : > { %7881 = vmatprep.subr.bf16.mxu0 %v8703_v62  ;;  %v4376_v38 = vld [vmem:[%s11653_s3 + $0x378] sm:$0xff] }
 0x484   : > { %7921 = vmatpush1.bf16.msra.mxu1 %v8838_v33  ;;  %v4500_v44 = vld [vmem:[%s11653_s3 + $0x758] sm:$0xff]  ;;  %v8791_v60 = vcombine.high %v4372_v41, %v4376_v38  ;;  %v8790_v61 = vcombine.low %v4372_v41, %v4376_v38 }
 0x485   : > { %7922 = vmatprep.subr.bf16.mxu1 %v8831_v0  ;;  %v4504_v45 = vld [vmem:[%s11653_s3 + $0x778] sm:$0xff] }
 0x486   : > { %7882 = vmatpush1.bf16.msra.mxu0 %v8702_v5  ;;  %v8919_v63 = vcombine.high %v4500_v44, %v4504_v45  ;;  %v4364_v49 = vld [vmem:[%s11653_s3 + $0x318] sm:$0xff]  ;;  %v8918_v33 = vcombine.low %v4500_v44, %v4504_v45 }
 0x487   : > { %7883 = vmatprep.subr.bf16.mxu0 %v8695_v6  ;;  %v4368_v1 = vld [vmem:[%s11653_s3 + $0x338] sm:$0xff] }
 0x488   : > { %7923 = vmatpush1.bf16.msra.mxu1 %v8830_v52  ;;  %v4492_v17 = vld [vmem:[%s11653_s3 + $0x718] sm:$0xff]  ;;  %v8783_v62 = vcombine.high %v4364_v49, %v4368_v1  ;;  %v8782_v5 = vcombine.low %v4364_v49, %v4368_v1 }
 0x489   : > { %7924 = vmatprep.subr.bf16.mxu1 %v8823_v7  ;;  %v4496_v28 = vld [vmem:[%s11653_s3 + $0x738] sm:$0xff] }
 0x48a   : > { %7884 = vmatpush1.bf16.msra.mxu0 %v8694_v13  ;;  %v8911_v0 = vcombine.high %v4492_v17, %v4496_v28  ;;  %v4356_v2 = vld [vmem:[%s11653_s3 + $0x2d8] sm:$0xff]  ;;  %v8910_v52 = vcombine.low %v4492_v17, %v4496_v28 }
 0x48b   : > { %7885 = vmatprep.subr.bf16.mxu0 %v8687_v4  ;;  %v4360_v42 = vld [vmem:[%s11653_s3 + $0x2f8] sm:$0xff] }
 0x48c   : > { %7925 = vmatpush1.bf16.msra.mxu1 %v8822_v14  ;;  %v4484_v3 = vld [vmem:[%s11653_s3 + $0x6d8] sm:$0xff]  ;;  %v8775_v6 = vcombine.high %v4356_v2, %v4360_v42  ;;  %v8774_v13 = vcombine.low %v4356_v2, %v4360_v42 }
 0x48d   : > { %7926 = vmatprep.subr.bf16.mxu1 %v8815_v16  ;;  %v4488_v34 = vld [vmem:[%s11653_s3 + $0x6f8] sm:$0xff] }
 0x48e   : > { %7886 = vmatpush1.bf16.msra.mxu0 %v8686_v24  ;;  %v8903_v7 = vcombine.high %v4484_v3, %v4488_v34  ;;  %v4348_v8 = vld [vmem:[%s11653_s3 + $0x298] sm:$0xff]  ;;  %v8902_v14 = vcombine.low %v4484_v3, %v4488_v34 }
 0x48f   : > { %7887 = vmatprep.subr.bf16.mxu0 %v8807_v27  ;;  %v4352_v9 = vld [vmem:[%s11653_s3 + $0x2b8] sm:$0xff] }
 0x490   : > { %7927 = vmatpush1.bf16.msra.mxu1 %v8814_v53  ;;  %v4476_v58 = vld [vmem:[%s11653_s3 + $0x698] sm:$0xff]  ;;  %v8767_v4 = vcombine.high %v4348_v8, %v4352_v9  ;;  %v8766_v24 = vcombine.low %v4348_v8, %v4352_v9  ;;  %v8056_v8 = vrot.slane %v11028_v59, %v10008_v23 }
 0x491   : > { %7928 = vmatprep.subr.bf16.mxu1 %v8935_v30  ;;  %v4480_v12 = vld [vmem:[%s11653_s3 + $0x6b8] sm:$0xff] }
 0x492   : > { %7888 = vmatpush2.bf16.msra.mxu0 %v8806_v22  ;;  %v8895_v16 = vcombine.high %v4476_v58, %v4480_v12  ;;  %v4340_v15 = vld [vmem:[%s11653_s3 + $0x258] sm:$0xff]  ;;  %v8894_v53 = vcombine.low %v4476_v58, %v4480_v12 }
 0x493   : > { %7889 = vmatprep.subr.bf16.mxu0 %v8799_v50  ;;  %v4344_v11 = vld [vmem:[%s11653_s3 + $0x278] sm:$0xff] }
 0x494   : > { %7929 = vmatpush2.bf16.msra.mxu1 %v8934_v46  ;;  %v4468_v37 = vld [vmem:[%s11653_s3 + $0x658] sm:$0xff]  ;;  %v8759_v27 = vcombine.high %v4340_v15, %v4344_v11  ;;  %v8758_v22 = vcombine.low %v4340_v15, %v4344_v11 }
 0x495   : > { %7930 = vmatprep.subr.bf16.mxu1 %v8927_v19  ;;  %v4472_v20 = vld [vmem:[%s11653_s3 + $0x678] sm:$0xff] }
 0x496   : > { %7890 = vmatpush2.bf16.msra.mxu0 %v8798_v48  ;;  %v8887_v30 = vcombine.high %v4468_v37, %v4472_v20  ;;  %v4332_v36 = vld [vmem:[%s11653_s3 + $0x218] sm:$0xff]  ;;  %v8886_v46 = vcombine.low %v4468_v37, %v4472_v20  ;;  %v8060_v37 = vrot.slane %v11028_v59, %v10011_v43 }
 0x497   : > { %7891 = vmatprep.subr.bf16.mxu0 %v8791_v60  ;;  %v4336_v40 = vld [vmem:[%s11653_s3 + $0x238] sm:$0xff] }
 0x498   : > { %7931 = vmatpush2.bf16.msra.mxu1 %v8926_v10  ;;  %v4460_v55 = vld [vmem:[%s11653_s3 + $0x618] sm:$0xff]  ;;  %v8751_v50 = vcombine.high %v4332_v36, %v4336_v40  ;;  %v8750_v48 = vcombine.low %v4332_v36, %v4336_v40 }
 0x499   : > { %7932 = vmatprep.subr.bf16.mxu1 %v8919_v63  ;;  %v4464_v54 = vld [vmem:[%s11653_s3 + $0x638] sm:$0xff] }
 0x49a   : > { %7892 = vmatpush2.bf16.msra.mxu0 %v8790_v61  ;;  %v8879_v19 = vcombine.high %v4460_v55, %v4464_v54  ;;  %v4580_v41 = vld [vmem:[%s11653_s3 + $0x9d8] sm:$0xff]  ;;  %v8878_v10 = vcombine.low %v4460_v55, %v4464_v54 }
 0x49b   : > { %7893 = vmatprep.subr.bf16.mxu0 %v8783_v62  ;;  %v4584_v38 = vld [vmem:[%s11653_s3 + $0x9f8] sm:$0xff] }
 0x49c   : > { %7933 = vmatpush2.bf16.msra.mxu1 %v8918_v33  ;;  %v4708_v44 = vld [vmem:[%s11653_s3 + $0xdd8] sm:$0xff]  ;;  %v8999_v60 = vcombine.high %v4580_v41, %v4584_v38  ;;  %v8998_v61 = vcombine.low %v4580_v41, %v4584_v38 }
 0x49d   : > { %7934 = vmatprep.subr.bf16.mxu1 %v8911_v0  ;;  %v4712_v45 = vld [vmem:[%s11653_s3 + $0xdf8] sm:$0xff] }
 0x49e   : > { %7894 = vmatpush2.bf16.msra.mxu0 %v8782_v5  ;;  %v9127_v63 = vcombine.high %v4708_v44, %v4712_v45  ;;  %v4572_v49 = vld [vmem:[%s11653_s3 + $0x998] sm:$0xff]  ;;  %v9126_v33 = vcombine.low %v4708_v44, %v4712_v45 }
 0x49f   : > { %7895 = vmatprep.subr.bf16.mxu0 %v8775_v6  ;;  %v4576_v1 = vld [vmem:[%s11653_s3 + $0x9b8] sm:$0xff] }
 0x4a0   : > { %7935 = vmatpush2.bf16.msra.mxu1 %v8910_v52  ;;  %v4700_v17 = vld [vmem:[%s11653_s3 + $0xd98] sm:$0xff]  ;;  %v8991_v62 = vcombine.high %v4572_v49, %v4576_v1 }
 0x4a1   : > { %7936 = vmatprep.subr.bf16.mxu1 %v8903_v7  ;;  %v4704_v28 = vld [vmem:[%s11653_s3 + $0xdb8] sm:$0xff]  ;;  %v8990_v7 = vcombine.low %v4572_v49, %v4576_v1 }
 0x4a2   : > { %7896 = vmatpush2.bf16.msra.mxu0 %v8774_v13  ;;  %v9119_v0 = vcombine.high %v4700_v17, %v4704_v28  ;;  %v4564_v2 = vld [vmem:[%s11653_s3 + $0x958] sm:$0xff]  ;;  %v9118_v9 = vcombine.low %v4700_v17, %v4704_v28 }
 0x4a3   : > { %7897 = vmatprep.subr.bf16.mxu0 %v8767_v4  ;;  %v4568_v42 = vld [vmem:[%s11653_s3 + $0x978] sm:$0xff] }
 0x4a4   : > { %7937 = vmatpush2.bf16.msra.mxu1 %v8902_v14  ;;  %v4692_v34 = vld [vmem:[%s11653_s3 + $0xd58] sm:$0xff]  ;;  %v8983_v58 = vcombine.high %v4564_v2, %v4568_v42 }
 0x4a5   : > { %7938 = vmatprep.subr.bf16.mxu1 %v8895_v16  ;;  %v4696_v5 = vld [vmem:[%s11653_s3 + $0xd78] sm:$0xff] }
 0x4a6   : > { %7898 = vmatpush2.bf16.msra.mxu0 %v8766_v24  ;;  %v9111_v4 = vcombine.high %v4692_v34, %v4696_v5  ;;  %v4684_v16 = vld [vmem:[%s11653_s3 + $0xd18] sm:$0xff]  ;;  %v8982_v24 = vcombine.low %v4564_v2, %v4568_v42 }
 0x4a7   : > { %7899 = vmatprep.subr.bf16.mxu0 %v8759_v27  ;;  %v4552_v43 = vld [vmem:[%s11653_s3 + $0x8f8] sm:$0xff] }
 0x4a8   : > { %7939 = vmatpush2.bf16.msra.mxu1 %v8894_v53  ;;  %v9110_v53 = vcombine.low %v4692_v34, %v4696_v5  ;;  %v4676_v59 = vld [vmem:[%s11653_s3 + $0xcd8] sm:$0xff] }
 0x4a9   : > { %7940 = vmatprep.subr.bf16.mxu1 %v8887_v30  ;;  %v4680_v54 = vld [vmem:[%s11653_s3 + $0xcf8] sm:$0xff] }
 0x4aa   : > { %7900 = vmatpush2.bf16.msra.mxu0 %v8758_v22  ;;  %v9095_v45 = vcombine.high %v4676_v59, %v4680_v54  ;;  %v9094_v1 = vcombine.low %v4676_v59, %v4680_v54  ;;  %v4524_v5 = vld [vmem:[%s11653_s3 + $0x818] sm:$0xff] }
 0x4ab   : > { %7901 = vmatprep.subr.bf16.mxu0 %v8751_v50  ;;  %v4620_v54 = vld [vmem:[%s11653_s3 + $0xb18] sm:$0xff] }
 0x4ac   : > { %7941 = vmatpush2.bf16.msra.mxu1 %v8886_v46 }
 0x4ad   : > { %7942 = vmatprep.subr.bf16.mxu1 %v8879_v19 }
 0x4ae   : > { %7902 = vmatpush2.bf16.msra.mxu0 %v8750_v48  ;;  %v4540_v48 = vld [vmem:[%s11653_s3 + $0x898] sm:$0xff] }
 0x4af   : > { %7953 = vmatprep.subr.bf16.mxu0 %v8999_v60 }
 0x4b0   : > { %7943 = vmatpush2.bf16.msra.mxu1 %v8878_v10  ;;  %v4544_v10 = vld [vmem:[%s11653_s3 + $0x8b8] sm:$0xff] }
 0x4b1   : > { %7994 = vmatprep.subr.bf16.mxu1 %v9127_v63  ;;  %v7659_v3 = vpop.f32.mrf.mxu0  ;;  %7904 = vmatmul.mubr.bf16.vlgmr.msra.gmra.mxu0 %v10202_v25  ;;  %v4672_v63 = vld [vmem:[%s11653_s3 + $0xcb8] sm:$0xff]  ;;  %v8959_v17 = vcombine.high %v4540_v48, %v4544_v10  ;;  %v8958_v2 = vcombine.low %v4540_v48, %v4544_v10 }
 0x4b2   : > { %v7660_v52 = vadd.f32 %v7659_v3, %v11254_v31  ;;  %7954 = vmatpush1.bf16.msra.mxu0 %v8998_v61  ;;  %v4560_v31 = vld [vmem:[%s11653_s3 + $0x938] sm:$0xff]  ;;  %7985 = vmatprep.mubr.bf16.mxu0 %v10222_v51 }
 0x4b3   : > { %v7700_v6 = vpop.f32.mrf.mxu1  ;;  %7945 = vmatmul.mubr.bf16.vlgmr.msra.gmra.mxu1 %v10214_v47  ;;  %v7661_v25 = vpop.f32.mrf.mxu0  ;;  %7955 = vmatprep.subr.bf16.mxu0 %v8991_v62  ;;  %v4556_v47 = vld [vmem:[%s11653_s3 + $0x918] sm:$0xff] }
 0x4b4   : > { %7995 = vmatpush1.bf16.msra.mxu1 %v9126_v33  ;;  %v7701_v12 = vadd.f32 %v7700_v6, %v7660_v52  ;;  %v7662_v13 = vadd.f32 %v7661_v25, %v11270_v35  ;;  %v4688_v35 = vld [vmem:[%s11653_s3 + $0xd38] sm:$0xff]  ;;  %8026 = vmatprep.mubr.bf16.mxu1 %v10231_v56  ;;  %v8975_v27 = vcombine.high %v4556_v47, %v4560_v31 }
 0x4b5   : > { %v7702_v14 = vpop.f32.mrf.mxu1  ;;  %7996 = vmatprep.subr.bf16.mxu1 %v9119_v0  ;;  %v7663_v23 = vpop.f32.mrf.mxu0  ;;  %v9103_v55 = vcombine.high %v4684_v16, %v4688_v35  ;;  %v4548_v56 = vld [vmem:[%s11653_s3 + $0x8d8] sm:$0xff]  ;;  %v8974_v50 = vcombine.low %v4556_v47, %v4560_v31  ;;  %v9102_v41 = vcombine.low %v4684_v16, %v4688_v35 }
 0x4b6   : > { %v8037_v15 = vmax.f32 %v7701_v12, 0.0  ;;  %v7703_v11 = vadd.f32 %v7702_v14, %v7662_v13  ;;  %7956 = vmatpush1.bf16.msra.mxu0 %v8990_v7  ;;  %v8967_v38 = vcombine.high %v4548_v56, %v4552_v43  ;;  %v8966_v49 = vcombine.low %v4548_v56, %v4552_v43  ;;  %v4532_v61 = vld [vmem:[%s11653_s3 + $0x858] sm:$0xff] }
 0x4b7   : > { %v7704_v20 = vpop.f32.mrf.mxu1  ;;  %v7664_v51 = vpop.f32.mrf.mxu0  ;;  %7957 = vmatprep.subr.bf16.mxu0 %v8983_v58  ;;  %v4536_v33 = vld [vmem:[%s11653_s3 + $0x878] sm:$0xff] }
 0x4b8   : > { %7997 = vmatpush1.bf16.msra.mxu1 %v9118_v9  ;;  %v8087_v30 = vmul.f32 %v8056_v8, %v8037_v15  ;;  %v8038_v36 = vmax.f32 %v7703_v11, 0.0  ;;  %v4660_v62 = vld [vmem:[%s11653_s3 + $0xc58] sm:$0xff]  ;;  %v8951_v3 = vcombine.high %v4532_v61, %v4536_v33  ;;  %v8950_v8 = vcombine.low %v4532_v61, %v4536_v33 }
 0x4b9   : > { %v7705_v40 = vpop.f32.mrf.mxu1  ;;  %7998 = vmatprep.subr.bf16.mxu1 %v9111_v4  ;;  %v4664_v0 = vld [vmem:[%s11653_s3 + $0xc78] sm:$0xff] }
 0x4ba   : > { %v8097_v22 = vsel %vm8093_vm0, %v8087_v30, 0.0  ;;  %v8088_v46 = vmul.f32 %v8060_v37, %v8038_v36  ;;  %7958 = vmatpush1.bf16.msra.mxu0 %v8982_v24  ;;  %v9079_v34 = vcombine.high %v4660_v62, %v4664_v0  ;;  %v4528_v52 = vld [vmem:[%s11653_s3 + $0x838] sm:$0xff]  ;;  %v9078_v25 = vcombine.low %v4660_v62, %v4664_v0 }
 0x4bb   : > { %v8098_v19 = vadd.f32 %v8097_v22, %v11084_v57  ;;  %7959 = vmatprep.subr.bf16.mxu0 %v8975_v27  ;;  %v4668_v57 = vld [vmem:[%s11653_s3 + $0xc98] sm:$0xff]  ;;  %v8943_v9 = vcombine.high %v4524_v5, %v4528_v52  ;;  %v8942_v47 = vcombine.low %v4524_v5, %v4528_v52 }
 0x4bc   : > { %7999 = vmatpush1.bf16.msra.mxu1 %v9110_v53  ;;  %v8099_v44 = vsel %vm8093_vm0, %v8088_v46, 0.0  ;;  %v9087_v28 = vcombine.high %v4668_v57, %v4672_v63  ;;  %v9086_v42 = vcombine.low %v4668_v57, %v4672_v63  ;;  %v4652_v6 = vld [vmem:[%s11653_s3 + $0xc18] sm:$0xff] }
 0x4bd   : > { %8000 = vmatprep.subr.bf16.mxu1 %v9103_v55  ;;  %v11495_v60 = vadd.f32 %v8099_v44, %v8098_v19  ;;  %v4656_v7 = vld [vmem:[%s11653_s3 + $0xc38] sm:$0xff] }
 0x4be   : > { %7960 = vmatpush1.bf16.msra.mxu0 %v8974_v50  ;;  %v9071_v58 = vcombine.high %v4652_v6, %v4656_v7  ;;  %v4644_v12 = vld [vmem:[%s11653_s3 + $0xbd8] sm:$0xff]  ;;  %v9070_v31 = vcombine.low %v4652_v6, %v4656_v7 }
 0x4bf   : > { %7961 = vmatprep.subr.bf16.mxu0 %v8967_v38  ;;  %v4648_v13 = vld [vmem:[%s11653_s3 + $0xbf8] sm:$0xff] }
 0x4c0   : > { %8001 = vmatpush1.bf16.msra.mxu1 %v9102_v41  ;;  %v4772_v14 = vld [vmem:[%s11653_s3 + $0xfd8] sm:$0xff]  ;;  %v9063_v23 = vcombine.high %v4644_v12, %v4648_v13  ;;  %v9062_v20 = vcombine.low %v4644_v12, %v4648_v13 }
 0x4c1   : > { %8002 = vmatprep.subr.bf16.mxu1 %v9095_v45  ;;  %v4776_v4 = vld [vmem:[%s11653_s3 + $0xff8] sm:$0xff] }
 0x4c2   : > { %7962 = vmatpush1.bf16.msra.mxu0 %v8966_v49  ;;  %v9191_v16 = vcombine.high %v4772_v14, %v4776_v4  ;;  %v4636_v35 = vld [vmem:[%s11653_s3 + $0xb98] sm:$0xff]  ;;  %v9190_v24 = vcombine.low %v4772_v14, %v4776_v4 }
 0x4c3   : > { %7963 = vmatprep.subr.bf16.mxu0 %v8959_v17  ;;  %v4640_v15 = vld [vmem:[%s11653_s3 + $0xbb8] sm:$0xff] }
 0x4c4   : > { %8003 = vmatpush1.bf16.msra.mxu1 %v9094_v1  ;;  %v4764_v11 = vld [vmem:[%s11653_s3 + $0xf98] sm:$0xff]  ;;  %v9055_v51 = vcombine.high %v4636_v35, %v4640_v15  ;;  %v9054_v55 = vcombine.low %v4636_v35, %v4640_v15  ;;  %v9208_v15 = vld [vmem:[%s11654_s4] sm:$0xff] }
 0x4c5   : > { %8004 = vmatprep.subr.bf16.mxu1 %v9087_v28  ;;  %v4768_v37 = vld [vmem:[%s11653_s3 + $0xfb8] sm:$0xff] }
 0x4c6   : > { %7964 = vmatpush1.bf16.msra.mxu0 %v8958_v2  ;;  %v9183_v53 = vcombine.high %v4764_v11, %v4768_v37  ;;  %v4628_v27 = vld [vmem:[%s11653_s3 + $0xb58] sm:$0xff]  ;;  %v9182_v56 = vcombine.low %v4764_v11, %v4768_v37  ;;  %v4798_v11 = vrot.slane %v9208_v15, %v10101_v26  ;;  %v4802_v37 = vrot.slane %v9208_v15, %v10104_v29 }
 0x4c7   : > { %7965 = vmatprep.subr.bf16.mxu0 %v8951_v3  ;;  %v4632_v30 = vld [vmem:[%s11653_s3 + $0xb78] sm:$0xff] }
 0x4c8   : > { %8005 = vmatpush1.bf16.msra.mxu1 %v9086_v42  ;;  %v4756_v36 = vld [vmem:[%s11653_s3 + $0xf58] sm:$0xff]  ;;  %v9047_v43 = vcombine.high %v4628_v27, %v4632_v30  ;;  %v9046_v19 = vcombine.low %v4628_v27, %v4632_v30 }
 0x4c9   : > { %8006 = vmatprep.subr.bf16.mxu1 %v9079_v34  ;;  %v4760_v40 = vld [vmem:[%s11653_s3 + $0xf78] sm:$0xff] }
 0x4ca   : > { %7966 = vmatpush1.bf16.msra.mxu0 %v8950_v8  ;;  %v9175_v59 = vcombine.high %v4756_v36, %v4760_v40  ;;  %v4624_v22 = vld [vmem:[%s11653_s3 + $0xb38] sm:$0xff]  ;;  %v9174_v41 = vcombine.low %v4756_v36, %v4760_v40 }
 0x4cb   : > { %7967 = vmatprep.subr.bf16.mxu0 %v8943_v9  ;;  %v4748_v46 = vld [vmem:[%s11653_s3 + $0xf18] sm:$0xff]  ;;  %v9039_v38 = vcombine.high %v4620_v54, %v4624_v22  ;;  %v9038_v63 = vcombine.low %v4620_v54, %v4624_v22 }
 0x4cc   : > { %8007 = vmatpush1.bf16.msra.mxu1 %v9078_v25  ;;  %v4752_v50 = vld [vmem:[%s11653_s3 + $0xf38] sm:$0xff] }
 0x4cd   : > { %8008 = vmatprep.subr.bf16.mxu1 %v9071_v58  ;;  %v9167_v44 = vcombine.high %v4748_v46, %v4752_v50  ;;  %v4612_v45 = vld [vmem:[%s11653_s3 + $0xad8] sm:$0xff]  ;;  %v9166_v49 = vcombine.low %v4748_v46, %v4752_v50 }
 0x4ce   : > { %7968 = vmatpush1.bf16.msra.mxu0 %v8942_v47  ;;  %v4616_v48 = vld [vmem:[%s11653_s3 + $0xaf8] sm:$0xff] }
 0x4cf   : > { %7969 = vmatprep.subr.bf16.mxu0 %v9063_v23  ;;  %v4740_v10 = vld [vmem:[%s11653_s3 + $0xed8] sm:$0xff]  ;;  %v9031_v1 = vcombine.high %v4612_v45, %v4616_v48  ;;  %v9030_v0 = vcombine.low %v4612_v45, %v4616_v48 }
 0x4d0   : > { %8009 = vmatpush1.bf16.msra.mxu1 %v9070_v31  ;;  %v4744_v57 = vld [vmem:[%s11653_s3 + $0xef8] sm:$0xff] }
 0x4d1   : > { %8010 = vmatprep.subr.bf16.mxu1 %v9191_v16  ;;  %v9159_v17 = vcombine.high %v4740_v10, %v4744_v57  ;;  %v4604_v28 = vld [vmem:[%s11653_s3 + $0xa98] sm:$0xff]  ;;  %v9158_v2 = vcombine.low %v4740_v10, %v4744_v57 }
 0x4d2   : > { %7970 = vmatpush2.bf16.msra.mxu0 %v9062_v20  ;;  %v4608_v61 = vld [vmem:[%s11653_s3 + $0xab8] sm:$0xff] }
 0x4d3   : > { %7971 = vmatprep.subr.bf16.mxu0 %v9055_v51  ;;  %v4732_v33 = vld [vmem:[%s11653_s3 + $0xe98] sm:$0xff]  ;;  %v9023_v42 = vcombine.high %v4604_v28, %v4608_v61  ;;  %v9022_v7 = vcombine.low %v4604_v28, %v4608_v61 }
 0x4d4   : > { %8011 = vmatpush2.bf16.msra.mxu1 %v9190_v24  ;;  %v4736_v62 = vld [vmem:[%s11653_s3 + $0xeb8] sm:$0xff] }
 0x4d5   : > { %8012 = vmatprep.subr.bf16.mxu1 %v9183_v53  ;;  %v9151_v3 = vcombine.high %v4732_v33, %v4736_v62  ;;  %v4596_v34 = vld [vmem:[%s11653_s3 + $0xa58] sm:$0xff]  ;;  %v9150_v8 = vcombine.low %v4732_v33, %v4736_v62 }
 0x4d6   : > { %7972 = vmatpush2.bf16.msra.mxu0 %v9054_v55  ;;  %v4600_v5 = vld [vmem:[%s11653_s3 + $0xa78] sm:$0xff] }
 0x4d7   : > { %7973 = vmatprep.subr.bf16.mxu0 %v9047_v43  ;;  %v4724_v52 = vld [vmem:[%s11653_s3 + $0xe58] sm:$0xff]  ;;  %v9015_v25 = vcombine.high %v4596_v34, %v4600_v5  ;;  %v9014_v4 = vcombine.low %v4596_v34, %v4600_v5 }
 0x4d8   : > { %8013 = vmatpush2.bf16.msra.mxu1 %v9182_v56  ;;  %v4728_v6 = vld [vmem:[%s11653_s3 + $0xe78] sm:$0xff] }
 0x4d9   : > { %8014 = vmatprep.subr.bf16.mxu1 %v9175_v59  ;;  %v9143_v9 = vcombine.high %v4724_v52, %v4728_v6  ;;  %v4588_v58 = vld [vmem:[%s11653_s3 + $0xa18] sm:$0xff]  ;;  %v9142_v47 = vcombine.low %v4724_v52, %v4728_v6  ;;  %v4806_v6 = vrot.slane %v9208_v15, %v10107_v32 }
 0x4da   : > { %7974 = vmatpush2.bf16.msra.mxu0 %v9046_v19  ;;  %v4592_v12 = vld [vmem:[%s11653_s3 + $0xa38] sm:$0xff] }
 0x4db   : > { %7975 = vmatprep.subr.bf16.mxu0 %v9039_v38  ;;  %v4716_v13 = vld [vmem:[%s11653_s3 + $0xe18] sm:$0xff]  ;;  %v9007_v31 = vcombine.high %v4588_v58, %v4592_v12  ;;  %v9006_v16 = vcombine.low %v4588_v58, %v4592_v12 }
 0x4dc   : > { %8015 = vmatpush2.bf16.msra.mxu1 %v9174_v41  ;;  %v4720_v14 = vld [vmem:[%s11653_s3 + $0xe38] sm:$0xff] }
 0x4dd   : > { %8016 = vmatprep.subr.bf16.mxu1 %v9167_v44  ;;  %v9135_v23 = vcombine.high %v4716_v13, %v4720_v14  ;;  %v9134_v35 = vcombine.low %v4716_v13, %v4720_v14 }
 0x4de   : > { %7976 = vmatpush2.bf16.msra.mxu0 %v9038_v63 }
 0x4df   : > { %7977 = vmatprep.subr.bf16.mxu0 %v9031_v1 }
 0x4e0   : > { %8017 = vmatpush2.bf16.msra.mxu1 %v9166_v49 }
 0x4e1   : > { %8018 = vmatprep.subr.bf16.mxu1 %v9159_v17 }
 0x4e2   : > { %7978 = vmatpush2.bf16.msra.mxu0 %v9030_v0 }
 0x4e3   : > { %7979 = vmatprep.subr.bf16.mxu0 %v9023_v42 }
 0x4e4   : > { %8019 = vmatpush2.bf16.msra.mxu1 %v9158_v2 }
 0x4e5   : > { %8020 = vmatprep.subr.bf16.mxu1 %v9151_v3 }
 0x4e6   : > { %7980 = vmatpush2.bf16.msra.mxu0 %v9022_v7  ;;  %v4810_v7 = vrot.slane %v9208_v15, %v10118_v39 }
 0x4e7   : > { %7981 = vmatprep.subr.bf16.mxu0 %v9015_v25 }
 0x4e8   : > { %8021 = vmatpush2.bf16.msra.mxu1 %v9150_v8 }
 0x4e9   : > { %8022 = vmatprep.subr.bf16.mxu1 %v9143_v9 }
 0x4ea   : > { %7982 = vmatpush2.bf16.msra.mxu0 %v9014_v4 }
 0x4eb   : > { %7983 = vmatprep.subr.bf16.mxu0 %v9007_v31 }
 0x4ec   : > { %8023 = vmatpush2.bf16.msra.mxu1 %v9142_v47 }
 0x4ed   : > { %8024 = vmatprep.subr.bf16.mxu1 %v9135_v23 }
 0x4ee   : > { %7984 = vmatpush2.bf16.msra.mxu0 %v9006_v16 }
 0x4f0   : > { %8025 = vmatpush2.bf16.msra.mxu1 %v9134_v35 }
 0x4f1   : > { %v7741_v20 = vpop.f32.mrf.mxu0  ;;  %7986 = vmatmul.mubr.bf16.vlgmr.msra.gmra.mxu0 %v10412_v21  ;;  %v9209_v21 = vld [vmem:[%s11655_s5] sm:$0xff] }
 0x4f2   : > { %v7742_v24 = vadd.f32 %v7741_v20, %v4798_v11  ;;  %v8068_v10 = vrot.slane %v9209_v21, %v10104_v29  ;;  %v8072_v47 = vrot.slane %v9209_v21, %v10107_v32  ;;  %v8076_v20 = vrot.slane %v9209_v21, %v10118_v39  ;;  %v9192_v32 = vld [vmem:[#allocation3] ss:$0 sm:$0xff] }
 0x4f3   : > { %v7782_v51 = vpop.f32.mrf.mxu1  ;;  %8027 = vmatmul.mubr.bf16.vlgmr.msra.gmra.mxu1 %v10422_v18  ;;  %v7743_v53 = vpop.f32.mrf.mxu0  ;;  %v8064_v18 = vrot.slane %v9209_v21, %v10101_v26 }
 0x4f4   : > { %v7783_v27 = vadd.f32 %v7782_v51, %v7742_v24  ;;  %v7744_v30 = vadd.f32 %v7743_v53, %v4802_v37 }
 0x4f5   : > { %v7784_v36 = vpop.f32.mrf.mxu1  ;;  %v7745_v40 = vpop.f32.mrf.mxu0 }
 0x4f6   : > { %v7785_v55 = vadd.f32 %v7784_v36, %v7744_v30 }
 0x4f7   : > { %v7786_v56 = vpop.f32.mrf.mxu1  ;;  %v7746_v43 = vpop.f32.mrf.mxu0 }
 0x4f9   : > { %v7787_v59 = vpop.f32.mrf.mxu1 }
 0x531   : > { %v7823_v54 = vpop.f32.mrf.mxu0 }
 0x532   : > { %v7824_v22 = vadd.f32 %v7823_v54, %v7783_v27 }
 0x533   : > { %v7864_v46 = vpop.f32.mrf.mxu1  ;;  %v7825_v50 = vpop.f32.mrf.mxu0 }
 0x534   : > { %v7865_v19 = vadd.f32 %v7864_v46, %v7824_v22  ;;  %v7826_v41 = vadd.f32 %v7825_v50, %v7785_v55 }
 0x535   : > { %v7866_v38 = vpop.f32.mrf.mxu1  ;;  %v7827_v44 = vpop.f32.mrf.mxu0 }
 0x536   : > { %v8039_v45 = vmax.f32 %v7865_v19, 0.0  ;;  %v7867_v48 = vadd.f32 %v7866_v38, %v7826_v41 }
 0x537   : > { %v7868_v57 = vpop.f32.mrf.mxu1  ;;  %v7828_v63 = vpop.f32.mrf.mxu0 }
 0x538   : > { %v8089_v49 = vmul.f32 %v8064_v18, %v8039_v45  ;;  %v8040_v1 = vmax.f32 %v7867_v48, 0.0 }
 0x539   : > { %v7869_v17 = vpop.f32.mrf.mxu1 }
 0x53a   : > { %v8101_v28 = vsel %vm8093_vm0, %v8089_v49, 0.0  ;;  %v8090_v61 = vmul.f32 %v8068_v10, %v8040_v1 }
 0x53b   : > { %v8102_v33 = vadd.f32 %v8101_v28, %v11495_v60 }
 0x53c   : > { %v8103_v62 = vsel %vm8093_vm0, %v8090_v61, 0.0 }
 0x53d   : > { %v8104_v26 = vadd.f32 %v8103_v62, %v8102_v33 }
 0x571   : > { %v7905_v0 = vpop.f32.mrf.mxu0 }
 0x572   : > { %v7906_v8 = vadd.f32 %v7905_v0, %v4806_v6 }
 0x573   : > { %v7946_v2 = vpop.f32.mrf.mxu1  ;;  %v7907_v42 = vpop.f32.mrf.mxu0 }
 0x574   : > { %v7908_v25 = vadd.f32 %v7907_v42, %v4810_v7  ;;  %v7947_v9 = vadd.f32 %v7946_v2, %v7906_v8 }
 0x575   : > { %v7948_v3 = vpop.f32.mrf.mxu1  ;;  %v7909_v34 = vpop.f32.mrf.mxu0 }
 0x576   : > { %v7949_v60 = vadd.f32 %v7948_v3, %v7908_v25 }
 0x577   : > { %v7950_v5 = vpop.f32.mrf.mxu1  ;;  %v7910_v29 = vpop.f32.mrf.mxu0 }
 0x579   : > { %v7951_v52 = vpop.f32.mrf.mxu1 }
 0x5b1   : > { %v7987_v58 = vpop.f32.mrf.mxu0 }
 0x5b2   : > { %v7988_v12 = vadd.f32 %v7987_v58, %v7947_v9 }
 0x5b3   : > { %v8028_v13 = vpop.f32.mrf.mxu1  ;;  %v7989_v14 = vpop.f32.mrf.mxu0 }
 0x5b4   : > { %v8029_v4 = vadd.f32 %v8028_v13, %v7988_v12  ;;  %v7990_v31 = vadd.f32 %v7989_v14, %v7949_v60 }
 0x5b5   : > { %v8030_v23 = vpop.f32.mrf.mxu1  ;;  %v7991_v16 = vpop.f32.mrf.mxu0 }
 0x5b6   : > { %v8041_v35 = vmax.f32 %v8029_v4, 0.0  ;;  %v8031_v11 = vadd.f32 %v8030_v23, %v7990_v31 }
 0x5b7   : > { %v8032_v37 = vpop.f32.mrf.mxu1  ;;  %v7992_v15 = vpop.f32.mrf.mxu0 }
 0x5b8   : > { %v8091_v24 = vmul.f32 %v8072_v47, %v8041_v35  ;;  %v8042_v51 = vmax.f32 %v8031_v11, 0.0 }
 0x5b9   : > { %v8033_v53 = vpop.f32.mrf.mxu1 }
 0x5ba   : > { %v8092_v27 = vmul.f32 %v8076_v20, %v8042_v51  ;;  %v8105_v30 = vsel %vm8093_vm0, %v8091_v24, 0.0 }
 0x5bb   : > { %v8106_v36 = vadd.f32 %v8105_v30, %v8104_v26 }
 0x5bc   : > { %v8107_v40 = vsel %vm8093_vm0, %v8092_v27, 0.0 }
 0x5bd   : > { %v8108_v55 = vadd.f32 %v8107_v40, %v8106_v36 }
 0x5bf   : > { %8109 = vadd.xlane.f32.xlu0 %v8108_v55 }
 0x648   : > { %v8110_v56 = vpop.xlane.xlu0 %8109 }
 0x649   : > { %v8118_v43 = vadd.f32 %v9192_v32, %v8110_v56 }
 0x64b   : > { %8120 = vst.msk [vmem:[%s11657_s7] sm:$0x3] %vm8119_vm1, %v8118_v43 }
 0x64c PF: > { %s19_s26 = sadd.s32 1, %s9216_s26  }
 0x64d   : > { %p16_p7 = scmp.ge.s32.totalorder %s19_s26, 14  }
 0x64f   :  { %18 = sbr.rel (!%p16_p7) target bundleno = 3 (0x3), region = 85 }

</bundles_post_ra>
